<compile_context>
chip_gen: v6e
topology: v6e:2x2x1
jax: 0.10.0
libtpu: 0.0.40
codegen_flags: <defaults>
</compile_context>

<pallas_src>
import functools

import jax
import jax.numpy as jnp
from jax import lax
from jax.experimental import pallas as pl
from jax.experimental.pallas import tpu as pltpu

BN_EPS = 1e-5


# ----------------------------------------------------------------------------
# Pallas kernel
# ----------------------------------------------------------------------------
def mrdm_kernel(x_ref, w1_ref, b1_ref, w2_ref, b2_ref, w3_ref, b3_ref,
                w45_ref, b45_ref, gamma_ref, beta_ref,
                out_ref, padx_ref, pada_ref, *, B, H, Wh, Wp, Cin, Cout):
    """Whole MRDM forward on one TensorCore (all operands VMEM-resident).

    Folded layout: a logical (B, H, W, C) image is stored as (B, H, Wh, 2*C)
    with Wh = W//2 and lane index = w_parity*C + c (phase-major).

    x_ref      : (B, H, Wh, 2*Cin)         folded input (unpadded)
    w1/w2/w3   : (9*2*Ci, 2*Cout)          im2col-flattened folded 3x3 weights
    w45_ref    : (2*Cin + 6*Cout, 2*Cout)  stacked folded 1x1 weights [w4; w5]
    b*_ref     : (1, 2*Cout)               phase-duplicated biases (b45 = b4+b5)
    gamma/beta : (1, 3*Cout)               BN affine parameters
    out_ref    : (B, H//2, Wh, Cout)       pooled + ReLU'ed output (chan last)
    padx_ref   : (B, H+2, Wp, 2*Cin)       padded-input scratch (halo = conv pad)
    pada_ref   : (B, H+2, Wp, 2*Cout)      padded scratch reused for x1 then x2
    """
    R = B * H * Wh
    Ci2 = 2 * Cin
    C2 = 2 * Cout
    CC = 3 * Cout
    CC2 = 6 * Cout
    K45 = Ci2 + CC2

    def zero_halo(ref, lanes):
        # Only the 1-pixel halo needs zeroing; the interior is overwritten.
        ref[:, 0:1, :, :] = jnp.zeros((B, 1, Wp, lanes), jnp.float32)
        ref[:, H + 1:H + 2, :, :] = jnp.zeros((B, 1, Wp, lanes), jnp.float32)
        ref[:, :, 0:1, :] = jnp.zeros((B, H + 2, 1, lanes), jnp.float32)
        ref[:, :, Wh + 1:Wh + 2, :] = jnp.zeros((B, H + 2, 1, lanes), jnp.float32)

    def conv3x3(src_ref, w_ref, b_ref, cin2):
        # im2col: all 9 shifted windows concatenated along lanes -> ONE fat
        # MXU matmul with K = 9*cin2 (instead of 9 tiny K=cin2 dots).
        patches = jnp.concatenate(
            [src_ref[:, dh:dh + H, dw:dw + Wh, :].reshape(R, cin2)
             for dh in range(3) for dw in range(3)], axis=-1)      # (R, 9*cin2)
        return jnp.dot(patches, w_ref[...],
                       preferred_element_type=jnp.float32) + b_ref[...]

    # --- in-kernel spatial zero-padding of the input (halo-only zeroing) ----
    zero_halo(padx_ref, Ci2)
    padx_ref[:, 1:H + 1, 1:Wh + 1, :] = x_ref[...]
    zero_halo(pada_ref, C2)

    # --- conv1 -> conv2 -> conv3 (pada_ref reused for x1 then x2) -----------
    x1 = conv3x3(padx_ref, w1_ref, b1_ref, Ci2)                    # (R, 2*Cout)
    pada_ref[:, 1:H + 1, 1:Wh + 1, :] = x1.reshape(B, H, Wh, C2)
    x2 = conv3x3(pada_ref, w2_ref, b2_ref, C2)
    pada_ref[:, 1:H + 1, 1:Wh + 1, :] = x2.reshape(B, H, Wh, C2)
    x3 = conv3x3(pada_ref, w3_ref, b3_ref, C2)

    # torch.cat([x1, x2, x3], dim=1) in phase-major folded lane order:
    #   lanes [0:3C)  -> W-even pixels, channels [x1 | x2 | x3]
    #   lanes [3C:6C) -> W-odd  pixels, channels [x1 | x2 | x3]
    cat = jnp.concatenate(
        [x1[:, :Cout], x2[:, :Cout], x3[:, :Cout],
         x1[:, Cout:], x2[:, Cout:], x3[:, Cout:]], axis=-1)       # (R, 6*Cout)

    # --- BatchNorm2d(3*Cout): training-mode biased batch stats, two-pass ----
    n = 2.0 * R                                  # real pixels per channel
    csum = jnp.sum(cat, axis=0, keepdims=True)                     # (1, 6*Cout)
    mean = (csum[:, :CC] + csum[:, CC:]) * (1.0 / n)               # (1, 3*Cout)
    meanf = jnp.concatenate([mean, mean], axis=-1)
    d = cat - meanf
    ssq = jnp.sum(d * d, axis=0, keepdims=True)
    var = (ssq[:, :CC] + ssq[:, CC:]) * (1.0 / n)
    scale = gamma_ref[...] * lax.rsqrt(var + BN_EPS)               # (1, 3*Cout)
    scalef = jnp.concatenate([scale, scale], axis=-1)              # (1, 6*Cout)
    betaf = jnp.concatenate([beta_ref[...], beta_ref[...]], axis=-1)

    # --- BN folded into conv5; conv4 + conv5 + residual fused in ONE dot ----
    #   out4 = [x | cat] @ (S @ [w4f; w5f]) + (beta - mean*scale) @ w5f + b4 + b5
    # S = blockdiag(I_{2Cin}, diag(scalef)); built with a 2-D iota mask so no
    # value transpose / column reshape is needed.  One tiny extra MXU op.
    srow = jnp.concatenate([jnp.ones((1, Ci2), jnp.float32), scalef], axis=-1)
    ii = lax.broadcasted_iota(jnp.int32, (K45, K45), 0)
    jj = lax.broadcasted_iota(jnp.int32, (K45, K45), 1)
    smat = jnp.where(ii == jj, jnp.broadcast_to(srow, (K45, K45)), 0.0)
    wcomb = jnp.dot(smat, w45_ref[...], preferred_element_type=jnp.float32)

    aff = betaf - meanf * scalef                                   # (1, 6*Cout)
    # M=8 (identical rows, take the first) keeps the matmul on the
    # well-trodden tile-aligned path instead of an M=1 vector-matrix dot.
    bias = jnp.dot(jnp.broadcast_to(aff, (8, CC2)), w45_ref[Ci2:, :],
                   preferred_element_type=jnp.float32)[0:1, :] + b45_ref[...]

    xin = x_ref[...].reshape(R, Ci2)
    xcomb = jnp.concatenate([xin, cat], axis=-1)                   # (R, K45)
    out4 = jnp.dot(xcomb, wcomb, preferred_element_type=jnp.float32) + bias

    # --- MaxPool2d(2,2) + ReLU ----------------------------------------------
    # W pairs are the two lane phase halves; H pairs become a size-2 dim.
    wmax = jnp.maximum(out4[:, :Cout], out4[:, Cout:])             # (R, Cout)
    t = wmax.reshape(B, H // 2, 2, Wh, Cout)
    pooled = jnp.maximum(t[:, :, 0], t[:, :, 1])                   # (B,H/2,W/2,C)
    out_ref[...] = jnp.maximum(pooled, 0.0)


# ----------------------------------------------------------------------------
# Host-side parameter folding (exact 0/1 re-arrangements)
# ----------------------------------------------------------------------------
def _fold_conv3x3(w):
    """Fold a PyTorch (Co, Ci, 3, 3) conv weight into (9, 2*Ci, 2*Co) taps.

    Tap index t = kh*3 + dw with dw the coarse (folded-W) shift index.  Block
    (p_in, p_out) of tap t holds kernel column kw = 2*(dw-1) + p_in - p_out + 1
    (zero when that column falls outside the 3x3 kernel).
    """
    Co, Ci = w.shape[0], w.shape[1]
    wf = jnp.zeros((3, 3, 2, Ci, 2, Co), w.dtype)
    for dwi in range(3):                       # coarse-W shift index (dw = dwi-1)
        for p_in in range(2):
            for p_out in range(2):
                dj = 2 * (dwi - 1) + p_in - p_out
                if -1 <= dj <= 1:
                    blk = jnp.transpose(w[:, :, :, dj + 1], (2, 1, 0))  # (3,Ci,Co)
                    wf = wf.at[:, dwi, p_in, :, p_out, :].set(blk)
    return wf.reshape(9, 2 * Ci, 2 * Co)


def _fold_1x1(w):
    """PyTorch (Co, Ci) 1x1 weight -> block-diagonal (2*Ci, 2*Co)."""
    return jnp.kron(jnp.eye(2, dtype=w.dtype), w.T)


def _fold_bias(b):
    """(C,) bias -> (1, 2*C), duplicated across the two W phases."""
    return jnp.tile(b, 2)[None, :]


# ----------------------------------------------------------------------------
# Wrapper
# ----------------------------------------------------------------------------
def mrdm_forward(x, params):
    """MRDM forward.  x: (B, Cin, H, W) f32  ->  (B, Cout, H//2, W//2) f32."""
    B, Cin, H, W = x.shape
    Cout = params["w1"].shape[0]
    assert H % 2 == 0 and W % 16 == 0, "kernel assumes even H and W % 16 == 0"
    Wh = W // 2
    Wp = ((Wh + 2 + 7) // 8) * 8          # sublane-aligned padded coarse-W

    # Parameter folding for the W-parity-folded layout.
    w1f = _fold_conv3x3(params["w1"]).reshape(9 * 2 * Cin, 2 * Cout)
    w2f = _fold_conv3x3(params["w2"]).reshape(9 * 2 * Cout, 2 * Cout)
    w3f = _fold_conv3x3(params["w3"]).reshape(9 * 2 * Cout, 2 * Cout)
    w45 = jnp.concatenate([_fold_1x1(params["w4"]),
                           _fold_1x1(params["w5"])], axis=0)  # (2Cin+6Cout, 2Cout)
    b1f, b2f, b3f = map(_fold_bias, (params["b1"], params["b2"], params["b3"]))
    b45 = _fold_bias(params["b4"]) + _fold_bias(params["b5"])
    gamma = params["bn_g"][None, :]                     # (1, 3*Cout)
    beta = params["bn_b"][None, :]

    # Input: NCHW -> folded channels-last (spatial padding happens in-kernel).
    xf = jnp.transpose(x, (0, 2, 3, 1)).reshape(B, H, Wh, 2 * Cin)

    # VMEM budget derived from the actual buffers (+ im2col temp + headroom).
    f32 = 4
    io_bytes = f32 * (xf.size + w1f.size + w2f.size + w3f.size + w45.size
                      + b1f.size + b2f.size + b3f.size + b45.size
                      + gamma.size + beta.size + B * (H // 2) * Wh * Cout)
    scratch_bytes = f32 * B * (H + 2) * Wp * (2 * Cin + 2 * Cout)
    im2col_bytes = f32 * B * H * Wh * 18 * max(Cin, Cout)
    vmem_limit = int(min(max(2 * (io_bytes + scratch_bytes + im2col_bytes)
                             + (2 << 20), 16 << 20), 48 << 20))

    vmem = pl.BlockSpec(memory_space=pltpu.MemorySpace.VMEM)
    kernel = functools.partial(mrdm_kernel, B=B, H=H, Wh=Wh, Wp=Wp,
                               Cin=Cin, Cout=Cout)

    out = pl.pallas_call(
        kernel,
        out_shape=jax.ShapeDtypeStruct((B, H // 2, Wh, Cout), jnp.float32),
        in_specs=[vmem] * 11,
        out_specs=vmem,
        scratch_shapes=[
            pltpu.VMEM((B, H + 2, Wp, 2 * Cin), jnp.float32),   # padded input
            pltpu.VMEM((B, H + 2, Wp, 2 * Cout), jnp.float32),  # x1 / x2 (reused)
        ],
        compiler_params=pltpu.CompilerParams(vmem_limit_bytes=vmem_limit),
    )(xf, w1f, b1f, w2f, b2f, w3f, b3f, w45, b45, gamma, beta)

    # (B, H//2, W//2, Cout) -> NCHW at the API boundary.
    return jnp.transpose(out, (0, 3, 1, 2))


# ----------------------------------------------------------------------------
# Pure-JAX reference (mirrors PyTorch semantics) for validation
# ----------------------------------------------------------------------------
def mrdm_reference(x, params):
    dn = ("NCHW", "OIHW", "NCHW")
    hi = lax.Precision.HIGHEST

    def c3(inp, w, b):
        y = lax.conv_general_dilated(inp, w, (1, 1), ((1, 1), (1, 1)),
                                     dimension_numbers=dn, precision=hi)
        return y + b[None, :, None, None]

    def c1(inp, w, b):
        return jnp.einsum("bchw,oc->bohw", inp, w,
                          precision=hi) + b[None, :, None, None]

    x1 = c3(x, params["w1"], params["b1"])
    x2 = c3(x1, params["w2"], params["b2"])
    x3 = c3(x2, params["w3"], params["b3"])
    x4 = c1(x, params["w4"], params["b4"])
    out1 = jnp.concatenate([x1, x2, x3], axis=1)
    mean = out1.mean(axis=(0, 2, 3), keepdims=True)
    var = ((out1 - mean) ** 2).mean(axis=(0, 2, 3), keepdims=True)
    out2 = (out1 - mean) * lax.rsqrt(var + BN_EPS)
    out2 = (out2 * params["bn_g"][None, :, None, None]
            + params["bn_b"][None, :, None, None])
    out3 = c1(out2, params["w5"], params["b5"])
    out4 = x4 + out3
    Bs, Cs, Hs, Ws = out4.shape
    out5 = out4.reshape(Bs, Cs, Hs // 2, 2, Ws // 2, 2).max(axis=(3, 5))
    return jnp.maximum(out5, 0.0)


if __name__ == "__main__":
    B, Cin, Cout, H, W = 2, 16, 8, 16, 16

    key = jax.random.PRNGKey(0)
    ks = jax.random.split(key, 13)
    rnd = lambda k, shape, s: jax.random.normal(k, shape, jnp.float32) * s
    params = {
        "w1": rnd(ks[0], (Cout, Cin, 3, 3), 0.10),
        "b1": rnd(ks[1], (Cout,), 0.10),
        "w2": rnd(ks[2], (Cout, Cout, 3, 3), 0.10),
        "b2": rnd(ks[3], (Cout,), 0.10),
        "w3": rnd(ks[4], (Cout, Cout, 3, 3), 0.10),
        "b3": rnd(ks[5], (Cout,), 0.10),
        "w4": rnd(ks[6], (Cout, Cin), 0.20),
        "b4": rnd(ks[7], (Cout,), 0.10),
        "w5": rnd(ks[8], (Cout, 3 * Cout), 0.15),
        "b5": rnd(ks[9], (Cout,), 0.10),
        "bn_g": 1.0 + rnd(ks[10], (3 * Cout,), 0.10),
        "bn_b": rnd(ks[11], (3 * Cout,), 0.10),
    }
    x = rnd(ks[12], (B, Cin, H, W), 1.0)

    # Snap test data onto the bf16 grid so the MXU's default-precision f32
    # matmul path is exact on the inputs; the remaining kernel-vs-reference
    # difference is accumulation-order-level.
    snap = lambda a: a.astype(jnp.bfloat16).astype(jnp.float32)
    params = jax.tree_util.tree_map(snap, params)
    x = snap(x)

    out = jax.block_until_ready(mrdm_forward(x, params))
    assert out.shape == (B, Cout, H // 2, W // 2), out.shape

    ref = jax.block_until_ready(mrdm_reference(x, params))
    max_err = float(jnp.max(jnp.abs(out - ref)))
    assert max_err < 5e-4, f"mismatch vs reference: max_err={max_err}"

    print("KERNEL_OK")
</pallas_src>

<mosaic_0001>
module attributes {stable_mosaic.version = 11 : i64} {
  func.func @mrdm_kernel(%arg0: memref<2x16x8x32xf32, #tpu.memory_space<vmem>>, %arg1: memref<288x16xf32, #tpu.memory_space<vmem>>, %arg2: memref<1x16xf32, #tpu.memory_space<vmem>>, %arg3: memref<144x16xf32, #tpu.memory_space<vmem>>, %arg4: memref<1x16xf32, #tpu.memory_space<vmem>>, %arg5: memref<144x16xf32, #tpu.memory_space<vmem>>, %arg6: memref<1x16xf32, #tpu.memory_space<vmem>>, %arg7: memref<80x16xf32, #tpu.memory_space<vmem>>, %arg8: memref<1x16xf32, #tpu.memory_space<vmem>>, %arg9: memref<1x24xf32, #tpu.memory_space<vmem>>, %arg10: memref<1x24xf32, #tpu.memory_space<vmem>>, %arg11: memref<2x8x8x8xf32, #tpu.memory_space<vmem>>, %arg12: memref<2x18x16x32xf32, #tpu.memory_space<vmem>>, %arg13: memref<2x18x16x16xf32, #tpu.memory_space<vmem>>) attributes {dimension_semantics = [], scalar_prefetch = 0 : i64, scratch_operands = 2 : i64, tpu.core_type = #tpu.core_type<tc>} {
    %cst = arith.constant 0.000000e+00 : f32
    %0 = vector.broadcast %cst : f32 to vector<2x1x16x32xf32>
    %c0 = arith.constant 0 : index
    %c0_0 = arith.constant 0 : index
    %c0_1 = arith.constant 0 : index
    %c0_2 = arith.constant 0 : index
    %1 = vector.load %arg12[%c0, %c0_0, %c0_1, %c0_2] : memref<2x18x16x32xf32, #tpu.memory_space<vmem>>, vector<2x1x16x32xf32>
    tpu.vector_store %arg12[%c0, %c0_0, %c0_1, %c0_2], %0 {strides = array<i32>} : memref<2x18x16x32xf32, #tpu.memory_space<vmem>>, vector<2x1x16x32xf32>,
    %cst_3 = arith.constant 0.000000e+00 : f32
    %2 = vector.broadcast %cst_3 : f32 to vector<2x1x16x32xf32>
    %c0_4 = arith.constant 0 : index
    %c17 = arith.constant 17 : index
    %c0_5 = arith.constant 0 : index
    %c0_6 = arith.constant 0 : index
    %3 = vector.load %arg12[%c0_4, %c17, %c0_5, %c0_6] : memref<2x18x16x32xf32, #tpu.memory_space<vmem>>, vector<2x1x16x32xf32>
    tpu.vector_store %arg12[%c0_4, %c17, %c0_5, %c0_6], %2 {strides = array<i32>} : memref<2x18x16x32xf32, #tpu.memory_space<vmem>>, vector<2x1x16x32xf32>,
    %cst_7 = arith.constant 0.000000e+00 : f32
    %4 = vector.broadcast %cst_7 : f32 to vector<2x18x1x32xf32>
    %c0_8 = arith.constant 0 : index
    %c0_9 = arith.constant 0 : index
    %c0_10 = arith.constant 0 : index
    %c0_11 = arith.constant 0 : index
    %5 = vector.load %arg12[%c0_8, %c0_9, %c0_10, %c0_11] : memref<2x18x16x32xf32, #tpu.memory_space<vmem>>, vector<2x18x1x32xf32>
    tpu.vector_store %arg12[%c0_8, %c0_9, %c0_10, %c0_11], %4 {strides = array<i32>} : memref<2x18x16x32xf32, #tpu.memory_space<vmem>>, vector<2x18x1x32xf32>,
    %cst_12 = arith.constant 0.000000e+00 : f32
    %6 = vector.broadcast %cst_12 : f32 to vector<2x18x1x32xf32>
    %c0_13 = arith.constant 0 : index
    %c0_14 = arith.constant 0 : index
    %c9 = arith.constant 9 : index
    %c0_15 = arith.constant 0 : index
    %7 = vector.load %arg12[%c0_13, %c0_14, %c9, %c0_15] : memref<2x18x16x32xf32, #tpu.memory_space<vmem>>, vector<2x18x1x32xf32>
    tpu.vector_store %arg12[%c0_13, %c0_14, %c9, %c0_15], %6 {strides = array<i32>} : memref<2x18x16x32xf32, #tpu.memory_space<vmem>>, vector<2x18x1x32xf32>,
    %c0_16 = arith.constant 0 : index
    %c0_17 = arith.constant 0 : index
    %c0_18 = arith.constant 0 : index
    %c0_19 = arith.constant 0 : index
    %8 = vector.load %arg0[%c0_16, %c0_17, %c0_18, %c0_19] : memref<2x16x8x32xf32, #tpu.memory_space<vmem>>, vector<2x16x8x32xf32>
    %c0_20 = arith.constant 0 : index
    %c1 = arith.constant 1 : index
    %c1_21 = arith.constant 1 : index
    %c0_22 = arith.constant 0 : index
    %9 = vector.load %arg12[%c0_20, %c1, %c1_21, %c0_22] : memref<2x18x16x32xf32, #tpu.memory_space<vmem>>, vector<2x16x8x32xf32>
    tpu.vector_store %arg12[%c0_20, %c1, %c1_21, %c0_22], %8 {strides = array<i32>} : memref<2x18x16x32xf32, #tpu.memory_space<vmem>>, vector<2x16x8x32xf32>,
    %cst_23 = arith.constant 0.000000e+00 : f32
    %10 = vector.broadcast %cst_23 : f32 to vector<2x1x16x16xf32>
    %c0_24 = arith.constant 0 : index
    %c0_25 = arith.constant 0 : index
    %c0_26 = arith.constant 0 : index
    %c0_27 = arith.constant 0 : index
    %11 = vector.load %arg13[%c0_24, %c0_25, %c0_26, %c0_27] : memref<2x18x16x16xf32, #tpu.memory_space<vmem>>, vector<2x1x16x16xf32>
    tpu.vector_store %arg13[%c0_24, %c0_25, %c0_26, %c0_27], %10 {strides = array<i32>} : memref<2x18x16x16xf32, #tpu.memory_space<vmem>>, vector<2x1x16x16xf32>,
    %cst_28 = arith.constant 0.000000e+00 : f32
    %12 = vector.broadcast %cst_28 : f32 to vector<2x1x16x16xf32>
    %c0_29 = arith.constant 0 : index
    %c17_30 = arith.constant 17 : index
    %c0_31 = arith.constant 0 : index
    %c0_32 = arith.constant 0 : index
    %13 = vector.load %arg13[%c0_29, %c17_30, %c0_31, %c0_32] : memref<2x18x16x16xf32, #tpu.memory_space<vmem>>, vector<2x1x16x16xf32>
    tpu.vector_store %arg13[%c0_29, %c17_30, %c0_31, %c0_32], %12 {strides = array<i32>} : memref<2x18x16x16xf32, #tpu.memory_space<vmem>>, vector<2x1x16x16xf32>,
    %cst_33 = arith.constant 0.000000e+00 : f32
    %14 = vector.broadcast %cst_33 : f32 to vector<2x18x1x16xf32>
    %c0_34 = arith.constant 0 : index
    %c0_35 = arith.constant 0 : index
    %c0_36 = arith.constant 0 : index
    %c0_37 = arith.constant 0 : index
    %15 = vector.load %arg13[%c0_34, %c0_35, %c0_36, %c0_37] : memref<2x18x16x16xf32, #tpu.memory_space<vmem>>, vector<2x18x1x16xf32>
    tpu.vector_store %arg13[%c0_34, %c0_35, %c0_36, %c0_37], %14 {strides = array<i32>} : memref<2x18x16x16xf32, #tpu.memory_space<vmem>>, vector<2x18x1x16xf32>,
    %cst_38 = arith.constant 0.000000e+00 : f32
    %16 = vector.broadcast %cst_38 : f32 to vector<2x18x1x16xf32>
    %c0_39 = arith.constant 0 : index
    %c0_40 = arith.constant 0 : index
    %c9_41 = arith.constant 9 : index
    %c0_42 = arith.constant 0 : index
    %17 = vector.load %arg13[%c0_39, %c0_40, %c9_41, %c0_42] : memref<2x18x16x16xf32, #tpu.memory_space<vmem>>, vector<2x18x1x16xf32>
    tpu.vector_store %arg13[%c0_39, %c0_40, %c9_41, %c0_42], %16 {strides = array<i32>} : memref<2x18x16x16xf32, #tpu.memory_space<vmem>>, vector<2x18x1x16xf32>,
    %c0_43 = arith.constant 0 : index
    %c0_44 = arith.constant 0 : index
    %c0_45 = arith.constant 0 : index
    %c0_46 = arith.constant 0 : index
    %18 = vector.load %arg12[%c0_43, %c0_44, %c0_45, %c0_46] : memref<2x18x16x32xf32, #tpu.memory_space<vmem>>, vector<2x16x8x32xf32>
    %19 = vector.shape_cast %18 : vector<2x16x8x32xf32> to vector<256x32xf32>
    %c0_47 = arith.constant 0 : index
    %c0_48 = arith.constant 0 : index
    %c1_49 = arith.constant 1 : index
    %c0_50 = arith.constant 0 : index
    %20 = vector.load %arg12[%c0_47, %c0_48, %c1_49, %c0_50] : memref<2x18x16x32xf32, #tpu.memory_space<vmem>>, vector<2x16x8x32xf32>
    %21 = vector.shape_cast %20 : vector<2x16x8x32xf32> to vector<256x32xf32>
    %c0_51 = arith.constant 0 : index
    %c0_52 = arith.constant 0 : index
    %c2 = arith.constant 2 : index
    %c0_53 = arith.constant 0 : index
    %22 = vector.load %arg12[%c0_51, %c0_52, %c2, %c0_53] : memref<2x18x16x32xf32, #tpu.memory_space<vmem>>, vector<2x16x8x32xf32>
    %23 = vector.shape_cast %22 : vector<2x16x8x32xf32> to vector<256x32xf32>
    %c0_54 = arith.constant 0 : index
    %c1_55 = arith.constant 1 : index
    %c0_56 = arith.constant 0 : index
    %c0_57 = arith.constant 0 : index
    %24 = vector.load %arg12[%c0_54, %c1_55, %c0_56, %c0_57] : memref<2x18x16x32xf32, #tpu.memory_space<vmem>>, vector<2x16x8x32xf32>
    %25 = vector.shape_cast %24 : vector<2x16x8x32xf32> to vector<256x32xf32>
    %c0_58 = arith.constant 0 : index
    %c1_59 = arith.constant 1 : index
    %c1_60 = arith.constant 1 : index
    %c0_61 = arith.constant 0 : index
    %26 = vector.load %arg12[%c0_58, %c1_59, %c1_60, %c0_61] : memref<2x18x16x32xf32, #tpu.memory_space<vmem>>, vector<2x16x8x32xf32>
    %27 = vector.shape_cast %26 : vector<2x16x8x32xf32> to vector<256x32xf32>
    %c0_62 = arith.constant 0 : index
    %c1_63 = arith.constant 1 : index
    %c2_64 = arith.constant 2 : index
    %c0_65 = arith.constant 0 : index
    %28 = vector.load %arg12[%c0_62, %c1_63, %c2_64, %c0_65] : memref<2x18x16x32xf32, #tpu.memory_space<vmem>>, vector<2x16x8x32xf32>
    %29 = vector.shape_cast %28 : vector<2x16x8x32xf32> to vector<256x32xf32>
    %c0_66 = arith.constant 0 : index
    %c2_67 = arith.constant 2 : index
    %c0_68 = arith.constant 0 : index
    %c0_69 = arith.constant 0 : index
    %30 = vector.load %arg12[%c0_66, %c2_67, %c0_68, %c0_69] : memref<2x18x16x32xf32, #tpu.memory_space<vmem>>, vector<2x16x8x32xf32>
    %31 = vector.shape_cast %30 : vector<2x16x8x32xf32> to vector<256x32xf32>
    %c0_70 = arith.constant 0 : index
    %c2_71 = arith.constant 2 : index
    %c1_72 = arith.constant 1 : index
    %c0_73 = arith.constant 0 : index
    %32 = vector.load %arg12[%c0_70, %c2_71, %c1_72, %c0_73] : memref<2x18x16x32xf32, #tpu.memory_space<vmem>>, vector<2x16x8x32xf32>
    %33 = vector.shape_cast %32 : vector<2x16x8x32xf32> to vector<256x32xf32>
    %c0_74 = arith.constant 0 : index
    %c2_75 = arith.constant 2 : index
    %c2_76 = arith.constant 2 : index
    %c0_77 = arith.constant 0 : index
    %34 = vector.load %arg12[%c0_74, %c2_75, %c2_76, %c0_77] : memref<2x18x16x32xf32, #tpu.memory_space<vmem>>, vector<2x16x8x32xf32>
    %35 = vector.shape_cast %34 : vector<2x16x8x32xf32> to vector<256x32xf32>
    %36 = tpu.concatenate %19, %21, %23, %25, %27, %29, %31, %33, %35 in 1 : vector<256x32xf32>, vector<256x32xf32>, vector<256x32xf32>, vector<256x32xf32>, vector<256x32xf32>, vector<256x32xf32>, vector<256x32xf32>, vector<256x32xf32>, vector<256x32xf32> -> vector<256x288xf32>
    %c0_78 = arith.constant 0 : index
    %c0_79 = arith.constant 0 : index
    %37 = vector.load %arg1[%c0_78, %c0_79] : memref<288x16xf32, #tpu.memory_space<vmem>>, vector<288x16xf32>
    %cst_80 = arith.constant dense<0.000000e+00> : vector<256x16xf32>
    %38 = tpu.matmul %36, %37, %cst_80 {dimension_numbers = #tpu.dot_dimension_numbers<[1], [0], [0], [1], [0, 0, 1, 1], [], []>} : vector<256x288xf32>, vector<288x16xf32>, vector<256x16xf32> -> vector<256x16xf32>
    %c0_81 = arith.constant 0 : index
    %c0_82 = arith.constant 0 : index
    %39 = vector.load %arg2[%c0_81, %c0_82] : memref<1x16xf32, #tpu.memory_space<vmem>>, vector<1x16xf32>
    %40 = vector.broadcast %39 : vector<1x16xf32> to vector<256x16xf32>
    %41 = arith.addf %38, %40 : vector<256x16xf32>
    %42 = vector.shape_cast %41 : vector<256x16xf32> to vector<2x16x8x16xf32>
    %c0_83 = arith.constant 0 : index
    %c1_84 = arith.constant 1 : index
    %c1_85 = arith.constant 1 : index
    %c0_86 = arith.constant 0 : index
    %43 = vector.load %arg13[%c0_83, %c1_84, %c1_85, %c0_86] : memref<2x18x16x16xf32, #tpu.memory_space<vmem>>, vector<2x16x8x16xf32>
    tpu.vector_store %arg13[%c0_83, %c1_84, %c1_85, %c0_86], %42 {strides = array<i32>} : memref<2x18x16x16xf32, #tpu.memory_space<vmem>>, vector<2x16x8x16xf32>,
    %c0_87 = arith.constant 0 : index
    %c0_88 = arith.constant 0 : index
    %c0_89 = arith.constant 0 : index
    %c0_90 = arith.constant 0 : index
    %44 = vector.load %arg13[%c0_87, %c0_88, %c0_89, %c0_90] : memref<2x18x16x16xf32, #tpu.memory_space<vmem>>, vector<2x16x8x16xf32>
    %45 = vector.shape_cast %44 : vector<2x16x8x16xf32> to vector<256x16xf32>
    %c0_91 = arith.constant 0 : index
    %c0_92 = arith.constant 0 : index
    %c1_93 = arith.constant 1 : index
    %c0_94 = arith.constant 0 : index
    %46 = vector.load %arg13[%c0_91, %c0_92, %c1_93, %c0_94] : memref<2x18x16x16xf32, #tpu.memory_space<vmem>>, vector<2x16x8x16xf32>
    %47 = vector.shape_cast %46 : vector<2x16x8x16xf32> to vector<256x16xf32>
    %c0_95 = arith.constant 0 : index
    %c0_96 = arith.constant 0 : index
    %c2_97 = arith.constant 2 : index
    %c0_98 = arith.constant 0 : index
    %48 = vector.load %arg13[%c0_95, %c0_96, %c2_97, %c0_98] : memref<2x18x16x16xf32, #tpu.memory_space<vmem>>, vector<2x16x8x16xf32>
    %49 = vector.shape_cast %48 : vector<2x16x8x16xf32> to vector<256x16xf32>
    %c0_99 = arith.constant 0 : index
    %c1_100 = arith.constant 1 : index
    %c0_101 = arith.constant 0 : index
    %c0_102 = arith.constant 0 : index
    %50 = vector.load %arg13[%c0_99, %c1_100, %c0_101, %c0_102] : memref<2x18x16x16xf32, #tpu.memory_space<vmem>>, vector<2x16x8x16xf32>
    %51 = vector.shape_cast %50 : vector<2x16x8x16xf32> to vector<256x16xf32>
    %c0_103 = arith.constant 0 : index
    %c1_104 = arith.constant 1 : index
    %c1_105 = arith.constant 1 : index
    %c0_106 = arith.constant 0 : index
    %52 = vector.load %arg13[%c0_103, %c1_104, %c1_105, %c0_106] : memref<2x18x16x16xf32, #tpu.memory_space<vmem>>, vector<2x16x8x16xf32>
    %53 = vector.shape_cast %52 : vector<2x16x8x16xf32> to vector<256x16xf32>
    %c0_107 = arith.constant 0 : index
    %c1_108 = arith.constant 1 : index
    %c2_109 = arith.constant 2 : index
    %c0_110 = arith.constant 0 : index
    %54 = vector.load %arg13[%c0_107, %c1_108, %c2_109, %c0_110] : memref<2x18x16x16xf32, #tpu.memory_space<vmem>>, vector<2x16x8x16xf32>
    %55 = vector.shape_cast %54 : vector<2x16x8x16xf32> to vector<256x16xf32>
    %c0_111 = arith.constant 0 : index
    %c2_112 = arith.constant 2 : index
    %c0_113 = arith.constant 0 : index
    %c0_114 = arith.constant 0 : index
    %56 = vector.load %arg13[%c0_111, %c2_112, %c0_113, %c0_114] : memref<2x18x16x16xf32, #tpu.memory_space<vmem>>, vector<2x16x8x16xf32>
    %57 = vector.shape_cast %56 : vector<2x16x8x16xf32> to vector<256x16xf32>
    %c0_115 = arith.constant 0 : index
    %c2_116 = arith.constant 2 : index
    %c1_117 = arith.constant 1 : index
    %c0_118 = arith.constant 0 : index
    %58 = vector.load %arg13[%c0_115, %c2_116, %c1_117, %c0_118] : memref<2x18x16x16xf32, #tpu.memory_space<vmem>>, vector<2x16x8x16xf32>
    %59 = vector.shape_cast %58 : vector<2x16x8x16xf32> to vector<256x16xf32>
    %c0_119 = arith.constant 0 : index
    %c2_120 = arith.constant 2 : index
    %c2_121 = arith.constant 2 : index
    %c0_122 = arith.constant 0 : index
    %60 = vector.load %arg13[%c0_119, %c2_120, %c2_121, %c0_122] : memref<2x18x16x16xf32, #tpu.memory_space<vmem>>, vector<2x16x8x16xf32>
    %61 = vector.shape_cast %60 : vector<2x16x8x16xf32> to vector<256x16xf32>
    %62 = tpu.concatenate %45, %47, %49, %51, %53, %55, %57, %59, %61 in 1 : vector<256x16xf32>, vector<256x16xf32>, vector<256x16xf32>, vector<256x16xf32>, vector<256x16xf32>, vector<256x16xf32>, vector<256x16xf32>, vector<256x16xf32>, vector<256x16xf32> -> vector<256x144xf32>
    %c0_123 = arith.constant 0 : index
    %c0_124 = arith.constant 0 : index
    %63 = vector.load %arg3[%c0_123, %c0_124] : memref<144x16xf32, #tpu.memory_space<vmem>>, vector<144x16xf32>
    %cst_125 = arith.constant dense<0.000000e+00> : vector<256x16xf32>
    %64 = tpu.matmul %62, %63, %cst_125 {dimension_numbers = #tpu.dot_dimension_numbers<[1], [0], [0], [1], [0, 0, 1, 1], [], []>} : vector<256x144xf32>, vector<144x16xf32>, vector<256x16xf32> -> vector<256x16xf32>
    %c0_126 = arith.constant 0 : index
    %c0_127 = arith.constant 0 : index
    %65 = vector.load %arg4[%c0_126, %c0_127] : memref<1x16xf32, #tpu.memory_space<vmem>>, vector<1x16xf32>
    %66 = vector.broadcast %65 : vector<1x16xf32> to vector<256x16xf32>
    %67 = arith.addf %64, %66 : vector<256x16xf32>
    %68 = vector.shape_cast %67 : vector<256x16xf32> to vector<2x16x8x16xf32>
    %c0_128 = arith.constant 0 : index
    %c1_129 = arith.constant 1 : index
    %c1_130 = arith.constant 1 : index
    %c0_131 = arith.constant 0 : index
    %69 = vector.load %arg13[%c0_128, %c1_129, %c1_130, %c0_131] : memref<2x18x16x16xf32, #tpu.memory_space<vmem>>, vector<2x16x8x16xf32>
    tpu.vector_store %arg13[%c0_128, %c1_129, %c1_130, %c0_131], %68 {strides = array<i32>} : memref<2x18x16x16xf32, #tpu.memory_space<vmem>>, vector<2x16x8x16xf32>,
    %c0_132 = arith.constant 0 : index
    %c0_133 = arith.constant 0 : index
    %c0_134 = arith.constant 0 : index
    %c0_135 = arith.constant 0 : index
    %70 = vector.load %arg13[%c0_132, %c0_133, %c0_134, %c0_135] : memref<2x18x16x16xf32, #tpu.memory_space<vmem>>, vector<2x16x8x16xf32>
    %71 = vector.shape_cast %70 : vector<2x16x8x16xf32> to vector<256x16xf32>
    %c0_136 = arith.constant 0 : index
    %c0_137 = arith.constant 0 : index
    %c1_138 = arith.constant 1 : index
    %c0_139 = arith.constant 0 : index
    %72 = vector.load %arg13[%c0_136, %c0_137, %c1_138, %c0_139] : memref<2x18x16x16xf32, #tpu.memory_space<vmem>>, vector<2x16x8x16xf32>
    %73 = vector.shape_cast %72 : vector<2x16x8x16xf32> to vector<256x16xf32>
    %c0_140 = arith.constant 0 : index
    %c0_141 = arith.constant 0 : index
    %c2_142 = arith.constant 2 : index
    %c0_143 = arith.constant 0 : index
    %74 = vector.load %arg13[%c0_140, %c0_141, %c2_142, %c0_143] : memref<2x18x16x16xf32, #tpu.memory_space<vmem>>, vector<2x16x8x16xf32>
    %75 = vector.shape_cast %74 : vector<2x16x8x16xf32> to vector<256x16xf32>
    %c0_144 = arith.constant 0 : index
    %c1_145 = arith.constant 1 : index
    %c0_146 = arith.constant 0 : index
    %c0_147 = arith.constant 0 : index
    %76 = vector.load %arg13[%c0_144, %c1_145, %c0_146, %c0_147] : memref<2x18x16x16xf32, #tpu.memory_space<vmem>>, vector<2x16x8x16xf32>
    %77 = vector.shape_cast %76 : vector<2x16x8x16xf32> to vector<256x16xf32>
    %c0_148 = arith.constant 0 : index
    %c1_149 = arith.constant 1 : index
    %c1_150 = arith.constant 1 : index
    %c0_151 = arith.constant 0 : index
    %78 = vector.load %arg13[%c0_148, %c1_149, %c1_150, %c0_151] : memref<2x18x16x16xf32, #tpu.memory_space<vmem>>, vector<2x16x8x16xf32>
    %79 = vector.shape_cast %78 : vector<2x16x8x16xf32> to vector<256x16xf32>
    %c0_152 = arith.constant 0 : index
    %c1_153 = arith.constant 1 : index
    %c2_154 = arith.constant 2 : index
    %c0_155 = arith.constant 0 : index
    %80 = vector.load %arg13[%c0_152, %c1_153, %c2_154, %c0_155] : memref<2x18x16x16xf32, #tpu.memory_space<vmem>>, vector<2x16x8x16xf32>
    %81 = vector.shape_cast %80 : vector<2x16x8x16xf32> to vector<256x16xf32>
    %c0_156 = arith.constant 0 : index
    %c2_157 = arith.constant 2 : index
    %c0_158 = arith.constant 0 : index
    %c0_159 = arith.constant 0 : index
    %82 = vector.load %arg13[%c0_156, %c2_157, %c0_158, %c0_159] : memref<2x18x16x16xf32, #tpu.memory_space<vmem>>, vector<2x16x8x16xf32>
    %83 = vector.shape_cast %82 : vector<2x16x8x16xf32> to vector<256x16xf32>
    %c0_160 = arith.constant 0 : index
    %c2_161 = arith.constant 2 : index
    %c1_162 = arith.constant 1 : index
    %c0_163 = arith.constant 0 : index
    %84 = vector.load %arg13[%c0_160, %c2_161, %c1_162, %c0_163] : memref<2x18x16x16xf32, #tpu.memory_space<vmem>>, vector<2x16x8x16xf32>
    %85 = vector.shape_cast %84 : vector<2x16x8x16xf32> to vector<256x16xf32>
    %c0_164 = arith.constant 0 : index
    %c2_165 = arith.constant 2 : index
    %c2_166 = arith.constant 2 : index
    %c0_167 = arith.constant 0 : index
    %86 = vector.load %arg13[%c0_164, %c2_165, %c2_166, %c0_167] : memref<2x18x16x16xf32, #tpu.memory_space<vmem>>, vector<2x16x8x16xf32>
    %87 = vector.shape_cast %86 : vector<2x16x8x16xf32> to vector<256x16xf32>
    %88 = tpu.concatenate %71, %73, %75, %77, %79, %81, %83, %85, %87 in 1 : vector<256x16xf32>, vector<256x16xf32>, vector<256x16xf32>, vector<256x16xf32>, vector<256x16xf32>, vector<256x16xf32>, vector<256x16xf32>, vector<256x16xf32>, vector<256x16xf32> -> vector<256x144xf32>
    %c0_168 = arith.constant 0 : index
    %c0_169 = arith.constant 0 : index
    %89 = vector.load %arg5[%c0_168, %c0_169] : memref<144x16xf32, #tpu.memory_space<vmem>>, vector<144x16xf32>
    %cst_170 = arith.constant dense<0.000000e+00> : vector<256x16xf32>
    %90 = tpu.matmul %88, %89, %cst_170 {dimension_numbers = #tpu.dot_dimension_numbers<[1], [0], [0], [1], [0, 0, 1, 1], [], []>} : vector<256x144xf32>, vector<144x16xf32>, vector<256x16xf32> -> vector<256x16xf32>
    %c0_171 = arith.constant 0 : index
    %c0_172 = arith.constant 0 : index
    %91 = vector.load %arg6[%c0_171, %c0_172] : memref<1x16xf32, #tpu.memory_space<vmem>>, vector<1x16xf32>
    %92 = vector.broadcast %91 : vector<1x16xf32> to vector<256x16xf32>
    %93 = arith.addf %90, %92 : vector<256x16xf32>
    %94 = vector.extract_strided_slice %41 {offsets = [0, 0], sizes = [256, 8], strides = [1, 1]} : vector<256x16xf32> to vector<256x8xf32>
    %95 = vector.extract_strided_slice %67 {offsets = [0, 0], sizes = [256, 8], strides = [1, 1]} : vector<256x16xf32> to vector<256x8xf32>
    %96 = vector.extract_strided_slice %93 {offsets = [0, 0], sizes = [256, 8], strides = [1, 1]} : vector<256x16xf32> to vector<256x8xf32>
    %97 = vector.extract_strided_slice %41 {offsets = [0, 8], sizes = [256, 8], strides = [1, 1]} : vector<256x16xf32> to vector<256x8xf32>
    %98 = vector.extract_strided_slice %67 {offsets = [0, 8], sizes = [256, 8], strides = [1, 1]} : vector<256x16xf32> to vector<256x8xf32>
    %99 = vector.extract_strided_slice %93 {offsets = [0, 8], sizes = [256, 8], strides = [1, 1]} : vector<256x16xf32> to vector<256x8xf32>
    %100 = tpu.concatenate %94, %95, %96, %97, %98, %99 in 1 : vector<256x8xf32>, vector<256x8xf32>, vector<256x8xf32>, vector<256x8xf32>, vector<256x8xf32>, vector<256x8xf32> -> vector<256x48xf32>
    %cst_173 = arith.constant dense<0.000000e+00> : vector<48xf32>
    %101 = vector.multi_reduction <add>, %100, %cst_173 [0] : vector<256x48xf32> to vector<48xf32>
    %102 = vector.shape_cast %101 : vector<48xf32> to vector<1x48xf32>
    %103 = vector.extract_strided_slice %102 {offsets = [0, 0], sizes = [1, 24], strides = [1, 1]} : vector<1x48xf32> to vector<1x24xf32>
    %104 = vector.extract_strided_slice %102 {offsets = [0, 24], sizes = [1, 24], strides = [1, 1]} : vector<1x48xf32> to vector<1x24xf32>
    %105 = arith.addf %103, %104 : vector<1x24xf32>
    %cst_174 = arith.constant 0.001953125 : f32
    %106 = vector.broadcast %cst_174 : f32 to vector<1x24xf32>
    %107 = arith.mulf %105, %106 : vector<1x24xf32>
    %108 = tpu.concatenate %107, %107 in 1 : vector<1x24xf32>, vector<1x24xf32> -> vector<1x48xf32>
    %109 = vector.broadcast %108 : vector<1x48xf32> to vector<256x48xf32>
    %110 = arith.subf %100, %109 : vector<256x48xf32>
    %111 = arith.mulf %110, %110 : vector<256x48xf32>
    %cst_175 = arith.constant dense<0.000000e+00> : vector<48xf32>
    %112 = vector.multi_reduction <add>, %111, %cst_175 [0] : vector<256x48xf32> to vector<48xf32>
    %113 = vector.shape_cast %112 : vector<48xf32> to vector<1x48xf32>
    %114 = vector.extract_strided_slice %113 {offsets = [0, 0], sizes = [1, 24], strides = [1, 1]} : vector<1x48xf32> to vector<1x24xf32>
    %115 = vector.extract_strided_slice %113 {offsets = [0, 24], sizes = [1, 24], strides = [1, 1]} : vector<1x48xf32> to vector<1x24xf32>
    %116 = arith.addf %114, %115 : vector<1x24xf32>
    %cst_176 = arith.constant 0.001953125 : f32
    %117 = vector.broadcast %cst_176 : f32 to vector<1x24xf32>
    %118 = arith.mulf %116, %117 : vector<1x24xf32>
    %c0_177 = arith.constant 0 : index
    %c0_178 = arith.constant 0 : index
    %119 = vector.load %arg9[%c0_177, %c0_178] : memref<1x24xf32, #tpu.memory_space<vmem>>, vector<1x24xf32>
    %cst_179 = arith.constant 9.99999974E-6 : f32
    %120 = vector.broadcast %cst_179 : f32 to vector<1x24xf32>
    %121 = arith.addf %118, %120 : vector<1x24xf32>
    %122 = math.rsqrt %121 : vector<1x24xf32>
    %123 = arith.mulf %119, %122 : vector<1x24xf32>
    %124 = tpu.concatenate %123, %123 in 1 : vector<1x24xf32>, vector<1x24xf32> -> vector<1x48xf32>
    %c0_180 = arith.constant 0 : index
    %c0_181 = arith.constant 0 : index
    %125 = vector.load %arg10[%c0_180, %c0_181] : memref<1x24xf32, #tpu.memory_space<vmem>>, vector<1x24xf32>
    %c0_182 = arith.constant 0 : index
    %c0_183 = arith.constant 0 : index
    %126 = vector.load %arg10[%c0_182, %c0_183] : memref<1x24xf32, #tpu.memory_space<vmem>>, vector<1x24xf32>
    %127 = tpu.concatenate %125, %126 in 1 : vector<1x24xf32>, vector<1x24xf32> -> vector<1x48xf32>
    %cst_184 = arith.constant 1.000000e+00 : f32
    %128 = vector.broadcast %cst_184 : f32 to vector<1x32xf32>
    %129 = tpu.concatenate %128, %124 in 1 : vector<1x32xf32>, vector<1x48xf32> -> vector<1x80xf32>
    %130 = tpu.iota {dimensions = array<i32: 0>} : vector<80x80xi32>
    %131 = tpu.iota {dimensions = array<i32: 1>} : vector<80x80xi32>
    %132 = arith.cmpi eq, %130, %131 : vector<80x80xi32>
    %133 = vector.shape_cast %129 : vector<1x80xf32> to vector<1x80xf32>
    %134 = vector.broadcast %133 : vector<1x80xf32> to vector<80x80xf32>
    %cst_185 = arith.constant 0.000000e+00 : f32
    %135 = vector.broadcast %cst_185 : f32 to vector<80x80xf32>
    %136 = arith.select %132, %134, %135 : vector<80x80xi1>, vector<80x80xf32>
    %c0_186 = arith.constant 0 : index
    %c0_187 = arith.constant 0 : index
    %137 = vector.load %arg7[%c0_186, %c0_187] : memref<80x16xf32, #tpu.memory_space<vmem>>, vector<80x16xf32>
    %cst_188 = arith.constant dense<0.000000e+00> : vector<80x16xf32>
    %138 = tpu.matmul %136, %137, %cst_188 {dimension_numbers = #tpu.dot_dimension_numbers<[1], [0], [0], [1], [0, 0, 1, 1], [], []>} : vector<80x80xf32>, vector<80x16xf32>, vector<80x16xf32> -> vector<80x16xf32>
    %139 = arith.mulf %108, %124 : vector<1x48xf32>
    %140 = arith.subf %127, %139 : vector<1x48xf32>
    %141 = vector.shape_cast %140 : vector<1x48xf32> to vector<1x48xf32>
    %142 = vector.broadcast %141 : vector<1x48xf32> to vector<8x48xf32>
    %c32 = arith.constant 32 : index
    %c0_189 = arith.constant 0 : index
    %143 = vector.load %arg7[%c32, %c0_189] : memref<80x16xf32, #tpu.memory_space<vmem>>, vector<48x16xf32>
    %cst_190 = arith.constant dense<0.000000e+00> : vector<8x16xf32>
    %144 = tpu.matmul %142, %143, %cst_190 {dimension_numbers = #tpu.dot_dimension_numbers<[1], [0], [0], [1], [0, 0, 1, 1], [], []>} : vector<8x48xf32>, vector<48x16xf32>, vector<8x16xf32> -> vector<8x16xf32>
    %145 = vector.extract_strided_slice %144 {offsets = [0, 0], sizes = [1, 16], strides = [1, 1]} : vector<8x16xf32> to vector<1x16xf32>
    %c0_191 = arith.constant 0 : index
    %c0_192 = arith.constant 0 : index
    %146 = vector.load %arg8[%c0_191, %c0_192] : memref<1x16xf32, #tpu.memory_space<vmem>>, vector<1x16xf32>
    %147 = arith.addf %145, %146 : vector<1x16xf32>
    %c0_193 = arith.constant 0 : index
    %c0_194 = arith.constant 0 : index
    %c0_195 = arith.constant 0 : index
    %c0_196 = arith.constant 0 : index
    %148 = vector.load %arg0[%c0_193, %c0_194, %c0_195, %c0_196] : memref<2x16x8x32xf32, #tpu.memory_space<vmem>>, vector<2x16x8x32xf32>
    %149 = vector.shape_cast %148 : vector<2x16x8x32xf32> to vector<256x32xf32>
    %150 = tpu.concatenate %149, %100 in 1 : vector<256x32xf32>, vector<256x48xf32> -> vector<256x80xf32>
    %cst_197 = arith.constant dense<0.000000e+00> : vector<256x16xf32>
    %151 = tpu.matmul %150, %138, %cst_197 {dimension_numbers = #tpu.dot_dimension_numbers<[1], [0], [0], [1], [0, 0, 1, 1], [], []>} : vector<256x80xf32>, vector<80x16xf32>, vector<256x16xf32> -> vector<256x16xf32>
    %152 = vector.broadcast %147 : vector<1x16xf32> to vector<256x16xf32>
    %153 = arith.addf %151, %152 : vector<256x16xf32>
    %154 = vector.extract_strided_slice %153 {offsets = [0, 0], sizes = [256, 8], strides = [1, 1]} : vector<256x16xf32> to vector<256x8xf32>
    %155 = vector.extract_strided_slice %153 {offsets = [0, 8], sizes = [256, 8], strides = [1, 1]} : vector<256x16xf32> to vector<256x8xf32>
    %156 = arith.maximumf %154, %155 : vector<256x8xf32>
    %157 = vector.shape_cast %156 : vector<256x8xf32> to vector<2x8x2x8x8xf32>
    %158 = vector.extract_strided_slice %157 {offsets = [0, 0, 0, 0, 0], sizes = [2, 8, 1, 8, 8], strides = [1, 1, 1, 1, 1]} : vector<2x8x2x8x8xf32> to vector<2x8x1x8x8xf32>
    %159 = vector.shape_cast %158 : vector<2x8x1x8x8xf32> to vector<2x8x8x8xf32>
    %160 = vector.extract_strided_slice %157 {offsets = [0, 0, 1, 0, 0], sizes = [2, 8, 1, 8, 8], strides = [1, 1, 1, 1, 1]} : vector<2x8x2x8x8xf32> to vector<2x8x1x8x8xf32>
    %161 = vector.shape_cast %160 : vector<2x8x1x8x8xf32> to vector<2x8x8x8xf32>
    %162 = arith.maximumf %159, %161 : vector<2x8x8x8xf32>
    %cst_198 = arith.constant 0.000000e+00 : f32
    %163 = vector.broadcast %cst_198 : f32 to vector<2x8x8x8xf32>
    %164 = arith.maximumf %162, %163 : vector<2x8x8x8xf32>
    %c0_199 = arith.constant 0 : index
    %c0_200 = arith.constant 0 : index
    %c0_201 = arith.constant 0 : index
    %c0_202 = arith.constant 0 : index
    %165 = vector.load %arg11[%c0_199, %c0_200, %c0_201, %c0_202] : memref<2x8x8x8xf32, #tpu.memory_space<vmem>>, vector<2x8x8x8xf32>
    tpu.vector_store %arg11[%c0_199, %c0_200, %c0_201, %c0_202], %164 {strides = array<i32>} : memref<2x8x8x8xf32, #tpu.memory_space<vmem>>, vector<2x8x8x8xf32>,
    return
  }
}

</mosaic_0001>

<bundles_post_ra>
// kernel: tpu_custom_call.1
= control target key start
LH: loop header
LB: loop body
LE: loop exit
PB: predicated region body
PF: predicated region fallthrough
CT: control target
= control target key end

     0   :  { %vm39_vm0 = vcmask 261120   ;;  %vm49_vm1 = vcmask 253952   ;;  %v14333_v2 = vmov 0.0   ;;  %s9770_s13 = smov 96   ;;  %s9771_s16 = smov 32   ;;  %s14321_s0 = inlined_call_operand.vmem [shape: f32[2,16,8,32], index: 0, kind: input, shape index: {}]   ;;  %s14322_s1 = inlined_call_operand.vmem [shape: f32[288,16], index: 1, kind: input, shape index: {}]   ;;  %s14323_s2 = inlined_call_operand.vmem [shape: f32[1,16], index: 2, kind: input, shape index: {}]   ;;  %s14324_s3 = inlined_call_operand.vmem [shape: f32[144,16], index: 3, kind: input, shape index: {}]   ;;  %s14325_s4 = inlined_call_operand.vmem [shape: f32[1,16], index: 4, kind: input, shape index: {}]   ;;  %s14326_s5 = inlined_call_operand.vmem [shape: f32[144,16], index: 5, kind: input, shape index: {}]   ;;  %s14327_s6 = inlined_call_operand.vmem [shape: f32[1,16], index: 6, kind: input, shape index: {}]   ;;  %s14328_s7 = inlined_call_operand.vmem [shape: f32[80,16], index: 7, kind: input, shape index: {}]   ;;  %s14329_s8 = inlined_call_operand.vmem [shape: f32[1,16], index: 8, kind: input, shape index: {}]   ;;  %s14330_s9 = inlined_call_operand.vmem [shape: f32[1,24], index: 9, kind: input, shape index: {}]   ;;  %s14331_s10 = inlined_call_operand.vmem [shape: f32[1,24], index: 10, kind: input, shape index: {}]   ;;  %s14332_s11 = inlined_call_operand.hbm [shape: f32[2,8,8,8], index: 11, kind: output, shape index: {}]  }
   0x1   :  { %v122_v0 = vld [vmem:[%s14321_s0] sm:$0xff]  ;;  %v123_v1 = vld [vmem:[%s14321_s0 + $0x8] sm:$0xff]  ;;  %51 = vst.msk [vmem:[#allocation2 + $0x10] sm:$0x1] %vm49_vm1, %v14333_v2  ;;  %52 = vst.msk [vmem:[#allocation2 + $0x20] sm:$0x1] %vm49_vm1, %v14333_v2  ;;  %1660 = vmatprep.subr.mxu0 %v14333_v2 }
   0x2   :  { %155 = vst.msk [vmem:[#allocation2 + $0x11] sm:$0xff] %vm39_vm0, %v122_v0  ;;  %156 = vst.msk [vmem:[#allocation2 + $0x21] sm:$0xff] %vm39_vm0, %v123_v1  ;;  %v124_v3 = vld [vmem:[%s14321_s0 + $0x10] sm:$0xff]  ;;  %v125_v4 = vld [vmem:[%s14321_s0 + $0x18] sm:$0xff]  ;;  %s9772_s21 = smov 64  }
   0x3   :  { %40 = vst.msk [vmem:[#allocation2] sm:$0xff] %vm39_vm0, %v14333_v2  ;;  %41 = vst.msk [vmem:[#allocation2 + $0x8] sm:$0xff] %vm39_vm0, %v14333_v2  ;;  %v126_v5 = vld [vmem:[%s14321_s0 + $0x20] sm:$0xff]  ;;  %v127_v6 = vld [vmem:[%s14321_s0 + $0x28] sm:$0xff] }
   0x4   :  { %42 = vst.msk [vmem:[#allocation2 + $0x120] sm:$0xff] %vm39_vm0, %v14333_v2  ;;  %43 = vst.msk [vmem:[#allocation2 + $0x128] sm:$0xff] %vm39_vm0, %v14333_v2  ;;  %v128_v7 = vld [vmem:[%s14321_s0 + $0x30] sm:$0xff]  ;;  %v129_v8 = vld [vmem:[%s14321_s0 + $0x38] sm:$0xff] }
   0x5   :  { %45 = vst.msk [vmem:[#allocation2 + $0x110] sm:$0xff] %vm39_vm0, %v14333_v2  ;;  %46 = vst.msk [vmem:[#allocation2 + $0x118] sm:$0xff] %vm39_vm0, %v14333_v2  ;;  %v130_v9 = vld [vmem:[%s14321_s0 + $0x40] sm:$0xff]  ;;  %v131_v10 = vld [vmem:[%s14321_s0 + $0x48] sm:$0xff] }
   0x6   :  { %47 = vst.msk [vmem:[#allocation2 + $0x230] sm:$0xff] %vm39_vm0, %v14333_v2  ;;  %48 = vst.msk [vmem:[#allocation2 + $0x238] sm:$0xff] %vm39_vm0, %v14333_v2  ;;  %v1536_v11 = vld [vmem:[%s14322_s1 + $0x78] sm:$0xff]  ;;  %v1535_v12 = vld [vmem:[%s14322_s1 + $0x70] sm:$0xff] }
   0x7   :  { %53 = vst.msk [vmem:[#allocation2 + $0x30] sm:$0x1] %vm49_vm1, %v14333_v2  ;;  %54 = vst.msk [vmem:[#allocation2 + $0x40] sm:$0x1] %vm49_vm1, %v14333_v2  ;;  %1661 = vmatpush1.msra.mxu0 %v1536_v11  ;;  %v1534_v13 = vld [vmem:[%s14322_s1 + $0x68] sm:$0xff]  ;;  %v132_v14 = vld [vmem:[%s14321_s0 + $0x50] sm:$0xff] }
   0x8   :  { %55 = vst.msk [vmem:[#allocation2 + $0x50] sm:$0x1] %vm49_vm1, %v14333_v2  ;;  %56 = vst.msk [vmem:[#allocation2 + $0x60] sm:$0x1] %vm49_vm1, %v14333_v2  ;;  %1662 = vmatprep.subr.mxu0 %v14333_v2  ;;  %v1533_v15 = vld [vmem:[%s14322_s1 + $0x60] sm:$0xff]  ;;  %v1532_v16 = vld [vmem:[%s14322_s1 + $0x58] sm:$0xff] }
   0x9   :  { %57 = vst.msk [vmem:[#allocation2 + $0x70] sm:$0x1] %vm49_vm1, %v14333_v2  ;;  %58 = vst.msk [vmem:[#allocation2 + $0x80] sm:$0x1] %vm49_vm1, %v14333_v2  ;;  %1663 = vmatpush1.msra.mxu0 %v1535_v12  ;;  %v133_v17 = vld [vmem:[%s14321_s0 + $0x58] sm:$0xff]  ;;  %v10069_v18 = vld [vmem:[#allocation2 + $0x10] sm:$0xff] }
   0xa   :  { %59 = vst.msk [vmem:[#allocation2 + $0x90] sm:$0x1] %vm49_vm1, %v14333_v2  ;;  %60 = vst.msk [vmem:[#allocation2 + $0xa0] sm:$0x1] %vm49_vm1, %v14333_v2  ;;  %1664 = vmatprep.subr.mxu0 %v14333_v2  ;;  %v10071_v19 = vld [vmem:[#allocation2 + $0x21] sm:$0xff]  ;;  %v10076_v23 = vld [vmem:[#allocation2 + $0x11] sm:$0xff] }
   0xb   :  { %61 = vst.msk [vmem:[#allocation2 + $0xb0] sm:$0x1] %vm49_vm1, %v14333_v2  ;;  %62 = vst.msk [vmem:[#allocation2 + $0xc0] sm:$0x1] %vm49_vm1, %v14333_v2  ;;  %v302_v20 = vld [vmem:[#allocation2 + $0x1] sm:$0xff]  ;;  %1665 = vmatpush1.msra.mxu0 %v1534_v13  ;;  %v8132_v21 = vpack.i.bf16 %v10069_v18, %v10071_v19  ;;  %v1531_v28 = vld [vmem:[%s14322_s1 + $0x50] sm:$0xff] }
   0xc   :  { %63 = vst.msk [vmem:[#allocation2 + $0xd0] sm:$0x1] %vm49_vm1, %v14333_v2  ;;  %64 = vst.msk [vmem:[#allocation2 + $0xe0] sm:$0x1] %vm49_vm1, %v14333_v2  ;;  %1666 = vmatprep.subr.mxu0 %v14333_v2  ;;  %v10090_v30 = vld [vmem:[#allocation2 + $0x20] sm:$0xff]  ;;  %v1530_v33 = vld [vmem:[%s14322_s1 + $0x48] sm:$0xff] }
   0xd   :  { %65 = vst.msk [vmem:[#allocation2 + $0xf0] sm:$0x1] %vm49_vm1, %v14333_v2  ;;  %66 = vst.msk [vmem:[#allocation2 + $0x100] sm:$0x1] %vm49_vm1, %v14333_v2  ;;  %1667 = vmatpush1.msra.mxu0 %v1533_v15  ;;  %8133 = vrot.lane.b32.xlu1 %v8132_v21, %s9770_s13  ;;  %v1529_v35 = vld [vmem:[%s14322_s1 + $0x40] sm:$0xff]  ;;  %v1528_v39 = vld [vmem:[%s14322_s1 + $0x38] sm:$0xff] }
   0xe   :  { %69 = vst.msk [vmem:[#allocation2 + $0x130] sm:$0x1] %vm49_vm1, %v14333_v2  ;;  %70 = vst.msk [vmem:[#allocation2 + $0x140] sm:$0x1] %vm49_vm1, %v14333_v2  ;;  %1668 = vmatprep.subr.mxu0 %v14333_v2  ;;  %v1527_v41 = vld [vmem:[%s14322_s1 + $0x30] sm:$0xff]  ;;  %v1526_v45 = vld [vmem:[%s14322_s1 + $0x28] sm:$0xff] }
   0xf   :  { %71 = vst.msk [vmem:[#allocation2 + $0x150] sm:$0x1] %vm49_vm1, %v14333_v2  ;;  %72 = vst.msk [vmem:[#allocation2 + $0x160] sm:$0x1] %vm49_vm1, %v14333_v2  ;;  %1669 = vmatpush1.msra.mxu0 %v1532_v16  ;;  %v134_v46 = vld [vmem:[%s14321_s0 + $0x60] sm:$0xff]  ;;  %v135_v47 = vld [vmem:[%s14321_s0 + $0x68] sm:$0xff] }
  0x10   :  { %73 = vst.msk [vmem:[#allocation2 + $0x170] sm:$0x1] %vm49_vm1, %v14333_v2  ;;  %74 = vst.msk [vmem:[#allocation2 + $0x180] sm:$0x1] %vm49_vm1, %v14333_v2  ;;  %1670 = vmatprep.subr.mxu0 %v14333_v2  ;;  %v1525_v49 = vld [vmem:[%s14322_s1 + $0x20] sm:$0xff]  ;;  %v136_v52 = vld [vmem:[%s14321_s0 + $0x70] sm:$0xff] }
  0x11   :  { %75 = vst.msk [vmem:[#allocation2 + $0x190] sm:$0x1] %vm49_vm1, %v14333_v2  ;;  %76 = vst.msk [vmem:[#allocation2 + $0x1a0] sm:$0x1] %vm49_vm1, %v14333_v2  ;;  %1671 = vmatpush1.msra.mxu0 %v1531_v28  ;;  %v1524_v54 = vld [vmem:[%s14322_s1 + $0x18] sm:$0xff]  ;;  %v1523_v57 = vld [vmem:[%s14322_s1 + $0x10] sm:$0xff] }
  0x12   :  { %77 = vst.msk [vmem:[#allocation2 + $0x1b0] sm:$0x1] %vm49_vm1, %v14333_v2  ;;  %78 = vst.msk [vmem:[#allocation2 + $0x1c0] sm:$0x1] %vm49_vm1, %v14333_v2  ;;  %1672 = vmatprep.subr.mxu0 %v14333_v2  ;;  %v137_v55 = vld [vmem:[%s14321_s0 + $0x78] sm:$0xff]  ;;  %v1522_v62 = vld [vmem:[%s14322_s1 + $0x8] sm:$0xff] }
  0x13   :  { %79 = vst.msk [vmem:[#allocation2 + $0x1d0] sm:$0x1] %vm49_vm1, %v14333_v2  ;;  %80 = vst.msk [vmem:[#allocation2 + $0x1e0] sm:$0x1] %vm49_vm1, %v14333_v2  ;;  %1673 = vmatpush1.msra.mxu0 %v1530_v33  ;;  %v1556_v58 = vld [vmem:[%s14322_s1 + $0x118] sm:$0xff]  ;;  %v1555_v63 = vld [vmem:[%s14322_s1 + $0x110] sm:$0xff] }
  0x14   :  { %81 = vst.msk [vmem:[#allocation2 + $0x1f0] sm:$0x1] %vm49_vm1, %v14333_v2  ;;  %82 = vst.msk [vmem:[#allocation2 + $0x200] sm:$0x1] %vm49_vm1, %v14333_v2  ;;  %1674 = vmatprep.subr.mxu0 %v14333_v2  ;;  %7938 = vmatprep.subr.mxu1 %v1556_v58  ;;  %v1521_v1 = vld [vmem:[%s14322_s1] sm:$0xff]  ;;  %v1551_v11 = vld [vmem:[%s14322_s1 + $0xf0] sm:$0xff] }
  0x15   :  { %83 = vst.msk [vmem:[#allocation2 + $0x210] sm:$0x1] %vm49_vm1, %v14333_v2  ;;  %84 = vst.msk [vmem:[#allocation2 + $0x220] sm:$0x1] %vm49_vm1, %v14333_v2  ;;  %1675 = vmatpush1.msra.mxu0 %v1529_v35  ;;  %7939 = vmatpush3.msra.mxu1 %v1556_v58  ;;  %v139_v12 = vld [vmem:[%s14321_s0 + $0x88] sm:$0xff]  ;;  %v140_v16 = vld [vmem:[%s14321_s0 + $0x90] sm:$0xff] }
  0x16   :  { %87 = vst.msk [vmem:[#allocation2 + $0x19] sm:$0x1] %vm49_vm1, %v14333_v2  ;;  %88 = vst.msk [vmem:[#allocation2 + $0x29] sm:$0x1] %vm49_vm1, %v14333_v2  ;;  %1676 = vmatprep.subr.mxu0 %v14333_v2  ;;  %7940 = vmatprep.subr.mxu1 %v1555_v63  ;;  %v1550_v15 = vld [vmem:[%s14322_s1 + $0xe8] sm:$0xff] }
  0x17   :  { %89 = vst.msk [vmem:[#allocation2 + $0x39] sm:$0x1] %vm49_vm1, %v14333_v2  ;;  %90 = vst.msk [vmem:[#allocation2 + $0x49] sm:$0x1] %vm49_vm1, %v14333_v2  ;;  %1677 = vmatpush1.msra.mxu0 %v1528_v39  ;;  %7941 = vmatpush3.msra.mxu1 %v1555_v63  ;;  %v143_v21 = vld [vmem:[%s14321_s0 + $0xa8] sm:$0xff] }
  0x18   :  { %91 = vst.msk [vmem:[#allocation2 + $0x59] sm:$0x1] %vm49_vm1, %v14333_v2  ;;  %92 = vst.msk [vmem:[#allocation2 + $0x69] sm:$0x1] %vm49_vm1, %v14333_v2  ;;  %1678 = vmatprep.subr.mxu0 %v14333_v2 }
  0x19   :  { %93 = vst.msk [vmem:[#allocation2 + $0x79] sm:$0x1] %vm49_vm1, %v14333_v2  ;;  %94 = vst.msk [vmem:[#allocation2 + $0x89] sm:$0x1] %vm49_vm1, %v14333_v2  ;;  %1679 = vmatpush1.msra.mxu0 %v1527_v41 }
  0x1a   :  { %95 = vst.msk [vmem:[#allocation2 + $0x99] sm:$0x1] %vm49_vm1, %v14333_v2  ;;  %96 = vst.msk [vmem:[#allocation2 + $0xa9] sm:$0x1] %vm49_vm1, %v14333_v2  ;;  %1680 = vmatprep.subr.mxu0 %v14333_v2 }
  0x1b   :  { %97 = vst.msk [vmem:[#allocation2 + $0xb9] sm:$0x1] %vm49_vm1, %v14333_v2  ;;  %98 = vst.msk [vmem:[#allocation2 + $0xc9] sm:$0x1] %vm49_vm1, %v14333_v2  ;;  %1681 = vmatpush1.msra.mxu0 %v1526_v45 }
  0x1c   :  { %99 = vst.msk [vmem:[#allocation2 + $0xd9] sm:$0x1] %vm49_vm1, %v14333_v2  ;;  %100 = vst.msk [vmem:[#allocation2 + $0xe9] sm:$0x1] %vm49_vm1, %v14333_v2  ;;  %1682 = vmatprep.subr.mxu0 %v14333_v2 }
  0x1d   :  { %101 = vst.msk [vmem:[#allocation2 + $0xf9] sm:$0x1] %vm49_vm1, %v14333_v2  ;;  %102 = vst.msk [vmem:[#allocation2 + $0x109] sm:$0x1] %vm49_vm1, %v14333_v2  ;;  %v430_v22 = vld [vmem:[#allocation2 + $0x12] sm:$0xff]  ;;  %v431_v24 = vld [vmem:[#allocation2 + $0x22] sm:$0xff]  ;;  %1683 = vmatpush1.msra.mxu0 %v1525_v49 }
  0x1e   :  { %105 = vst.msk [vmem:[#allocation2 + $0x139] sm:$0x1] %vm49_vm1, %v14333_v2  ;;  %106 = vst.msk [vmem:[#allocation2 + $0x149] sm:$0x1] %vm49_vm1, %v14333_v2  ;;  %v8127_v25 = vpack.i.bf16 %v302_v20, %v430_v22  ;;  %7946 = vmatprep.mubr.msk.f32.mxu1 %vm39_vm0, %v431_v24  ;;  %v8137_v27 = vpack.i.bf16 %v10076_v23, %v431_v24  ;;  %1684 = vmatprep.subr.mxu0 %v14333_v2  ;;  %v142_v20 = vld [vmem:[%s14321_s0 + $0xa0] sm:$0xff] }
  0x1f   :  { %107 = vst.msk [vmem:[#allocation2 + $0x159] sm:$0x1] %vm49_vm1, %v14333_v2  ;;  %108 = vst.msk [vmem:[#allocation2 + $0x169] sm:$0x1] %vm49_vm1, %v14333_v2  ;;  %1685 = vmatpush1.msra.mxu0 %v1524_v54 }
  0x20   :  { %109 = vst.msk [vmem:[#allocation2 + $0x179] sm:$0x1] %vm49_vm1, %v14333_v2  ;;  %110 = vst.msk [vmem:[#allocation2 + $0x189] sm:$0x1] %vm49_vm1, %v14333_v2  ;;  %8128 = vrot.lane.b32.xlu0 %v8127_v25, %s9771_s16  ;;  %8138 = vrot.lane.b32.xlu1 %v8137_v27, %s9771_s16 }
  0x21   :  { %111 = vst.msk [vmem:[#allocation2 + $0x199] sm:$0x1] %vm49_vm1, %v14333_v2  ;;  %112 = vst.msk [vmem:[#allocation2 + $0x1a9] sm:$0x1] %vm49_vm1, %v14333_v2  ;;  %1686 = vmatprep.subr.mxu0 %v14333_v2 }
  0x22   :  { %113 = vst.msk [vmem:[#allocation2 + $0x1b9] sm:$0x1] %vm49_vm1, %v14333_v2  ;;  %114 = vst.msk [vmem:[#allocation2 + $0x1c9] sm:$0x1] %vm49_vm1, %v14333_v2  ;;  %1687 = vmatpush1.msra.mxu0 %v1523_v57 }
  0x23   :  { %115 = vst.msk [vmem:[#allocation2 + $0x1d9] sm:$0x1] %vm49_vm1, %v14333_v2  ;;  %116 = vst.msk [vmem:[#allocation2 + $0x1e9] sm:$0x1] %vm49_vm1, %v14333_v2  ;;  %1688 = vmatprep.subr.mxu0 %v14333_v2 }
  0x24   :  { %117 = vst.msk [vmem:[#allocation2 + $0x1f9] sm:$0x1] %vm49_vm1, %v14333_v2  ;;  %118 = vst.msk [vmem:[#allocation2 + $0x209] sm:$0x1] %vm49_vm1, %v14333_v2  ;;  %1689 = vmatpush1.msra.mxu0 %v1522_v62 }
  0x25   :  { %119 = vst.msk [vmem:[#allocation2 + $0x219] sm:$0x1] %vm49_vm1, %v14333_v2  ;;  %120 = vst.msk [vmem:[#allocation2 + $0x229] sm:$0x1] %vm49_vm1, %v14333_v2  ;;  %1690 = vmatprep.subr.mxu0 %v14333_v2 }
  0x26   :  { %86 = vst.msk [vmem:[#allocation2 + $0x9] sm:$0x1] %vm49_vm1, %v14333_v2  ;;  %50 = vst.msk [vmem:[#allocation2] sm:$0x1] %vm49_vm1, %v14333_v2  ;;  %1691 = vmatpush1.msra.mxu0 %v1521_v1 }
  0x27   :  { %67 = vst.msk [vmem:[#allocation2 + $0x110] sm:$0x1] %vm49_vm1, %v14333_v2  ;;  %68 = vst.msk [vmem:[#allocation2 + $0x120] sm:$0x1] %vm49_vm1, %v14333_v2  ;;  %1692 = vmatprep.subr.mxu0 %v14333_v2 }
  0x28   :  { %85 = vst.msk [vmem:[#allocation2 + $0x230] sm:$0x1] %vm49_vm1, %v14333_v2  ;;  %103 = vst.msk [vmem:[#allocation2 + $0x119] sm:$0x1] %vm49_vm1, %v14333_v2 }
  0x29   :  { %104 = vst.msk [vmem:[#allocation2 + $0x129] sm:$0x1] %vm49_vm1, %v14333_v2  ;;  %121 = vst.msk [vmem:[#allocation2 + $0x239] sm:$0x1] %vm49_vm1, %v14333_v2 }
  0x2a   :  { %157 = vst.msk [vmem:[#allocation2 + $0x31] sm:$0xff] %vm39_vm0, %v124_v3  ;;  %158 = vst.msk [vmem:[#allocation2 + $0x41] sm:$0xff] %vm39_vm0, %v125_v4 }
  0x2b   :  { %159 = vst.msk [vmem:[#allocation2 + $0x51] sm:$0xff] %vm39_vm0, %v126_v5  ;;  %160 = vst.msk [vmem:[#allocation2 + $0x61] sm:$0xff] %vm39_vm0, %v127_v6  ;;  %v1552_v6 = vld [vmem:[%s14322_s1 + $0xf8] sm:$0xff] }
  0x2c   :  { %161 = vst.msk [vmem:[#allocation2 + $0x71] sm:$0xff] %vm39_vm0, %v128_v7  ;;  %162 = vst.msk [vmem:[#allocation2 + $0x81] sm:$0xff] %vm39_vm0, %v129_v8  ;;  %v138_v7 = vld [vmem:[%s14321_s0 + $0x80] sm:$0xff]  ;;  %v1554_v8 = vld [vmem:[%s14322_s1 + $0x108] sm:$0xff]  ;;  %1693 = vmatpush2.msra.mxu0 %v1552_v6 }
  0x2d   :  { %163 = vst.msk [vmem:[#allocation2 + $0x91] sm:$0xff] %vm39_vm0, %v130_v9  ;;  %164 = vst.msk [vmem:[#allocation2 + $0xa1] sm:$0xff] %vm39_vm0, %v131_v10  ;;  %v334_v32 = vld [vmem:[#allocation2 + $0x2] sm:$0xff]  ;;  %1694 = vmatprep.subr.mxu0 %v14333_v2  ;;  %7942 = vmatprep.subr.mxu1 %v1554_v8 }
  0x2e   :  { %165 = vst.msk [vmem:[#allocation2 + $0xb1] sm:$0xff] %vm39_vm0, %v132_v14  ;;  %166 = vst.msk [vmem:[#allocation2 + $0xc1] sm:$0xff] %vm39_vm0, %v133_v17  ;;  %v8152_v36 = vpack.i.bf16 %v334_v32, %v10090_v30  ;;  %v141_v17 = vld [vmem:[%s14321_s0 + $0x98] sm:$0xff]  ;;  %1695 = vmatpush2.msra.mxu0 %v1551_v11  ;;  %7943 = vmatpush3.msra.mxu1 %v1554_v8 }
  0x2f   :  { %167 = vst.msk [vmem:[#allocation2 + $0xd1] sm:$0xff] %vm39_vm0, %v134_v46  ;;  %168 = vst.msk [vmem:[#allocation2 + $0xe1] sm:$0xff] %vm39_vm0, %v135_v47 }
  0x30   :  { %169 = vst.msk [vmem:[#allocation2 + $0xf1] sm:$0xff] %vm39_vm0, %v136_v52  ;;  %170 = vst.msk [vmem:[#allocation2 + $0x101] sm:$0xff] %vm39_vm0, %v137_v55 }
  0x31   :  { %v10079_v26 = vld [vmem:[#allocation2 + $0x30] sm:$0xff]  ;;  %v10107_v37 = vld [vmem:[#allocation2 + $0x40] sm:$0xff]  ;;  %171 = vst.msk [vmem:[#allocation2 + $0x131] sm:$0xff] %vm39_vm0, %v138_v7  ;;  %172 = vst.msk [vmem:[#allocation2 + $0x141] sm:$0xff] %vm39_vm0, %v139_v12 }
  0x32   :  { %v8142_v29 = vpack.i.bf16 %v430_v22, %v10079_v26  ;;  %v10092_v31 = vld [vmem:[#allocation2 + $0x31] sm:$0xff]  ;;  %v8162_v40 = vpack.i.bf16 %v431_v24, %v10107_v37  ;;  %v10124_v43 = vld [vmem:[#allocation2 + $0x42] sm:$0xff]  ;;  %173 = vst.msk [vmem:[#allocation2 + $0x151] sm:$0xff] %vm39_vm0, %v140_v16  ;;  %174 = vst.msk [vmem:[#allocation2 + $0x161] sm:$0xff] %vm39_vm0, %v141_v17 }
  0x33   :  { %v8147_v34 = vpack.i.bf16 %v10090_v30, %v10092_v31  ;;  %v10109_v38 = vld [vmem:[#allocation2 + $0x32] sm:$0xff]  ;;  %v10126_v44 = vld [vmem:[#allocation2 + $0x41] sm:$0xff]  ;;  %v8172_v48 = vpack.i.bf16 %v10092_v31, %v10124_v43  ;;  %175 = vst.msk [vmem:[#allocation2 + $0x171] sm:$0xff] %vm39_vm0, %v142_v20  ;;  %176 = vst.msk [vmem:[#allocation2 + $0x181] sm:$0xff] %vm39_vm0, %v143_v21 }
  0x34   :  { %8143 = vrot.lane.b32.xlu0 %v8142_v29, %s9772_s21  ;;  %v8157_v42 = vpack.i.bf16 %v10071_v19, %v10109_v38  ;;  %v8167_v50 = vpack.i.bf16 %v10079_v26, %v10126_v44  ;;  %v10150_v51 = vld [vmem:[#allocation2 + $0x51] sm:$0xff]  ;;  %v10179_v60 = vld [vmem:[#allocation2 + $0x60] sm:$0xff] }
  0x35   :  { %8148 = vrot.lane.b32.xlu1 %v8147_v34, %s9770_s13  ;;  %v10155_v53 = vld [vmem:[#allocation2 + $0x50] sm:$0xff]  ;;  %v8182_v56 = vpack.i.bf16 %v10107_v37, %v10150_v51  ;;  %v8192_v0 = vpack.i.bf16 %v10124_v43, %v10179_v60  ;;  %v10200_v4 = vld [vmem:[#allocation2 + $0x62] sm:$0xff] }
  0x36   :  { %v8177_v59 = vpack.i.bf16 %v10109_v38, %v10155_v53  ;;  %v10181_v61 = vld [vmem:[#allocation2 + $0x52] sm:$0xff]  ;;  %v10202_v5 = vld [vmem:[#allocation2 + $0x61] sm:$0xff]  ;;  %v8202_v9 = vpack.i.bf16 %v10150_v51, %v10200_v4 }
  0x37   :  { %v8187_v3 = vpack.i.bf16 %v10126_v44, %v10181_v61  ;;  %v10218_v10 = vld [vmem:[#allocation2 + $0x70] sm:$0xff]  ;;  %v8197_v13 = vpack.i.bf16 %v10155_v53, %v10202_v5  ;;  %v1553_v22 = vld [vmem:[%s14322_s1 + $0x100] sm:$0xff] }
  0x38   :  { %8153 = vrot.lane.b32.xlu0 %v8152_v36, %s9772_s21  ;;  %v10230_v14 = vld [vmem:[#allocation2 + $0x71] sm:$0xff] }
  0x39   :  { %8163 = vrot.lane.b32.xlu1 %v8162_v40, %s9772_s21  ;;  %v144_v24 = vld [vmem:[%s14321_s0 + $0xb0] sm:$0xff] }
  0x3c   :  { %8158 = vrot.lane.b32.xlu0 %v8157_v42, %s9771_s16 }
  0x3d   :  { %8173 = vrot.lane.b32.xlu1 %v8172_v48, %s9771_s16 }
  0x40   :  { %8168 = vrot.lane.b32.xlu0 %v8167_v50, %s9770_s13 }
  0x41   :  { %8183 = vrot.lane.b32.xlu1 %v8182_v56, %s9770_s13 }
  0x44   :  { %8178 = vrot.lane.b32.xlu0 %v8177_v59, %s9772_s21 }
  0x45   :  { %8193 = vrot.lane.b32.xlu1 %v8192_v0, %s9772_s21 }
  0x48   :  { %8188 = vrot.lane.b32.xlu0 %v8187_v3, %s9771_s16 }
  0x49   :  { %16 = vsyncpa [#allocation5], 0  ;;  %8203 = vrot.lane.b32.xlu1 %v8202_v9, %s9771_s16  ;;  %v8212_v25 = vpack.i.bf16 %v10179_v60, %v10230_v14  ;;  %1696 = vmatprep.subr.mxu0 %v14333_v2  ;;  %v1549_v27 = vld [vmem:[%s14322_s1 + $0xe0] sm:$0xff]  ;;  %177 = vst.msk [vmem:[#allocation2 + $0x191] sm:$0xff] %vm39_vm0, %v144_v24  ;;  %v8207_v28 = vpack.i.bf16 %v10181_v61, %v10218_v10  ;;  %v436_v32 = vld [vmem:[#allocation2 + $0x72] sm:$0xff]  ;;  %vm1359_vm2 = vcmask 523264  }
  0x4a   :  { %v469_v29 = vld [vmem:[#allocation2 + $0x80] sm:$0xff]  ;;  %1697 = vmatpush2.msra.mxu0 %v1550_v15  ;;  %v1548_v33 = vld [vmem:[%s14322_s1 + $0xd8] sm:$0xff]  ;;  %7944 = vmatprep.subr.mxu1 %v1553_v22  ;;  %v1547_v36 = vld [vmem:[%s14322_s1 + $0xd0] sm:$0xff]  ;;  %v8217_v39 = vpack.i.bf16 %v10202_v5, %v436_v32  ;;  %vm1392_vm3 = vcmask 785408   ;;  %vm187_vm4 = vcmask 130048   ;;  %vm197_vm5 = vcmask 122880  }
  0x4b   :  { %1698 = vmatprep.subr.mxu0 %v14333_v2  ;;  %7945 = vmatpush3.msra.mxu1 %v1553_v22  ;;  %v145_v34 = vld [vmem:[%s14321_s0 + $0xb8] sm:$0xff]  ;;  %v8222_v35 = vpack.i.bf16 %v10200_v4, %v469_v29  ;;  %v437_v40 = vld [vmem:[#allocation2 + $0x82] sm:$0xff]  ;;  %v1543_v52 = vld [vmem:[%s14322_s1 + $0xb0] sm:$0xff]  ;;  %188 = vst.msk [vmem:[#allocation3] sm:$0xff] %vm187_vm4, %v14333_v2  ;;  %s9773_s30 = smov 16   ;;  %s9774_s22 = smov 48  }
  0x4c   :  { %8198 = vrot.lane.b32.xlu0 %v8197_v13, %s9770_s13  ;;  %1699 = vmatpush2.msra.mxu0 %v1549_v27  ;;  %178 = vst.msk [vmem:[#allocation2 + $0x1a1] sm:$0xff] %vm39_vm0, %v145_v34  ;;  %v501_v41 = vld [vmem:[#allocation2 + $0x81] sm:$0xff]  ;;  %v8232_v45 = vpack.i.bf16 %v10230_v14, %v437_v40  ;;  %v502_v48 = vld [vmem:[#allocation2 + $0x91] sm:$0xff]  ;;  %s9775_s27 = smov 80   ;;  %vm3392_vm6 = vcmask 392192   ;;  %vm3457_vm7 = vcmask 654336  }
  0x4d   :  { %8213 = vrot.lane.b32.xlu1 %v8212_v25, %s9770_s13  ;;  %1700 = vmatprep.subr.mxu0 %v14333_v2  ;;  %v1546_v42 = vld [vmem:[%s14322_s1 + $0xc8] sm:$0xff]  ;;  %v1545_v46 = vld [vmem:[%s14322_s1 + $0xc0] sm:$0xff]  ;;  %v8227_v47 = vpack.i.bf16 %v10218_v10, %v501_v41  ;;  %v8242_v50 = vpack.i.bf16 %v469_v29, %v502_v48  ;;  %v438_v57 = vld [vmem:[#allocation2 + $0x92] sm:$0xff]  ;;  %189 = vst.msk [vmem:[#allocation3 + $0x8] sm:$0xff] %vm187_vm4, %v14333_v2  ;;  %vm3522_vm8 = vcmask 916480   ;;  %s9777_s20 = smov 8  }
  0x4e   :  { %1701 = vmatpush2.msra.mxu0 %v1548_v33  ;;  %7947 = vmatmul.mubr.msk.f32.vlgmr.msra.gmra.mxu1 %vm39_vm0, %v10109_v38  ;;  %v470_v38 = vld [vmem:[#allocation2 + $0x90] sm:$0xff]  ;;  %v146_v49 = vld [vmem:[%s14321_s0 + $0xc0] sm:$0xff]  ;;  %v147_v54 = vld [vmem:[%s14321_s0 + $0xc8] sm:$0xff]  ;;  %v8247_v63 = vpack.i.bf16 %v501_v41, %v438_v57  ;;  %190 = vst.msk [vmem:[#allocation3 + $0x120] sm:$0xff] %vm187_vm4, %v14333_v2  ;;  %s9778_s28 = smov 24   ;;  %vm6263_vm9 = vcmask 64512  }
  0x4f   :  { %1702 = vmatprep.subr.mxu0 %v14333_v2  ;;  %7949 = vmatprep.mubr.msk.f32.mxu1 %vm39_vm0, %v10124_v43  ;;  %v1544_v43 = vld [vmem:[%s14322_s1 + $0xb8] sm:$0xff]  ;;  %179 = vst.msk [vmem:[#allocation2 + $0x1b1] sm:$0xff] %vm39_vm0, %v146_v49  ;;  %v8237_v55 = vpack.i.bf16 %v436_v32, %v470_v38  ;;  %v471_v56 = vld [vmem:[#allocation2 + $0xa0] sm:$0xff]  ;;  %180 = vst.msk [vmem:[#allocation2 + $0x1c1] sm:$0xff] %vm39_vm0, %v147_v54  ;;  %vm6328_vm10 = vcmask 195584   ;;  %vm6393_vm11 = vcmask 326656  }
  0x50   :  { %8208 = vrot.lane.b32.xlu0 %v8207_v28, %s9772_s21  ;;  %1703 = vmatpush2.msra.mxu0 %v1547_v36  ;;  %v1542_v58 = vld [vmem:[%s14322_s1 + $0xa8] sm:$0xff]  ;;  %v8252_v59 = vpack.i.bf16 %v437_v40, %v471_v56  ;;  %v148_v62 = vld [vmem:[%s14321_s0 + $0xd0] sm:$0xff]  ;;  %v1540_v3 = vld [vmem:[%s14322_s1 + $0x98] sm:$0xff]  ;;  %191 = vst.msk [vmem:[#allocation3 + $0x128] sm:$0xff] %vm187_vm4, %v14333_v2 }
  0x51   :  { %8223 = vrot.lane.b32.xlu1 %v8222_v35, %s9772_s21  ;;  %1704 = vmatprep.subr.mxu0 %v14333_v2  ;;  %v439_v0 = vld [vmem:[#allocation2 + $0xa2] sm:$0xff]  ;;  %181 = vst.msk [vmem:[#allocation2 + $0x1d1] sm:$0xff] %vm39_vm0, %v148_v62  ;;  %v1539_v6 = vld [vmem:[%s14322_s1 + $0x90] sm:$0xff]  ;;  %v149_v10 = vld [vmem:[%s14321_s0 + $0xd8] sm:$0xff] }
  0x52   :  { %1705 = vmatpush2.msra.mxu0 %v1546_v42  ;;  %7950 = vmatmul.mubr.msk.f32.gmra.mxu1 %vm39_vm0, %v10181_v61  ;;  %v1541_v61 = vld [vmem:[%s14322_s1 + $0xa0] sm:$0xff]  ;;  %v504_v8 = vld [vmem:[#allocation2 + $0xb1] sm:$0xff]  ;;  %v1538_v12 = vld [vmem:[%s14322_s1 + $0x88] sm:$0xff]  ;;  %182 = vst.msk [vmem:[#allocation2 + $0x1e1] sm:$0xff] %vm39_vm0, %v149_v10 }
  0x53   :  { %1706 = vmatprep.subr.mxu0 %v14333_v2  ;;  %7952 = vmatprep.mubr.msk.f32.mxu1 %vm39_vm0, %v10200_v4  ;;  %v503_v1 = vld [vmem:[#allocation2 + $0xa1] sm:$0xff]  ;;  %v8262_v4 = vpack.i.bf16 %v502_v48, %v439_v0  ;;  %v440_v9 = vld [vmem:[#allocation2 + $0xb2] sm:$0xff]  ;;  %v8272_v13 = vpack.i.bf16 %v471_v56, %v504_v8  ;;  %193 = vst.msk [vmem:[#allocation3 + $0x110] sm:$0xff] %vm187_vm4, %v14333_v2  ;;  %194 = vst.msk [vmem:[#allocation3 + $0x118] sm:$0xff] %vm187_vm4, %v14333_v2 }
  0x54   :  { %8218 = vrot.lane.b32.xlu0 %v8217_v39, %s9771_s16  ;;  %1707 = vmatpush2.msra.mxu0 %v1545_v46  ;;  %v8257_v7 = vpack.i.bf16 %v470_v38, %v503_v1  ;;  %v472_v11 = vld [vmem:[#allocation2 + $0xb0] sm:$0xff]  ;;  %v1537_v15 = vld [vmem:[%s14322_s1 + $0x80] sm:$0xff]  ;;  %v8277_v25 = vpack.i.bf16 %v503_v1, %v440_v9  ;;  %195 = vst.msk [vmem:[#allocation3 + $0x230] sm:$0xff] %vm187_vm4, %v14333_v2  ;;  %196 = vst.msk [vmem:[#allocation3 + $0x238] sm:$0xff] %vm187_vm4, %v14333_v2 }
  0x55   :  { %8233 = vrot.lane.b32.xlu1 %v8232_v45, %s9771_s16  ;;  %1708 = vmatprep.subr.mxu0 %v14333_v2  ;;  %v8267_v16 = vpack.i.bf16 %v438_v57, %v472_v11  ;;  %v473_v17 = vld [vmem:[#allocation2 + $0xc0] sm:$0xff]  ;;  %v538_v24 = vld [vmem:[#allocation2 + $0xd2] sm:$0xff]  ;;  %234 = vst.msk [vmem:[#allocation3 + $0x9] sm:$0x1] %vm197_vm5, %v14333_v2  ;;  %235 = vst.msk [vmem:[#allocation3 + $0x19] sm:$0x1] %vm197_vm5, %v14333_v2 }
  0x56   :  { %1709 = vmatpush2.msra.mxu0 %v1544_v43  ;;  %7953 = vmatmul.mubr.msk.f32.gmra.mxu1 %vm39_vm0, %v436_v32  ;;  %v150_v20 = vld [vmem:[%s14321_s0 + $0xe0] sm:$0xff]  ;;  %v8282_v22 = vpack.i.bf16 %v439_v0, %v473_v17  ;;  %v151_v32 = vld [vmem:[%s14321_s0 + $0xe8] sm:$0xff]  ;;  %v506_v34 = vld [vmem:[#allocation2 + $0xd1] sm:$0xff]  ;;  %198 = vst.msk [vmem:[#allocation3] sm:$0x1] %vm197_vm5, %v14333_v2 }
  0x57   :  { %1710 = vmatprep.subr.mxu0 %v14333_v2  ;;  %7955 = vmatprep.mubr.msk.f32.mxu1 %vm39_vm0, %v437_v40  ;;  %v537_v21 = vld [vmem:[#allocation2 + $0xc2] sm:$0xff]  ;;  %183 = vst.msk [vmem:[#allocation2 + $0x1f1] sm:$0xff] %vm39_vm0, %v150_v20  ;;  %184 = vst.msk [vmem:[#allocation2 + $0x201] sm:$0xff] %vm39_vm0, %v151_v32  ;;  %v474_v35 = vld [vmem:[#allocation2 + $0xd0] sm:$0xff]  ;;  %v8302_v36 = vpack.i.bf16 %v473_v17, %v506_v34 }
  0x58   :  { %8228 = vrot.lane.b32.xlu0 %v8227_v47, %s9770_s13  ;;  %1711 = vmatpush2.msra.mxu0 %v1543_v52  ;;  %v441_v27 = vld [vmem:[#allocation2 + $0xc2] sm:$0xff]  ;;  %v8297_v40 = vpack.i.bf16 %v440_v9, %v474_v35  ;;  %v442_v42 = vld [vmem:[#allocation2 + $0xd2] sm:$0xff]  ;;  %199 = vst.msk [vmem:[#allocation3 + $0x10] sm:$0x1] %vm197_vm5, %v14333_v2  ;;  %200 = vst.msk [vmem:[#allocation3 + $0x20] sm:$0x1] %vm197_vm5, %v14333_v2 }
  0x59   :  { %8243 = vrot.lane.b32.xlu1 %v8242_v50, %s9770_s13  ;;  %1712 = vmatprep.subr.mxu0 %v14333_v2  ;;  %v505_v28 = vld [vmem:[#allocation2 + $0xc1] sm:$0xff]  ;;  %v8292_v29 = vpack.i.bf16 %v504_v8, %v441_v27  ;;  %v540_v45 = vld [vmem:[#allocation2 + $0xf2] sm:$0xff]  ;;  %201 = vst.msk [vmem:[#allocation3 + $0x30] sm:$0x1] %vm197_vm5, %v14333_v2  ;;  %202 = vst.msk [vmem:[#allocation3 + $0x40] sm:$0x1] %vm197_vm5, %v14333_v2 }
  0x5a   :  { %1713 = vmatpush2.msra.mxu0 %v1542_v58  ;;  %7956 = vmatmul.mubr.msk.f32.gmra.mxu1 %vm39_vm0, %v438_v57  ;;  %v8287_v33 = vpack.i.bf16 %v472_v11, %v505_v28  ;;  %v539_v39 = vld [vmem:[#allocation2 + $0xe2] sm:$0xff]  ;;  %v152_v46 = vld [vmem:[%s14321_s0 + $0xf0] sm:$0xff]  ;;  %v8307_v48 = vpack.i.bf16 %v505_v28, %v442_v42  ;;  %v153_v50 = vld [vmem:[%s14321_s0 + $0xf8] sm:$0xff]  ;;  %203 = vst.msk [vmem:[#allocation3 + $0x50] sm:$0x1] %vm197_vm5, %v14333_v2 }
  0x5b   :  { %1714 = vmatprep.subr.mxu0 %v14333_v2  ;;  %7958 = vmatprep.mubr.msk.f32.mxu1 %vm39_vm0, %v439_v0  ;;  %v475_v41 = vld [vmem:[#allocation2 + $0xe0] sm:$0xff]  ;;  %185 = vst.msk [vmem:[#allocation2 + $0x211] sm:$0xff] %vm39_vm0, %v152_v46  ;;  %v508_v54 = vld [vmem:[#allocation2 + $0xf1] sm:$0xff]  ;;  %186 = vst.msk [vmem:[#allocation2 + $0x221] sm:$0xff] %vm39_vm0, %v153_v50 }
  0x5c   :  { %8238 = vrot.lane.b32.xlu0 %v8237_v55, %s9772_s21  ;;  %1715 = vmatpush2.msra.mxu0 %v1541_v61  ;;  %v8312_v47 = vpack.i.bf16 %v441_v27, %v475_v41  ;;  %v443_v38 = vld [vmem:[#allocation2 + $0xe2] sm:$0xff]  ;;  %v476_v55 = vld [vmem:[#allocation2 + $0xf0] sm:$0xff]  ;;  %v8332_v56 = vpack.i.bf16 %v475_v41, %v508_v54  ;;  %204 = vst.msk [vmem:[#allocation3 + $0x60] sm:$0x1] %vm197_vm5, %v14333_v2  ;;  %205 = vst.msk [vmem:[#allocation3 + $0x70] sm:$0x1] %vm197_vm5, %v14333_v2 }
  0x5d   :  { %8253 = vrot.lane.b32.xlu1 %v8252_v59, %s9772_s21  ;;  %1716 = vmatprep.subr.mxu0 %v14333_v2  ;;  %v507_v43 = vld [vmem:[#allocation2 + $0xe1] sm:$0xff]  ;;  %v8322_v49 = vpack.i.bf16 %v506_v34, %v443_v38  ;;  %v8327_v58 = vpack.i.bf16 %v442_v42, %v476_v55  ;;  %v444_v61 = vld [vmem:[#allocation2 + $0xf2] sm:$0xff]  ;;  %206 = vst.msk [vmem:[#allocation3 + $0x80] sm:$0x1] %vm197_vm5, %v14333_v2  ;;  %207 = vst.msk [vmem:[#allocation3 + $0x90] sm:$0x1] %vm197_vm5, %v14333_v2 }
  0x5e   :  { %1717 = vmatpush2.msra.mxu0 %v1540_v3  ;;  %7959 = vmatmul.mubr.msk.f32.gmra.mxu1 %vm39_vm0, %v440_v9  ;;  %v8317_v52 = vpack.i.bf16 %v474_v35, %v507_v43  ;;  %v541_v57 = vld [vmem:[#allocation2 + $0x102] sm:$0xff]  ;;  %v542_v62 = vld [vmem:[#allocation2 + $0x112] sm:$0xff]  ;;  %v8337_v0 = vpack.i.bf16 %v507_v43, %v444_v61  ;;  %208 = vst.msk [vmem:[#allocation3 + $0xa0] sm:$0x1] %vm197_vm5, %v14333_v2  ;;  %209 = vst.msk [vmem:[#allocation3 + $0xb0] sm:$0x1] %vm197_vm5, %v14333_v2 }
  0x5f   :  { %1718 = vmatprep.subr.mxu0 %v14333_v2  ;;  %3676 = vmatprep.subr.mxu1 %v14333_v2  ;;  %v477_v59 = vld [vmem:[#allocation2 + $0x100] sm:$0xff]  ;;  %v478_v8 = vld [vmem:[#allocation2 + $0x110] sm:$0xff]  ;;  %210 = vst.msk [vmem:[#allocation3 + $0xc0] sm:$0x1] %vm197_vm5, %v14333_v2  ;;  %211 = vst.msk [vmem:[#allocation3 + $0xd0] sm:$0x1] %vm197_vm5, %v14333_v2 }
  0x60   :  { %8248 = vrot.lane.b32.xlu0 %v8247_v63, %s9771_s16  ;;  %1719 = vmatpush2.msra.mxu0 %v1539_v6  ;;  %v8342_v63 = vpack.i.bf16 %v443_v38, %v477_v59  ;;  %v445_v1 = vld [vmem:[#allocation2 + $0x102] sm:$0xff]  ;;  %v8357_v10 = vpack.i.bf16 %v444_v61, %v478_v8  ;;  %v10420_v34 = vld [vmem:[#allocation2 + $0x172] sm:$0xff]  ;;  %212 = vst.msk [vmem:[#allocation3 + $0xe0] sm:$0x1] %vm197_vm5, %v14333_v2  ;;  %213 = vst.msk [vmem:[#allocation3 + $0xf0] sm:$0x1] %vm197_vm5, %v14333_v2 }
  0x61   :  { %8263 = vrot.lane.b32.xlu1 %v8262_v4, %s9771_s16  ;;  %1720 = vmatprep.subr.mxu0 %v14333_v2  ;;  %v509_v3 = vld [vmem:[#allocation2 + $0x101] sm:$0xff]  ;;  %v8352_v4 = vpack.i.bf16 %v508_v54, %v445_v1  ;;  %v480_v35 = vld [vmem:[#allocation2 + $0x150] sm:$0xff]  ;;  %214 = vst.msk [vmem:[#allocation3 + $0x100] sm:$0x1] %vm197_vm5, %v14333_v2  ;;  %215 = vst.msk [vmem:[#allocation3 + $0x110] sm:$0x1] %vm197_vm5, %v14333_v2 }
  0x62   :  { %1721 = vmatpush2.msra.mxu0 %v1538_v12  ;;  %7961 = vmatprep.mubr.msk.f32.mxu1 %vm39_vm0, %v537_v21  ;;  %v8347_v6 = vpack.i.bf16 %v476_v55, %v509_v3  ;;  %v350_v11 = vld [vmem:[#allocation2 + $0x122] sm:$0xff]  ;;  %v319_v21 = vld [vmem:[#allocation2 + $0x131] sm:$0xff]  ;;  %216 = vst.msk [vmem:[#allocation3 + $0x120] sm:$0x1] %vm197_vm5, %v14333_v2  ;;  %217 = vst.msk [vmem:[#allocation3 + $0x130] sm:$0x1] %vm197_vm5, %v14333_v2 }
  0x63   :  { %1722 = vmatprep.subr.mxu0 %v14333_v2  ;;  %7962 = vmatmul.mubr.msk.f32.gmra.mxu1 %vm39_vm0, %v538_v24  ;;  %v479_v12 = vld [vmem:[#allocation2 + $0x140] sm:$0xff]  ;;  %v448_v24 = vld [vmem:[#allocation2 + $0x152] sm:$0xff]  ;;  %218 = vst.msk [vmem:[#allocation3 + $0x140] sm:$0x1] %vm197_vm5, %v14333_v2  ;;  %219 = vst.msk [vmem:[#allocation3 + $0x150] sm:$0x1] %vm197_vm5, %v14333_v2 }
  0x64   :  { %8258 = vrot.lane.b32.xlu0 %v8257_v7, %s9770_s13  ;;  %1723 = vmatpush2.msra.mxu0 %v1537_v15  ;;  %v510_v7 = vld [vmem:[#allocation2 + $0x111] sm:$0xff]  ;;  %v543_v17 = vld [vmem:[#allocation2 + $0x142] sm:$0xff]  ;;  %220 = vst.msk [vmem:[#allocation3 + $0x160] sm:$0x1] %vm197_vm5, %v14333_v2  ;;  %221 = vst.msk [vmem:[#allocation3 + $0x170] sm:$0x1] %vm197_vm5, %v14333_v2 }
  0x65   :  { %8273 = vrot.lane.b32.xlu1 %v8272_v13, %s9770_s13  ;;  %5462 = vmatprep.subr.mxu0 %v14333_v2  ;;  %v8362_v9 = vpack.i.bf16 %v477_v59, %v510_v7  ;;  %v318_v13 = vld [vmem:[#allocation2 + $0x121] sm:$0xff]  ;;  %v446_v15 = vld [vmem:[#allocation2 + $0x132] sm:$0xff]  ;;  %222 = vst.msk [vmem:[#allocation3 + $0x180] sm:$0x1] %vm197_vm5, %v14333_v2  ;;  %223 = vst.msk [vmem:[#allocation3 + $0x190] sm:$0x1] %vm197_vm5, %v14333_v2 }
  0x66   :  { %7964 = vmatprep.mubr.msk.f32.mxu1 %vm39_vm0, %v539_v39  ;;  %v8367_v20 = vpack.i.bf16 %v318_v13, %v446_v15  ;;  %v511_v27 = vld [vmem:[#allocation2 + $0x141] sm:$0xff]  ;;  %v10430_v42 = vld [vmem:[#allocation2 + $0x192] sm:$0xff]  ;;  %224 = vst.msk [vmem:[#allocation3 + $0x1a0] sm:$0x1] %vm197_vm5, %v14333_v2  ;;  %225 = vst.msk [vmem:[#allocation3 + $0x1b0] sm:$0x1] %vm197_vm5, %v14333_v2 }
  0x67   :  { %7965 = vmatmul.mubr.msk.f32.gmra.mxu1 %vm39_vm0, %v540_v45  ;;  %v10413_v28 = vld [vmem:[#allocation2 + $0x162] sm:$0xff]  ;;  %v10451_v54 = vld [vmem:[#allocation2 + $0x1d2] sm:$0xff]  ;;  %226 = vst.msk [vmem:[#allocation3 + $0x1c0] sm:$0x1] %vm197_vm5, %v14333_v2  ;;  %227 = vst.msk [vmem:[#allocation3 + $0x1d0] sm:$0x1] %vm197_vm5, %v14333_v2 }
  0x68   :  { %8268 = vrot.lane.b32.xlu0 %v8267_v16, %s9772_s21  ;;  %7967 = vmatprep.mubr.msk.f32.mxu1 %vm39_vm0, %v541_v57  ;;  %v8372_v16 = vpack.i.bf16 %v350_v11, %v479_v12  ;;  %v481_v41 = vld [vmem:[#allocation2 + $0x160] sm:$0xff]  ;;  %v482_v55 = vld [vmem:[#allocation2 + $0x170] sm:$0xff]  ;;  %228 = vst.msk [vmem:[#allocation3 + $0x1e0] sm:$0x1] %vm197_vm5, %v14333_v2  ;;  %229 = vst.msk [vmem:[#allocation3 + $0x1f0] sm:$0x1] %vm197_vm5, %v14333_v2 }
  0x69   :  { %8283 = vrot.lane.b32.xlu1 %v8282_v22, %s9772_s21  ;;  %v447_v22 = vld [vmem:[#allocation2 + $0x142] sm:$0xff]  ;;  %v10463_v61 = vld [vmem:[#allocation2 + $0x1f2] sm:$0xff]  ;;  %230 = vst.msk [vmem:[#allocation3 + $0x200] sm:$0x1] %vm197_vm5, %v14333_v2  ;;  %231 = vst.msk [vmem:[#allocation3 + $0x210] sm:$0x1] %vm197_vm5, %v14333_v2 }
  0x6a   :  { %v10432_v45 = vld [vmem:[#allocation2 + $0x1a2] sm:$0xff]  ;;  %v8402_v46 = vpack.i.bf16 %v447_v22, %v481_v41  ;;  %v10488_v11 = vld [vmem:[#allocation2 + $0x190] sm:$0xff]  ;;  %232 = vst.msk [vmem:[#allocation3 + $0x220] sm:$0x1] %vm197_vm5, %v14333_v2  ;;  %233 = vst.msk [vmem:[#allocation3 + $0x230] sm:$0x1] %vm197_vm5, %v14333_v2 }
  0x6b   :  { %7968 = vmatmul.mubr.msk.f32.gmra.mxu1 %vm39_vm0, %v542_v62  ;;  %v513_v38 = vld [vmem:[#allocation2 + $0x161] sm:$0xff]  ;;  %236 = vst.msk [vmem:[#allocation3 + $0x29] sm:$0x1] %vm197_vm5, %v14333_v2  ;;  %237 = vst.msk [vmem:[#allocation3 + $0x39] sm:$0x1] %vm197_vm5, %v14333_v2 }
  0x6c   :  { %8278 = vrot.lane.b32.xlu0 %v8277_v25, %s9771_s16  ;;  %7970 = vmatprep.mubr.msk.f32.mxu1 %vm39_vm0, %v543_v17  ;;  %v382_v25 = vld [vmem:[#allocation2 + $0x130] sm:$0xff]  ;;  %v10442_v43 = vld [vmem:[#allocation2 + $0x1c2] sm:$0xff]  ;;  %v8407_v50 = vpack.i.bf16 %v480_v35, %v513_v38  ;;  %v8427_v3 = vpack.i.bf16 %v513_v38, %v10420_v34  ;;  %238 = vst.msk [vmem:[#allocation3 + $0x49] sm:$0x1] %vm197_vm5, %v14333_v2  ;;  %239 = vst.msk [vmem:[#allocation3 + $0x59] sm:$0x1] %vm197_vm5, %v14333_v2 }
  0x6d   :  { %8293 = vrot.lane.b32.xlu1 %v8292_v29, %s9771_s16  ;;  %v8382_v29 = vpack.i.bf16 %v319_v21, %v447_v22  ;;  %v8377_v32 = vpack.i.bf16 %v382_v25, %v511_v27  ;;  %v10461_v59 = vld [vmem:[#allocation2 + $0x180] sm:$0xff]  ;;  %240 = vst.msk [vmem:[#allocation3 + $0x69] sm:$0x1] %vm197_vm5, %v14333_v2  ;;  %241 = vst.msk [vmem:[#allocation3 + $0x79] sm:$0x1] %vm197_vm5, %v14333_v2 }
  0x6e   :  { %v8432_v1 = vpack.i.bf16 %v10413_v28, %v10461_v59  ;;  %v10478_v7 = vld [vmem:[#allocation2 + $0x181] sm:$0xff]  ;;  %242 = vst.msk [vmem:[#allocation3 + $0x89] sm:$0x1] %vm197_vm5, %v14333_v2  ;;  %243 = vst.msk [vmem:[#allocation3 + $0x99] sm:$0x1] %vm197_vm5, %v14333_v2 }
  0x6f   :  { %7971 = vmatmul.mubr.msk.f32.gmra.mxu1 %vm39_vm0, %v448_v24  ;;  %v10480_v8 = vld [vmem:[#allocation2 + $0x222] sm:$0xff]  ;;  %v8437_v17 = vpack.i.bf16 %v482_v55, %v10478_v7  ;;  %244 = vst.msk [vmem:[#allocation3 + $0xa9] sm:$0x1] %vm197_vm5, %v14333_v2  ;;  %245 = vst.msk [vmem:[#allocation3 + $0xb9] sm:$0x1] %vm197_vm5, %v14333_v2 }
  0x70   :  { %8288 = vrot.lane.b32.xlu0 %v8287_v33, %s9770_s13  ;;  %7973 = vmatprep.mubr.msk.f32.mxu1 %vm39_vm0, %v10413_v28  ;;  %v512_v33 = vld [vmem:[#allocation2 + $0x151] sm:$0xff]  ;;  %246 = vst.msk [vmem:[#allocation3 + $0xc9] sm:$0x1] %vm197_vm5, %v14333_v2  ;;  %247 = vst.msk [vmem:[#allocation3 + $0xd9] sm:$0x1] %vm197_vm5, %v14333_v2 }
  0x71   :  { %8303 = vrot.lane.b32.xlu1 %v8302_v36, %s9770_s13  ;;  %v10422_v36 = vld [vmem:[#allocation2 + $0x182] sm:$0xff]  ;;  %v8392_v39 = vpack.i.bf16 %v479_v12, %v512_v33  ;;  %v10490_v12 = vld [vmem:[#allocation2 + $0x191] sm:$0xff]  ;;  %248 = vst.msk [vmem:[#allocation3 + $0xe9] sm:$0x1] %vm197_vm5, %v14333_v2  ;;  %249 = vst.msk [vmem:[#allocation3 + $0xf9] sm:$0x1] %vm197_vm5, %v14333_v2 }
  0x72   :  { %250 = vst.msk [vmem:[#allocation3 + $0x109] sm:$0x1] %vm197_vm5, %v14333_v2  ;;  %251 = vst.msk [vmem:[#allocation3 + $0x119] sm:$0x1] %vm197_vm5, %v14333_v2 }
  0x73   :  { %7974 = vmatmul.mubr.msk.f32.gmra.mxu1 %vm39_vm0, %v10420_v34  ;;  %252 = vst.msk [vmem:[#allocation3 + $0x129] sm:$0x1] %vm197_vm5, %v14333_v2  ;;  %253 = vst.msk [vmem:[#allocation3 + $0x139] sm:$0x1] %vm197_vm5, %v14333_v2 }
  0x74   :  { %8298 = vrot.lane.b32.xlu0 %v8297_v40, %s9772_s21  ;;  %7976 = vmatprep.mubr.msk.f32.mxu1 %vm39_vm0, %v10422_v36  ;;  %v8387_v40 = vpack.i.bf16 %v446_v15, %v480_v35  ;;  %254 = vst.msk [vmem:[#allocation3 + $0x149] sm:$0x1] %vm197_vm5, %v14333_v2  ;;  %255 = vst.msk [vmem:[#allocation3 + $0x159] sm:$0x1] %vm197_vm5, %v14333_v2 }
  0x75   :  { %8313 = vrot.lane.b32.xlu1 %v8312_v47, %s9772_s21  ;;  %v8397_v47 = vpack.i.bf16 %v511_v27, %v448_v24  ;;  %256 = vst.msk [vmem:[#allocation3 + $0x169] sm:$0x1] %vm197_vm5, %v14333_v2  ;;  %257 = vst.msk [vmem:[#allocation3 + $0x179] sm:$0x1] %vm197_vm5, %v14333_v2 }
  0x76   :  { %258 = vst.msk [vmem:[#allocation3 + $0x189] sm:$0x1] %vm197_vm5, %v14333_v2  ;;  %259 = vst.msk [vmem:[#allocation3 + $0x199] sm:$0x1] %vm197_vm5, %v14333_v2 }
  0x77   :  { %7977 = vmatmul.mubr.msk.f32.gmra.mxu1 %vm39_vm0, %v10430_v42  ;;  %260 = vst.msk [vmem:[#allocation3 + $0x1a9] sm:$0x1] %vm197_vm5, %v14333_v2  ;;  %261 = vst.msk [vmem:[#allocation3 + $0x1b9] sm:$0x1] %vm197_vm5, %v14333_v2 }
  0x78   :  { %8308 = vrot.lane.b32.xlu0 %v8307_v48, %s9771_s16  ;;  %7979 = vmatprep.mubr.msk.f32.mxu1 %vm39_vm0, %v10432_v45  ;;  %v10440_v48 = vld [vmem:[#allocation2 + $0x1b2] sm:$0xff]  ;;  %262 = vst.msk [vmem:[#allocation3 + $0x1c9] sm:$0x1] %vm197_vm5, %v14333_v2  ;;  %263 = vst.msk [vmem:[#allocation3 + $0x1d9] sm:$0x1] %vm197_vm5, %v14333_v2 }
  0x79   :  { %8323 = vrot.lane.b32.xlu1 %v8322_v49, %s9771_s16  ;;  %v8412_v49 = vpack.i.bf16 %v512_v33, %v10413_v28  ;;  %264 = vst.msk [vmem:[#allocation3 + $0x1e9] sm:$0x1] %vm197_vm5, %v14333_v2  ;;  %265 = vst.msk [vmem:[#allocation3 + $0x1f9] sm:$0x1] %vm197_vm5, %v14333_v2 }
  0x7a   :  { %266 = vst.msk [vmem:[#allocation3 + $0x209] sm:$0x1] %vm197_vm5, %v14333_v2  ;;  %267 = vst.msk [vmem:[#allocation3 + $0x219] sm:$0x1] %vm197_vm5, %v14333_v2 }
  0x7b   :  { %7980 = vmatmul.mubr.msk.f32.gmra.mxu1 %vm39_vm0, %v10440_v48  ;;  %268 = vst.msk [vmem:[#allocation3 + $0x229] sm:$0x1] %vm197_vm5, %v14333_v2  ;;  %269 = vst.msk [vmem:[#allocation3 + $0x239] sm:$0x1] %vm197_vm5, %v14333_v2 }
  0x7c   :  { %8318 = vrot.lane.b32.xlu0 %v8317_v52, %s9770_s13  ;;  %7982 = vmatprep.mubr.msk.f32.mxu1 %vm39_vm0, %v10442_v43  ;;  %v514_v52 = vld [vmem:[#allocation2 + $0x171] sm:$0xff] }
  0x7d   :  { %8333 = vrot.lane.b32.xlu1 %v8332_v56, %s9770_s13  ;;  %v10453_v56 = vld [vmem:[#allocation2 + $0x1e2] sm:$0xff]  ;;  %v8422_v57 = vpack.i.bf16 %v481_v41, %v514_v52 }
  0x7f   :  { %7983 = vmatmul.mubr.msk.f32.gmra.mxu1 %vm39_vm0, %v10451_v54  ;;  %v8134_v62 = vpop.permute.xlu1 %8133 }
  0x80   :  { %8328 = vrot.lane.b32.xlu0 %v8327_v58, %s9772_s21  ;;  %7985 = vmatprep.mubr.msk.f32.mxu1 %vm39_vm0, %v10453_v56  ;;  %v8417_v58 = vpack.i.bf16 %v448_v24, %v482_v55  ;;  %v270_v24 = vld [vmem:[#allocation2] sm:$0xff]  ;;  %v8136_v25 = vunpack.i.h.bf16 %v8134_v62  ;;  %v8135_v27 = vunpack.i.l.bf16 %v8134_v62 }
  0x81   :  { %8343 = vrot.lane.b32.xlu1 %v8342_v63, %s9772_s21  ;;  %v10465_v63 = vld [vmem:[#allocation2 + $0x202] sm:$0xff] }
  0x83   :  { %7986 = vmatmul.mubr.msk.f32.gmra.mxu1 %vm39_vm0, %v10463_v61 }
  0x84   :  { %8338 = vrot.lane.b32.xlu0 %v8337_v0, %s9771_s16  ;;  %7988 = vmatprep.mubr.msk.f32.mxu1 %vm39_vm0, %v10465_v63 }
  0x85   :  { %8353 = vrot.lane.b32.xlu1 %v8352_v4, %s9771_s16  ;;  %v10476_v4 = vld [vmem:[#allocation2 + $0x212] sm:$0xff] }
  0x87   :  { %7989 = vmatmul.mubr.msk.f32.gmra.mxu1 %vm39_vm0, %v10476_v4 }
  0x88   :  { %8348 = vrot.lane.b32.xlu0 %v8347_v6, %s9770_s13  ;;  %7991 = vmatprep.mubr.msk.f32.mxu1 %vm39_vm0, %v10480_v8 }
  0x89   :  { %8363 = vrot.lane.b32.xlu1 %v8362_v9, %s9770_s13 }
  0x8c   :  { %8358 = vrot.lane.b32.xlu0 %v8357_v10, %s9772_s21  ;;  %v8442_v10 = vpack.i.bf16 %v514_v52, %v10422_v36 }
  0x8d   :  { %8373 = vrot.lane.b32.xlu1 %v8372_v16, %s9772_s21 }
  0x90   :  { %8368 = vrot.lane.b32.xlu0 %v8367_v20, %s9771_s16  ;;  %v10494_v20 = vld [vmem:[#allocation2 + $0x1a0] sm:$0xff] }
  0x91   :  { %8383 = vrot.lane.b32.xlu1 %v8382_v29, %s9771_s16  ;;  %v8447_v29 = vpack.i.bf16 %v10420_v34, %v10488_v11 }
  0x92   :  { %v8129_v0 = vpop.permute.xlu0 %8128  ;;  %v8139_v6 = vpop.permute.xlu1 %8138 }
  0x93   :  { %v8131_v13 = vunpack.i.h.bf16 %v8129_v0  ;;  %v8130_v15 = vunpack.i.l.bf16 %v8129_v0  ;;  %v8140_v16 = vunpack.i.l.bf16 %v8139_v6  ;;  %v8141_v21 = vunpack.i.h.bf16 %v8139_v6 }
  0x94   :  { %8378 = vrot.lane.b32.xlu0 %v8377_v32, %s9770_s13  ;;  %v8452_v32 = vpack.i.bf16 %v10461_v59, %v10490_v12 }
  0x95   :  { %8393 = vrot.lane.b32.xlu1 %v8392_v39, %s9770_s13  ;;  %v1426_v34 = vsel %vm39_vm0, %v10071_v19, %v8140_v16 }
  0x98   :  { %8388 = vrot.lane.b32.xlu0 %v8387_v40, %s9772_s21  ;;  %v8462_v40 = vpack.i.bf16 %v10422_v36, %v10494_v20  ;;  %v1328_v36 = vsel %vm39_vm0, %v10069_v18, %v8141_v21  ;;  %v8457_v18 = vpack.i.bf16 %v10478_v7, %v10430_v42 }
  0x99   :  { %8403 = vrot.lane.b32.xlu1 %v8402_v46, %s9772_s21  ;;  %v1425_v46 = vsel %vm39_vm0, %v10076_v23, %v8130_v15  ;;  %v517_v15 = vld [vmem:[#allocation2 + $0x1a1] sm:$0xff] }
  0x9c   :  { %8398 = vrot.lane.b32.xlu0 %v8397_v47, %s9771_s16  ;;  %v1327_v47 = vsel %vm39_vm0, %v270_v24, %v8131_v13 }
  0x9d   :  { %8413 = vrot.lane.b32.xlu1 %v8412_v49, %s9771_s16 }
  0xa0   :  { %8408 = vrot.lane.b32.xlu0 %v8407_v50, %s9770_s13 }
  0xa1   :  { %8423 = vrot.lane.b32.xlu1 %v8422_v57, %s9770_s13 }
  0xa4   :  { %8418 = vrot.lane.b32.xlu0 %v8417_v58, %s9772_s21 }
  0xa5   :  { %8433 = vrot.lane.b32.xlu1 %v8432_v1, %s9772_s21 }
  0xa6   :  { %v8144_v9 = vpop.permute.xlu0 %8143 }
  0xa7   :  { %v8149_v22 = vpop.permute.xlu1 %8148  ;;  %v8145_v33 = vunpack.i.l.bf16 %v8144_v9  ;;  %v8146_v38 = vunpack.i.h.bf16 %v8144_v9 }
  0xa8   :  { %8428 = vrot.lane.b32.xlu0 %v8427_v3, %s9771_s16  ;;  %v8150_v41 = vunpack.i.l.bf16 %v8149_v22  ;;  %v8151_v62 = vunpack.i.h.bf16 %v8149_v22 }
  0xa9   :  { %8443 = vrot.lane.b32.xlu1 %v8442_v10, %s9771_s16  ;;  %v1458_v1 = vsel %vm1359_vm2, %v1426_v34, %v8145_v33  ;;  %v1361_v9 = vsel %vm1359_vm2, %v1328_v36, %v8146_v38 }
  0xaa   :  { %v8154_v28 = vpop.permute.xlu0 %8153  ;;  %v1490_v3 = vsel %vm1392_vm3, %v1458_v1, %v8150_v41  ;;  %v519_v1 = vld [vmem:[#allocation2 + $0x1c1] sm:$0xff] }
  0xab   :  { %v8156_v35 = vunpack.i.h.bf16 %v8154_v28  ;;  %v8155_v39 = vunpack.i.l.bf16 %v8154_v28  ;;  %v8164_v49 = vpop.permute.xlu1 %8163  ;;  %v10534_v28 = vld [vmem:[#allocation2 + $0x1b1] sm:$0xff] }
  0xac   :  { %8438 = vrot.lane.b32.xlu0 %v8437_v17, %s9770_s13  ;;  %v8166_v57 = vunpack.i.h.bf16 %v8164_v49  ;;  %v8165_v58 = vunpack.i.l.bf16 %v8164_v49  ;;  %v8482_v34 = vpack.i.bf16 %v10494_v20, %v10534_v28  ;;  %v487_v49 = vld [vmem:[#allocation2 + $0x1c0] sm:$0xff] }
  0xad   :  { %v1457_v50 = vsel %vm1359_vm2, %v1425_v46, %v8155_v39  ;;  %v1360_v52 = vsel %vm1359_vm2, %v1327_v47, %v8156_v35  ;;  %8453 = vrot.lane.b32.xlu1 %v8452_v32, %s9770_s13  ;;  %v486_v35 = vld [vmem:[#allocation2 + $0x1b0] sm:$0xff] }
  0xae   :  { %v8159_v55 = vpop.permute.xlu0 %8158  ;;  %v1489_v23 = vsel %vm1392_vm3, %v1457_v50, %v8135_v27  ;;  %v1393_v59 = vsel %vm1392_vm3, %v1360_v52, %v8136_v25  ;;  %v1394_v27 = vsel %vm1392_vm3, %v1361_v9, %v8151_v62  ;;  %v8477_v38 = vpack.i.bf16 %v10430_v42, %v486_v35 }
  0xaf   :  { %v8161_v19 = vunpack.i.h.bf16 %v8159_v55  ;;  %v8160_v0 = vunpack.i.l.bf16 %v8159_v55  ;;  %1724 = vmatprep.mubr.f32.mxu0 %v1489_v23  ;;  %v8174_v6 = vpop.permute.xlu1 %8173  ;;  %v8492_v42 = vpack.i.bf16 %v10432_v45, %v487_v49 }
  0xb0   :  { %1725 = vmatmul.mubr.f32.vlgmr.msra.gmra.mxu0 %v1393_v59  ;;  %8448 = vrot.lane.b32.xlu0 %v8447_v29, %s9772_s21  ;;  %v8176_v17 = vunpack.i.h.bf16 %v8174_v6  ;;  %v8175_v21 = vunpack.i.l.bf16 %v8174_v6  ;;  %v8487_v59 = vpack.i.bf16 %v517_v15, %v10440_v48 }
  0xb1   :  { %1729 = vmatprep.mubr.f32.mxu0 %v1490_v3  ;;  %v1427_v10 = vsel %vm39_vm0, %v10092_v31, %v8160_v0  ;;  %v1329_v13 = vsel %vm39_vm0, %v10090_v30, %v8161_v19  ;;  %8463 = vrot.lane.b32.xlu1 %v8462_v40, %s9772_s21  ;;  %v8472_v31 = vpack.i.bf16 %v10490_v12, %v10432_v45 }
  0xb2   :  { %v8169_v16 = vpop.permute.xlu0 %8168  ;;  %v1459_v22 = vsel %vm1359_vm2, %v1427_v10, %v8165_v58  ;;  %v1362_v24 = vsel %vm1359_vm2, %v1329_v13, %v8166_v57  ;;  %v8467_v30 = vpack.i.bf16 %v10488_v11, %v517_v15  ;;  %v1428_v12 = vsel %vm39_vm0, %v10126_v44, %v8175_v21 }
  0xb3   :  { %v8171_v25 = vunpack.i.h.bf16 %v8169_v16  ;;  %v8170_v7 = vunpack.i.l.bf16 %v8169_v16  ;;  %v8184_v29 = vpop.permute.xlu1 %8183  ;;  %v1330_v40 = vsel %vm39_vm0, %v10079_v26, %v8176_v17  ;;  %v8502_v15 = vpack.i.bf16 %v10534_v28, %v10442_v43  ;;  %v10565_v16 = vld [vmem:[#allocation2 + $0x1d1] sm:$0xff] }
  0xb4   :  { %1730 = vmatmul.mubr.f32.gmra.mxu0 %v1394_v27  ;;  %8458 = vrot.lane.b32.xlu0 %v8457_v18, %s9771_s16  ;;  %v8186_v41 = vunpack.i.h.bf16 %v8184_v29  ;;  %v8185_v46 = vunpack.i.l.bf16 %v8184_v29  ;;  %v8512_v29 = vpack.i.bf16 %v487_v49, %v10565_v16 }
  0xb5   :  { %v1491_v32 = vsel %vm1392_vm3, %v1459_v22, %v8170_v7  ;;  %v1395_v33 = vsel %vm1392_vm3, %v1362_v24, %v8171_v25  ;;  %8473 = vrot.lane.b32.xlu1 %v8472_v31, %s9771_s16  ;;  %v10569_v22 = vld [vmem:[#allocation2 + $0x1d0] sm:$0xff] }
  0xb6   :  { %v8179_v39 = vpop.permute.xlu0 %8178  ;;  %1734 = vmatprep.mubr.f32.mxu0 %v1491_v32  ;;  %v8507_v32 = vpack.i.bf16 %v10440_v48, %v10569_v22 }
  0xb7   :  { %v8181_v47 = vunpack.i.h.bf16 %v8179_v39  ;;  %v8180_v11 = vunpack.i.l.bf16 %v8179_v39  ;;  %v8194_v52 = vpop.permute.xlu1 %8193 }
  0xb8   :  { %1735 = vmatmul.mubr.f32.gmra.mxu0 %v1395_v33  ;;  %8468 = vrot.lane.b32.xlu0 %v8467_v30, %s9770_s13  ;;  %v8196_v57 = vunpack.i.h.bf16 %v8194_v52  ;;  %v8195_v58 = vunpack.i.l.bf16 %v8194_v52  ;;  %v10580_v33 = vld [vmem:[#allocation2 + $0x1e0] sm:$0xff] }
  0xb9   :  { %v1460_v50 = vsel %vm1359_vm2, %v1428_v12, %v8180_v11  ;;  %v1363_v44 = vsel %vm1359_vm2, %v1330_v40, %v8181_v47  ;;  %8483 = vrot.lane.b32.xlu1 %v8482_v34, %s9770_s13  ;;  %v8522_v48 = vpack.i.bf16 %v10442_v43, %v10580_v33  ;;  %v8517_v34 = vpack.i.bf16 %v519_v1, %v10451_v54 }
  0xba   :  { %v8189_v36 = vpop.permute.xlu0 %8188  ;;  %v1492_v26 = vsel %vm1392_vm3, %v1460_v50, %v8185_v46  ;;  %v1396_v55 = vsel %vm1392_vm3, %v1363_v44, %v8186_v41  ;;  %v10595_v44 = vld [vmem:[#allocation2 + $0x1e1] sm:$0xff] }
  0xbb   :  { %v8191_v23 = vunpack.i.h.bf16 %v8189_v36  ;;  %v8190_v20 = vunpack.i.l.bf16 %v8189_v36  ;;  %1739 = vmatprep.mubr.f32.mxu0 %v1492_v26  ;;  %v8204_v19 = vpop.permute.xlu1 %8203 }
  0xbc   :  { %1740 = vmatmul.mubr.f32.gmra.mxu0 %v1396_v55  ;;  %8478 = vrot.lane.b32.xlu0 %v8477_v38, %s9772_s21  ;;  %v8206_v6 = vunpack.i.h.bf16 %v8204_v19  ;;  %v8205_v9 = vunpack.i.l.bf16 %v8204_v19 }
  0xbd   :  { %v1429_v62 = vsel %vm39_vm0, %v10150_v51, %v8190_v20  ;;  %v1331_v0 = vsel %vm39_vm0, %v10107_v37, %v8191_v23  ;;  %8493 = vrot.lane.b32.xlu1 %v8492_v42, %s9772_s21  ;;  %v8497_v51 = vpack.i.bf16 %v486_v35, %v519_v1  ;;  %v405_v23 = vld [vmem:[#allocation2 + $0x81] sm:$0xff]  ;;  %v277_v20 = vld [vmem:[#allocation2 + $0x70] sm:$0xff] }
  0xbe   :  { %v8199_v3 = vpop.permute.xlu0 %8198  ;;  %v1461_v18 = vsel %vm1359_vm2, %v1429_v62, %v8195_v58  ;;  %v1364_v45 = vsel %vm1359_vm2, %v1331_v0, %v8196_v57  ;;  %v1430_v27 = vsel %vm39_vm0, %v10202_v5, %v8205_v9  ;;  %v1332_v31 = vsel %vm39_vm0, %v10155_v53, %v8206_v6  ;;  %v10605_v42 = vld [vmem:[#allocation2 + $0x1f1] sm:$0xff] }
  0xbf   :  { %v8201_v10 = vunpack.i.h.bf16 %v8199_v3  ;;  %v8200_v13 = vunpack.i.l.bf16 %v8199_v3  ;;  %v8214_v21 = vpop.permute.xlu1 %8213  ;;  %v10609_v0 = vld [vmem:[#allocation2 + $0x1f0] sm:$0xff] }
  0xc0   :  { %8488 = vrot.lane.b32.xlu0 %v8487_v59, %s9771_s16  ;;  %v8216_v25 = vunpack.i.h.bf16 %v8214_v21  ;;  %v8215_v7 = vunpack.i.l.bf16 %v8214_v21 }
  0xc1   :  { %v1493_v37 = vsel %vm1392_vm3, %v1461_v18, %v8200_v13  ;;  %v1397_v17 = vsel %vm1392_vm3, %v1364_v45, %v8201_v10  ;;  %8503 = vrot.lane.b32.xlu1 %v8502_v15, %s9771_s16  ;;  %v8542_v13 = vpack.i.bf16 %v10580_v33, %v10605_v42  ;;  %v8537_v15 = vpack.i.bf16 %v10451_v54, %v10609_v0 }
  0xc2   :  { %1744 = vmatprep.mubr.f32.mxu0 %v1493_v37  ;;  %v8209_v24 = vpop.permute.xlu0 %8208 }
  0xc3   :  { %1745 = vmatmul.mubr.f32.gmra.mxu0 %v1397_v17  ;;  %v8211_v30 = vunpack.i.h.bf16 %v8209_v24  ;;  %v8210_v28 = vunpack.i.l.bf16 %v8209_v24  ;;  %v8224_v35 = vpop.permute.xlu1 %8223 }
  0xc4   :  { %8498 = vrot.lane.b32.xlu0 %v8497_v51, %s9770_s13  ;;  %v8226_v41 = vunpack.i.h.bf16 %v8224_v35  ;;  %v8225_v46 = vunpack.i.l.bf16 %v8224_v35  ;;  %v10619_v51 = vld [vmem:[#allocation2 + $0x200] sm:$0xff] }
  0xc5   :  { %v1462_v5 = vsel %vm1359_vm2, %v1430_v27, %v8210_v28  ;;  %v1365_v39 = vsel %vm1359_vm2, %v1332_v31, %v8211_v30  ;;  %8513 = vrot.lane.b32.xlu1 %v8512_v29, %s9770_s13  ;;  %v406_v27 = vld [vmem:[#allocation2 + $0x91] sm:$0xff]  ;;  %v278_v31 = vld [vmem:[#allocation2 + $0x80] sm:$0xff]  ;;  %v8552_v54 = vpack.i.bf16 %v10453_v56, %v10619_v51  ;;  %v8547_v29 = vpack.i.bf16 %v10595_v44, %v10463_v61 }
  0xc6   :  { %v8219_v53 = vpop.permute.xlu0 %8218  ;;  %v1494_v12 = vsel %vm1392_vm3, %v1462_v5, %v8215_v7  ;;  %v1398_v40 = vsel %vm1392_vm3, %v1365_v39, %v8216_v25  ;;  %v10633_v5 = vld [vmem:[#allocation2 + $0x201] sm:$0xff] }
  0xc7   :  { %v8221_v47 = vunpack.i.h.bf16 %v8219_v53  ;;  %v8220_v11 = vunpack.i.l.bf16 %v8219_v53  ;;  %1749 = vmatprep.mubr.f32.mxu0 %v1494_v12  ;;  %v8234_v50 = vpop.permute.xlu1 %8233 }
  0xc8   :  { %1750 = vmatmul.mubr.f32.gmra.mxu0 %v1398_v40  ;;  %8508 = vrot.lane.b32.xlu0 %v8507_v32, %s9772_s21  ;;  %v8236_v43 = vunpack.i.h.bf16 %v8234_v50  ;;  %v8235_v55 = vunpack.i.l.bf16 %v8234_v50 }
  0xc9   :  { %v1431_v38 = vsel %vm39_vm0, %v10230_v14, %v8220_v11  ;;  %v1333_v49 = vsel %vm39_vm0, %v10179_v60, %v8221_v47  ;;  %8523 = vrot.lane.b32.xlu1 %v8522_v48, %s9772_s21  ;;  %v8532_v14 = vpack.i.bf16 %v10565_v16, %v10453_v56  ;;  %v8527_v60 = vpack.i.bf16 %v10569_v22, %v10595_v44  ;;  %v407_v47 = vld [vmem:[#allocation2 + $0xa1] sm:$0xff]  ;;  %v279_v11 = vld [vmem:[#allocation2 + $0x90] sm:$0xff] }
  0xca   :  { %v8229_v52 = vpop.permute.xlu0 %8228  ;;  %v1463_v36 = vsel %vm1359_vm2, %v1431_v38, %v8225_v46  ;;  %v1366_v26 = vsel %vm1359_vm2, %v1333_v49, %v8226_v41  ;;  %v1432_v6 = vsel %vm39_vm0, %v405_v23, %v8235_v55  ;;  %v1334_v9 = vsel %vm39_vm0, %v277_v20, %v8236_v43  ;;  %v10643_v38 = vld [vmem:[#allocation2 + $0x211] sm:$0xff] }
  0xcb   :  { %v8231_v57 = vunpack.i.h.bf16 %v8229_v52  ;;  %v8230_v58 = vunpack.i.l.bf16 %v8229_v52  ;;  %v8244_v19 = vpop.permute.xlu1 %8243  ;;  %v8562_v48 = vpack.i.bf16 %v10605_v42, %v10465_v63  ;;  %v10647_v52 = vld [vmem:[#allocation2 + $0x210] sm:$0xff]  ;;  %v8572_v20 = vpack.i.bf16 %v10619_v51, %v10643_v38 }
  0xcc   :  { %8518 = vrot.lane.b32.xlu0 %v8517_v34, %s9771_s16  ;;  %v8246_v3 = vunpack.i.h.bf16 %v8244_v19  ;;  %v8245_v18 = vunpack.i.l.bf16 %v8244_v19  ;;  %v8557_v34 = vpack.i.bf16 %v10609_v0, %v10633_v5 }
  0xcd   :  { %v1495_v59 = vsel %vm1392_vm3, %v1463_v36, %v8230_v58  ;;  %v1399_v62 = vsel %vm1392_vm3, %v1366_v26, %v8231_v57  ;;  %8533 = vrot.lane.b32.xlu1 %v8532_v14, %s9771_s16  ;;  %v8567_v14 = vpack.i.bf16 %v10463_v61, %v10647_v52 }
  0xce   :  { %1754 = vmatprep.mubr.f32.mxu0 %v1495_v59  ;;  %v8239_v1 = vpop.permute.xlu0 %8238 }
  0xcf   :  { %1755 = vmatmul.mubr.f32.gmra.mxu0 %v1399_v62  ;;  %v8241_v45 = vunpack.i.h.bf16 %v8239_v1  ;;  %v8240_v10 = vunpack.i.l.bf16 %v8239_v1  ;;  %v8254_v16 = vpop.permute.xlu1 %8253 }
  0xd0   :  { %8528 = vrot.lane.b32.xlu0 %v8527_v60, %s9770_s13  ;;  %v8256_v22 = vunpack.i.h.bf16 %v8254_v16  ;;  %v8255_v24 = vunpack.i.l.bf16 %v8254_v16  ;;  %v10657_v60 = vld [vmem:[#allocation2 + $0x220] sm:$0xff] }
  0xd1   :  { %v1464_v37 = vsel %vm1359_vm2, %v1432_v6, %v8240_v10  ;;  %v1367_v17 = vsel %vm1359_vm2, %v1334_v9, %v8241_v45  ;;  %8543 = vrot.lane.b32.xlu1 %v8542_v13, %s9770_s13  ;;  %v408_v6 = vld [vmem:[#allocation2 + $0xb1] sm:$0xff]  ;;  %v280_v9 = vld [vmem:[#allocation2 + $0xa0] sm:$0xff]  ;;  %v8582_v61 = vpack.i.bf16 %v10465_v63, %v10657_v60  ;;  %v8577_v13 = vpack.i.bf16 %v10633_v5, %v10476_v4 }
  0xd2   :  { %v8249_v21 = vpop.permute.xlu0 %8248  ;;  %v1496_v25 = vsel %vm1392_vm3, %v1464_v37, %v8245_v18  ;;  %v1400_v7 = vsel %vm1392_vm3, %v1367_v17, %v8246_v3  ;;  %v525_v37 = vld [vmem:[#allocation2 + $0x221] sm:$0xff] }
  0xd3   :  { %v8251_v30 = vunpack.i.h.bf16 %v8249_v21  ;;  %v8250_v28 = vunpack.i.l.bf16 %v8249_v21  ;;  %1759 = vmatprep.mubr.f32.mxu0 %v1496_v25  ;;  %v8264_v35 = vpop.permute.xlu1 %8263 }
  0xd4   :  { %1760 = vmatmul.mubr.f32.gmra.mxu0 %v1400_v7  ;;  %8538 = vrot.lane.b32.xlu0 %v8537_v15, %s9772_s21  ;;  %v8266_v46 = vunpack.i.h.bf16 %v8264_v35  ;;  %v8265_v56 = vunpack.i.l.bf16 %v8264_v35  ;;  %v494_v35 = vld [vmem:[#allocation2 + $0x230] sm:$0xff] }
  0xd5   :  { %v1433_v32 = vsel %vm39_vm0, %v406_v27, %v8250_v28  ;;  %v1335_v33 = vsel %vm39_vm0, %v278_v31, %v8251_v30  ;;  %8553 = vrot.lane.b32.xlu1 %v8552_v54, %s9772_s21  ;;  %v409_v27 = vld [vmem:[#allocation2 + $0xc1] sm:$0xff]  ;;  %v281_v31 = vld [vmem:[#allocation2 + $0xb0] sm:$0xff]  ;;  %v8592_v30 = vpack.i.bf16 %v10643_v38, %v10480_v8  ;;  %v8587_v28 = vpack.i.bf16 %v10647_v52, %v525_v37 }
  0xd6   :  { %v8259_v39 = vpop.permute.xlu0 %8258  ;;  %v1465_v53 = vsel %vm1359_vm2, %v1433_v32, %v8255_v24  ;;  %v1368_v41 = vsel %vm1359_vm2, %v1335_v33, %v8256_v22  ;;  %v1434_v55 = vsel %vm39_vm0, %v407_v47, %v8265_v56  ;;  %v1336_v57 = vsel %vm39_vm0, %v279_v11, %v8266_v46  ;;  %v526_v54 = vld [vmem:[#allocation2 + $0x231] sm:$0xff] }
  0xd7   :  { %v8261_v12 = vunpack.i.h.bf16 %v8259_v39  ;;  %v8260_v40 = vunpack.i.l.bf16 %v8259_v39  ;;  %v8274_v44 = vpop.permute.xlu1 %8273  ;;  %v8597_v47 = vpack.i.bf16 %v10476_v4, %v494_v35 }
  0xd8   :  { %8548 = vrot.lane.b32.xlu0 %v8547_v29, %s9771_s16  ;;  %v8276_v26 = vunpack.i.h.bf16 %v8274_v44  ;;  %v8275_v43 = vunpack.i.l.bf16 %v8274_v44 }
  0xd9   :  { %v1497_v49 = vsel %vm1392_vm3, %v1465_v53, %v8260_v40  ;;  %v1401_v50 = vsel %vm1392_vm3, %v1368_v41, %v8261_v12  ;;  %8563 = vrot.lane.b32.xlu1 %v8562_v48, %s9771_s16  ;;  %v8602_v40 = vpack.i.bf16 %v10657_v60, %v526_v54 }
  0xda   :  { %1764 = vmatprep.mubr.f32.mxu0 %v1497_v49  ;;  %v8269_v36 = vpop.permute.xlu0 %8268 }
  0xdb   :  { %1765 = vmatmul.mubr.f32.gmra.mxu0 %v1401_v50  ;;  %v8271_v58 = vunpack.i.h.bf16 %v8269_v36  ;;  %v8270_v23 = vunpack.i.l.bf16 %v8269_v36  ;;  %v8284_v62 = vpop.permute.xlu1 %8283  ;;  %v410_v36 = vld [vmem:[#allocation2 + $0xd1] sm:$0xff] }
  0xdc   :  { %8558 = vrot.lane.b32.xlu0 %v8557_v34, %s9770_s13  ;;  %v8286_v3 = vunpack.i.h.bf16 %v8284_v62  ;;  %v8285_v18 = vunpack.i.l.bf16 %v8284_v62 }
  0xdd   :  { %v1466_v42 = vsel %vm1359_vm2, %v1434_v55, %v8270_v23  ;;  %v1369_v59 = vsel %vm1359_vm2, %v1336_v57, %v8271_v58  ;;  %8573 = vrot.lane.b32.xlu1 %v8572_v20, %s9770_s13 }
  0xde   :  { %v8279_v19 = vpop.permute.xlu0 %8278  ;;  %v1498_v0 = vsel %vm1392_vm3, %v1466_v42, %v8275_v43  ;;  %v1402_v1 = vsel %vm1392_vm3, %v1369_v59, %v8276_v26  ;;  %v282_v26 = vld [vmem:[#allocation2 + $0xc0] sm:$0xff] }
  0xdf   :  { %v8281_v45 = vunpack.i.h.bf16 %v8279_v19  ;;  %v8280_v10 = vunpack.i.l.bf16 %v8279_v19  ;;  %1769 = vmatprep.mubr.f32.mxu0 %v1498_v0  ;;  %v8294_v15 = vpop.permute.xlu1 %8293  ;;  %v411_v19 = vld [vmem:[#allocation2 + $0xe1] sm:$0xff]  ;;  %v283_v0 = vld [vmem:[#allocation2 + $0xd0] sm:$0xff] }
  0xe0   :  { %1770 = vmatmul.mubr.f32.gmra.mxu0 %v1402_v1  ;;  %8568 = vrot.lane.b32.xlu0 %v8567_v14, %s9772_s21  ;;  %v8296_v21 = vunpack.i.h.bf16 %v8294_v15  ;;  %v8295_v22 = vunpack.i.l.bf16 %v8294_v15 }
  0xe1   :  { %v1435_v51 = vsel %vm39_vm0, %v408_v6, %v8280_v10  ;;  %v1337_v16 = vsel %vm39_vm0, %v280_v9, %v8281_v45  ;;  %8583 = vrot.lane.b32.xlu1 %v8582_v61, %s9772_s21 }
  0xe2   :  { %v8289_v17 = vpop.permute.xlu0 %8288  ;;  %v1467_v24 = vsel %vm1359_vm2, %v1435_v51, %v8285_v18  ;;  %v1370_v25 = vsel %vm1359_vm2, %v1337_v16, %v8286_v3  ;;  %v1436_v46 = vsel %vm39_vm0, %v409_v27, %v8295_v22  ;;  %v1338_v56 = vsel %vm39_vm0, %v281_v31, %v8296_v21 }
  0xe3   :  { %v8291_v63 = vunpack.i.h.bf16 %v8289_v17  ;;  %v8290_v7 = vunpack.i.l.bf16 %v8289_v17  ;;  %v8304_v33 = vpop.permute.xlu1 %8303 }
  0xe4   :  { %8578 = vrot.lane.b32.xlu0 %v8577_v13, %s9771_s16  ;;  %v8306_v53 = vunpack.i.h.bf16 %v8304_v33  ;;  %v8305_v41 = vunpack.i.l.bf16 %v8304_v33 }
  0xe5   :  { %v1499_v29 = vsel %vm1392_vm3, %v1467_v24, %v8290_v7  ;;  %v1403_v32 = vsel %vm1392_vm3, %v1370_v25, %v8291_v63  ;;  %8593 = vrot.lane.b32.xlu1 %v8592_v30, %s9771_s16  ;;  %v412_v63 = vld [vmem:[#allocation2 + $0xf1] sm:$0xff]  ;;  %v284_v7 = vld [vmem:[#allocation2 + $0xe0] sm:$0xff] }
  0xe6   :  { %v8299_v39 = vpop.permute.xlu0 %8298  ;;  %1774 = vmatprep.mubr.f32.mxu0 %v1499_v29 }
  0xe7   :  { %v8301_v8 = vunpack.i.h.bf16 %v8299_v39  ;;  %v8300_v12 = vunpack.i.l.bf16 %v8299_v39  ;;  %1775 = vmatmul.mubr.f32.gmra.mxu0 %v1403_v32  ;;  %v8314_v11 = vpop.permute.xlu1 %8313 }
  0xe8   :  { %8588 = vrot.lane.b32.xlu0 %v8587_v28, %s9770_s13  ;;  %v8316_v49 = vunpack.i.h.bf16 %v8314_v11  ;;  %v8315_v50 = vunpack.i.l.bf16 %v8314_v11 }
  0xe9   :  { %v1468_v48 = vsel %vm1359_vm2, %v1436_v46, %v8300_v12  ;;  %v1371_v34 = vsel %vm1359_vm2, %v1338_v56, %v8301_v8  ;;  %8603 = vrot.lane.b32.xlu1 %v8602_v40, %s9770_s13  ;;  %v413_v46 = vld [vmem:[#allocation2 + $0x101] sm:$0xff]  ;;  %v285_v56 = vld [vmem:[#allocation2 + $0xf0] sm:$0xff] }
  0xea   :  { %v8309_v38 = vpop.permute.xlu0 %8308  ;;  %v1500_v44 = vsel %vm1392_vm3, %v1468_v48, %v8305_v41  ;;  %v1404_v52 = vsel %vm1392_vm3, %v1371_v34, %v8306_v53 }
  0xeb   :  { %v8311_v43 = vunpack.i.h.bf16 %v8309_v38  ;;  %v8310_v55 = vunpack.i.l.bf16 %v8309_v38  ;;  %1779 = vmatprep.mubr.f32.mxu0 %v1500_v44  ;;  %v8324_v4 = vpop.permute.xlu1 %8323  ;;  %v558_v44 = vld [vmem:[#allocation2 + $0x232] sm:$0xff] }
  0xec   :  { %1780 = vmatmul.mubr.f32.gmra.mxu0 %v1404_v52  ;;  %8598 = vrot.lane.b32.xlu0 %v8597_v47, %s9772_s21  ;;  %v8326_v20 = vunpack.i.h.bf16 %v8324_v4  ;;  %v8325_v14 = vunpack.i.l.bf16 %v8324_v4 }
  0xed   :  { %v1437_v57 = vsel %vm39_vm0, %v410_v36, %v8310_v55  ;;  %v1339_v58 = vsel %vm39_vm0, %v282_v26, %v8311_v43  ;;  %7992 = vmatmul.mubr.msk.f32.gmra.mxu1 %vm39_vm0, %v558_v44 }
  0xee   :  { %v8319_v23 = vpop.permute.xlu0 %8318  ;;  %v1469_v60 = vsel %vm1359_vm2, %v1437_v57, %v8315_v50  ;;  %v1372_v42 = vsel %vm1359_vm2, %v1339_v58, %v8316_v49  ;;  %v1438_v10 = vsel %vm39_vm0, %v411_v19, %v8325_v14  ;;  %v1340_v61 = vsel %vm39_vm0, %v283_v0, %v8326_v20  ;;  %v286_v20 = vld [vmem:[#allocation2 + $0x120] sm:$0xff] }
  0xef   :  { %v8321_v59 = vunpack.i.h.bf16 %v8319_v23  ;;  %v8320_v62 = vunpack.i.l.bf16 %v8319_v23  ;;  %v10698_v18 = vpop.permute.xlu1 %8333  ;;  %v414_v23 = vld [vmem:[#allocation2 + $0x131] sm:$0xff] }
  0xf0   :  { %v8336_v9 = vunpack.i.h.bf16 %v10698_v18  ;;  %v8335_v45 = vunpack.i.l.bf16 %v10698_v18 }
  0xf1   :  { %v1501_v1 = vsel %vm1392_vm3, %v1469_v60, %v8320_v62  ;;  %v1405_v3 = vsel %vm1392_vm3, %v1372_v42, %v8321_v59 }
  0xf2   :  { %1784 = vmatprep.mubr.f32.mxu0 %v1501_v1  ;;  %v8329_v6 = vpop.permute.xlu0 %8328 }
  0xf3   :  { %1785 = vmatmul.mubr.f32.gmra.mxu0 %v1405_v3  ;;  %v8331_v13 = vunpack.i.h.bf16 %v8329_v6  ;;  %v8330_v15 = vunpack.i.l.bf16 %v8329_v6  ;;  %v10726_v37 = vpop.permute.xlu1 %8343 }
  0xf4   :  { %v8346_v24 = vunpack.i.h.bf16 %v10726_v37  ;;  %v8345_v25 = vunpack.i.l.bf16 %v10726_v37 }
  0xf5   :  { %v10721_v51 = vsel %vm1359_vm2, %v1438_v10, %v8330_v15  ;;  %v10724_v16 = vsel %vm1359_vm2, %v1340_v61, %v8331_v13  ;;  %v287_v10 = vld [vmem:[#allocation2 + $0x130] sm:$0xff] }
  0xf6   :  { %v8339_v17 = vpop.permute.xlu0 %8338  ;;  %v1502_v21 = vsel %vm1392_vm3, %v10721_v51, %v8335_v45  ;;  %v1406_v22 = vsel %vm1392_vm3, %v10724_v16, %v8336_v9  ;;  %v415_v45 = vld [vmem:[#allocation2 + $0x141] sm:$0xff] }
  0xf7   :  { %v8341_v27 = vunpack.i.h.bf16 %v8339_v17  ;;  %v8340_v31 = vunpack.i.l.bf16 %v8339_v17  ;;  %1789 = vmatprep.mubr.f32.mxu0 %v1502_v21  ;;  %v8354_v30 = vpop.permute.xlu1 %8353 }
  0xf8   :  { %1790 = vmatmul.mubr.f32.gmra.mxu0 %v1406_v22  ;;  %v8356_v32 = vunpack.i.h.bf16 %v8354_v30  ;;  %v8355_v33 = vunpack.i.l.bf16 %v8354_v30 }
  0xf9   :  { %v1439_v28 = vsel %vm39_vm0, %v412_v63, %v8340_v31  ;;  %v1341_v54 = vsel %vm39_vm0, %v284_v7, %v8341_v27 }
  0xfa   :  { %v8349_v29 = vpop.permute.xlu0 %8348  ;;  %v1471_v35 = vsel %vm1359_vm2, %v1439_v28, %v8345_v25  ;;  %v1374_v39 = vsel %vm1359_vm2, %v1341_v54, %v8346_v24  ;;  %v1440_v34 = vsel %vm39_vm0, %v413_v46, %v8355_v33  ;;  %v1342_v38 = vsel %vm39_vm0, %v285_v56, %v8356_v32  ;;  %v288_v32 = vld [vmem:[#allocation2 + $0x140] sm:$0xff] }
  0xfb   :  { %v8351_v53 = vunpack.i.h.bf16 %v8349_v29  ;;  %v8350_v41 = vunpack.i.l.bf16 %v8349_v29  ;;  %v8364_v40 = vpop.permute.xlu1 %8363  ;;  %v416_v29 = vld [vmem:[#allocation2 + $0x151] sm:$0xff] }
  0xfc   :  { %v8366_v11 = vunpack.i.h.bf16 %v8364_v40  ;;  %v8365_v48 = vunpack.i.l.bf16 %v8364_v40 }
  0xfd   :  { %v1503_v8 = vsel %vm1392_vm3, %v1471_v35, %v8350_v41  ;;  %v1407_v12 = vsel %vm1392_vm3, %v1374_v39, %v8351_v53 }
  0xfe   :  { %1794 = vmatprep.mubr.f32.mxu0 %v1503_v8  ;;  %v8359_v47 = vpop.permute.xlu0 %8358 }
  0xff   :  { %1795 = vmatmul.mubr.f32.gmra.mxu0 %v1407_v12  ;;  %v8361_v49 = vunpack.i.h.bf16 %v8359_v47  ;;  %v8360_v50 = vunpack.i.l.bf16 %v8359_v47  ;;  %v8374_v52 = vpop.permute.xlu1 %8373 }
 0x100   :  { %v8376_v55 = vunpack.i.h.bf16 %v8374_v52  ;;  %v8375_v4 = vunpack.i.l.bf16 %v8374_v52 }
 0x101   :  { %v1472_v36 = vsel %vm1359_vm2, %v1440_v34, %v8360_v50  ;;  %v1375_v26 = vsel %vm1359_vm2, %v1342_v38, %v8361_v49 }
 0x102   :  { %v8369_v43 = vpop.permute.xlu0 %8368  ;;  %v1504_v57 = vsel %vm1392_vm3, %v1472_v36, %v8365_v48  ;;  %v1408_v58 = vsel %vm1392_vm3, %v1375_v26, %v8366_v11  ;;  %v289_v48 = vld [vmem:[#allocation2 + $0x150] sm:$0xff]  ;;  %v9729_v36 = vld [vmem:[#allocation2 + $0x161] sm:$0xff] }
 0x103   :  { %v8371_v14 = vunpack.i.h.bf16 %v8369_v43  ;;  %v8370_v60 = vunpack.i.l.bf16 %v8369_v43  ;;  %1799 = vmatprep.mubr.f32.mxu0 %v1504_v57  ;;  %v8384_v42 = vpop.permute.xlu1 %8383 }
 0x104   :  { %1800 = vmatmul.mubr.f32.gmra.mxu0 %v1408_v58  ;;  %v8386_v0 = vunpack.i.h.bf16 %v8384_v42  ;;  %v8385_v1 = vunpack.i.l.bf16 %v8384_v42 }
 0x105   :  { %v1441_v59 = vsel %vm39_vm0, %v414_v23, %v8370_v60  ;;  %v1343_v62 = vsel %vm39_vm0, %v286_v20, %v8371_v14 }
 0x106   :  { %v8379_v19 = vpop.permute.xlu0 %8378  ;;  %v1473_v3 = vsel %vm1359_vm2, %v1441_v59, %v8375_v4  ;;  %v1376_v18 = vsel %vm1359_vm2, %v1343_v62, %v8376_v55  ;;  %v1442_v17 = vsel %vm39_vm0, %v415_v45, %v8385_v1  ;;  %v1344_v21 = vsel %vm39_vm0, %v287_v10, %v8386_v0  ;;  %v290_v62 = vld [vmem:[#allocation2 + $0x160] sm:$0xff] }
 0x107   :  { %v8381_v6 = vunpack.i.h.bf16 %v8379_v19  ;;  %v8380_v9 = vunpack.i.l.bf16 %v8379_v19  ;;  %v8394_v61 = vpop.permute.xlu1 %8393 }
 0x108   :  { %v8396_v16 = vunpack.i.h.bf16 %v8394_v61  ;;  %v8395_v37 = vunpack.i.l.bf16 %v8394_v61 }
 0x109   :  { %v1505_v13 = vsel %vm1392_vm3, %v1473_v3, %v8380_v9  ;;  %v1409_v15 = vsel %vm1392_vm3, %v1376_v18, %v8381_v6  ;;  %v9730_v3 = vld [vmem:[#allocation2 + $0x171] sm:$0xff] }
 0x10a   :  { %v8389_v51 = vpop.permute.xlu0 %8388  ;;  %1804 = vmatprep.mubr.f32.mxu0 %v1505_v13 }
 0x10b   :  { %v8391_v22 = vunpack.i.h.bf16 %v8389_v51  ;;  %v8390_v24 = vunpack.i.l.bf16 %v8389_v51  ;;  %1805 = vmatmul.mubr.f32.gmra.mxu0 %v1409_v15  ;;  %v8404_v7 = vpop.permute.xlu1 %8403 }
 0x10c   :  { %v8406_v28 = vunpack.i.h.bf16 %v8404_v7  ;;  %v8405_v54 = vunpack.i.l.bf16 %v8404_v7 }
 0x10d   :  { %v1474_v25 = vsel %vm1359_vm2, %v1442_v17, %v8390_v24  ;;  %v1377_v63 = vsel %vm1359_vm2, %v1344_v21, %v8391_v22 }
 0x10e   :  { %v8399_v27 = vpop.permute.xlu0 %8398  ;;  %v1506_v31 = vsel %vm1392_vm3, %v1474_v25, %v8395_v37  ;;  %v1410_v30 = vsel %vm1392_vm3, %v1377_v63, %v8396_v16  ;;  %v291_v16 = vld [vmem:[#allocation2 + $0x170] sm:$0xff]  ;;  %v9731_v63 = vld [vmem:[#allocation2 + $0x181] sm:$0xff] }
 0x10f   :  { %v8401_v33 = vunpack.i.h.bf16 %v8399_v27  ;;  %v8400_v35 = vunpack.i.l.bf16 %v8399_v27  ;;  %1809 = vmatprep.mubr.f32.mxu0 %v1506_v31  ;;  %v8414_v39 = vpop.permute.xlu1 %8413 }
 0x110   :  { %1810 = vmatmul.mubr.f32.gmra.mxu0 %v1410_v30  ;;  %v8416_v56 = vunpack.i.h.bf16 %v8414_v39  ;;  %v8415_v8 = vunpack.i.l.bf16 %v8414_v39 }
 0x111   :  { %v1443_v53 = vsel %vm39_vm0, %v416_v29, %v8400_v35  ;;  %v1345_v41 = vsel %vm39_vm0, %v288_v32, %v8401_v33 }
 0x112   :  { %v8409_v46 = vpop.permute.xlu0 %8408  ;;  %v1475_v12 = vsel %vm1359_vm2, %v1443_v53, %v8405_v54  ;;  %v1378_v40 = vsel %vm1359_vm2, %v1345_v41, %v8406_v28  ;;  %v1444_v26 = vsel %vm39_vm0, %v9729_v36, %v8415_v8  ;;  %v1346_v43 = vsel %vm39_vm0, %v289_v48, %v8416_v56  ;;  %v292_v41 = vld [vmem:[#allocation2 + $0x180] sm:$0xff] }
 0x113   :  { %v8411_v47 = vunpack.i.h.bf16 %v8409_v46  ;;  %v8410_v11 = vunpack.i.l.bf16 %v8409_v46  ;;  %v8424_v49 = vpop.permute.xlu1 %8423 }
 0x114   :  { %v8426_v44 = vunpack.i.h.bf16 %v8424_v49  ;;  %v8425_v52 = vunpack.i.l.bf16 %v8424_v49 }
 0x115   :  { %v1507_v34 = vsel %vm1392_vm3, %v1475_v12, %v8410_v11  ;;  %v1411_v38 = vsel %vm1392_vm3, %v1378_v40, %v8411_v47  ;;  %v9732_v12 = vld [vmem:[#allocation2 + $0x191] sm:$0xff] }
 0x116   :  { %v8419_v50 = vpop.permute.xlu0 %8418  ;;  %1814 = vmatprep.mubr.f32.mxu0 %v1507_v34 }
 0x117   :  { %v8421_v55 = vunpack.i.h.bf16 %v8419_v50  ;;  %v8420_v4 = vunpack.i.l.bf16 %v8419_v50  ;;  %1815 = vmatmul.mubr.f32.gmra.mxu0 %v1411_v38  ;;  %v8434_v57 = vpop.permute.xlu1 %8433 }
 0x118   :  { %v8436_v14 = vunpack.i.h.bf16 %v8434_v57  ;;  %v8435_v60 = vunpack.i.l.bf16 %v8434_v57 }
 0x119   :  { %v1476_v58 = vsel %vm1359_vm2, %v1444_v26, %v8420_v4  ;;  %v1379_v23 = vsel %vm1359_vm2, %v1346_v43, %v8421_v55 }
 0x11a   :  { %v8429_v20 = vpop.permute.xlu0 %8428  ;;  %v1508_v42 = vsel %vm1392_vm3, %v1476_v58, %v8425_v52  ;;  %v1412_v59 = vsel %vm1392_vm3, %v1379_v23, %v8426_v44  ;;  %v293_v52 = vld [vmem:[#allocation2 + $0x190] sm:$0xff]  ;;  %v9733_v58 = vld [vmem:[#allocation2 + $0x1a1] sm:$0xff] }
 0x11b   :  { %v8431_v19 = vunpack.i.h.bf16 %v8429_v20  ;;  %v8430_v0 = vunpack.i.l.bf16 %v8429_v20  ;;  %1819 = vmatprep.mubr.f32.mxu0 %v1508_v42  ;;  %v8444_v1 = vpop.permute.xlu1 %8443 }
 0x11c   :  { %1820 = vmatmul.mubr.f32.gmra.mxu0 %v1412_v59  ;;  %v8446_v45 = vunpack.i.h.bf16 %v8444_v1  ;;  %v8445_v10 = vunpack.i.l.bf16 %v8444_v1 }
 0x11d   :  { %v1445_v18 = vsel %vm39_vm0, %v9730_v3, %v8430_v0  ;;  %v1347_v6 = vsel %vm39_vm0, %v290_v62, %v8431_v19 }
 0x11e   :  { %v8439_v9 = vpop.permute.xlu0 %8438  ;;  %v1477_v61 = vsel %vm1359_vm2, %v1445_v18, %v8435_v60  ;;  %v1380_v13 = vsel %vm1359_vm2, %v1347_v6, %v8436_v14  ;;  %v1446_v7 = vsel %vm39_vm0, %v9731_v63, %v8445_v10  ;;  %v1348_v27 = vsel %vm39_vm0, %v291_v16, %v8446_v45  ;;  %v9734_v10 = vld [vmem:[#allocation2 + $0x1b1] sm:$0xff] }
 0x11f   :  { %v8441_v15 = vunpack.i.h.bf16 %v8439_v9  ;;  %v8440_v51 = vunpack.i.l.bf16 %v8439_v9  ;;  %v8454_v21 = vpop.permute.xlu1 %8453 }
 0x120   :  { %v8456_v24 = vunpack.i.h.bf16 %v8454_v21  ;;  %v8455_v25 = vunpack.i.l.bf16 %v8454_v21 }
 0x121   :  { %v1509_v37 = vsel %vm1392_vm3, %v1477_v61, %v8440_v51  ;;  %v1413_v17 = vsel %vm1392_vm3, %v1380_v13, %v8441_v15  ;;  %v9735_v13 = vld [vmem:[#allocation2 + $0x1a0] sm:$0xff] }
 0x122   :  { %1824 = vmatprep.mubr.f32.mxu0 %v1509_v37  ;;  %v8449_v22 = vpop.permute.xlu0 %8448 }
 0x123   :  { %1825 = vmatmul.mubr.f32.gmra.mxu0 %v1413_v17  ;;  %v8451_v31 = vunpack.i.h.bf16 %v8449_v22  ;;  %v8450_v30 = vunpack.i.l.bf16 %v8449_v22  ;;  %v8464_v29 = vpop.permute.xlu1 %8463 }
 0x124   :  { %v8466_v39 = vunpack.i.h.bf16 %v8464_v29  ;;  %v8465_v53 = vunpack.i.l.bf16 %v8464_v29  ;;  %v9737_v29 = vld [vmem:[#allocation2 + $0x1b0] sm:$0xff] }
 0x125   :  { %v1478_v28 = vsel %vm1359_vm2, %v1446_v7, %v8450_v30  ;;  %v1381_v54 = vsel %vm1359_vm2, %v1348_v27, %v8451_v31 }
 0x126   :  { %v8459_v32 = vpop.permute.xlu0 %8458  ;;  %v1510_v33 = vsel %vm1392_vm3, %v1478_v28, %v8455_v25  ;;  %v1414_v35 = vsel %vm1392_vm3, %v1381_v54, %v8456_v24  ;;  %v9736_v28 = vld [vmem:[#allocation2 + $0x1c1] sm:$0xff] }
 0x127   :  { %v8461_v46 = vunpack.i.h.bf16 %v8459_v32  ;;  %v8460_v56 = vunpack.i.l.bf16 %v8459_v32  ;;  %1829 = vmatprep.mubr.f32.mxu0 %v1510_v33  ;;  %v8474_v8 = vpop.permute.xlu1 %8473 }
 0x128   :  { %1830 = vmatmul.mubr.f32.gmra.mxu0 %v1414_v35  ;;  %v8476_v48 = vunpack.i.h.bf16 %v8474_v8  ;;  %v8475_v34 = vunpack.i.l.bf16 %v8474_v8 }
 0x129   :  { %v1447_v40 = vsel %vm39_vm0, %v9732_v12, %v8460_v56  ;;  %v1349_v47 = vsel %vm39_vm0, %v292_v41, %v8461_v46 }
 0x12a   :  { %v8469_v11 = vpop.permute.xlu0 %8468  ;;  %v1479_v38 = vsel %vm1359_vm2, %v1447_v40, %v8465_v53  ;;  %v1382_v49 = vsel %vm1359_vm2, %v1349_v47, %v8466_v39  ;;  %v1448_v23 = vsel %vm39_vm0, %v9733_v58, %v8475_v34  ;;  %v1350_v20 = vsel %vm39_vm0, %v293_v52, %v8476_v48  ;;  %v9738_v34 = vld [vmem:[#allocation2 + $0x1d1] sm:$0xff] }
 0x12b   :  { %v8471_v50 = vunpack.i.h.bf16 %v8469_v11  ;;  %v8470_v44 = vunpack.i.l.bf16 %v8469_v11  ;;  %v8484_v43 = vpop.permute.xlu1 %8483 }
 0x12c   :  { %v8486_v4 = vunpack.i.h.bf16 %v8484_v43  ;;  %v8485_v57 = vunpack.i.l.bf16 %v8484_v43 }
 0x12d   :  { %v1511_v36 = vsel %vm1392_vm3, %v1479_v38, %v8470_v44  ;;  %v1415_v26 = vsel %vm1392_vm3, %v1382_v49, %v8471_v50  ;;  %v9739_v49 = vld [vmem:[#allocation2 + $0x1c0] sm:$0xff] }
 0x12e   :  { %v8479_v55 = vpop.permute.xlu0 %8478  ;;  %1834 = vmatprep.mubr.f32.mxu0 %v1511_v36 }
 0x12f   :  { %v8481_v14 = vunpack.i.h.bf16 %v8479_v55  ;;  %v8480_v60 = vunpack.i.l.bf16 %v8479_v55  ;;  %1835 = vmatmul.mubr.f32.gmra.mxu0 %v1415_v26  ;;  %v8494_v42 = vpop.permute.xlu1 %8493 }
 0x130   :  { %v8496_v0 = vunpack.i.h.bf16 %v8494_v42  ;;  %v8495_v1 = vunpack.i.l.bf16 %v8494_v42  ;;  %v9740_v42 = vld [vmem:[#allocation2 + $0x1e1] sm:$0xff] }
 0x131   :  { %v1480_v59 = vsel %vm1359_vm2, %v1448_v23, %v8480_v60  ;;  %v1383_v62 = vsel %vm1359_vm2, %v1350_v20, %v8481_v14 }
 0x132   :  { %v8489_v19 = vpop.permute.xlu0 %8488  ;;  %v1512_v3 = vsel %vm1392_vm3, %v1480_v59, %v8485_v57  ;;  %v1416_v18 = vsel %vm1392_vm3, %v1383_v62, %v8486_v4  ;;  %v9741_v62 = vld [vmem:[#allocation2 + $0x1d0] sm:$0xff] }
 0x133   :  { %v8491_v6 = vunpack.i.h.bf16 %v8489_v19  ;;  %v8490_v9 = vunpack.i.l.bf16 %v8489_v19  ;;  %1839 = vmatprep.mubr.f32.mxu0 %v1512_v3  ;;  %v8504_v45 = vpop.permute.xlu1 %8503  ;;  %v3570_v3 = vld [vmem:[%s14324_s3 + $0x78] sm:$0xff] }
 0x134   :  { %1840 = vmatmul.mubr.f32.gmra.mxu0 %v1416_v18  ;;  %v8506_v16 = vunpack.i.h.bf16 %v8504_v45  ;;  %v8505_v37 = vunpack.i.l.bf16 %v8504_v45  ;;  %3677 = vmatpush1.msra.mxu1 %v3570_v3 }
 0x135   :  { %v1449_v61 = vsel %vm39_vm0, %v9734_v10, %v8490_v9  ;;  %v1351_v15 = vsel %vm39_vm0, %v9735_v13, %v8491_v6  ;;  %3678 = vmatprep.subr.mxu1 %v14333_v2 }
 0x136   :  { %v8499_v51 = vpop.permute.xlu0 %8498  ;;  %v1481_v17 = vsel %vm1359_vm2, %v1449_v61, %v8495_v1  ;;  %v1384_v21 = vsel %vm1359_vm2, %v1351_v15, %v8496_v0  ;;  %v1450_v54 = vsel %vm39_vm0, %v9736_v28, %v8505_v37  ;;  %v1352_v32 = vsel %vm39_vm0, %v9737_v29, %v8506_v16  ;;  %v3569_v37 = vld [vmem:[%s14324_s3 + $0x70] sm:$0xff] }
 0x137   :  { %v8501_v22 = vunpack.i.h.bf16 %v8499_v51  ;;  %v8500_v24 = vunpack.i.l.bf16 %v8499_v51  ;;  %v8514_v7 = vpop.permute.xlu1 %8513  ;;  %3679 = vmatpush1.msra.mxu1 %v3569_v37  ;;  %v299_v29 = vld [vmem:[#allocation2 + $0x1f0] sm:$0xff] }
 0x138   :  { %v8516_v31 = vunpack.i.h.bf16 %v8514_v7  ;;  %v8515_v30 = vunpack.i.l.bf16 %v8514_v7  ;;  %3680 = vmatprep.subr.mxu1 %v14333_v2 }
 0x139   :  { %v1513_v25 = vsel %vm1392_vm3, %v1481_v17, %v8500_v24  ;;  %v1417_v63 = vsel %vm1392_vm3, %v1384_v21, %v8501_v22  ;;  %v9742_v21 = vld [vmem:[#allocation2 + $0x1f1] sm:$0xff]  ;;  %v9743_v24 = vld [vmem:[#allocation2 + $0x1e0] sm:$0xff] }
 0x13a   :  { %1844 = vmatprep.mubr.f32.mxu0 %v1513_v25  ;;  %v8509_v27 = vpop.permute.xlu0 %8508 }
 0x13b   :  { %1845 = vmatmul.mubr.f32.gmra.mxu0 %v1417_v63  ;;  %v8511_v33 = vunpack.i.h.bf16 %v8509_v27  ;;  %v8510_v35 = vunpack.i.l.bf16 %v8509_v27  ;;  %v8524_v41 = vpop.permute.xlu1 %8523 }
 0x13c   :  { %v8526_v12 = vunpack.i.h.bf16 %v8524_v41  ;;  %v8525_v40 = vunpack.i.l.bf16 %v8524_v41 }
 0x13d   :  { %v1482_v39 = vsel %vm1359_vm2, %v1450_v54, %v8510_v35  ;;  %v1385_v53 = vsel %vm1359_vm2, %v1352_v32, %v8511_v33  ;;  %v3568_v32 = vld [vmem:[%s14324_s3 + $0x68] sm:$0xff] }
 0x13e   :  { %v8519_v46 = vpop.permute.xlu0 %8518  ;;  %v1514_v56 = vsel %vm1392_vm3, %v1482_v39, %v8515_v30  ;;  %v1418_v8 = vsel %vm1392_vm3, %v1385_v53, %v8516_v31  ;;  %3681 = vmatpush1.msra.mxu1 %v3568_v32 }
 0x13f   :  { %v8521_v47 = vunpack.i.h.bf16 %v8519_v46  ;;  %v8520_v11 = vunpack.i.l.bf16 %v8519_v46  ;;  %1849 = vmatprep.mubr.f32.mxu0 %v1514_v56  ;;  %v8534_v48 = vpop.permute.xlu1 %8533  ;;  %3682 = vmatprep.subr.mxu1 %v14333_v2 }
 0x140   :  { %1850 = vmatmul.mubr.f32.gmra.mxu0 %v1418_v8  ;;  %v8536_v52 = vunpack.i.h.bf16 %v8534_v48  ;;  %v8535_v36 = vunpack.i.l.bf16 %v8534_v48 }
 0x141   :  { %v1451_v38 = vsel %vm39_vm0, %v9738_v34, %v8520_v11  ;;  %v1353_v50 = vsel %vm39_vm0, %v9739_v49, %v8521_v47  ;;  %v3567_v47 = vld [vmem:[%s14324_s3 + $0x60] sm:$0xff] }
 0x142   :  { %v8529_v44 = vpop.permute.xlu0 %8528  ;;  %v1483_v26 = vsel %vm1359_vm2, %v1451_v38, %v8525_v40  ;;  %v1386_v43 = vsel %vm1359_vm2, %v1353_v50, %v8526_v12  ;;  %v1452_v59 = vsel %vm39_vm0, %v9740_v42, %v8535_v36  ;;  %v1354_v19 = vsel %vm39_vm0, %v9741_v62, %v8536_v52  ;;  %3683 = vmatpush1.msra.mxu1 %v3567_v47  ;;  %v428_v52 = vld [vmem:[#allocation2 + $0x211] sm:$0xff]  ;;  %v300_v36 = vld [vmem:[#allocation2 + $0x200] sm:$0xff] }
 0x143   :  { %v8531_v55 = vunpack.i.h.bf16 %v8529_v44  ;;  %v8530_v4 = vunpack.i.l.bf16 %v8529_v44  ;;  %v8544_v23 = vpop.permute.xlu1 %8543  ;;  %3684 = vmatprep.subr.mxu1 %v14333_v2 }
 0x144   :  { %v8546_v14 = vunpack.i.h.bf16 %v8544_v23  ;;  %v8545_v60 = vunpack.i.l.bf16 %v8544_v23 }
 0x145   :  { %v1515_v57 = vsel %vm1392_vm3, %v1483_v26, %v8530_v4  ;;  %v1419_v58 = vsel %vm1392_vm3, %v1386_v43, %v8531_v55  ;;  %v3566_v55 = vld [vmem:[%s14324_s3 + $0x58] sm:$0xff] }
 0x146   :  { %v8539_v20 = vpop.permute.xlu0 %8538  ;;  %1854 = vmatprep.mubr.f32.mxu0 %v1515_v57  ;;  %3685 = vmatpush1.msra.mxu1 %v3566_v55 }
 0x147   :  { %v8541_v0 = vunpack.i.h.bf16 %v8539_v20  ;;  %v8540_v1 = vunpack.i.l.bf16 %v8539_v20  ;;  %1855 = vmatmul.mubr.f32.gmra.mxu0 %v1419_v58  ;;  %v8554_v18 = vpop.permute.xlu1 %8553  ;;  %3686 = vmatprep.subr.mxu1 %v14333_v2 }
 0x148   :  { %v8556_v10 = vunpack.i.h.bf16 %v8554_v18  ;;  %v8555_v61 = vunpack.i.l.bf16 %v8554_v18 }
 0x149   :  { %v1484_v6 = vsel %vm1359_vm2, %v1452_v59, %v8540_v1  ;;  %v1387_v9 = vsel %vm1359_vm2, %v1354_v19, %v8541_v0  ;;  %v429_v19 = vld [vmem:[#allocation2 + $0x221] sm:$0xff]  ;;  %v301_v0 = vld [vmem:[#allocation2 + $0x210] sm:$0xff] }
 0x14a   :  { %v8549_v45 = vpop.permute.xlu0 %8548  ;;  %v1516_v13 = vsel %vm1392_vm3, %v1484_v6, %v8545_v60  ;;  %v1420_v15 = vsel %vm1392_vm3, %v1387_v9, %v8546_v14  ;;  %v3565_v1 = vld [vmem:[%s14324_s3 + $0x50] sm:$0xff] }
 0x14b   :  { %v8551_v51 = vunpack.i.h.bf16 %v8549_v45  ;;  %v8550_v16 = vunpack.i.l.bf16 %v8549_v45  ;;  %1859 = vmatprep.mubr.f32.mxu0 %v1516_v13  ;;  %v8564_v17 = vpop.permute.xlu1 %8563  ;;  %3687 = vmatpush1.msra.mxu1 %v3565_v1 }
 0x14c   :  { %1860 = vmatmul.mubr.f32.gmra.mxu0 %v1420_v15  ;;  %v8566_v7 = vunpack.i.h.bf16 %v8564_v17  ;;  %v8565_v27 = vunpack.i.l.bf16 %v8564_v17  ;;  %3688 = vmatprep.subr.mxu1 %v14333_v2 }
 0x14d   :  { %v1453_v22 = vsel %vm39_vm0, %v9742_v21, %v8550_v16  ;;  %v1355_v25 = vsel %vm39_vm0, %v9743_v24, %v8551_v51  ;;  %v3564_v16 = vld [vmem:[%s14324_s3 + $0x48] sm:$0xff]  ;;  %v3563_v24 = vld [vmem:[%s14324_s3 + $0x40] sm:$0xff] }
 0x14e   :  { %v8559_v63 = vpop.permute.xlu0 %8558  ;;  %v1485_v31 = vsel %vm1359_vm2, %v1453_v22, %v8555_v61  ;;  %v1388_v30 = vsel %vm1359_vm2, %v1355_v25, %v8556_v10  ;;  %v1454_v56 = vsel %vm39_vm0, %v10633_v5, %v8565_v27  ;;  %v1356_v8 = vsel %vm39_vm0, %v299_v29, %v8566_v7  ;;  %3689 = vmatpush1.msra.mxu1 %v3564_v16  ;;  %v3562_v25 = vld [vmem:[%s14324_s3 + $0x38] sm:$0xff]  ;;  %v3560_v7 = vld [vmem:[%s14324_s3 + $0x28] sm:$0xff]  ;;  %v7948_v27 = vpop.f32.mrf.mxu1 }
 0x14f   :  { %v8561_v28 = vunpack.i.h.bf16 %v8559_v63  ;;  %v8560_v54 = vunpack.i.l.bf16 %v8559_v63  ;;  %v8574_v39 = vpop.permute.xlu1 %8573  ;;  %3690 = vmatprep.subr.mxu1 %v14333_v2  ;;  %v3561_v63 = vld [vmem:[%s14324_s3 + $0x30] sm:$0xff] }
 0x150   :  { %v8576_v41 = vunpack.i.h.bf16 %v8574_v39  ;;  %v8575_v46 = vunpack.i.l.bf16 %v8574_v39  ;;  %3691 = vmatpush1.msra.mxu1 %v3563_v24  ;;  %v3559_v39 = vld [vmem:[%s14324_s3 + $0x20] sm:$0xff] }
 0x151   :  { %v1517_v33 = vsel %vm1392_vm3, %v1485_v31, %v8560_v54  ;;  %v1421_v35 = vsel %vm1392_vm3, %v1388_v30, %v8561_v28  ;;  %3692 = vmatprep.subr.mxu1 %v14333_v2  ;;  %v11039_v31 = vld [vmem:[%s14323_s2] ss:$0 sm:$0xff]  ;;  %v1951_v54 = vpop.f32.mrf.mxu1 }
 0x152   :  { %1864 = vmatprep.mubr.f32.mxu0 %v1517_v33  ;;  %v8569_v53 = vpop.permute.xlu0 %8568  ;;  %3693 = vmatpush1.msra.mxu1 %v3562_v25 }
 0x153   :  { %1865 = vmatmul.mubr.f32.gmra.mxu0 %v1421_v35  ;;  %v8571_v12 = vunpack.i.h.bf16 %v8569_v53  ;;  %v8570_v40 = vunpack.i.l.bf16 %v8569_v53  ;;  %v8584_v34 = vpop.permute.xlu1 %8583  ;;  %3694 = vmatprep.subr.mxu1 %v14333_v2  ;;  %v7951_v35 = vpop.f32.mrf.mxu1 }
 0x154   :  { %v8586_v50 = vunpack.i.h.bf16 %v8584_v34  ;;  %v8585_v44 = vunpack.i.l.bf16 %v8584_v34  ;;  %3695 = vmatpush1.msra.mxu1 %v3561_v63 }
 0x155   :  { %v1486_v11 = vsel %vm1359_vm2, %v1454_v56, %v8570_v40  ;;  %v1389_v48 = vsel %vm1359_vm2, %v1356_v8, %v8571_v12  ;;  %3696 = vmatprep.subr.mxu1 %v14333_v2  ;;  %v1961_v8 = vpop.f32.mrf.mxu1  ;;  %v3558_v12 = vld [vmem:[%s14324_s3 + $0x18] sm:$0xff] }
 0x156   :  { %v8579_v38 = vpop.permute.xlu0 %8578  ;;  %v1518_v5 = vsel %vm1392_vm3, %v1486_v11, %v8575_v46  ;;  %v1422_v49 = vsel %vm1392_vm3, %v1389_v48, %v8576_v41  ;;  %3697 = vmatpush1.msra.mxu1 %v3560_v7  ;;  %v2207_v11 = vld [vmem:[#allocation3 + $0x2] sm:$0xff] }
 0x157   :  { %v8581_v26 = vunpack.i.h.bf16 %v8579_v38  ;;  %v8580_v43 = vunpack.i.l.bf16 %v8579_v38  ;;  %1869 = vmatprep.mubr.f32.mxu0 %v1518_v5  ;;  %v8594_v4 = vpop.permute.xlu1 %8593  ;;  %3698 = vmatprep.subr.mxu1 %v14333_v2  ;;  %v2175_v48 = vld [vmem:[#allocation3 + $0x1] sm:$0xff] }
 0x158   :  { %1870 = vmatmul.mubr.f32.gmra.mxu0 %v1422_v49  ;;  %v8596_v20 = vunpack.i.h.bf16 %v8594_v4  ;;  %v8595_v14 = vunpack.i.l.bf16 %v8594_v4  ;;  %3699 = vmatpush1.msra.mxu1 %v3559_v39  ;;  %v7954_v4 = vpop.f32.mrf.mxu1 }
 0x159   :  { %v1455_v57 = vsel %vm39_vm0, %v428_v52, %v8580_v43  ;;  %v1357_v58 = vsel %vm39_vm0, %v300_v36, %v8581_v26  ;;  %3700 = vmatprep.subr.mxu1 %v14333_v2  ;;  %v3557_v36 = vld [vmem:[%s14324_s3 + $0x10] sm:$0xff]  ;;  %v3556_v43 = vld [vmem:[%s14324_s3 + $0x8] sm:$0xff] }
 0x15a   :  { %v8589_v23 = vpop.permute.xlu0 %8588  ;;  %v1487_v60 = vsel %vm1359_vm2, %v1455_v57, %v8585_v44  ;;  %v1390_v42 = vsel %vm1359_vm2, %v1357_v58, %v8586_v50  ;;  %v1456_v61 = vsel %vm39_vm0, %v429_v19, %v8595_v14  ;;  %v1358_v13 = vsel %vm39_vm0, %v301_v0, %v8596_v20  ;;  %3701 = vmatpush1.msra.mxu1 %v3558_v12  ;;  %v3555_v14 = vld [vmem:[%s14324_s3] sm:$0xff] }
 0x15b   :  { %v8591_v59 = vunpack.i.h.bf16 %v8589_v23  ;;  %v8590_v62 = vunpack.i.l.bf16 %v8589_v23  ;;  %v8604_v6 = vpop.permute.xlu1 %8603  ;;  %3702 = vmatprep.subr.mxu1 %v14333_v2 }
 0x15c   :  { %v8606_v45 = vunpack.i.h.bf16 %v8604_v6  ;;  %v8605_v10 = vunpack.i.l.bf16 %v8604_v6  ;;  %3703 = vmatpush1.msra.mxu1 %v3557_v36 }
 0x15d   :  { %v1519_v3 = vsel %vm1392_vm3, %v1487_v60, %v8590_v62  ;;  %v1423_v18 = vsel %vm1392_vm3, %v1390_v42, %v8591_v59  ;;  %3704 = vmatprep.subr.mxu1 %v14333_v2  ;;  %v1971_v59 = vpop.f32.mrf.mxu1  ;;  %v3572_v62 = vld [vmem:[%s14324_s3 + $0x88] sm:$0xff] }
 0x15e   :  { %1874 = vmatprep.mubr.f32.mxu0 %v1519_v3  ;;  %v8599_v9 = vpop.permute.xlu0 %8598  ;;  %3705 = vmatpush1.msra.mxu1 %v3556_v43 }
 0x15f   :  { %1875 = vmatmul.mubr.f32.gmra.mxu0 %v1423_v18  ;;  %v8601_v15 = vunpack.i.h.bf16 %v8599_v9  ;;  %v8600_v51 = vunpack.i.l.bf16 %v8599_v9  ;;  %3706 = vmatprep.subr.mxu1 %v14333_v2  ;;  %v3571_v9 = vld [vmem:[%s14324_s3 + $0x80] sm:$0xff]  ;;  %s9776_s3 = smov 112  }
 0x160   :  { %3707 = vmatpush1.msra.mxu1 %v3555_v14 }
 0x161   :  { %v1488_v37 = vsel %vm1359_vm2, %v1456_v61, %v8600_v51  ;;  %v1391_v17 = vsel %vm1359_vm2, %v1358_v13, %v8601_v15  ;;  %3736 = vmatprep.subr.mxu1 %v14333_v2 }
 0x162   :  { %v1520_v21 = vsel %vm1392_vm3, %v1488_v37, %v8605_v10  ;;  %v1424_v22 = vsel %vm1392_vm3, %v1391_v17, %v8606_v45  ;;  %3737 = vmatpush2.msra.mxu1 %v3572_v62  ;;  %v7957_v37 = vpop.f32.mrf.mxu1 }
 0x163   :  { %1879 = vmatprep.mubr.f32.mxu0 %v1520_v21  ;;  %3738 = vmatprep.subr.mxu1 %v14333_v2 }
 0x164   :  { %1880 = vmatmul.mubr.f32.gmra.mxu0 %v1424_v22  ;;  %3739 = vmatpush2.msra.mxu1 %v3571_v9  ;;  %v1981_v24 = vpop.f32.mrf.mxu1 }
 0x170   :  { %v1726_v30 = vpop.f32.mrf.mxu0 }
 0x171   :  { %v1727_v28 = vadd.f32 %v11039_v31, %v1726_v30 }
 0x172   :  { %v1728_v29 = vpop.f32.mrf.mxu0 }
 0x173   :  { %v11042_v32 = vadd.f32 %v1951_v54, %v1727_v28 }
 0x174   :  { %v1731_v33 = vpop.f32.mrf.mxu0 }
 0x175   :  { %14395 = vst [vmem:[#allocation7_spill] sm:$0xff] %v11042_v32  ;;  %2111 = vst.msk [vmem:[#allocation3 + $0x11] sm:$0xff] %vm187_vm4, %v11042_v32  ;;  %v1732_v53 = vadd.f32 %v11039_v31, %v1731_v33  ;;  %5975 = vrot.lane.b32.xlu1 %v11042_v32, %s9773_s30 }
 0x176   :  { %v1733_v41 = vpop.f32.mrf.mxu0 }
 0x177   :  { %v11053_v46 = vadd.f32 %v7948_v27, %v1732_v53 }
 0x178   :  { %v1736_v56 = vpop.f32.mrf.mxu0 }
 0x179   :  { %14396 = vst [vmem:[#allocation8_spill] sm:$0xff] %v11053_v46  ;;  %2112 = vst.msk [vmem:[#allocation3 + $0x21] sm:$0xff] %vm187_vm4, %v11053_v46  ;;  %v1737_v40 = vadd.f32 %v11039_v31, %v1736_v56  ;;  %5977 = vrot.lane.b32.xlu0 %v11053_v46, %s9773_s30  ;;  %v7960_v56 = vpop.f32.mrf.mxu1 }
 0x17a   :  { %v1738_v47 = vpop.f32.mrf.mxu0 }
 0x17b   :  { %v11064_v34 = vadd.f32 %v1961_v8, %v1737_v40 }
 0x17c   :  { %v1741_v38 = vpop.f32.mrf.mxu0  ;;  %v2208_v5 = vld [vmem:[#allocation3 + $0x12] sm:$0xff] }
 0x17d   :  { %14397 = vst [vmem:[#allocation9_spill] sm:$0xff] %v11064_v34  ;;  %v2176_v49 = vld [vmem:[#allocation3 + $0x11] sm:$0xff]  ;;  %2113 = vst.msk [vmem:[#allocation3 + $0x31] sm:$0xff] %vm187_vm4, %v11064_v34  ;;  %v1742_v50 = vadd.f32 %v11039_v31, %v1741_v38  ;;  %v8612_v44 = vpack.i.bf16 %v2208_v5, %v2207_v11  ;;  %v1991_v11 = vpop.f32.mrf.mxu1 }
 0x17e   :  { %v8607_v52 = vpack.i.bf16 %v2176_v49, %v2175_v48  ;;  %v1743_v26 = vpop.f32.mrf.mxu0  ;;  %v11079_v58 = vld [vmem:[#allocation3 + $0x10] sm:$0xff] }
 0x17f   :  { %v11075_v55 = vadd.f32 %v7951_v35, %v1742_v50  ;;  %8613 = vrot.lane.b32.xlu1 %v8612_v44, %s9771_s16 }
 0x180   :  { %8608 = vrot.lane.b32.xlu0 %v8607_v52, %s9773_s30  ;;  %v2400_v57 = vld [vmem:[#allocation3 + $0x22] sm:$0xff] }
 0x181   :  { %14398 = vst [vmem:[#allocation10_spill] sm:$0xff] %v11075_v55  ;;  %v11081_v23 = vld [vmem:[#allocation3 + $0x20] sm:$0xff]  ;;  %2114 = vst.msk [vmem:[#allocation3 + $0x41] sm:$0xff] %vm187_vm4, %v11075_v55  ;;  %7725 = vmatprep.mubr.msk.f32.mxu1 %vm187_vm4, %v2400_v57  ;;  %v8627_v1 = vpack.i.bf16 %v2400_v57, %v2208_v5 }
 0x182   :  { %v8617_v20 = vpack.i.bf16 %v11081_v23, %v11079_v58  ;;  %v2272_v60 = vld [vmem:[#allocation3 + $0x21] sm:$0xff] }
 0x183   :  { %v1746_v42 = vpop.f32.mrf.mxu0  ;;  %5979 = vrot.lane.b32.xlu1 %v11064_v34, %s9773_s30  ;;  %v8622_v0 = vpack.i.bf16 %v2272_v60, %v2176_v49 }
 0x184   :  { %8618 = vrot.lane.b32.xlu0 %v8617_v20, %s9774_s22  ;;  %v1747_v19 = vadd.f32 %v11039_v31, %v1746_v42  ;;  %v2369_v6 = vld [vmem:[#allocation3 + $0x31] sm:$0xff] }
 0x185   :  { %v1748_v3 = vpop.f32.mrf.mxu0  ;;  %v8637_v10 = vpack.i.bf16 %v2369_v6, %v2272_v60  ;;  %v11112_v15 = vld [vmem:[#allocation3 + $0x30] sm:$0xff] }
 0x186   :  { %v11101_v18 = vadd.f32 %v1971_v59, %v1747_v19  ;;  %v11114_v51 = vld [vmem:[#allocation3 + $0x32] sm:$0xff]  ;;  %v8632_v17 = vpack.i.bf16 %v11112_v15, %v11081_v23 }
 0x187   :  { %8623 = vrot.lane.b32.xlu1 %v8622_v0, %s9772_s21  ;;  %v8647_v21 = vpack.i.bf16 %v11114_v51, %v2400_v57 }
 0x188   :  { %14399 = vst [vmem:[#allocation11_spill] sm:$0xff] %v11101_v18  ;;  %8628 = vrot.lane.b32.xlu0 %v8627_v1, %s9775_s27  ;;  %2115 = vst.msk [vmem:[#allocation3 + $0x51] sm:$0xff] %vm187_vm4, %v11101_v18  ;;  %v1751_v45 = vpop.f32.mrf.mxu0  ;;  %v11131_v27 = vld [vmem:[#allocation3 + $0x40] sm:$0xff] }
 0x189   :  { %v1752_v61 = vadd.f32 %v11039_v31, %v1751_v45  ;;  %v2274_v30 = vld [vmem:[#allocation3 + $0x41] sm:$0xff]  ;;  %v8652_v54 = vpack.i.bf16 %v11131_v27, %v11112_v15 }
 0x18a   :  { %v1753_v13 = vpop.f32.mrf.mxu0  ;;  %v8657_v29 = vpack.i.bf16 %v2274_v30, %v2369_v6  ;;  %v11141_v35 = vld [vmem:[#allocation3 + $0x42] sm:$0xff] }
 0x18b   :  { %5981 = vrot.lane.b32.xlu1 %v11075_v55, %s9773_s30  ;;  %v11119_v16 = vadd.f32 %v7954_v4, %v1752_v61  ;;  %v8662_v8 = vpack.i.bf16 %v11141_v35, %v11114_v51  ;;  %v7963_v4 = vpop.f32.mrf.mxu1 }
 0x18c   :  { %8638 = vrot.lane.b32.xlu0 %v8637_v10, %s9776_s3 }
 0x18d   :  { %14400 = vst [vmem:[#allocation12_spill] sm:$0xff] %v11119_v16  ;;  %2116 = vst.msk [vmem:[#allocation3 + $0x61] sm:$0xff] %vm187_vm4, %v11119_v16  ;;  %v2001_v59 = vpop.f32.mrf.mxu1 }
 0x18f   :  { %8633 = vrot.lane.b32.xlu1 %v8632_v17, %s9770_s13  ;;  %v1756_v22 = vpop.f32.mrf.mxu0  ;;  %v11143_v39 = vld [vmem:[#allocation3 + $0x50] sm:$0xff] }
 0x190   :  { %8648 = vrot.lane.b32.xlu0 %v8647_v21, %s9771_s16  ;;  %v1757_v25 = vadd.f32 %v11039_v31, %v1756_v22  ;;  %v8667_v12 = vpack.i.bf16 %v11143_v39, %v11131_v27  ;;  %v2180_v40 = vld [vmem:[#allocation3 + $0x51] sm:$0xff]  ;;  %v7966_v22 = vpop.f32.mrf.mxu1 }
 0x191   :  { %v1758_v63 = vpop.f32.mrf.mxu0  ;;  %v8677_v38 = vpack.i.bf16 %v2180_v40, %v2274_v30  ;;  %v11166_v52 = vld [vmem:[#allocation3 + $0x52] sm:$0xff] }
 0x192   :  { %v11129_v7 = vadd.f32 %v1981_v24, %v1757_v25  ;;  %v8682_v57 = vpack.i.bf16 %v11166_v52, %v11141_v35 }
 0x193   :  { %8643 = vrot.lane.b32.xlu1 %v8637_v10, %s9773_s30 }
 0x194   :  { %14401 = vst [vmem:[#allocation13_spill] sm:$0xff] %v11129_v7  ;;  %5983 = vrot.lane.b32.xlu0 %v11101_v18, %s9773_s30  ;;  %2117 = vst.msk [vmem:[#allocation3 + $0x71] sm:$0xff] %vm187_vm4, %v11129_v7  ;;  %v1761_v28 = vpop.f32.mrf.mxu0  ;;  %v2244_v36 = vld [vmem:[#allocation3 + $0x60] sm:$0xff] }
 0x195   :  { %v1762_v33 = vadd.f32 %v11039_v31, %v1761_v28  ;;  %v8687_v20 = vpack.i.bf16 %v2244_v36, %v11143_v39  ;;  %v2276_v14 = vld [vmem:[#allocation3 + $0x61] sm:$0xff]  ;;  %v2011_v28 = vpop.f32.mrf.mxu1 }
 0x196   :  { %v1763_v53 = vpop.f32.mrf.mxu0  ;;  %v11178_v60 = vld [vmem:[#allocation3 + $0x62] sm:$0xff]  ;;  %v8692_v19 = vpack.i.bf16 %v2276_v14, %v2180_v40 }
 0x197   :  { %8653 = vrot.lane.b32.xlu1 %v8652_v54, %s9774_s22  ;;  %v11147_v41 = vadd.f32 %v7957_v37, %v1762_v33  ;;  %v8697_v0 = vpack.i.bf16 %v11178_v60, %v11166_v52 }
 0x198   :  { %8658 = vrot.lane.b32.xlu0 %v8657_v29, %s9772_s21 }
 0x199   :  { %14402 = vst [vmem:[#allocation14_spill] sm:$0xff] %v11147_v41  ;;  %2118 = vst.msk [vmem:[#allocation3 + $0x81] sm:$0xff] %vm187_vm4, %v11147_v41 }
 0x19b   :  { %8663 = vrot.lane.b32.xlu1 %v8662_v8, %s9775_s27  ;;  %v1766_v47 = vpop.f32.mrf.mxu0  ;;  %v2341_v3 = vld [vmem:[#allocation3 + $0x70] sm:$0xff] }
 0x19c   :  { %8668 = vrot.lane.b32.xlu0 %v8667_v12, %s9770_s13  ;;  %v1767_v48 = vadd.f32 %v11039_v31, %v1766_v47  ;;  %v2373_v6 = vld [vmem:[#allocation3 + $0x71] sm:$0xff]  ;;  %v8702_v10 = vpack.i.bf16 %v2341_v3, %v2244_v36 }
 0x19d   :  { %v1768_v5 = vpop.f32.mrf.mxu0  ;;  %v8707_v61 = vpack.i.bf16 %v2373_v6, %v2276_v14  ;;  %v2214_v37 = vld [vmem:[#allocation3 + $0x72] sm:$0xff] }
 0x19e   :  { %v11158_v49 = vadd.f32 %v1991_v11, %v1767_v48  ;;  %v8717_v24 = vpack.i.bf16 %v2214_v37, %v11178_v60 }
 0x19f   :  { %5985 = vrot.lane.b32.xlu1 %v11119_v16, %s9773_s30 }
 0x1a0   :  { %14403 = vst [vmem:[#allocation15_spill] sm:$0xff] %v11158_v49  ;;  %8678 = vrot.lane.b32.xlu0 %v8677_v38, %s9773_s30  ;;  %2119 = vst.msk [vmem:[#allocation3 + $0x91] sm:$0xff] %vm187_vm4, %v11158_v49  ;;  %v1771_v50 = vpop.f32.mrf.mxu0  ;;  %v2246_v25 = vld [vmem:[#allocation3 + $0x80] sm:$0xff] }
 0x1a1   :  { %v1772_v44 = vadd.f32 %v11039_v31, %v1771_v50  ;;  %v2278_v63 = vld [vmem:[#allocation3 + $0x81] sm:$0xff]  ;;  %v8722_v29 = vpack.i.bf16 %v2246_v25, %v2341_v3 }
 0x1a2   :  { %v1773_v26 = vpop.f32.mrf.mxu0  ;;  %v8727_v33 = vpack.i.bf16 %v2278_v63, %v2373_v6 }
 0x1a3   :  { %8673 = vrot.lane.b32.xlu1 %v8677_v38, %s9776_s3  ;;  %v11171_v43 = vadd.f32 %v7960_v56, %v1772_v44  ;;  %v2310_v56 = vld [vmem:[#allocation3 + $0x82] sm:$0xff]  ;;  %v7969_v44 = vpop.f32.mrf.mxu1 }
 0x1a4   :  { %5987 = vrot.lane.b32.xlu0 %v11129_v7, %s9773_s30  ;;  %v8732_v47 = vpack.i.bf16 %v2310_v56, %v2214_v37 }
 0x1a5   :  { %2120 = vst.msk [vmem:[#allocation3 + $0xa1] sm:$0xff] %vm187_vm4, %v11171_v43  ;;  %v2021_v14 = vpop.f32.mrf.mxu1 }
 0x1a7   :  { %8683 = vrot.lane.b32.xlu1 %v8682_v57, %s9771_s16  ;;  %v1776_v42 = vpop.f32.mrf.mxu0  ;;  %v2343_v8 = vld [vmem:[#allocation3 + $0x90] sm:$0xff] }
 0x1a8   :  { %8688 = vrot.lane.b32.xlu0 %v8687_v20, %s9774_s22  ;;  %v1777_v62 = vadd.f32 %v11039_v31, %v1776_v42  ;;  %v8737_v11 = vpack.i.bf16 %v2343_v8, %v2246_v25  ;;  %v2375_v38 = vld [vmem:[#allocation3 + $0x91] sm:$0xff]  ;;  %v7972_v25 = vpop.f32.mrf.mxu1 }
 0x1a9   :  { %v1778_v1 = vpop.f32.mrf.mxu0  ;;  %v8742_v26 = vpack.i.bf16 %v2375_v38, %v2278_v63 }
 0x1aa   :  { %v11185_v9 = vadd.f32 %v2001_v59, %v1777_v62 }
 0x1ab   :  { %8693 = vrot.lane.b32.xlu1 %v8692_v19, %s9772_s21 }
 0x1ac   :  { %8698 = vrot.lane.b32.xlu0 %v8697_v0, %s9775_s27  ;;  %2121 = vst.msk [vmem:[#allocation3 + $0xb1] sm:$0xff] %vm187_vm4, %v11185_v9  ;;  %v1781_v45 = vpop.f32.mrf.mxu0  ;;  %v2248_v36 = vld [vmem:[#allocation3 + $0xa0] sm:$0xff] }
 0x1ad   :  { %v1782_v13 = vadd.f32 %v11039_v31, %v1781_v45  ;;  %v8757_v57 = vpack.i.bf16 %v2248_v36, %v2343_v8  ;;  %v2280_v42 = vld [vmem:[#allocation3 + $0xa1] sm:$0xff] }
 0x1ae   :  { %v1783_v17 = vpop.f32.mrf.mxu0  ;;  %v2312_v59 = vld [vmem:[#allocation3 + $0xa2] sm:$0xff]  ;;  %v8762_v3 = vpack.i.bf16 %v2280_v42, %v2375_v38 }
 0x1af   :  { %8703 = vrot.lane.b32.xlu1 %v8702_v10, %s9770_s13  ;;  %v11194_v21 = vadd.f32 %v7963_v4, %v1782_v13  ;;  %v2216_v4 = vld [vmem:[#allocation3 + $0x92] sm:$0xff] }
 0x1b0   :  { %8708 = vrot.lane.b32.xlu0 %v8707_v61, %s9776_s3  ;;  %v8752_v19 = vpack.i.bf16 %v2216_v4, %v2310_v56  ;;  %v8767_v6 = vpack.i.bf16 %v2312_v59, %v2216_v4 }
 0x1b1   :  { %2122 = vst.msk [vmem:[#allocation3 + $0xc1] sm:$0xff] %vm187_vm4, %v11194_v21 }
 0x1b3   :  { %8713 = vrot.lane.b32.xlu1 %v8707_v61, %s9773_s30  ;;  %v1786_v30 = vpop.f32.mrf.mxu0  ;;  %v2345_v45 = vld [vmem:[#allocation3 + $0xb0] sm:$0xff] }
 0x1b4   :  { %8718 = vrot.lane.b32.xlu0 %v8717_v24, %s9771_s16  ;;  %v1787_v54 = vadd.f32 %v11039_v31, %v1786_v30  ;;  %v2377_v10 = vld [vmem:[#allocation3 + $0xb1] sm:$0xff]  ;;  %v8772_v17 = vpack.i.bf16 %v2345_v45, %v2248_v36 }
 0x1b5   :  { %v1788_v53 = vpop.f32.mrf.mxu0  ;;  %v2218_v63 = vld [vmem:[#allocation3 + $0xb2] sm:$0xff] }
 0x1b6   :  { %v11202_v12 = vadd.f32 %v2011_v28, %v1787_v54  ;;  %v2031_v28 = vpop.f32.mrf.mxu1  ;;  %v8787_v53 = vpack.i.bf16 %v2218_v63, %v2312_v59 }
 0x1b7   :  { %8723 = vrot.lane.b32.xlu1 %v8722_v29, %s9774_s22 }
 0x1b8   :  { %8728 = vrot.lane.b32.xlu0 %v8727_v33, %s9772_s21  ;;  %2123 = vst.msk [vmem:[#allocation3 + $0xd1] sm:$0xff] %vm187_vm4, %v11202_v12  ;;  %v1791_v40 = vpop.f32.mrf.mxu0  ;;  %v2250_v54 = vld [vmem:[#allocation3 + $0xc0] sm:$0xff] }
 0x1b9   :  { %v1792_v48 = vadd.f32 %v11039_v31, %v1791_v40  ;;  %v2282_v29 = vld [vmem:[#allocation3 + $0xc1] sm:$0xff]  ;;  %v8792_v40 = vpack.i.bf16 %v2250_v54, %v2345_v45 }
 0x1ba   :  { %v1793_v5 = vpop.f32.mrf.mxu0 }
 0x1bb   :  { %8733 = vrot.lane.b32.xlu1 %v8732_v47, %s9775_s27  ;;  %v11211_v50 = vadd.f32 %v7966_v22, %v1792_v48  ;;  %v8777_v22 = vpack.i.bf16 %v2377_v10, %v2280_v42  ;;  %v8797_v47 = vpack.i.bf16 %v2282_v29, %v2377_v10 }
 0x1bc   :  { %8738 = vrot.lane.b32.xlu0 %v8737_v11, %s9770_s13  ;;  %v2314_v11 = vld [vmem:[#allocation3 + $0xc2] sm:$0xff] }
 0x1bd   :  { %2124 = vst.msk [vmem:[#allocation3 + $0xe1] sm:$0xff] %vm187_vm4, %v11211_v50  ;;  %v8802_v36 = vpack.i.bf16 %v2314_v11, %v2218_v63 }
 0x1bf   :  { %8743 = vrot.lane.b32.xlu1 %v8742_v26, %s9776_s3  ;;  %v1796_v20 = vpop.f32.mrf.mxu0  ;;  %v2347_v48 = vld [vmem:[#allocation3 + $0xd0] sm:$0xff] }
 0x1c0   :  { %8748 = vrot.lane.b32.xlu0 %v8742_v26, %s9773_s30  ;;  %v1797_v62 = vadd.f32 %v11039_v31, %v1796_v20  ;;  %v8807_v26 = vpack.i.bf16 %v2347_v48, %v2250_v54  ;;  %v2379_v20 = vld [vmem:[#allocation3 + $0xd1] sm:$0xff] }
 0x1c1   :  { %v1798_v0 = vpop.f32.mrf.mxu0 }
 0x1c2   :  { %v11218_v1 = vadd.f32 %v2021_v14, %v1797_v62  ;;  %v8812_v14 = vpack.i.bf16 %v2379_v20, %v2282_v29  ;;  %v2220_v62 = vld [vmem:[#allocation3 + $0xd2] sm:$0xff] }
 0x1c3   :  { %8753 = vrot.lane.b32.xlu1 %v8752_v19, %s9771_s16  ;;  %v8822_v45 = vpack.i.bf16 %v2220_v62, %v2314_v11 }
 0x1c4   :  { %8758 = vrot.lane.b32.xlu0 %v8757_v57, %s9774_s22  ;;  %2125 = vst.msk [vmem:[#allocation3 + $0xf1] sm:$0xff] %vm187_vm4, %v11218_v1  ;;  %v1801_v61 = vpop.f32.mrf.mxu0  ;;  %v7975_v57 = vpop.f32.mrf.mxu1  ;;  %v2252_v19 = vld [vmem:[#allocation3 + $0xe0] sm:$0xff] }
 0x1c5   :  { %v1802_v13 = vadd.f32 %v11039_v31, %v1801_v61  ;;  %v8827_v10 = vpack.i.bf16 %v2252_v19, %v2347_v48  ;;  %v2284_v61 = vld [vmem:[#allocation3 + $0xe1] sm:$0xff] }
 0x1c6   :  { %v1803_v37 = vpop.f32.mrf.mxu0  ;;  %v2041_v59 = vpop.f32.mrf.mxu1 }
 0x1c7   :  { %8763 = vrot.lane.b32.xlu1 %v8762_v3, %s9772_s21  ;;  %v11227_v24 = vadd.f32 %v7969_v44, %v1802_v13  ;;  %v2316_v13 = vld [vmem:[#allocation3 + $0xe2] sm:$0xff] }
 0x1c8   :  { %8768 = vrot.lane.b32.xlu0 %v8767_v6, %s9775_s27  ;;  %v8837_v63 = vpack.i.bf16 %v2316_v13, %v2220_v62 }
 0x1c9   :  { %2126 = vst.msk [vmem:[#allocation3 + $0x101] sm:$0xff] %vm187_vm4, %v11227_v24 }
 0x1cb   :  { %8773 = vrot.lane.b32.xlu1 %v8772_v17, %s9770_s13  ;;  %v1806_v30 = vpop.f32.mrf.mxu0  ;;  %v2349_v54 = vld [vmem:[#allocation3 + $0xf0] sm:$0xff] }
 0x1cc   :  { %8778 = vrot.lane.b32.xlu0 %v8777_v22, %s9776_s3  ;;  %v1807_v33 = vadd.f32 %v11039_v31, %v1806_v30  ;;  %v2381_v29 = vld [vmem:[#allocation3 + $0xf1] sm:$0xff] }
 0x1cd   :  { %v1808_v56 = vpop.f32.mrf.mxu0 }
 0x1ce   :  { %v11234_v8 = vadd.f32 %v2031_v28, %v1807_v33  ;;  %v7978_v28 = vpop.f32.mrf.mxu1  ;;  %v8842_v33 = vpack.i.bf16 %v2349_v54, %v2252_v19  ;;  %v2351_v19 = vld [vmem:[#allocation3 + $0x110] sm:$0xff] }
 0x1cf   :  { %8783 = vrot.lane.b32.xlu1 %v8777_v22, %s9773_s30 }
 0x1d0   :  { %14404 = vst [vmem:[#allocation16_spill] sm:$0xff] %v11234_v8  ;;  %8788 = vrot.lane.b32.xlu0 %v8787_v53, %s9771_s16  ;;  %2127 = vst.msk [vmem:[#allocation3 + $0x131] sm:$0xff] %vm187_vm4, %v11234_v8  ;;  %v1811_v38 = vpop.f32.mrf.mxu0  ;;  %v8847_v53 = vpack.i.bf16 %v2381_v29, %v2284_v61  ;;  %v2318_v62 = vld [vmem:[#allocation3 + $0x102] sm:$0xff] }
 0x1d1   :  { %v1812_v5 = vadd.f32 %v11039_v31, %v1811_v38 }
 0x1d2   :  { %v1813_v44 = vpop.f32.mrf.mxu0 }
 0x1d3   :  { %8793 = vrot.lane.b32.xlu1 %v8792_v40, %s9774_s22  ;;  %v11243_v4 = vadd.f32 %v7972_v25, %v1812_v5  ;;  %v8832_v25 = vpack.i.bf16 %v2284_v61, %v2379_v20  ;;  %v2051_v40 = vpop.f32.mrf.mxu1  ;;  %v2254_v44 = vld [vmem:[#allocation3 + $0x100] sm:$0xff] }
 0x1d4   :  { %8798 = vrot.lane.b32.xlu0 %v8797_v47, %s9772_s21  ;;  %v2222_v47 = vld [vmem:[#allocation3 + $0xf2] sm:$0xff]  ;;  %v8877_v61 = vpack.i.bf16 %v2351_v19, %v2254_v44 }
 0x1d5   :  { %14405 = vst [vmem:[#allocation17_spill] sm:$0xff] %v11243_v4  ;;  %2128 = vst.msk [vmem:[#allocation3 + $0x141] sm:$0xff] %vm187_vm4, %v11243_v4  ;;  %v8857_v5 = vpack.i.bf16 %v2222_v47, %v2316_v13 }
 0x1d7   :  { %8803 = vrot.lane.b32.xlu1 %v8802_v36, %s9775_s27  ;;  %v1816_v42 = vpop.f32.mrf.mxu0  ;;  %v2286_v36 = vld [vmem:[#allocation3 + $0x101] sm:$0xff] }
 0x1d8   :  { %8808 = vrot.lane.b32.xlu0 %v8807_v26, %s9770_s13  ;;  %v1817_v0 = vadd.f32 %v11039_v31, %v1816_v42  ;;  %v8867_v42 = vpack.i.bf16 %v2286_v36, %v2381_v29 }
 0x1d9   :  { %v1818_v3 = vpop.f32.mrf.mxu0 }
 0x1da   :  { %v11250_v6 = vadd.f32 %v2041_v59, %v1817_v0  ;;  %v7981_v0 = vpop.f32.mrf.mxu1 }
 0x1db   :  { %8813 = vrot.lane.b32.xlu1 %v8812_v14, %s9776_s3 }
 0x1dc   :  { %14406 = vst [vmem:[#allocation18_spill] sm:$0xff] %v11250_v6  ;;  %8818 = vrot.lane.b32.xlu0 %v8812_v14, %s9773_s30  ;;  %2129 = vst.msk [vmem:[#allocation3 + $0x151] sm:$0xff] %vm187_vm4, %v11250_v6  ;;  %v1821_v37 = vpop.f32.mrf.mxu0  ;;  %v8862_v14 = vpack.i.bf16 %v2254_v44, %v2349_v54 }
 0x1dd   :  { %v1822_v17 = vadd.f32 %v11039_v31, %v1821_v37  ;;  %v2383_v37 = vld [vmem:[#allocation3 + $0x111] sm:$0xff] }
 0x1de   :  { %v1823_v22 = vpop.f32.mrf.mxu0 }
 0x1df   :  { %8823 = vrot.lane.b32.xlu1 %v8822_v45, %s9771_s16  ;;  %v11259_v30 = vadd.f32 %v7975_v57, %v1822_v17  ;;  %v2191_v17 = vld [vmem:[#allocation3 + $0x121] sm:$0xff]  ;;  %v2192_v22 = vld [vmem:[#allocation3 + $0x131] sm:$0xff] }
 0x1e0   :  { %8828 = vrot.lane.b32.xlu0 %v8827_v10, %s9774_s22  ;;  %v8872_v10 = vpack.i.bf16 %v2318_v62, %v2222_v47  ;;  %v2224_v47 = vld [vmem:[#allocation3 + $0x132] sm:$0xff] }
 0x1e1   :  { %14407 = vst [vmem:[#allocation19_spill] sm:$0xff] %v11259_v30  ;;  %2130 = vst.msk [vmem:[#allocation3 + $0x161] sm:$0xff] %vm187_vm4, %v11259_v30 }
 0x1e3   :  { %8833 = vrot.lane.b32.xlu1 %v8832_v25, %s9772_s21  ;;  %v1826_v56 = vpop.f32.mrf.mxu0 }
 0x1e4   :  { %8838 = vrot.lane.b32.xlu0 %v8837_v63, %s9775_s27  ;;  %v1827_v11 = vadd.f32 %v11039_v31, %v1826_v56  ;;  %v2061_v63 = vpop.f32.mrf.mxu1  ;;  %v2223_v56 = vld [vmem:[#allocation3 + $0x122] sm:$0xff] }
 0x1e5   :  { %v1828_v48 = vpop.f32.mrf.mxu0 }
 0x1e6   :  { %v11266_v38 = vadd.f32 %v2051_v40, %v1827_v11  ;;  %v2255_v11 = vld [vmem:[#allocation3 + $0x130] sm:$0xff]  ;;  %v11292_v48 = vld [vmem:[#allocation3 + $0x140] sm:$0xff]  ;;  %v7984_v19 = vpop.f32.mrf.mxu1 }
 0x1e7   :  { %8843 = vrot.lane.b32.xlu1 %v8842_v33, %s9770_s13  ;;  %v11277_v3 = vpop.permute.xlu1 %5975  ;;  %v8882_v33 = vpack.i.bf16 %v2383_v37, %v2286_v36  ;;  %v8892_v36 = vpack.i.bf16 %v2224_v47, %v2223_v56 }
 0x1e8   :  { %14408 = vst [vmem:[#allocation20_spill] sm:$0xff] %v11266_v38  ;;  %8848 = vrot.lane.b32.xlu0 %v8847_v53, %s9776_s3  ;;  %2131 = vst.msk [vmem:[#allocation3 + $0x171] sm:$0xff] %vm187_vm4, %v11266_v38  ;;  %v1831_v26 = vpop.f32.mrf.mxu0 }
 0x1e9   :  { %v1832_v57 = vadd.f32 %v11039_v31, %v1831_v26  ;;  %14410 = vst [vmem:[#allocation22_spill] sm:$0xff] %v11277_v3 }
 0x1ea   :  { %v1833_v20 = vpop.f32.mrf.mxu0 }
 0x1eb   :  { %8853 = vrot.lane.b32.xlu1 %v8847_v53, %s9773_s30  ;;  %v11275_v59 = vadd.f32 %v7978_v28, %v1832_v57  ;;  %v11279_v45 = vpop.permute.xlu0 %5977  ;;  %v8887_v53 = vpack.i.bf16 %v2192_v22, %v2191_v17 }
 0x1ec   :  { %8858 = vrot.lane.b32.xlu0 %v8857_v5, %s9771_s16  ;;  %14411 = vst [vmem:[#allocation23_spill] sm:$0xff] %v11279_v45 }
 0x1ed   :  { %14409 = vst [vmem:[#allocation21_spill] sm:$0xff] %v11275_v59  ;;  %2132 = vst.msk [vmem:[#allocation3 + $0x181] sm:$0xff] %vm187_vm4, %v11275_v59  ;;  %v4140_v59 = vld [vmem:[#allocation3 + $0x110] sm:$0xff] }
 0x1ef   :  { %8863 = vrot.lane.b32.xlu1 %v8862_v14, %s9774_s22  ;;  %v1836_v13 = vpop.f32.mrf.mxu0 }
 0x1f0   :  { %8868 = vrot.lane.b32.xlu0 %v8867_v42, %s9772_s21  ;;  %v1837_v25 = vadd.f32 %v11039_v31, %v1836_v13  ;;  %v8897_v42 = vpack.i.bf16 %v11292_v48, %v2255_v11  ;;  %v11304_v13 = vld [vmem:[#allocation3 + $0x142] sm:$0xff]  ;;  %v2071_v11 = vpop.f32.mrf.mxu1 }
 0x1f1   :  { %v11286_v28 = vpop.permute.xlu1 %8613  ;;  %v1838_v29 = vpop.f32.mrf.mxu0 }
 0x1f2   :  { %v8609_v54 = vpop.permute.xlu0 %8608  ;;  %v11290_v40 = vadd.f32 %v2061_v63, %v1837_v25  ;;  %v8615_v63 = vunpack.i.l.bf16 %v11286_v28 }
 0x1f3   :  { %8873 = vrot.lane.b32.xlu1 %v8872_v10, %s9775_s27  ;;  %v8610_v14 = vunpack.i.l.bf16 %v8609_v54  ;;  %v2143_v10 = vld [vmem:[#allocation3] sm:$0xff]  ;;  %v8611_v37 = vunpack.i.h.bf16 %v8609_v54  ;;  %v8616_v54 = vunpack.i.h.bf16 %v11286_v28 }
 0x1f4   :  { %8878 = vrot.lane.b32.xlu0 %v8877_v61, %s9770_s13  ;;  %14412 = vst [vmem:[#allocation24_spill] sm:$0xff] %v11290_v40  ;;  %v1841_v5 = vpop.f32.mrf.mxu0  ;;  %2133 = vst.msk [vmem:[#allocation3 + $0x191] sm:$0xff] %vm187_vm4, %v11290_v40  ;;  %v2288_v61 = vld [vmem:[#allocation3 + $0x141] sm:$0xff] }
 0x1f5   :  { %v11294_v44 = vpop.permute.xlu1 %5979  ;;  %v1842_v57 = vadd.f32 %v11039_v31, %v1841_v5  ;;  %v3328_v29 = vsel %vm187_vm4, %v2143_v10, %v8610_v14 }
 0x1f6   :  { %14413 = vst [vmem:[#allocation25_spill] sm:$0xff] %v11294_v44  ;;  %v8619_v26 = vpop.permute.xlu0 %8618  ;;  %v1843_v20 = vpop.f32.mrf.mxu0 }
 0x1f7   :  { %8883 = vrot.lane.b32.xlu1 %v8882_v33, %s9776_s3  ;;  %v11302_v62 = vadd.f32 %v7981_v0, %v1842_v57  ;;  %v8620_v33 = vunpack.i.l.bf16 %v8619_v26  ;;  %v8902_v0 = vpack.i.bf16 %v2288_v61, %v2192_v22  ;;  %v11314_v57 = vld [vmem:[#allocation3 + $0x150] sm:$0xff]  ;;  %v8621_v10 = vunpack.i.h.bf16 %v8619_v26 }
 0x1f8   :  { %8888 = vrot.lane.b32.xlu0 %v8887_v53, %s9773_s30  ;;  %v8907_v53 = vpack.i.bf16 %v11304_v13, %v2224_v47  ;;  %v11316_v20 = vld [vmem:[#allocation3 + $0x151] sm:$0xff]  ;;  %v3360_v47 = vsel %vm39_vm0, %v3328_v29, %v8615_v63 }
 0x1f9   :  { %14414 = vst [vmem:[#allocation26_spill] sm:$0xff] %v11302_v62  ;;  %v8624_v17 = vpop.permute.xlu1 %8623  ;;  %2134 = vst.msk [vmem:[#allocation3 + $0x1a1] sm:$0xff] %vm187_vm4, %v11302_v62  ;;  %v3393_v16 = vsel %vm3392_vm6, %v3360_v47, %v8620_v33  ;;  %v8917_v26 = vpack.i.bf16 %v11316_v20, %v2288_v61  ;;  %v2258_v47 = vld [vmem:[#allocation3 + $0x160] sm:$0xff] }
 0x1fa   :  { %v8629_v25 = vpop.permute.xlu0 %8628  ;;  %v8625_v5 = vunpack.i.l.bf16 %v8624_v17  ;;  %v8626_v2 = vunpack.i.h.bf16 %v8624_v17  ;;  %v11334_v17 = vld [vmem:[#allocation3 + $0x152] sm:$0xff] }
 0x1fb   :  { %8893 = vrot.lane.b32.xlu1 %v8892_v36, %s9771_s16  ;;  %v1846_v56 = vpop.f32.mrf.mxu0  ;;  %v3329_v36 = vsel %vm187_vm4, %v11079_v58, %v8611_v37  ;;  %v8630_v18 = vunpack.i.l.bf16 %v8629_v25  ;;  %v8912_v58 = vpack.i.bf16 %v11314_v57, %v11292_v48 }
 0x1fc   :  { %8898 = vrot.lane.b32.xlu0 %v8897_v42, %s9774_s22  ;;  %v1847_v14 = vadd.f32 %v11039_v31, %v1846_v56  ;;  %v3361_v37 = vsel %vm39_vm0, %v3329_v36, %v8616_v54  ;;  %v3425_v63 = vsel %vm1359_vm2, %v3393_v16, %v8625_v5 }
 0x1fd   :  { %v11321_v42 = vpop.permute.xlu1 %5981  ;;  %v1848_v28 = vpop.f32.mrf.mxu0  ;;  %v3394_v33 = vsel %vm3392_vm6, %v3361_v37, %v8621_v10  ;;  %v3458_v5 = vsel %vm3457_vm7, %v3425_v63, %v8630_v18 }
 0x1fe   :  { %14415 = vst [vmem:[#allocation27_spill] sm:$0xff] %v11321_v42  ;;  %v8639_v22 = vpop.permute.xlu0 %8638  ;;  %v11324_v7 = vadd.f32 %v2071_v11, %v1847_v14  ;;  %v3426_v61 = vsel %vm1359_vm2, %v3394_v33, %v8626_v2  ;;  %v2290_v2 = vld [vmem:[#allocation3 + $0x161] sm:$0xff]  ;;  %v7987_v28 = vpop.f32.mrf.mxu1 }
 0x1ff   :  { %8903 = vrot.lane.b32.xlu1 %v8902_v0, %s9772_s21  ;;  %v8631_v0 = vunpack.i.h.bf16 %v8629_v25  ;;  %v8640_v14 = vunpack.i.l.bf16 %v8639_v22  ;;  %v8927_v25 = vpack.i.bf16 %v11334_v17, %v11304_v13  ;;  %v8937_v33 = vpack.i.bf16 %v2290_v2, %v11316_v20 }
 0x200   :  { %14416 = vst [vmem:[#allocation28_spill] sm:$0xff] %v11324_v7  ;;  %8908 = vrot.lane.b32.xlu0 %v8907_v53, %s9775_s27  ;;  %2135 = vst.msk [vmem:[#allocation3 + $0x1b1] sm:$0xff] %vm187_vm4, %v11324_v7  ;;  %v1851_v29 = vpop.f32.mrf.mxu0 }
 0x201   :  { %v8634_v53 = vpop.permute.xlu1 %8633  ;;  %v1852_v48 = vadd.f32 %v11039_v31, %v1851_v29  ;;  %v3459_v63 = vsel %vm3457_vm7, %v3426_v61, %v8631_v0  ;;  %v11364_v0 = vld [vmem:[#allocation3 + $0x162] sm:$0xff]  ;;  %v11366_v61 = vld [vmem:[#allocation3 + $0x170] sm:$0xff] }
 0x202   :  { %v11339_v56 = vpop.permute.xlu0 %8648  ;;  %v8636_v11 = vunpack.i.h.bf16 %v8634_v53  ;;  %v8635_v54 = vunpack.i.l.bf16 %v8634_v53  ;;  %v1853_v16 = vpop.f32.mrf.mxu0  ;;  %v8947_v20 = vpack.i.bf16 %v11366_v61, %v2258_v47 }
 0x203   :  { %8913 = vrot.lane.b32.xlu1 %v8912_v58, %s9770_s13  ;;  %v11348_v36 = vadd.f32 %v7984_v19, %v1852_v48  ;;  %v8641_v19 = vunpack.i.h.bf16 %v8639_v22  ;;  %v8932_v58 = vpack.i.bf16 %v2258_v47, %v11314_v57  ;;  %v2081_v22 = vpop.f32.mrf.mxu1 }
 0x204   :  { %8918 = vrot.lane.b32.xlu0 %v8917_v26, %s9776_s3  ;;  %v3490_v10 = vsel %vm1392_vm3, %v3458_v5, %v8635_v54  ;;  %v3491_v13 = vsel %vm1392_vm3, %v3459_v63, %v8636_v11 }
 0x205   :  { %14417 = vst [vmem:[#allocation29_spill] sm:$0xff] %v11348_v36  ;;  %v8644_v37 = vpop.permute.xlu1 %8643  ;;  %v3523_v18 = vsel %vm3522_vm8, %v3490_v10, %v8640_v14  ;;  %2136 = vst.msk [vmem:[#allocation3 + $0x1c1] sm:$0xff] %vm187_vm4, %v11348_v36  ;;  %v3524_v16 = vsel %vm3522_vm8, %v3491_v13, %v8641_v19  ;;  %v8650_v13 = vunpack.i.l.bf16 %v11339_v56 }
 0x206   :  { %v11351_v29 = vpop.permute.xlu0 %5983  ;;  %3741 = vmatmul.mubr.f32.vlgmr.msra.gmra.mxu1 %v3523_v18  ;;  %v8645_v48 = vunpack.i.l.bf16 %v8644_v37  ;;  %v8646_v14 = vunpack.i.h.bf16 %v8644_v37  ;;  %v11383_v18 = vld [vmem:[#allocation3 + $0x171] sm:$0xff] }
 0x207   :  { %14418 = vst [vmem:[#allocation30_spill] sm:$0xff] %v11351_v29  ;;  %8923 = vrot.lane.b32.xlu1 %v8917_v26, %s9773_s30  ;;  %v1856_v53 = vpop.f32.mrf.mxu0  ;;  %7726 = vmatprep.mubr.msk.f32.mxu1 %vm187_vm4, %v11114_v51  ;;  %v8942_v51 = vpack.i.bf16 %v11364_v0, %v11334_v17 }
 0x208   :  { %8928 = vrot.lane.b32.xlu0 %v8927_v25, %s9771_s16  ;;  %v1857_v11 = vadd.f32 %v11039_v31, %v1856_v53  ;;  %v3330_v25 = vsel %vm187_vm4, %v11081_v23, %v8645_v48  ;;  %v11396_v53 = vld [vmem:[#allocation3 + $0x180] sm:$0xff] }
 0x209   :  { %v8654_v54 = vpop.permute.xlu1 %8653  ;;  %v1858_v57 = vpop.f32.mrf.mxu0  ;;  %v3362_v23 = vsel %vm39_vm0, %v3330_v25, %v8650_v13 }
 0x20a   :  { %v11369_v26 = vpop.permute.xlu0 %8658  ;;  %3746 = vmatmul.mubr.f32.gmra.mxu1 %v3524_v16  ;;  %v11377_v5 = vadd.f32 %v2081_v22, %v1857_v11  ;;  %v8655_v10 = vunpack.i.l.bf16 %v8654_v54  ;;  %v7990_v11 = vpop.f32.mrf.mxu1  ;;  %v3331_v22 = vsel %vm187_vm4, %v11112_v15, %v8646_v14  ;;  %v8656_v16 = vunpack.i.h.bf16 %v8654_v54 }
 0x20b   :  { %8933 = vrot.lane.b32.xlu1 %v8932_v58, %s9774_s22  ;;  %7727 = vmatprep.mubr.msk.f32.mxu1 %vm187_vm4, %v11141_v35  ;;  %v8660_v37 = vunpack.i.l.bf16 %v11369_v26  ;;  %v8952_v35 = vpack.i.bf16 %v11383_v18, %v2290_v2  ;;  %v8661_v15 = vunpack.i.h.bf16 %v11369_v26 }
 0x20c   :  { %8938 = vrot.lane.b32.xlu0 %v8937_v33, %s9772_s21  ;;  %14419 = vst [vmem:[#allocation31_spill] sm:$0xff] %v11377_v5  ;;  %v1861_v63 = vpop.f32.mrf.mxu0  ;;  %2137 = vst.msk [vmem:[#allocation3 + $0x1d1] sm:$0xff] %vm187_vm4, %v11377_v5  ;;  %v2228_v33 = vld [vmem:[#allocation3 + $0x172] sm:$0xff]  ;;  %v3395_v57 = vsel %vm3392_vm6, %v3362_v23, %v8655_v10  ;;  %v11417_v10 = vld [vmem:[#allocation3 + $0x182] sm:$0xff] }
 0x20d   :  { %v8664_v19 = vpop.permute.xlu1 %8663  ;;  %v1862_v17 = vadd.f32 %v11039_v31, %v1861_v63  ;;  %v8651_v63 = vunpack.i.h.bf16 %v11339_v56  ;;  %v8962_v2 = vpack.i.bf16 %v2228_v33, %v11364_v0  ;;  %v3427_v54 = vsel %vm1359_vm2, %v3395_v57, %v8660_v37  ;;  %v2292_v56 = vld [vmem:[#allocation3 + $0x181] sm:$0xff]  ;;  %v2091_v0 = vpop.f32.mrf.mxu1 }
 0x20e   :  { %v11386_v58 = vpop.permute.xlu0 %8668  ;;  %v1863_v47 = vpop.f32.mrf.mxu0  ;;  %v8665_v25 = vunpack.i.l.bf16 %v8664_v19 }
 0x20f   :  { %8943 = vrot.lane.b32.xlu1 %v8942_v51, %s9775_s27  ;;  %v11398_v48 = vadd.f32 %v7987_v28, %v1862_v17  ;;  %v8967_v28 = vpack.i.bf16 %v11396_v53, %v11366_v61  ;;  %v3363_v13 = vsel %vm39_vm0, %v3331_v22, %v8651_v63  ;;  %v8670_v14 = vunpack.i.l.bf16 %v11386_v58 }
 0x210   :  { %8948 = vrot.lane.b32.xlu0 %v8947_v20, %s9770_s13  ;;  %v3396_v47 = vsel %vm3392_vm6, %v3363_v13, %v8656_v16  ;;  %v8666_v61 = vunpack.i.h.bf16 %v8664_v19  ;;  %v3460_v23 = vsel %vm3457_vm7, %v3427_v54, %v8665_v25  ;;  %v8972_v63 = vpack.i.bf16 %v2292_v56, %v11383_v18  ;;  %v11433_v13 = vld [vmem:[#allocation3 + $0x190] sm:$0xff] }
 0x211   :  { %14420 = vst [vmem:[#allocation32_spill] sm:$0xff] %v11398_v48  ;;  %v11404_v51 = vpop.permute.xlu1 %5985  ;;  %2138 = vst.msk [vmem:[#allocation3 + $0x1e1] sm:$0xff] %vm187_vm4, %v11398_v48  ;;  %v3428_v42 = vsel %vm1359_vm2, %v3396_v47, %v8661_v15  ;;  %v8671_v16 = vunpack.i.h.bf16 %v11386_v58  ;;  %v3492_v25 = vsel %vm1392_vm3, %v3460_v23, %v8670_v14  ;;  %v11435_v54 = vld [vmem:[#allocation3 + $0x191] sm:$0xff]  ;;  %v8982_v47 = vpack.i.bf16 %v11433_v13, %v11396_v53 }
 0x212   :  { %14421 = vst [vmem:[#allocation33_spill] sm:$0xff] %v11404_v51  ;;  %v8679_v20 = vpop.permute.xlu0 %8678  ;;  %v11456_v53 = vld [vmem:[#allocation3 + $0x192] sm:$0xff] }
 0x213   :  { %8953 = vrot.lane.b32.xlu1 %v8952_v35, %s9776_s3  ;;  %v1866_v17 = vpop.f32.mrf.mxu0  ;;  %v8680_v19 = vunpack.i.l.bf16 %v8679_v20  ;;  %v8681_v15 = vunpack.i.h.bf16 %v8679_v20 }
 0x214   :  { %8958 = vrot.lane.b32.xlu0 %v8952_v35, %s9773_s30  ;;  %v1867_v26 = vadd.f32 %v11039_v31, %v1866_v17  ;;  %v8977_v35 = vpack.i.bf16 %v11417_v10, %v2228_v33 }
 0x215   :  { %v8674_v22 = vpop.permute.xlu1 %8673  ;;  %v1868_v29 = vpop.f32.mrf.mxu0  ;;  %v3332_v23 = vsel %vm187_vm4, %v11131_v27, %v8680_v19 }
 0x216   :  { %v11422_v37 = vpop.permute.xlu0 %5987  ;;  %v8675_v57 = vunpack.i.l.bf16 %v8674_v22  ;;  %v11426_v51 = vadd.f32 %v2091_v0, %v1867_v26  ;;  %v8676_v18 = vunpack.i.h.bf16 %v8674_v22  ;;  %v3461_v29 = vsel %vm3457_vm7, %v3428_v42, %v8666_v61 }
 0x217   :  { %14422 = vst [vmem:[#allocation34_spill] sm:$0xff] %v11422_v37  ;;  %8963 = vrot.lane.b32.xlu1 %v8962_v2, %s9771_s16  ;;  %v8987_v42 = vpack.i.bf16 %v11435_v54, %v2292_v56  ;;  %v7993_v56 = vpop.f32.mrf.mxu1 }
 0x218   :  { %14423 = vst [vmem:[#allocation35_spill] sm:$0xff] %v11426_v51  ;;  %8968 = vrot.lane.b32.xlu0 %v8967_v28, %s9774_s22  ;;  %v3525_v33 = vsel %vm3522_vm8, %v3492_v25, %v8675_v57  ;;  %2139 = vst.msk [vmem:[#allocation3 + $0x1f1] sm:$0xff] %vm187_vm4, %v11426_v51  ;;  %v1871_v58 = vpop.f32.mrf.mxu0  ;;  %v3333_v57 = vsel %vm187_vm4, %v11143_v39, %v8681_v15  ;;  %v8997_v39 = vpack.i.bf16 %v11456_v53, %v11417_v10  ;;  %v2294_v15 = vld [vmem:[#allocation3 + $0x1a1] sm:$0xff] }
 0x219   :  { %v8684_v17 = vpop.permute.xlu1 %8683  ;;  %3751 = vmatmul.mubr.f32.gmra.mxu1 %v3525_v33  ;;  %v1872_v28 = vadd.f32 %v11039_v31, %v1871_v58  ;;  %v3493_v31 = vsel %vm1392_vm3, %v3461_v29, %v8671_v16  ;;  %v11465_v16 = vld [vmem:[#allocation3 + $0x1a0] sm:$0xff] }
 0x21a   :  { %v8689_v2 = vpop.permute.xlu0 %8688  ;;  %v8686_v14 = vunpack.i.h.bf16 %v8684_v17  ;;  %v8685_v0 = vunpack.i.l.bf16 %v8684_v17  ;;  %7728 = vmatprep.mubr.msk.f32.mxu1 %vm187_vm4, %v11166_v52  ;;  %v1873_v61 = vpop.f32.mrf.mxu0  ;;  %v3526_v22 = vsel %vm3522_vm8, %v3493_v31, %v8676_v18 }
 0x21b   :  { %v8690_v20 = vunpack.i.l.bf16 %v8689_v2  ;;  %8973 = vrot.lane.b32.xlu1 %v8972_v63, %s9772_s21  ;;  %v11452_v26 = vadd.f32 %v7990_v11, %v1872_v28  ;;  %v8691_v27 = vunpack.i.h.bf16 %v8689_v2  ;;  %v2101_v2 = vpop.f32.mrf.mxu1  ;;  %v9002_v61 = vpack.i.bf16 %v11465_v16, %v11433_v13  ;;  %v11489_v13 = vld [vmem:[#allocation3 + $0x1b0] sm:$0xff] }
 0x21c   :  { %8978 = vrot.lane.b32.xlu0 %v8977_v35, %s9775_s27  ;;  %v3364_v52 = vsel %vm39_vm0, %v3332_v23, %v8685_v0  ;;  %v3365_v11 = vsel %vm39_vm0, %v3333_v57, %v8686_v14  ;;  %v9007_v57 = vpack.i.bf16 %v2294_v15, %v11435_v54 }
 0x21d   :  { %14424 = vst [vmem:[#allocation36_spill] sm:$0xff] %v11452_v26  ;;  %v8694_v19 = vpop.permute.xlu1 %8693  ;;  %3756 = vmatmul.mubr.f32.gmra.mxu1 %v3526_v22  ;;  %2140 = vst.msk [vmem:[#allocation3 + $0x201] sm:$0xff] %vm187_vm4, %v11452_v26  ;;  %v3397_v18 = vsel %vm3392_vm6, %v3364_v52, %v8690_v20  ;;  %v3398_v28 = vsel %vm3392_vm6, %v3365_v11, %v8691_v27 }
 0x21e   :  { %v8699_v25 = vpop.permute.xlu0 %8698  ;;  %v8696_v63 = vunpack.i.h.bf16 %v8694_v19  ;;  %v8695_v35 = vunpack.i.l.bf16 %v8694_v19  ;;  %7729 = vmatprep.mubr.msk.f32.mxu1 %vm187_vm4, %v11178_v60  ;;  %v9744_v60 = vld [vmem:[%s14323_s2] ss:$0 sm:$0xff] }
 0x21f   :  { %v8700_v33 = vunpack.i.l.bf16 %v8699_v25  ;;  %8983 = vrot.lane.b32.xlu1 %v8982_v47, %s9770_s13  ;;  %v1876_v29 = vpop.f32.mrf.mxu0  ;;  %v8701_v14 = vunpack.i.h.bf16 %v8699_v25  ;;  %v11487_v25 = vld [vmem:[#allocation3 + $0x1a2] sm:$0xff] }
 0x220   :  { %8988 = vrot.lane.b32.xlu0 %v8987_v42, %s9776_s3  ;;  %v3429_v58 = vsel %vm1359_vm2, %v3397_v18, %v8695_v35  ;;  %v1877_v17 = vadd.f32 %v9744_v60, %v1876_v29  ;;  %v3430_v10 = vsel %vm1359_vm2, %v3398_v28, %v8696_v63  ;;  %v2405_v28 = vld [vmem:[#allocation3 + $0x72] sm:$0xff] }
 0x221   :  { %v8704_v0 = vpop.permute.xlu1 %8703  ;;  %v1878_v52 = vpop.f32.mrf.mxu0  ;;  %v3462_v22 = vsel %vm3457_vm7, %v3429_v58, %v8700_v33 }
 0x222   :  { %v8709_v47 = vpop.permute.xlu0 %8708  ;;  %v8706_v23 = vunpack.i.h.bf16 %v8704_v0  ;;  %v8705_v20 = vunpack.i.l.bf16 %v8704_v0  ;;  %v11484_v27 = vadd.f32 %v2101_v2, %v1877_v17  ;;  %v2149_v17 = vld [vmem:[#allocation3 + $0x60] sm:$0xff]  ;;  %v9012_v0 = vpack.i.bf16 %v11487_v25, %v11456_v53  ;;  %v2150_v53 = vld [vmem:[#allocation3 + $0x70] sm:$0xff] }
 0x223   :  { %v8710_v31 = vunpack.i.l.bf16 %v8709_v47  ;;  %8993 = vrot.lane.b32.xlu1 %v8987_v42, %s9773_s30  ;;  %v8711_v63 = vunpack.i.h.bf16 %v8709_v47 }
 0x224   :  { %8998 = vrot.lane.b32.xlu0 %v8997_v39, %s9771_s16  ;;  %14425 = vst [vmem:[#allocation37_spill] sm:$0xff] %v11484_v27  ;;  %v3494_v19 = vsel %vm1392_vm3, %v3462_v22, %v8705_v20  ;;  %v1881_v11 = vpop.f32.mrf.mxu0  ;;  %v3463_v39 = vsel %vm3457_vm7, %v3430_v10, %v8701_v14  ;;  %2141 = vst.msk [vmem:[#allocation3 + $0x211] sm:$0xff] %vm187_vm4, %v11484_v27  ;;  %v9017_v14 = vpack.i.bf16 %v11489_v13, %v11465_v16  ;;  %v3933_v27 = vld [vmem:[#allocation3] sm:$0xff] }
 0x225   :  { %v8714_v35 = vpop.permute.xlu1 %8713  ;;  %v3527_v42 = vsel %vm3522_vm8, %v3494_v19, %v8710_v31  ;;  %v1882_v54 = vadd.f32 %v9744_v60, %v1881_v11  ;;  %v3495_v29 = vsel %vm1392_vm3, %v3463_v39, %v8706_v23  ;;  %v11506_v23 = vld [vmem:[#allocation3 + $0x1b1] sm:$0xff] }
 0x226   :  { %v8719_v18 = vpop.permute.xlu0 %8718  ;;  %v8715_v33 = vunpack.i.l.bf16 %v8714_v35  ;;  %3761 = vmatmul.mubr.f32.gmra.mxu1 %v3527_v42  ;;  %v1883_v58 = vpop.f32.mrf.mxu0  ;;  %v8716_v60 = vunpack.i.h.bf16 %v8714_v35  ;;  %v3528_v31 = vsel %vm3522_vm8, %v3495_v29, %v8711_v63  ;;  %v9022_v19 = vpack.i.bf16 %v11506_v23, %v2294_v15  ;;  %v11515_v11 = vld [vmem:[#allocation3 + $0x1b2] sm:$0xff]  ;;  %v11517_v63 = vld [vmem:[#allocation3 + $0x1c0] sm:$0xff] }
 0x227   :  { %v8720_v2 = vunpack.i.l.bf16 %v8719_v18  ;;  %9003 = vrot.lane.b32.xlu1 %v9002_v61, %s9774_s22  ;;  %v11502_v47 = vadd.f32 %v7993_v56, %v1882_v54  ;;  %7730 = vmatprep.mubr.msk.f32.mxu1 %vm187_vm4, %v2405_v28  ;;  %v8721_v16 = vunpack.i.h.bf16 %v8719_v18  ;;  %v9032_v29 = vpack.i.bf16 %v11515_v11, %v11487_v25 }
 0x228   :  { %9008 = vrot.lane.b32.xlu0 %v9007_v57, %s9772_s21  ;;  %v3334_v10 = vsel %vm187_vm4, %v2149_v17, %v8715_v33  ;;  %v2406_v57 = vld [vmem:[#allocation3 + $0x82] sm:$0xff]  ;;  %v3335_v35 = vsel %vm187_vm4, %v2150_v53, %v8716_v60  ;;  %v9037_v15 = vpack.i.bf16 %v11517_v63, %v11489_v13 }
 0x229   :  { %14426 = vst [vmem:[#allocation38_spill] sm:$0xff] %v11502_v47  ;;  %v8724_v20 = vpop.permute.xlu1 %8723  ;;  %2142 = vst.msk [vmem:[#allocation3 + $0x221] sm:$0xff] %vm187_vm4, %v11502_v47  ;;  %v3366_v56 = vsel %vm39_vm0, %v3334_v10, %v8720_v2  ;;  %v3367_v58 = vsel %vm39_vm0, %v3335_v35, %v8721_v16 }
 0x22a   :  { %v8729_v61 = vpop.permute.xlu0 %8728  ;;  %v8725_v52 = vunpack.i.l.bf16 %v8724_v20  ;;  %3766 = vmatmul.mubr.f32.gmra.mxu1 %v3528_v31  ;;  %v8726_v42 = vunpack.i.h.bf16 %v8724_v20 }
 0x22b   :  { %v8730_v22 = vunpack.i.l.bf16 %v8729_v61  ;;  %9013 = vrot.lane.b32.xlu1 %v9012_v0, %s9775_s27  ;;  %7731 = vmatprep.mubr.msk.f32.mxu1 %vm187_vm4, %v2406_v57  ;;  %v8731_v17 = vunpack.i.h.bf16 %v8729_v61  ;;  %v2296_v0 = vld [vmem:[#allocation3 + $0x1c1] sm:$0xff] }
 0x22c   :  { %9018 = vrot.lane.b32.xlu0 %v9017_v14, %s9770_s13  ;;  %v3399_v39 = vsel %vm3392_vm6, %v3366_v56, %v8725_v52  ;;  %v11530_v14 = vld [vmem:[#allocation3 + $0x1c2] sm:$0xff]  ;;  %v3400_v60 = vsel %vm3392_vm6, %v3367_v58, %v8726_v42  ;;  %v9042_v61 = vpack.i.bf16 %v2296_v0, %v11506_v23 }
 0x22d   :  { %v8734_v18 = vpop.permute.xlu1 %8733  ;;  %v3431_v2 = vsel %vm1359_vm2, %v3399_v39, %v8730_v22  ;;  %v9047_v52 = vpack.i.bf16 %v11530_v14, %v11515_v11  ;;  %v3432_v16 = vsel %vm1359_vm2, %v3400_v60, %v8731_v17  ;;  %v11545_v39 = vld [vmem:[#allocation3 + $0x1d1] sm:$0xff]  ;;  %v2151_v17 = vld [vmem:[#allocation3 + $0x80] sm:$0xff] }
 0x22e   :  { %v8739_v54 = vpop.permute.xlu0 %8738  ;;  %v8735_v33 = vunpack.i.l.bf16 %v8734_v18  ;;  %v8736_v10 = vunpack.i.h.bf16 %v8734_v18 }
 0x22f   :  { %v8740_v28 = vunpack.i.l.bf16 %v8739_v54  ;;  %9023 = vrot.lane.b32.xlu1 %v9022_v19, %s9776_s3  ;;  %v8741_v56 = vunpack.i.h.bf16 %v8739_v54  ;;  %v2407_v54 = vld [vmem:[#allocation3 + $0x92] sm:$0xff] }
 0x230   :  { %9028 = vrot.lane.b32.xlu0 %v9022_v19, %s9773_s30  ;;  %v3464_v20 = vsel %vm3457_vm7, %v3431_v2, %v8735_v33  ;;  %v11541_v19 = vld [vmem:[#allocation3 + $0x1d0] sm:$0xff]  ;;  %v3465_v23 = vsel %vm3457_vm7, %v3432_v16, %v8736_v10 }
 0x231   :  { %v8744_v31 = vpop.permute.xlu1 %8743  ;;  %v3496_v57 = vsel %vm1392_vm3, %v3464_v20, %v8740_v28  ;;  %v3497_v10 = vsel %vm1392_vm3, %v3465_v23, %v8741_v56  ;;  %v9057_v20 = vpack.i.bf16 %v11545_v39, %v2296_v0  ;;  %v11557_v16 = vld [vmem:[#allocation3 + $0x1d2] sm:$0xff] }
 0x232   :  { %v8749_v13 = vpop.permute.xlu0 %8748  ;;  %v8745_v53 = vunpack.i.l.bf16 %v8744_v31  ;;  %v8746_v35 = vunpack.i.h.bf16 %v8744_v31  ;;  %v2152_v31 = vld [vmem:[#allocation3 + $0x90] sm:$0xff] }
 0x233   :  { %v8750_v22 = vunpack.i.l.bf16 %v8749_v13  ;;  %9033 = vrot.lane.b32.xlu1 %v9032_v29, %s9771_s16  ;;  %v8751_v18 = vunpack.i.h.bf16 %v8749_v13 }
 0x234   :  { %9038 = vrot.lane.b32.xlu0 %v9037_v15, %s9774_s22  ;;  %v3529_v42 = vsel %vm3522_vm8, %v3496_v57, %v8745_v53  ;;  %v9052_v15 = vpack.i.bf16 %v11541_v19, %v11517_v63  ;;  %v3530_v53 = vsel %vm3522_vm8, %v3497_v10, %v8746_v35  ;;  %v9067_v35 = vpack.i.bf16 %v11557_v16, %v11530_v14 }
 0x235   :  { %v8754_v33 = vpop.permute.xlu1 %8753  ;;  %3771 = vmatmul.mubr.f32.gmra.mxu1 %v3529_v42  ;;  %v3336_v28 = vsel %vm187_vm4, %v2151_v17, %v8750_v22  ;;  %v3337_v63 = vsel %vm187_vm4, %v2152_v31, %v8751_v18 }
 0x236   :  { %v8759_v58 = vpop.permute.xlu0 %8758  ;;  %v8756_v29 = vunpack.i.h.bf16 %v8754_v33  ;;  %v8755_v2 = vunpack.i.l.bf16 %v8754_v33  ;;  %7732 = vmatprep.mubr.msk.f32.mxu1 %vm187_vm4, %v2407_v54  ;;  %v2298_v54 = vld [vmem:[#allocation3 + $0x1e1] sm:$0xff] }
 0x237   :  { %v8760_v60 = vunpack.i.l.bf16 %v8759_v58  ;;  %9043 = vrot.lane.b32.xlu1 %v9042_v61, %s9772_s21  ;;  %v8761_v57 = vunpack.i.h.bf16 %v8759_v58  ;;  %v2408_v61 = vld [vmem:[#allocation3 + $0xa2] sm:$0xff] }
 0x238   :  { %9048 = vrot.lane.b32.xlu0 %v9047_v52, %s9775_s27  ;;  %v3368_v13 = vsel %vm39_vm0, %v3336_v28, %v8755_v2  ;;  %v3369_v52 = vsel %vm39_vm0, %v3337_v63, %v8756_v29  ;;  %v11568_v58 = vld [vmem:[#allocation3 + $0x1e0] sm:$0xff]  ;;  %v9077_v63 = vpack.i.bf16 %v2298_v54, %v11545_v39  ;;  %v2409_v39 = vld [vmem:[#allocation3 + $0xb2] sm:$0xff] }
 0x239   :  { %v8764_v22 = vpop.permute.xlu1 %8763  ;;  %3776 = vmatmul.mubr.f32.gmra.mxu1 %v3530_v53  ;;  %v3401_v0 = vsel %vm3392_vm6, %v3368_v13, %v8760_v60  ;;  %v3402_v17 = vsel %vm3392_vm6, %v3369_v52, %v8761_v57  ;;  %v9072_v53 = vpack.i.bf16 %v11568_v58, %v11541_v19 }
 0x23a   :  { %v8769_v42 = vpop.permute.xlu0 %8768  ;;  %v8766_v33 = vunpack.i.h.bf16 %v8764_v22  ;;  %v8765_v56 = vunpack.i.l.bf16 %v8764_v22  ;;  %7733 = vmatprep.mubr.msk.f32.mxu1 %vm187_vm4, %v2408_v61  ;;  %v11579_v22 = vld [vmem:[#allocation3 + $0x1e2] sm:$0xff] }
 0x23b   :  { %v8770_v23 = vunpack.i.l.bf16 %v8769_v42  ;;  %9053 = vrot.lane.b32.xlu1 %v9052_v15, %s9770_s13  ;;  %v8771_v29 = vunpack.i.h.bf16 %v8769_v42  ;;  %v11581_v42 = vld [vmem:[#allocation3 + $0x1f0] sm:$0xff] }
 0x23c   :  { %9058 = vrot.lane.b32.xlu0 %v9057_v20, %s9776_s3  ;;  %v3433_v18 = vsel %vm1359_vm2, %v3401_v0, %v8765_v56  ;;  %v3434_v60 = vsel %vm1359_vm2, %v3402_v17, %v8766_v33  ;;  %v9082_v17 = vpack.i.bf16 %v11579_v22, %v11557_v16 }
 0x23d   :  { %v8774_v2 = vpop.permute.xlu1 %8773  ;;  %v3466_v13 = vsel %vm3457_vm7, %v3433_v18, %v8770_v23  ;;  %v3467_v56 = vsel %vm3457_vm7, %v3434_v60, %v8771_v29  ;;  %v11594_v60 = vld [vmem:[#allocation3 + $0x1f1] sm:$0xff] }
 0x23e   :  { %v8779_v28 = vpop.permute.xlu0 %8778  ;;  %v8776_v10 = vunpack.i.h.bf16 %v8774_v2  ;;  %v8775_v31 = vunpack.i.l.bf16 %v8774_v2  ;;  %v9087_v2 = vpack.i.bf16 %v11581_v42, %v11568_v58 }
 0x23f   :  { %v8780_v15 = vunpack.i.l.bf16 %v8779_v28  ;;  %9063 = vrot.lane.b32.xlu1 %v9057_v20, %s9773_s30  ;;  %v8781_v61 = vunpack.i.h.bf16 %v8779_v28 }
 0x240   :  { %9068 = vrot.lane.b32.xlu0 %v9067_v35, %s9771_s16  ;;  %v3498_v57 = vsel %vm1392_vm3, %v3466_v13, %v8775_v31  ;;  %v3499_v23 = vsel %vm1392_vm3, %v3467_v56, %v8776_v10  ;;  %v2153_v35 = vld [vmem:[#allocation3 + $0xa0] sm:$0xff]  ;;  %v2154_v13 = vld [vmem:[#allocation3 + $0xb0] sm:$0xff]  ;;  %v9092_v56 = vpack.i.bf16 %v11594_v60, %v2298_v54 }
 0x241   :  { %v8784_v52 = vpop.permute.xlu1 %8783  ;;  %v3531_v20 = vsel %vm3522_vm8, %v3498_v57, %v8780_v15  ;;  %v3532_v15 = vsel %vm3522_vm8, %v3499_v23, %v8781_v61 }
 0x242   :  { %v8789_v33 = vpop.permute.xlu0 %8788  ;;  %v8785_v0 = vunpack.i.l.bf16 %v8784_v52  ;;  %3781 = vmatmul.mubr.f32.gmra.mxu1 %v3531_v20  ;;  %v8786_v28 = vunpack.i.h.bf16 %v8784_v52  ;;  %v2410_v52 = vld [vmem:[#allocation3 + $0xc2] sm:$0xff] }
 0x243   :  { %v8790_v18 = vunpack.i.l.bf16 %v8789_v33  ;;  %9073 = vrot.lane.b32.xlu1 %v9072_v53, %s9774_s22  ;;  %7734 = vmatprep.mubr.msk.f32.mxu1 %vm187_vm4, %v2409_v39 }
 0x244   :  { %9078 = vrot.lane.b32.xlu0 %v9077_v63, %s9772_s21  ;;  %v3338_v29 = vsel %vm187_vm4, %v2153_v35, %v8785_v0  ;;  %v8791_v63 = vunpack.i.h.bf16 %v8789_v33  ;;  %v11601_v0 = vld [vmem:[#allocation3 + $0x1f2] sm:$0xff]  ;;  %v11603_v35 = vld [vmem:[#allocation3 + $0x200] sm:$0xff]  ;;  %v3339_v61 = vsel %vm187_vm4, %v2154_v13, %v8786_v28 }
 0x245   :  { %v8794_v10 = vpop.permute.xlu1 %8793  ;;  %v3370_v57 = vsel %vm39_vm0, %v3338_v29, %v8790_v18  ;;  %v9107_v54 = vpack.i.bf16 %v11603_v35, %v11581_v42  ;;  %v11616_v13 = vld [vmem:[#allocation3 + $0x202] sm:$0xff] }
 0x246   :  { %v8799_v31 = vpop.permute.xlu0 %8798  ;;  %v8795_v53 = vunpack.i.l.bf16 %v8794_v10  ;;  %3786 = vmatmul.mubr.f32.gmra.mxu1 %v3532_v15  ;;  %v8796_v23 = vunpack.i.h.bf16 %v8794_v10  ;;  %v2300_v10 = vld [vmem:[#allocation3 + $0x201] sm:$0xff] }
 0x247   :  { %v8800_v20 = vunpack.i.l.bf16 %v8799_v31  ;;  %9083 = vrot.lane.b32.xlu1 %v9082_v17, %s9775_s27  ;;  %7735 = vmatprep.mubr.msk.f32.mxu1 %vm187_vm4, %v2410_v52  ;;  %v9102_v17 = vpack.i.bf16 %v11601_v0, %v11579_v22  ;;  %v8801_v15 = vunpack.i.h.bf16 %v8799_v31  ;;  %v9112_v31 = vpack.i.bf16 %v2300_v10, %v11594_v60 }
 0x248   :  { %9088 = vrot.lane.b32.xlu0 %v9087_v2, %s9770_s13  ;;  %v3403_v39 = vsel %vm3392_vm6, %v3370_v57, %v8795_v53  ;;  %v3371_v2 = vsel %vm39_vm0, %v3339_v61, %v8791_v63  ;;  %v9117_v63 = vpack.i.bf16 %v11616_v13, %v11601_v0 }
 0x249   :  { %v8804_v33 = vpop.permute.xlu1 %8803  ;;  %v3435_v37 = vsel %vm1359_vm2, %v3403_v39, %v8800_v20  ;;  %v3404_v53 = vsel %vm3392_vm6, %v3371_v2, %v8796_v23  ;;  %v11627_v39 = vld [vmem:[#allocation3 + $0x210] sm:$0xff] }
 0x24a   :  { %v8809_v18 = vpop.permute.xlu0 %8808  ;;  %v8805_v29 = vunpack.i.l.bf16 %v8804_v33  ;;  %v8806_v57 = vunpack.i.h.bf16 %v8804_v33  ;;  %v3436_v20 = vsel %vm1359_vm2, %v3404_v53, %v8801_v15  ;;  %v2155_v53 = vld [vmem:[#allocation3 + $0xc0] sm:$0xff] }
 0x24b   :  { %v8810_v28 = vunpack.i.l.bf16 %v8809_v18  ;;  %9093 = vrot.lane.b32.xlu1 %v9092_v56, %s9776_s3  ;;  %v8811_v61 = vunpack.i.h.bf16 %v8809_v18  ;;  %v2411_v18 = vld [vmem:[#allocation3 + $0xd2] sm:$0xff] }
 0x24c   :  { %9098 = vrot.lane.b32.xlu0 %v9092_v56, %s9773_s30  ;;  %v3468_v52 = vsel %vm3457_vm7, %v3435_v37, %v8805_v29  ;;  %v3469_v60 = vsel %vm3457_vm7, %v3436_v20, %v8806_v57  ;;  %v11631_v29 = vld [vmem:[#allocation3 + $0x211] sm:$0xff] }
 0x24d   :  { %v8814_v44 = vpop.permute.xlu1 %8813  ;;  %v3500_v23 = vsel %vm1392_vm3, %v3468_v52, %v8810_v28  ;;  %v9127_v28 = vpack.i.bf16 %v11631_v29, %v2300_v10  ;;  %v2156_v57 = vld [vmem:[#allocation3 + $0xd0] sm:$0xff] }
 0x24e   :  { %v8819_v45 = vpop.permute.xlu0 %8818  ;;  %v8815_v3 = vunpack.i.l.bf16 %v8814_v44  ;;  %v8816_v37 = vunpack.i.h.bf16 %v8814_v44  ;;  %v11643_v20 = vld [vmem:[#allocation3 + $0x212] sm:$0xff] }
 0x24f   :  { %v8820_v56 = vunpack.i.l.bf16 %v8819_v45  ;;  %9103 = vrot.lane.b32.xlu1 %v9102_v17, %s9771_s16  ;;  %v8821_v2 = vunpack.i.h.bf16 %v8819_v45  ;;  %v3501_v45 = vsel %vm1392_vm3, %v3469_v60, %v8811_v61 }
 0x250   :  { %9108 = vrot.lane.b32.xlu0 %v9107_v54, %s9774_s22  ;;  %v3533_v33 = vsel %vm3522_vm8, %v3500_v23, %v8815_v3  ;;  %v9122_v54 = vpack.i.bf16 %v11627_v39, %v11603_v35 }
 0x251   :  { %v8824_v55 = vpop.permute.xlu1 %8823  ;;  %3791 = vmatmul.mubr.f32.gmra.mxu1 %v3533_v33  ;;  %v3340_v44 = vsel %vm187_vm4, %v2155_v53, %v8820_v56  ;;  %v3341_v23 = vsel %vm187_vm4, %v2156_v57, %v8821_v2  ;;  %v2270_v2 = vld [vmem:[#allocation3 + $0x220] sm:$0xff] }
 0x252   :  { %v8829_v15 = vpop.permute.xlu0 %8828  ;;  %v8826_v17 = vunpack.i.h.bf16 %v8824_v55  ;;  %v8825_v34 = vunpack.i.l.bf16 %v8824_v55  ;;  %7736 = vmatprep.mubr.msk.f32.mxu1 %vm187_vm4, %v2411_v18  ;;  %v3534_v55 = vsel %vm3522_vm8, %v3501_v45, %v8816_v37  ;;  %v9137_v37 = vpack.i.bf16 %v11643_v20, %v11616_v13 }
 0x253   :  { %v8830_v3 = vunpack.i.l.bf16 %v8829_v15  ;;  %9113 = vrot.lane.b32.xlu1 %v9112_v31, %s9772_s21  ;;  %v8831_v33 = vunpack.i.h.bf16 %v8829_v15  ;;  %v2412_v31 = vld [vmem:[#allocation3 + $0xe2] sm:$0xff] }
 0x254   :  { %9118 = vrot.lane.b32.xlu0 %v9117_v63, %s9775_s27  ;;  %v3372_v52 = vsel %vm39_vm0, %v3340_v44, %v8825_v34  ;;  %v3373_v63 = vsel %vm39_vm0, %v3341_v23, %v8826_v17  ;;  %v2302_v15 = vld [vmem:[#allocation3 + $0x221] sm:$0xff] }
 0x255   :  { %v8834_v56 = vpop.permute.xlu1 %8833  ;;  %3796 = vmatmul.mubr.f32.gmra.mxu1 %v3534_v55  ;;  %v3405_v10 = vsel %vm3392_vm6, %v3372_v52, %v8830_v3  ;;  %v3406_v17 = vsel %vm3392_vm6, %v3373_v63, %v8831_v33  ;;  %v2367_v63 = vld [vmem:[#allocation3 + $0x230] sm:$0xff] }
 0x256   :  { %v8839_v18 = vpop.permute.xlu0 %8838  ;;  %v8836_v53 = vunpack.i.h.bf16 %v8834_v56  ;;  %v8835_v61 = vunpack.i.l.bf16 %v8834_v56  ;;  %7737 = vmatprep.mubr.msk.f32.mxu1 %vm187_vm4, %v2412_v31  ;;  %v9142_v56 = vpack.i.bf16 %v2270_v2, %v11627_v39  ;;  %v9147_v31 = vpack.i.bf16 %v2302_v15, %v11631_v29  ;;  %v2413_v29 = vld [vmem:[#allocation3 + $0xf2] sm:$0xff] }
 0x257   :  { %v8840_v34 = vunpack.i.l.bf16 %v8839_v18  ;;  %9123 = vrot.lane.b32.xlu1 %v9122_v54, %s9770_s13  ;;  %v8841_v44 = vunpack.i.h.bf16 %v8839_v18  ;;  %v11662_v18 = vld [vmem:[#allocation3 + $0x222] sm:$0xff] }
 0x258   :  { %9128 = vrot.lane.b32.xlu0 %v9127_v28, %s9776_s3  ;;  %v3437_v60 = vsel %vm1359_vm2, %v3405_v10, %v8835_v61  ;;  %v3438_v55 = vsel %vm1359_vm2, %v3406_v17, %v8836_v53 }
 0x259   :  { %v8844_v45 = vpop.permute.xlu1 %8843  ;;  %v3470_v54 = vsel %vm3457_vm7, %v3437_v60, %v8840_v34 }
 0x25a   :  { %v8849_v57 = vpop.permute.xlu0 %8848  ;;  %v8846_v3 = vunpack.i.h.bf16 %v8844_v45  ;;  %v8845_v52 = vunpack.i.l.bf16 %v8844_v45 }
 0x25b   :  { %v8850_v23 = vunpack.i.l.bf16 %v8849_v57  ;;  %9133 = vrot.lane.b32.xlu1 %v9127_v28, %s9773_s30  ;;  %v8851_v61 = vunpack.i.h.bf16 %v8849_v57  ;;  %v3471_v28 = vsel %vm3457_vm7, %v3438_v55, %v8841_v44  ;;  %v9152_v57 = vpack.i.bf16 %v11662_v18, %v11643_v20  ;;  %v2399_v44 = vld [vmem:[#allocation3 + $0x231] sm:$0xff] }
 0x25c   :  { %9138 = vrot.lane.b32.xlu0 %v9137_v37, %s9771_s16  ;;  %v3502_v33 = vsel %vm1392_vm3, %v3470_v54, %v8845_v52  ;;  %v3503_v34 = vsel %vm1392_vm3, %v3471_v28, %v8846_v3  ;;  %v2157_v37 = vld [vmem:[#allocation3 + $0xe0] sm:$0xff]  ;;  %v9157_v52 = vpack.i.bf16 %v2367_v63, %v2270_v2  ;;  %v9162_v63 = vpack.i.bf16 %v2399_v44, %v2302_v15 }
 0x25d   :  { %v8854_v53 = vpop.permute.xlu1 %8853  ;;  %v3535_v17 = vsel %vm3522_vm8, %v3502_v33, %v8850_v23  ;;  %v3536_v3 = vsel %vm3522_vm8, %v3503_v34, %v8851_v61  ;;  %v2414_v2 = vld [vmem:[#allocation3 + $0x102] sm:$0xff] }
 0x25e   :  { %v8859_v10 = vpop.permute.xlu0 %8858  ;;  %v8855_v45 = vunpack.i.l.bf16 %v8854_v53  ;;  %3801 = vmatmul.mubr.f32.gmra.mxu1 %v3535_v17  ;;  %v8856_v54 = vunpack.i.h.bf16 %v8854_v53 }
 0x25f   :  { %v8860_v60 = vunpack.i.l.bf16 %v8859_v10  ;;  %9143 = vrot.lane.b32.xlu1 %v9142_v56, %s9774_s22  ;;  %7738 = vmatprep.mubr.msk.f32.mxu1 %vm187_vm4, %v2413_v29  ;;  %v2158_v56 = vld [vmem:[#allocation3 + $0xf0] sm:$0xff]  ;;  %v8861_v28 = vunpack.i.h.bf16 %v8859_v10 }
 0x260   :  { %9148 = vrot.lane.b32.xlu0 %v9147_v31, %s9772_s21  ;;  %v3342_v23 = vsel %vm187_vm4, %v2157_v37, %v8855_v45  ;;  %v3343_v53 = vsel %vm187_vm4, %v2158_v56, %v8856_v54 }
 0x261   :  { %v8864_v55 = vpop.permute.xlu1 %8863  ;;  %v3374_v31 = vsel %vm39_vm0, %v3342_v23, %v8860_v60  ;;  %v3375_v10 = vsel %vm39_vm0, %v3343_v53, %v8861_v28 }
 0x262   :  { %v8869_v33 = vpop.permute.xlu0 %8868  ;;  %v8865_v17 = vunpack.i.l.bf16 %v8864_v55  ;;  %3806 = vmatmul.mubr.f32.gmra.mxu1 %v3536_v3  ;;  %v8866_v45 = vunpack.i.h.bf16 %v8864_v55 }
 0x263   :  { %v8870_v46 = vunpack.i.l.bf16 %v8869_v33  ;;  %9153 = vrot.lane.b32.xlu1 %v9152_v57, %s9775_s27  ;;  %7739 = vmatprep.mubr.msk.f32.mxu1 %vm187_vm4, %v2414_v2  ;;  %v8871_v60 = vunpack.i.h.bf16 %v8869_v33 }
 0x264   :  { %9158 = vrot.lane.b32.xlu0 %v9157_v52, %s9770_s13  ;;  %v3407_v37 = vsel %vm3392_vm6, %v3374_v31, %v8865_v17  ;;  %v3408_v15 = vsel %vm3392_vm6, %v3375_v10, %v8866_v45  ;;  %v2159_v17 = vld [vmem:[#allocation3 + $0x120] sm:$0xff]  ;;  %v2415_v31 = vld [vmem:[#allocation3 + $0x112] sm:$0xff] }
 0x265   :  { %v8874_v61 = vpop.permute.xlu1 %8873  ;;  %v3439_v23 = vsel %vm1359_vm2, %v3407_v37, %v8870_v46  ;;  %v3440_v33 = vsel %vm1359_vm2, %v3408_v15, %v8871_v60 }
 0x266   :  { %v8879_v34 = vpop.permute.xlu0 %8878  ;;  %v8875_v29 = vunpack.i.l.bf16 %v8874_v61  ;;  %v8876_v52 = vunpack.i.h.bf16 %v8874_v61 }
 0x267   :  { %v8880_v57 = vunpack.i.l.bf16 %v8879_v34  ;;  %9163 = vrot.lane.b32.xlu1 %v9162_v63, %s9776_s3  ;;  %v8881_v28 = vunpack.i.h.bf16 %v8879_v34 }
 0x268   :  { %5991 = vrot.lane.b32.xlu0 %v11158_v49, %s9773_s30  ;;  %v3472_v54 = vsel %vm3457_vm7, %v3439_v23, %v8875_v29  ;;  %v3473_v53 = vsel %vm3457_vm7, %v3440_v33, %v8876_v52 }
 0x269   :  { %v8884_v44 = vpop.permute.xlu1 %8883  ;;  %v3504_v46 = vsel %vm1392_vm3, %v3472_v54, %v8880_v57  ;;  %v3505_v23 = vsel %vm1392_vm3, %v3473_v53, %v8881_v28  ;;  %v2160_v57 = vld [vmem:[#allocation3 + $0x130] sm:$0xff] }
 0x26a   :  { %v8889_v55 = vpop.permute.xlu0 %8888  ;;  %v8885_v3 = vunpack.i.l.bf16 %v8884_v44  ;;  %v8886_v2 = vunpack.i.h.bf16 %v8884_v44 }
 0x26b   :  { %v8890_v56 = vunpack.i.l.bf16 %v8889_v55  ;;  %5989 = vrot.lane.b32.xlu1 %v11147_v41, %s9773_s30  ;;  %v8891_v45 = vunpack.i.h.bf16 %v8889_v55 }
 0x26c   :  { %v3537_v63 = vsel %vm3522_vm8, %v3504_v46, %v8885_v3  ;;  %v3538_v54 = vsel %vm3522_vm8, %v3505_v23, %v8886_v2 }
 0x26d   :  { %v3344_v37 = vsel %vm187_vm4, %v2159_v17, %v8890_v56  ;;  %v8894_v61 = vpop.permute.xlu1 %8893  ;;  %3811 = vmatmul.mubr.f32.gmra.mxu1 %v3537_v63  ;;  %v3345_v52 = vsel %vm187_vm4, %v2160_v57, %v8891_v45  ;;  %v2416_v56 = vld [vmem:[#allocation3 + $0x142] sm:$0xff] }
 0x26e   :  { %v8899_v29 = vpop.permute.xlu0 %8898  ;;  %v8896_v10 = vunpack.i.h.bf16 %v8894_v61  ;;  %v8895_v60 = vunpack.i.l.bf16 %v8894_v61  ;;  %7740 = vmatprep.mubr.msk.f32.mxu1 %vm187_vm4, %v2415_v31 }
 0x26f   :  { %v8900_v34 = vunpack.i.l.bf16 %v8899_v29  ;;  %v8901_v44 = vunpack.i.h.bf16 %v8899_v29 }
 0x270   :  { %v3376_v15 = vsel %vm39_vm0, %v3344_v37, %v8895_v60  ;;  %v3377_v33 = vsel %vm39_vm0, %v3345_v52, %v8896_v10 }
 0x271   :  { %v3409_v55 = vsel %vm3392_vm6, %v3376_v15, %v8900_v34  ;;  %v8904_v3 = vpop.permute.xlu1 %8903  ;;  %3816 = vmatmul.mubr.f32.gmra.mxu1 %v3538_v54  ;;  %v3410_v2 = vsel %vm3392_vm6, %v3377_v33, %v8901_v44 }
 0x272   :  { %v8909_v17 = vpop.permute.xlu0 %8908  ;;  %v8906_v46 = vunpack.i.h.bf16 %v8904_v3  ;;  %v8905_v31 = vunpack.i.l.bf16 %v8904_v3  ;;  %7741 = vmatprep.mubr.msk.f32.mxu1 %vm187_vm4, %v2416_v56  ;;  %v2417_v3 = vld [vmem:[#allocation3 + $0x152] sm:$0xff]  ;;  %v2161_v56 = vld [vmem:[#allocation3 + $0x140] sm:$0xff] }
 0x273   :  { %v8910_v63 = vunpack.i.l.bf16 %v8909_v17  ;;  %v8911_v53 = vunpack.i.h.bf16 %v8909_v17 }
 0x274   :  { %v3441_v28 = vsel %vm1359_vm2, %v3409_v55, %v8905_v31  ;;  %v3442_v29 = vsel %vm1359_vm2, %v3410_v2, %v8906_v46 }
 0x275   :  { %v8914_v45 = vpop.permute.xlu1 %8913  ;;  %v3474_v61 = vsel %vm3457_vm7, %v3441_v28, %v8910_v63  ;;  %v3475_v55 = vsel %vm3457_vm7, %v3442_v29, %v8911_v53  ;;  %v2162_v53 = vld [vmem:[#allocation3 + $0x150] sm:$0xff] }
 0x276   :  { %v8919_v37 = vpop.permute.xlu0 %8918  ;;  %v8916_v60 = vunpack.i.h.bf16 %v8914_v45  ;;  %v8915_v34 = vunpack.i.l.bf16 %v8914_v45 }
 0x277   :  { %v8920_v23 = vunpack.i.l.bf16 %v8919_v37  ;;  %v8921_v57 = vunpack.i.h.bf16 %v8919_v37  ;;  %v2418_v37 = vld [vmem:[#allocation3 + $0x162] sm:$0xff] }
 0x278   :  { %v3506_v10 = vsel %vm1392_vm3, %v3474_v61, %v8915_v34  ;;  %v3507_v17 = vsel %vm1392_vm3, %v3475_v55, %v8916_v60 }
 0x279   :  { %v8924_v15 = vpop.permute.xlu1 %8923  ;;  %v3539_v52 = vsel %vm3522_vm8, %v3506_v10, %v8920_v23  ;;  %v3540_v2 = vsel %vm3522_vm8, %v3507_v17, %v8921_v57 }
 0x27a   :  { %v8929_v54 = vpop.permute.xlu0 %8928  ;;  %v8925_v44 = vunpack.i.l.bf16 %v8924_v15  ;;  %3821 = vmatmul.mubr.f32.gmra.mxu1 %v3539_v52  ;;  %v8926_v46 = vunpack.i.h.bf16 %v8924_v15 }
 0x27b   :  { %v8930_v33 = vunpack.i.l.bf16 %v8929_v54  ;;  %7742 = vmatprep.mubr.msk.f32.mxu1 %vm187_vm4, %v2417_v3  ;;  %v8931_v61 = vunpack.i.h.bf16 %v8929_v54 }
 0x27c   :  { %v3346_v31 = vsel %vm187_vm4, %v2161_v56, %v8925_v44  ;;  %v3347_v60 = vsel %vm187_vm4, %v2162_v53, %v8926_v46 }
 0x27d   :  { %v8934_v63 = vpop.permute.xlu1 %8933  ;;  %v3378_v29 = vsel %vm39_vm0, %v3346_v31, %v8930_v33  ;;  %v3379_v57 = vsel %vm39_vm0, %v3347_v60, %v8931_v61 }
 0x27e   :  { %v8939_v28 = vpop.permute.xlu0 %8938  ;;  %v8935_v45 = vunpack.i.l.bf16 %v8934_v63  ;;  %3826 = vmatmul.mubr.f32.gmra.mxu1 %v3540_v2  ;;  %v8936_v23 = vunpack.i.h.bf16 %v8934_v63 }
 0x27f   :  { %v8940_v34 = vunpack.i.l.bf16 %v8939_v28  ;;  %7743 = vmatprep.mubr.msk.f32.mxu1 %vm187_vm4, %v2418_v37  ;;  %v8941_v44 = vunpack.i.h.bf16 %v8939_v28 }
 0x280   :  { %v3411_v10 = vsel %vm3392_vm6, %v3378_v29, %v8935_v45  ;;  %v3412_v54 = vsel %vm3392_vm6, %v3379_v57, %v8936_v23 }
 0x281   :  { %v8944_v15 = vpop.permute.xlu1 %8943  ;;  %v3443_v3 = vsel %vm1359_vm2, %v3411_v10, %v8940_v34  ;;  %v3444_v63 = vsel %vm1359_vm2, %v3412_v54, %v8941_v44  ;;  %v2419_v10 = vld [vmem:[#allocation3 + $0x172] sm:$0xff] }
 0x282   :  { %v8949_v52 = vpop.permute.xlu0 %8948  ;;  %v8945_v55 = vunpack.i.l.bf16 %v8944_v15  ;;  %v8946_v56 = vunpack.i.h.bf16 %v8944_v15  ;;  %v2163_v15 = vld [vmem:[#allocation3 + $0x160] sm:$0xff] }
 0x283   :  { %v8950_v17 = vunpack.i.l.bf16 %v8949_v52  ;;  %v8951_v45 = vunpack.i.h.bf16 %v8949_v52 }
 0x284   :  { %v3476_v33 = vsel %vm3457_vm7, %v3443_v3, %v8945_v55  ;;  %v3477_v61 = vsel %vm3457_vm7, %v3444_v63, %v8946_v56  ;;  %v2420_v63 = vld [vmem:[#allocation3 + $0x182] sm:$0xff] }
 0x285   :  { %v8954_v31 = vpop.permute.xlu1 %8953  ;;  %v3508_v53 = vsel %vm1392_vm3, %v3476_v33, %v8950_v17  ;;  %v3509_v3 = vsel %vm1392_vm3, %v3477_v61, %v8951_v45  ;;  %v2164_v17 = vld [vmem:[#allocation3 + $0x170] sm:$0xff] }
 0x286   :  { %v8959_v2 = vpop.permute.xlu0 %8958  ;;  %v8955_v46 = vunpack.i.l.bf16 %v8954_v31  ;;  %v8956_v29 = vunpack.i.h.bf16 %v8954_v31 }
 0x287   :  { %v8960_v37 = vunpack.i.l.bf16 %v8959_v2  ;;  %v8961_v34 = vunpack.i.h.bf16 %v8959_v2 }
 0x288   :  { %v3541_v28 = vsel %vm3522_vm8, %v3508_v53, %v8955_v46  ;;  %v3542_v56 = vsel %vm3522_vm8, %v3509_v3, %v8956_v29 }
 0x289   :  { %v8964_v60 = vpop.permute.xlu1 %8963  ;;  %3831 = vmatmul.mubr.f32.gmra.mxu1 %v3541_v28  ;;  %v3348_v52 = vsel %vm187_vm4, %v2163_v15, %v8960_v37  ;;  %v3349_v33 = vsel %vm187_vm4, %v2164_v17, %v8961_v34 }
 0x28a   :  { %v8969_v23 = vpop.permute.xlu0 %8968  ;;  %v8966_v55 = vunpack.i.h.bf16 %v8964_v60  ;;  %v8965_v57 = vunpack.i.l.bf16 %v8964_v60  ;;  %7744 = vmatprep.mubr.msk.f32.mxu1 %vm187_vm4, %v2419_v10 }
 0x28b   :  { %v8970_v44 = vunpack.i.l.bf16 %v8969_v23  ;;  %v8971_v31 = vunpack.i.h.bf16 %v8969_v23 }
 0x28c   :  { %v3380_v54 = vsel %vm39_vm0, %v3348_v52, %v8965_v57  ;;  %v3381_v53 = vsel %vm39_vm0, %v3349_v33, %v8966_v55 }
 0x28d   :  { %v8974_v2 = vpop.permute.xlu1 %8973  ;;  %3836 = vmatmul.mubr.f32.gmra.mxu1 %v3542_v56  ;;  %v3413_v45 = vsel %vm3392_vm6, %v3380_v54, %v8970_v44  ;;  %v3414_v29 = vsel %vm3392_vm6, %v3381_v53, %v8971_v31  ;;  %v2165_v53 = vld [vmem:[#allocation3 + $0x180] sm:$0xff] }
 0x28e   :  { %v8979_v46 = vpop.permute.xlu0 %8978  ;;  %v8976_v28 = vunpack.i.h.bf16 %v8974_v2  ;;  %v8975_v60 = vunpack.i.l.bf16 %v8974_v2  ;;  %7745 = vmatprep.mubr.msk.f32.mxu1 %vm187_vm4, %v2420_v63 }
 0x28f   :  { %v8980_v37 = vunpack.i.l.bf16 %v8979_v46  ;;  %v8981_v10 = vunpack.i.h.bf16 %v8979_v46  ;;  %v2421_v46 = vld [vmem:[#allocation3 + $0x192] sm:$0xff] }
 0x290   :  { %v3445_v61 = vsel %vm1359_vm2, %v3413_v45, %v8975_v60  ;;  %v3446_v15 = vsel %vm1359_vm2, %v3414_v29, %v8976_v28 }
 0x291   :  { %v8984_v34 = vpop.permute.xlu1 %8983  ;;  %v3478_v55 = vsel %vm3457_vm7, %v3445_v61, %v8980_v37  ;;  %v3479_v2 = vsel %vm3457_vm7, %v3446_v15, %v8981_v10 }
 0x292   :  { %v8989_v23 = vpop.permute.xlu0 %8988  ;;  %v8986_v57 = vunpack.i.h.bf16 %v8984_v34  ;;  %v8985_v52 = vunpack.i.l.bf16 %v8984_v34 }
 0x293   :  { %v8990_v3 = vunpack.i.l.bf16 %v8989_v23  ;;  %v8991_v56 = vunpack.i.h.bf16 %v8989_v23  ;;  %v2166_v23 = vld [vmem:[#allocation3 + $0x190] sm:$0xff] }
 0x294   :  { %v3510_v17 = vsel %vm1392_vm3, %v3478_v55, %v8985_v52  ;;  %v3511_v63 = vsel %vm1392_vm3, %v3479_v2, %v8986_v57 }
 0x295   :  { %v8994_v33 = vpop.permute.xlu1 %8993  ;;  %v3543_v54 = vsel %vm3522_vm8, %v3510_v17, %v8990_v3  ;;  %v3544_v29 = vsel %vm3522_vm8, %v3511_v63, %v8991_v56 }
 0x296   :  { %v8999_v44 = vpop.permute.xlu0 %8998  ;;  %v8995_v31 = vunpack.i.l.bf16 %v8994_v33  ;;  %3841 = vmatmul.mubr.f32.gmra.mxu1 %v3543_v54  ;;  %v8996_v60 = vunpack.i.h.bf16 %v8994_v33 }
 0x297   :  { %v9000_v28 = vunpack.i.l.bf16 %v8999_v44  ;;  %7746 = vmatprep.mubr.msk.f32.mxu1 %vm187_vm4, %v2421_v46  ;;  %v9001_v10 = vunpack.i.h.bf16 %v8999_v44 }
 0x298   :  { %v3350_v45 = vsel %vm187_vm4, %v2165_v53, %v8995_v31  ;;  %v3351_v57 = vsel %vm187_vm4, %v2166_v23, %v8996_v60 }
 0x299   :  { %v9004_v37 = vpop.permute.xlu1 %9003  ;;  %v3382_v15 = vsel %vm39_vm0, %v3350_v45, %v9000_v28  ;;  %v3383_v56 = vsel %vm39_vm0, %v3351_v57, %v9001_v10 }
 0x29a   :  { %v9009_v61 = vpop.permute.xlu0 %9008  ;;  %v9005_v34 = vunpack.i.l.bf16 %v9004_v37  ;;  %3846 = vmatmul.mubr.f32.gmra.mxu1 %v3544_v29  ;;  %v9006_v3 = vunpack.i.h.bf16 %v9004_v37 }
 0x29b   :  { %v9010_v52 = vunpack.i.l.bf16 %v9009_v61  ;;  %7747 = vmatprep.mubr.msk.f32.mxu1 %vm187_vm4, %v11487_v25  ;;  %v9011_v2 = vunpack.i.h.bf16 %v9009_v61 }
 0x29c   :  { %v3415_v55 = vsel %vm3392_vm6, %v3382_v15, %v9005_v34  ;;  %v3416_v46 = vsel %vm3392_vm6, %v3383_v56, %v9006_v3  ;;  %v2167_v3 = vld [vmem:[#allocation3 + $0x1a0] sm:$0xff] }
 0x29d   :  { %v9014_v17 = vpop.permute.xlu1 %9013  ;;  %v3447_v31 = vsel %vm1359_vm2, %v3415_v55, %v9010_v52  ;;  %v3448_v45 = vsel %vm1359_vm2, %v3416_v46, %v9011_v2  ;;  %v2168_v2 = vld [vmem:[#allocation3 + $0x1b0] sm:$0xff] }
 0x29e   :  { %v9019_v33 = vpop.permute.xlu0 %9018  ;;  %v9015_v54 = vunpack.i.l.bf16 %v9014_v17  ;;  %v9016_v63 = vunpack.i.h.bf16 %v9014_v17 }
 0x29f   :  { %v9020_v44 = vunpack.i.l.bf16 %v9019_v33  ;;  %v9021_v37 = vunpack.i.h.bf16 %v9019_v33 }
 0x2a0   :  { %v3480_v53 = vsel %vm3457_vm7, %v3447_v31, %v9015_v54  ;;  %v3481_v10 = vsel %vm3457_vm7, %v3448_v45, %v9016_v63 }
 0x2a1   :  { %v9024_v25 = vpop.permute.xlu1 %9023  ;;  %v3512_v34 = vsel %vm1392_vm3, %v3480_v53, %v9020_v44  ;;  %v3513_v56 = vsel %vm1392_vm3, %v3481_v10, %v9021_v37 }
 0x2a2   :  { %v9029_v28 = vpop.permute.xlu0 %9028  ;;  %v9025_v60 = vunpack.i.l.bf16 %v9024_v25  ;;  %v9026_v23 = vunpack.i.h.bf16 %v9024_v25 }
 0x2a3   :  { %v9030_v29 = vunpack.i.l.bf16 %v9029_v28  ;;  %v9031_v15 = vunpack.i.h.bf16 %v9029_v28 }
 0x2a4   :  { %v3545_v61 = vsel %vm3522_vm8, %v3512_v34, %v9025_v60  ;;  %v3546_v44 = vsel %vm3522_vm8, %v3513_v56, %v9026_v23 }
 0x2a5   :  { %v9034_v52 = vpop.permute.xlu1 %9033  ;;  %3851 = vmatmul.mubr.f32.gmra.mxu1 %v3545_v61  ;;  %v3352_v33 = vsel %vm187_vm4, %v2167_v3, %v9030_v29  ;;  %v3353_v46 = vsel %vm187_vm4, %v2168_v2, %v9031_v15 }
 0x2a6   :  { %v9039_v57 = vpop.permute.xlu0 %9038  ;;  %v9036_v55 = vunpack.i.h.bf16 %v9034_v52  ;;  %v9035_v17 = vunpack.i.l.bf16 %v9034_v52  ;;  %7748 = vmatprep.mubr.msk.f32.mxu1 %vm187_vm4, %v11515_v11 }
 0x2a7   :  { %v9040_v54 = vunpack.i.l.bf16 %v9039_v57  ;;  %v9041_v63 = vunpack.i.h.bf16 %v9039_v57 }
 0x2a8   :  { %v3384_v31 = vsel %vm39_vm0, %v3352_v33, %v9035_v17  ;;  %v3385_v28 = vsel %vm39_vm0, %v3353_v46, %v9036_v55  ;;  %v2169_v46 = vld [vmem:[#allocation3 + $0x1c0] sm:$0xff] }
 0x2a9   :  { %v9044_v53 = vpop.permute.xlu1 %9043  ;;  %3856 = vmatmul.mubr.f32.gmra.mxu1 %v3546_v44  ;;  %v3417_v45 = vsel %vm3392_vm6, %v3384_v31, %v9040_v54  ;;  %v3418_v34 = vsel %vm3392_vm6, %v3385_v28, %v9041_v63 }
 0x2aa   :  { %v9049_v25 = vpop.permute.xlu0 %9048  ;;  %v9046_v60 = vunpack.i.h.bf16 %v9044_v53  ;;  %v9045_v11 = vunpack.i.l.bf16 %v9044_v53  ;;  %7749 = vmatprep.mubr.msk.f32.mxu1 %vm187_vm4, %v11530_v14 }
 0x2ab   :  { %v9050_v37 = vunpack.i.l.bf16 %v9049_v25  ;;  %v9051_v23 = vunpack.i.h.bf16 %v9049_v25 }
 0x2ac   :  { %v3449_v29 = vsel %vm1359_vm2, %v3417_v45, %v9045_v11  ;;  %v3450_v15 = vsel %vm1359_vm2, %v3418_v34, %v9046_v60 }
 0x2ad   :  { %v9054_v61 = vpop.permute.xlu1 %9053  ;;  %v3482_v55 = vsel %vm3457_vm7, %v3449_v29, %v9050_v37  ;;  %v3483_v2 = vsel %vm3457_vm7, %v3450_v15, %v9051_v23 }
 0x2ae   :  { %v9059_v10 = vpop.permute.xlu0 %9058  ;;  %v9056_v52 = vunpack.i.h.bf16 %v9054_v61  ;;  %v9055_v57 = vunpack.i.l.bf16 %v9054_v61 }
 0x2af   :  { %v9060_v3 = vunpack.i.l.bf16 %v9059_v10  ;;  %v9061_v14 = vunpack.i.h.bf16 %v9059_v10 }
 0x2b0   :  { %v3514_v17 = vsel %vm1392_vm3, %v3482_v55, %v9055_v57  ;;  %v3515_v44 = vsel %vm1392_vm3, %v3483_v2, %v9056_v52 }
 0x2b1   :  { %v9064_v33 = vpop.permute.xlu1 %9063  ;;  %v3547_v56 = vsel %vm3522_vm8, %v3514_v17, %v9060_v3  ;;  %v3548_v11 = vsel %vm3522_vm8, %v3515_v44, %v9061_v14 }
 0x2b2   :  { %v9069_v54 = vpop.permute.xlu0 %9068  ;;  %v9065_v31 = vunpack.i.l.bf16 %v9064_v33  ;;  %3861 = vmatmul.mubr.f32.gmra.mxu1 %v3547_v56  ;;  %v9066_v53 = vunpack.i.h.bf16 %v9064_v33 }
 0x2b3   :  { %v9070_v63 = vunpack.i.l.bf16 %v9069_v54  ;;  %7750 = vmatprep.mubr.msk.f32.mxu1 %vm187_vm4, %v11557_v16  ;;  %v9071_v37 = vunpack.i.h.bf16 %v9069_v54 }
 0x2b4   :  { %v3354_v25 = vsel %vm187_vm4, %v2169_v46, %v9065_v31  ;;  %v3355_v23 = vsel %vm187_vm4, %v11541_v19, %v9066_v53 }
 0x2b5   :  { %v9074_v28 = vpop.permute.xlu1 %9073  ;;  %v3386_v29 = vsel %vm39_vm0, %v3354_v25, %v9070_v63  ;;  %v3387_v57 = vsel %vm39_vm0, %v3355_v23, %v9071_v37 }
 0x2b6   :  { %v9079_v60 = vpop.permute.xlu0 %9078  ;;  %v9075_v45 = vunpack.i.l.bf16 %v9074_v28  ;;  %3866 = vmatmul.mubr.f32.gmra.mxu1 %v3548_v11  ;;  %v9076_v16 = vunpack.i.h.bf16 %v9074_v28 }
 0x2b7   :  { %v9080_v34 = vunpack.i.l.bf16 %v9079_v60  ;;  %7751 = vmatprep.mubr.msk.f32.mxu1 %vm187_vm4, %v11579_v22  ;;  %v9081_v3 = vunpack.i.h.bf16 %v9079_v60 }
 0x2b8   :  { %v3419_v61 = vsel %vm3392_vm6, %v3386_v29, %v9075_v45  ;;  %v3420_v14 = vsel %vm3392_vm6, %v3387_v57, %v9076_v16  ;;  %v5356_v16 = vld [vmem:[%s14326_s5 + $0x78] sm:$0xff] }
 0x2b9   :  { %v9084_v10 = vpop.permute.xlu1 %9083  ;;  %v3451_v55 = vsel %vm1359_vm2, %v3419_v61, %v9080_v34  ;;  %v3452_v2 = vsel %vm1359_vm2, %v3420_v14, %v9081_v3  ;;  %5463 = vmatpush1.msra.mxu0 %v5356_v16  ;;  %v14427_v3 = vmov 0.0   ;;  %v5352_v16 = vld [vmem:[%s14326_s5 + $0x58] sm:$0xff] }
 0x2ba   :  { %v9089_v15 = vpop.permute.xlu0 %9088  ;;  %v9085_v52 = vunpack.i.l.bf16 %v9084_v10  ;;  %v9086_v33 = vunpack.i.h.bf16 %v9084_v10  ;;  %5464 = vmatprep.subr.mxu0 %v14427_v3 }
 0x2bb   :  { %v9090_v17 = vunpack.i.l.bf16 %v9089_v15  ;;  %v9091_v31 = vunpack.i.h.bf16 %v9089_v15  ;;  %v11808_v15 = vld [vmem:[%s14325_s4] ss:$0 sm:$0xff] }
 0x2bc   :  { %v3484_v22 = vsel %vm3457_vm7, %v3451_v55, %v9085_v52  ;;  %v3485_v25 = vsel %vm3457_vm7, %v3452_v2, %v9086_v33  ;;  %v5355_v55 = vld [vmem:[%s14326_s5 + $0x70] sm:$0xff] }
 0x2bd   :  { %v9094_v54 = vpop.permute.xlu1 %9093  ;;  %v3516_v46 = vsel %vm1392_vm3, %v3484_v22, %v9090_v17  ;;  %v3517_v23 = vsel %vm1392_vm3, %v3485_v25, %v9091_v31  ;;  %5465 = vmatpush1.msra.mxu0 %v5355_v55  ;;  %v5354_v31 = vld [vmem:[%s14326_s5 + $0x68] sm:$0xff] }
 0x2be   :  { %v9099_v56 = vpop.permute.xlu0 %9098  ;;  %v9095_v19 = vunpack.i.l.bf16 %v9094_v54  ;;  %v9096_v63 = vunpack.i.h.bf16 %v9094_v54  ;;  %5466 = vmatprep.subr.mxu0 %v14427_v3 }
 0x2bf   :  { %v9100_v44 = vunpack.i.l.bf16 %v9099_v56  ;;  %v9101_v28 = vunpack.i.h.bf16 %v9099_v56  ;;  %5467 = vmatpush1.msra.mxu0 %v5354_v31 }
 0x2c0   :  { %v3549_v53 = vsel %vm3522_vm8, %v3516_v46, %v9095_v19  ;;  %v3550_v10 = vsel %vm3522_vm8, %v3517_v23, %v9096_v63  ;;  %5468 = vmatprep.subr.mxu0 %v14427_v3 }
 0x2c1   :  { %v9104_v60 = vpop.permute.xlu1 %9103  ;;  %3871 = vmatmul.mubr.f32.gmra.mxu1 %v3549_v53  ;;  %v3356_v29 = vsel %vm187_vm4, %v11568_v58, %v9100_v44  ;;  %v3357_v58 = vsel %vm187_vm4, %v11581_v42, %v9101_v28 }
 0x2c2   :  { %v9109_v11 = vpop.permute.xlu0 %9108  ;;  %v9106_v45 = vunpack.i.h.bf16 %v9104_v60  ;;  %v9105_v37 = vunpack.i.l.bf16 %v9104_v60  ;;  %7752 = vmatprep.mubr.msk.f32.mxu1 %vm187_vm4, %v11601_v0 }
 0x2c3   :  { %v9110_v34 = vunpack.i.l.bf16 %v9109_v11  ;;  %v9111_v0 = vunpack.i.h.bf16 %v9109_v11 }
 0x2c4   :  { %v3388_v61 = vsel %vm39_vm0, %v3356_v29, %v9105_v37  ;;  %v3389_v17 = vsel %vm39_vm0, %v3357_v58, %v9106_v45  ;;  %v5353_v45 = vld [vmem:[%s14326_s5 + $0x60] sm:$0xff] }
 0x2c5   :  { %v9114_v52 = vpop.permute.xlu1 %9113  ;;  %3876 = vmatmul.mubr.f32.gmra.mxu1 %v3550_v10  ;;  %v3421_v42 = vsel %vm3392_vm6, %v3388_v61, %v9110_v34  ;;  %v3422_v44 = vsel %vm3392_vm6, %v3389_v17, %v9111_v0  ;;  %5469 = vmatpush1.msra.mxu0 %v5353_v45  ;;  %v3965_v17 = vld [vmem:[#allocation3 + $0x1] sm:$0xff] }
 0x2c6   :  { %v9119_v57 = vpop.permute.xlu0 %9118  ;;  %v9116_v14 = vunpack.i.h.bf16 %v9114_v52  ;;  %v9115_v33 = vunpack.i.l.bf16 %v9114_v52  ;;  %v3742_v22 = vpop.f32.mrf.mxu1  ;;  %7753 = vmatprep.mubr.msk.f32.mxu1 %vm187_vm4, %v11616_v13  ;;  %5470 = vmatprep.subr.mxu0 %v14427_v3 }
 0x2c7   :  { %v9120_v54 = vunpack.i.l.bf16 %v9119_v57  ;;  %v3743_v56 = vadd.f32 %v11808_v15, %v3742_v22  ;;  %v9121_v46 = vunpack.i.h.bf16 %v9119_v57  ;;  %5471 = vmatpush1.msra.mxu0 %v5352_v16 }
 0x2c8   :  { %v3453_v19 = vsel %vm1359_vm2, %v3421_v42, %v9115_v33  ;;  %v3744_v2 = vpop.f32.mrf.mxu1  ;;  %v3454_v53 = vsel %vm1359_vm2, %v3422_v44, %v9116_v14  ;;  %v5351_v14 = vld [vmem:[%s14326_s5 + $0x50] sm:$0xff]  ;;  %5472 = vmatprep.subr.mxu0 %v14427_v3 }
 0x2c9   :  { %3901 = vst.msk [vmem:[#allocation3 + $0x11] sm:$0xff] %vm187_vm4, %v3743_v56  ;;  %v9124_v13 = vpop.permute.xlu1 %9123  ;;  %5719 = vrot.lane.b32.xlu0 %v3743_v56, %s9777_s20  ;;  %v3486_v29 = vsel %vm3457_vm7, %v3453_v19, %v9120_v54  ;;  %v3487_v52 = vsel %vm3457_vm7, %v3454_v53, %v9121_v46  ;;  %v3997_v54 = vld [vmem:[#allocation3 + $0x2] sm:$0xff]  ;;  %5473 = vmatpush1.msra.mxu0 %v5351_v14 }
 0x2ca   :  { %v9129_v63 = vpop.permute.xlu0 %9128  ;;  %v9126_v25 = vunpack.i.h.bf16 %v9124_v13  ;;  %v9125_v28 = vunpack.i.l.bf16 %v9124_v13  ;;  %v3747_v11 = vpop.f32.mrf.mxu1  ;;  %v5350_v46 = vld [vmem:[%s14326_s5 + $0x48] sm:$0xff]  ;;  %5474 = vmatprep.subr.mxu0 %v14427_v3 }
 0x2cb   :  { %v9130_v60 = vunpack.i.l.bf16 %v9129_v63  ;;  %v3748_v37 = vadd.f32 %v11808_v15, %v3747_v11  ;;  %v9131_v61 = vunpack.i.h.bf16 %v9129_v63  ;;  %5475 = vmatpush1.msra.mxu0 %v5350_v46  ;;  %v5349_v11 = vld [vmem:[%s14326_s5 + $0x40] sm:$0xff] }
 0x2cc   :  { %v3749_v34 = vpop.f32.mrf.mxu1  ;;  %v3518_v23 = vsel %vm1392_vm3, %v3486_v29, %v9125_v28  ;;  %v3519_v55 = vsel %vm1392_vm3, %v3487_v52, %v9126_v25  ;;  %5476 = vmatprep.subr.mxu0 %v14427_v3 }
 0x2cd   :  { %3902 = vst.msk [vmem:[#allocation3 + $0x21] sm:$0xff] %vm187_vm4, %v3748_v37  ;;  %v9134_v10 = vpop.permute.xlu1 %9133  ;;  %6071 = vrot.lane.b32.xlu0 %v3743_v56, %s9778_s28  ;;  %5721 = vrot.lane.b32.xlu1 %v3748_v37, %s9777_s20  ;;  %v3551_v0 = vsel %vm3522_vm8, %v3518_v23, %v9130_v60  ;;  %v3552_v44 = vsel %vm3522_vm8, %v3519_v55, %v9131_v61  ;;  %v5348_v23 = vld [vmem:[%s14326_s5 + $0x38] sm:$0xff] }
 0x2ce   :  { %v9139_v58 = vpop.permute.xlu0 %9138  ;;  %v9135_v57 = vunpack.i.l.bf16 %v9134_v10  ;;  %3881 = vmatmul.mubr.f32.gmra.mxu1 %v3551_v0  ;;  %v9136_v19 = vunpack.i.h.bf16 %v9134_v10  ;;  %5477 = vmatpush1.msra.mxu0 %v5349_v11  ;;  %v5347_v0 = vld [vmem:[%s14326_s5 + $0x30] sm:$0xff] }
 0x2cf   :  { %v9140_v33 = vunpack.i.l.bf16 %v9139_v58  ;;  %7754 = vmatprep.mubr.msk.f32.mxu1 %vm187_vm4, %v11643_v20  ;;  %v9141_v25 = vunpack.i.h.bf16 %v9139_v58  ;;  %5478 = vmatprep.subr.mxu0 %v14427_v3 }
 0x2d0   :  { %v3358_v22 = vsel %vm187_vm4, %v11603_v35, %v9135_v57  ;;  %v11855_v42 = vld [vmem:[#allocation3 + $0x11] sm:$0xff]  ;;  %v3359_v45 = vsel %vm187_vm4, %v11627_v39, %v9136_v19  ;;  %5479 = vmatpush1.msra.mxu0 %v5348_v23 }
 0x2d1   :  { %v11857_v56 = vld [vmem:[#allocation3 + $0x12] sm:$0xff]  ;;  %v9144_v2 = vpop.permute.xlu1 %9143  ;;  %6073 = vrot.lane.b32.xlu1 %v3748_v37, %s9778_s28  ;;  %v9167_v20 = vpack.i.bf16 %v11855_v42, %v3965_v17  ;;  %v3390_v13 = vsel %vm39_vm0, %v3358_v22, %v9140_v33  ;;  %v3391_v39 = vsel %vm39_vm0, %v3359_v45, %v9141_v25  ;;  %5480 = vmatprep.subr.mxu0 %v14427_v3 }
 0x2d2   :  { %v9149_v31 = vpop.permute.xlu0 %9148  ;;  %v9145_v35 = vunpack.i.l.bf16 %v9144_v2  ;;  %3886 = vmatmul.mubr.f32.gmra.mxu1 %v3552_v44  ;;  %v9172_v53 = vpack.i.bf16 %v11857_v56, %v3997_v54  ;;  %v9146_v37 = vunpack.i.h.bf16 %v9144_v2  ;;  %5481 = vmatpush1.msra.mxu0 %v5347_v0  ;;  %v5346_v54 = vld [vmem:[%s14326_s5 + $0x28] sm:$0xff]  ;;  %v5343_v23 = vld [vmem:[%s14326_s5 + $0x10] sm:$0xff] }
 0x2d3   :  { %v9150_v63 = vunpack.i.l.bf16 %v9149_v31  ;;  %9168 = vrot.lane.b32.xlu0 %v9167_v20, %s9773_s30  ;;  %7755 = vmatprep.mubr.msk.f32.mxu1 %vm187_vm4, %v11662_v18  ;;  %v9151_v10 = vunpack.i.h.bf16 %v9149_v31  ;;  %v2431_v20 = vld [vmem:[#allocation3 + $0x232] sm:$0xff] }
 0x2d4   :  { %v3423_v28 = vsel %vm3392_vm6, %v3390_v13, %v9145_v35  ;;  %v11872_v60 = vld [vmem:[#allocation3 + $0x22] sm:$0xff]  ;;  %v3424_v52 = vsel %vm3392_vm6, %v3391_v39, %v9146_v37  ;;  %5482 = vmatprep.subr.mxu0 %v14427_v3 }
 0x2d5   :  { %v9154_v29 = vpop.permute.xlu1 %9153  ;;  %9173 = vrot.lane.b32.xlu1 %v9172_v53, %s9771_s16  ;;  %7758 = vmatprep.mubr.msk.f32.mxu0 %vm187_vm4, %v11872_v60  ;;  %v3455_v16 = vsel %vm1359_vm2, %v3423_v28, %v9150_v63  ;;  %v3456_v19 = vsel %vm1359_vm2, %v3424_v52, %v9151_v10  ;;  %v4062_v46 = vld [vmem:[#allocation3 + $0x21] sm:$0xff]  ;;  %v11912_v28 = vld [vmem:[#allocation3 + $0x10] sm:$0xff] }
 0x2d6   :  { %v9159_v34 = vpop.permute.xlu0 %9158  ;;  %v9155_v18 = vunpack.i.l.bf16 %v9154_v29  ;;  %v9156_v57 = vunpack.i.h.bf16 %v9154_v29  ;;  %v11902_v35 = vld [vmem:[#allocation3 + $0x20] sm:$0xff]  ;;  %5483 = vmatpush1.msra.mxu0 %v5346_v54  ;;  %v9182_v45 = vpack.i.bf16 %v4062_v46, %v11855_v42  ;;  %v5342_v39 = vld [vmem:[%s14326_s5 + $0x8] sm:$0xff] }
 0x2d7   :  { %v9160_v61 = vunpack.i.l.bf16 %v9159_v34  ;;  %v9161_v2 = vunpack.i.h.bf16 %v9159_v34  ;;  %v5345_v53 = vld [vmem:[%s14326_s5 + $0x20] sm:$0xff]  ;;  %v9177_v37 = vpack.i.bf16 %v11902_v35, %v11912_v28  ;;  %5484 = vmatprep.subr.mxu0 %v14427_v3 }
 0x2d8   :  { %v3488_v58 = vsel %vm3457_vm7, %v3455_v16, %v9155_v18  ;;  %v3489_v63 = vsel %vm3457_vm7, %v3456_v19, %v9156_v57  ;;  %5485 = vmatpush1.msra.mxu0 %v5345_v53  ;;  %v5344_v18 = vld [vmem:[%s14326_s5 + $0x18] sm:$0xff]  ;;  %v9187_v16 = vpack.i.bf16 %v11872_v60, %v11857_v56  ;;  %v5341_v56 = vld [vmem:[%s14326_s5] sm:$0xff] }
 0x2d9   :  { %v9164_v55 = vpop.permute.xlu1 %9163  ;;  %v3752_v14 = vpop.f32.mrf.mxu1  ;;  %v3520_v22 = vsel %vm1392_vm3, %v3488_v58, %v9160_v61  ;;  %v3521_v34 = vsel %vm1392_vm3, %v3489_v63, %v9161_v2  ;;  %5486 = vmatprep.subr.mxu0 %v14427_v3 }
 0x2da   :  { %v9165_v17 = vunpack.i.l.bf16 %v9164_v55  ;;  %v3753_v33 = vadd.f32 %v11808_v15, %v3752_v14  ;;  %v9166_v13 = vunpack.i.h.bf16 %v9164_v55  ;;  %5487 = vmatpush1.msra.mxu0 %v5344_v18  ;;  %v5358_v55 = vld [vmem:[%s14326_s5 + $0x88] sm:$0xff] }
 0x2db   :  { %v3754_v31 = vpop.f32.mrf.mxu1  ;;  %5488 = vmatprep.subr.mxu0 %v14427_v3 }
 0x2dc   :  { %v3553_v44 = vsel %vm3522_vm8, %v3520_v22, %v9165_v17  ;;  %3903 = vst.msk [vmem:[#allocation3 + $0x31] sm:$0xff] %vm187_vm4, %v3753_v33  ;;  %5723 = vrot.lane.b32.xlu0 %v3753_v33, %s9777_s20  ;;  %6075 = vrot.lane.b32.xlu1 %v3753_v33, %s9778_s28  ;;  %v3554_v42 = vsel %vm3522_vm8, %v3521_v34, %v9166_v13  ;;  %v5357_v33 = vld [vmem:[%s14326_s5 + $0x80] sm:$0xff] }
 0x2dd   :  { %v3757_v25 = vpop.f32.mrf.mxu1  ;;  %3891 = vmatmul.mubr.f32.gmra.mxu1 %v3553_v44  ;;  %5489 = vmatpush1.msra.mxu0 %v5343_v23 }
 0x2de   :  { %v3758_v11 = vadd.f32 %v11808_v15, %v3757_v25  ;;  %7756 = vmatprep.mubr.msk.f32.mxu1 %vm187_vm4, %v2431_v20  ;;  %5490 = vmatprep.subr.mxu0 %v14427_v3 }
 0x2df   :  { %v3759_v29 = vpop.f32.mrf.mxu1  ;;  %5491 = vmatpush1.msra.mxu0 %v5342_v39 }
 0x2e0   :  { %3904 = vst.msk [vmem:[#allocation3 + $0x41] sm:$0xff] %vm187_vm4, %v3758_v11  ;;  %9183 = vrot.lane.b32.xlu1 %v9182_v45, %s9772_s21  ;;  %9178 = vrot.lane.b32.xlu0 %v9177_v37, %s9774_s22 }
 0x2e1   :  { %3896 = vmatmul.mubr.f32.gmra.mxu1 %v3554_v42  ;;  %5492 = vmatprep.subr.mxu0 %v14427_v3 }
 0x2e2   :  { %5493 = vmatpush1.msra.mxu0 %v5341_v56 }
 0x2e3   :  { %v11934_v61 = vld [vmem:[#allocation3 + $0x30] sm:$0xff]  ;;  %5522 = vmatprep.subr.mxu0 %v14427_v3 }
 0x2e4   :  { %9188 = vrot.lane.b32.xlu0 %v9187_v16, %s9775_s27  ;;  %v9192_v10 = vpack.i.bf16 %v11934_v61, %v11902_v35  ;;  %v3968_v0 = vld [vmem:[#allocation3 + $0x31] sm:$0xff]  ;;  %5523 = vmatpush2.msra.mxu0 %v5358_v55 }
 0x2e5   :  { %v9202_v17 = vpack.i.bf16 %v3968_v0, %v4062_v46  ;;  %5524 = vmatprep.subr.mxu0 %v14427_v3  ;;  %v11967_v2 = vld [vmem:[#allocation3 + $0x32] sm:$0xff] }
 0x2e6   :  { %v3762_v58 = vpop.f32.mrf.mxu1  ;;  %9193 = vrot.lane.b32.xlu1 %v9192_v10, %s9770_s13  ;;  %5525 = vmatpush2.msra.mxu0 %v5357_v33  ;;  %v9207_v20 = vpack.i.bf16 %v11967_v2, %v11872_v60 }
 0x2e7   :  { %v3763_v52 = vadd.f32 %v11808_v15, %v3762_v58  ;;  %v11964_v19 = vld [vmem:[#allocation3 + $0x40] sm:$0xff] }
 0x2e8   :  { %v3764_v57 = vpop.f32.mrf.mxu1  ;;  %5725 = vrot.lane.b32.xlu0 %v3758_v11, %s9777_s20  ;;  %v9212_v31 = vpack.i.bf16 %v11964_v19, %v11934_v61  ;;  %v11972_v44 = vld [vmem:[#allocation3 + $0x42] sm:$0xff] }
 0x2e9   :  { %3905 = vst.msk [vmem:[#allocation3 + $0x51] sm:$0xff] %vm187_vm4, %v3763_v52  ;;  %v9222_v13 = vpack.i.bf16 %v11972_v44, %v11967_v2  ;;  %v4064_v25 = vld [vmem:[#allocation3 + $0x41] sm:$0xff] }
 0x2ea   :  { %v3767_v14 = vpop.f32.mrf.mxu1  ;;  %9203 = vrot.lane.b32.xlu1 %v9202_v17, %s9773_s30  ;;  %v9217_v29 = vpack.i.bf16 %v4064_v25, %v3968_v0 }
 0x2eb   :  { %v3768_v22 = vadd.f32 %v11808_v15, %v3767_v14 }
 0x2ec   :  { %v3769_v54 = vpop.f32.mrf.mxu1  ;;  %6077 = vrot.lane.b32.xlu0 %v3758_v11, %s9778_s28 }
 0x2ed   :  { %3906 = vst.msk [vmem:[#allocation3 + $0x61] sm:$0xff] %vm187_vm4, %v3768_v22 }
 0x2ee   :  { %6079 = vrot.lane.b32.xlu1 %v3763_v52, %s9778_s28 }
 0x2f0   :  { %9198 = vrot.lane.b32.xlu0 %v9202_v17, %s9776_s3  ;;  %v4160_v60 = vld [vmem:[#allocation3 + $0x51] sm:$0xff] }
 0x2f1   :  { %v9232_v34 = vpack.i.bf16 %v4160_v60, %v4064_v25  ;;  %v11988_v18 = vld [vmem:[#allocation3 + $0x52] sm:$0xff] }
 0x2f2   :  { %9213 = vrot.lane.b32.xlu1 %v9212_v31, %s9774_s22  ;;  %v11991_v42 = vld [vmem:[#allocation3 + $0x50] sm:$0xff]  ;;  %v9242_v23 = vpack.i.bf16 %v11988_v18, %v11972_v44 }
 0x2f3   :  { %v9227_v10 = vpack.i.bf16 %v11991_v42, %v11964_v19 }
 0x2f4   :  { %9208 = vrot.lane.b32.xlu0 %v9207_v20, %s9771_s16  ;;  %v4066_v56 = vld [vmem:[#allocation3 + $0x61] sm:$0xff] }
 0x2f5   :  { %v3772_v46 = vpop.f32.mrf.mxu1  ;;  %v9252_v55 = vpack.i.bf16 %v4066_v56, %v4160_v60  ;;  %v12010_v17 = vld [vmem:[#allocation3 + $0x60] sm:$0xff] }
 0x2f6   :  { %v3773_v63 = vadd.f32 %v11808_v15, %v3772_v46  ;;  %9223 = vrot.lane.b32.xlu1 %v9222_v13, %s9775_s27  ;;  %v9247_v33 = vpack.i.bf16 %v12010_v17, %v11991_v42 }
 0x2f7   :  { %v3774_v53 = vpop.f32.mrf.mxu1 }
 0x2f8   :  { %3907 = vst.msk [vmem:[#allocation3 + $0x71] sm:$0xff] %vm187_vm4, %v3773_v63  ;;  %5727 = vrot.lane.b32.xlu0 %v3763_v52, %s9777_s20 }
 0x2f9   :  { %v3777_v11 = vpop.f32.mrf.mxu1 }
 0x2fa   :  { %v3778_v45 = vadd.f32 %v11808_v15, %v3777_v11  ;;  %5729 = vrot.lane.b32.xlu1 %v3768_v22, %s9777_s20 }
 0x2fb   :  { %v3779_v37 = vpop.f32.mrf.mxu1 }
 0x2fc   :  { %3908 = vst.msk [vmem:[#allocation3 + $0x81] sm:$0xff] %vm187_vm4, %v3778_v45  ;;  %9218 = vrot.lane.b32.xlu0 %v9217_v29, %s9772_s21 }
 0x2fe   :  { %9233 = vrot.lane.b32.xlu1 %v9232_v34, %s9776_s3 }
 0x2ff   :  { %v12013_v14 = vld [vmem:[#allocation3 + $0x70] sm:$0xff] }
 0x300   :  { %6081 = vrot.lane.b32.xlu0 %v3768_v22, %s9778_s28  ;;  %v12018_v22 = vld [vmem:[#allocation3 + $0x62] sm:$0xff]  ;;  %v9262_v31 = vpack.i.bf16 %v12013_v14, %v12010_v17  ;;  %v3972_v46 = vld [vmem:[#allocation3 + $0x71] sm:$0xff] }
 0x301   :  { %v9272_v25 = vpack.i.bf16 %v3972_v46, %v4066_v56  ;;  %v12040_v29 = vld [vmem:[#allocation3 + $0x72] sm:$0xff] }
 0x302   :  { %v3782_v16 = vpop.f32.mrf.mxu1  ;;  %9243 = vrot.lane.b32.xlu1 %v9242_v23, %s9771_s16 }
 0x303   :  { %v3783_v39 = vadd.f32 %v11808_v15, %v3782_v16  ;;  %v4036_v37 = vld [vmem:[#allocation3 + $0x80] sm:$0xff] }
 0x304   :  { %v3784_v58 = vpop.f32.mrf.mxu1  ;;  %9228 = vrot.lane.b32.xlu0 %v9227_v10, %s9770_s13  ;;  %v4100_v16 = vld [vmem:[#allocation3 + $0x82] sm:$0xff] }
 0x305   :  { %3909 = vst.msk [vmem:[#allocation3 + $0x91] sm:$0xff] %vm187_vm4, %v3783_v39  ;;  %v9277_v58 = vpack.i.bf16 %v12040_v29, %v12018_v22 }
 0x306   :  { %v3787_v0 = vpop.f32.mrf.mxu1  ;;  %6083 = vrot.lane.b32.xlu1 %v3773_v63, %s9778_s28 }
 0x307   :  { %v12003_v52 = vadd.f32 %v11808_v15, %v3787_v0  ;;  %v9292_v0 = vpack.i.bf16 %v4100_v16, %v12040_v29 }
 0x308   :  { %v3789_v57 = vpop.f32.mrf.mxu1  ;;  %9238 = vrot.lane.b32.xlu0 %v9232_v34, %s9773_s30  ;;  %v9282_v34 = vpack.i.bf16 %v4036_v37, %v12013_v14 }
 0x309   :  { %3910 = vst.msk [vmem:[#allocation3 + $0xa1] sm:$0xff] %vm187_vm4, %v12003_v52 }
 0x30a   :  { %9253 = vrot.lane.b32.xlu1 %v9252_v55, %s9772_s21 }
 0x30c   :  { %5731 = vrot.lane.b32.xlu0 %v3773_v63, %s9777_s20  ;;  %v9257_v63 = vpack.i.bf16 %v12018_v22, %v11988_v18 }
 0x30e   :  { %5733 = vrot.lane.b32.xlu1 %v3778_v45, %s9777_s20 }
 0x310   :  { %9248 = vrot.lane.b32.xlu0 %v9247_v33, %s9774_s22  ;;  %v4068_v33 = vld [vmem:[#allocation3 + $0x81] sm:$0xff] }
 0x311   :  { %v3792_v54 = vpop.f32.mrf.mxu1 }
 0x312   :  { %v12024_v20 = vadd.f32 %v11808_v15, %v3792_v54  ;;  %9263 = vrot.lane.b32.xlu1 %v9262_v31, %s9770_s13  ;;  %v4164_v54 = vld [vmem:[#allocation3 + $0x91] sm:$0xff]  ;;  %v9287_v31 = vpack.i.bf16 %v4068_v33, %v3972_v46  ;;  %v4038_v46 = vld [vmem:[#allocation3 + $0xa0] sm:$0xff] }
 0x313   :  { %v3794_v13 = vpop.f32.mrf.mxu1 }
 0x314   :  { %3911 = vst.msk [vmem:[#allocation3 + $0xb1] sm:$0xff] %vm187_vm4, %v12024_v20  ;;  %9258 = vrot.lane.b32.xlu0 %v9257_v63, %s9775_s27  ;;  %v4132_v13 = vld [vmem:[#allocation3 + $0x90] sm:$0xff]  ;;  %v9302_v63 = vpack.i.bf16 %v4164_v54, %v4068_v33  ;;  %v4102_v33 = vld [vmem:[#allocation3 + $0xa2] sm:$0xff] }
 0x315   :  { %v3797_v53 = vpop.f32.mrf.mxu1 }
 0x316   :  { %v12033_v11 = vadd.f32 %v11808_v15, %v3797_v53  ;;  %9273 = vrot.lane.b32.xlu1 %v9272_v25, %s9773_s30  ;;  %v4006_v53 = vld [vmem:[#allocation3 + $0x92] sm:$0xff] }
 0x317   :  { %v3799_v60 = vpop.f32.mrf.mxu1 }
 0x318   :  { %3912 = vst.msk [vmem:[#allocation3 + $0xc1] sm:$0xff] %vm187_vm4, %v12033_v11  ;;  %6085 = vrot.lane.b32.xlu0 %v3778_v45, %s9778_s28 }
 0x31a   :  { %6087 = vrot.lane.b32.xlu1 %v3783_v39, %s9778_s28 }
 0x31c   :  { %9268 = vrot.lane.b32.xlu0 %v9272_v25, %s9776_s3  ;;  %v9297_v25 = vpack.i.bf16 %v4132_v13, %v4036_v37 }
 0x31e   :  { %v3802_v23 = vpop.f32.mrf.mxu1  ;;  %9283 = vrot.lane.b32.xlu1 %v9282_v34, %s9774_s22  ;;  %v9312_v34 = vpack.i.bf16 %v4006_v53, %v4100_v16 }
 0x31f   :  { %v12045_v10 = vadd.f32 %v11808_v15, %v3802_v23  ;;  %v4072_v3 = vld [vmem:[#allocation3 + $0xc1] sm:$0xff] }
 0x320   :  { %v3804_v45 = vpop.f32.mrf.mxu1  ;;  %9278 = vrot.lane.b32.xlu0 %v9277_v58, %s9771_s16 }
 0x321   :  { %3913 = vst.msk [vmem:[#allocation3 + $0xd1] sm:$0xff] %vm187_vm4, %v12045_v10 }
 0x322   :  { %v3807_v56 = vpop.f32.mrf.mxu1  ;;  %9293 = vrot.lane.b32.xlu1 %v9292_v0, %s9775_s27 }
 0x323   :  { %v12055_v57 = vadd.f32 %v11808_v15, %v3807_v56  ;;  %v4134_v56 = vld [vmem:[#allocation3 + $0xb0] sm:$0xff] }
 0x324   :  { %v3809_v55 = vpop.f32.mrf.mxu1  ;;  %5735 = vrot.lane.b32.xlu0 %v3783_v39, %s9777_s20  ;;  %v4070_v39 = vld [vmem:[#allocation3 + $0xa1] sm:$0xff] }
 0x325   :  { %3914 = vst.msk [vmem:[#allocation3 + $0xe1] sm:$0xff] %vm187_vm4, %v12055_v57  ;;  %v9322_v0 = vpack.i.bf16 %v4070_v39, %v4164_v54  ;;  %v9317_v55 = vpack.i.bf16 %v4038_v46, %v4132_v13 }
 0x326   :  { %5737 = vrot.lane.b32.xlu1 %v12003_v52, %s9777_s20 }
 0x328   :  { %9288 = vrot.lane.b32.xlu0 %v9287_v31, %s9772_s21  ;;  %v9332_v31 = vpack.i.bf16 %v4134_v56, %v4038_v46  ;;  %v4008_v46 = vld [vmem:[#allocation3 + $0xb2] sm:$0xff] }
 0x32a   :  { %9303 = vrot.lane.b32.xlu1 %v9302_v63, %s9776_s3 }
 0x32c   :  { %9298 = vrot.lane.b32.xlu0 %v9297_v25, %s9770_s13  ;;  %v3976_v25 = vld [vmem:[#allocation3 + $0xb1] sm:$0xff]  ;;  %v4106_v32 = vld [vmem:[#allocation3 + $0xe2] sm:$0xff] }
 0x32d   :  { %v3812_v60 = vpop.f32.mrf.mxu1  ;;  %v9342_v54 = vpack.i.bf16 %v3976_v25, %v4070_v39 }
 0x32e   :  { %v12067_v23 = vadd.f32 %v11808_v15, %v3812_v60  ;;  %9313 = vrot.lane.b32.xlu1 %v9312_v34, %s9771_s16  ;;  %v4040_v34 = vld [vmem:[#allocation3 + $0xc0] sm:$0xff] }
 0x32f   :  { %v3814_v58 = vpop.f32.mrf.mxu1 }
 0x330   :  { %3915 = vst.msk [vmem:[#allocation3 + $0xf1] sm:$0xff] %vm187_vm4, %v12067_v23  ;;  %9308 = vrot.lane.b32.xlu0 %v9302_v63, %s9773_s30  ;;  %v9327_v63 = vpack.i.bf16 %v4102_v33, %v4006_v53  ;;  %v12082_v58 = vpop.permute.xlu1 %5989  ;;  %v9352_v53 = vpack.i.bf16 %v4040_v34, %v4134_v56 }
 0x331   :  { %v3817_v45 = vpop.f32.mrf.mxu1  ;;  %14428 = vst [vmem:[#allocation39_spill] sm:$0xff] %v12082_v58 }
 0x332   :  { %v12074_v37 = vadd.f32 %v11808_v15, %v3817_v45  ;;  %9323 = vrot.lane.b32.xlu1 %v9322_v0, %s9772_s21  ;;  %v12088_v45 = vpop.permute.xlu0 %5991 }
 0x333   :  { %v3819_v16 = vpop.f32.mrf.mxu1  ;;  %14429 = vst [vmem:[#allocation40_spill] sm:$0xff] %v12088_v45  ;;  %v4136_v45 = vld [vmem:[#allocation3 + $0xd0] sm:$0xff] }
 0x334   :  { %3916 = vst.msk [vmem:[#allocation3 + $0x101] sm:$0xff] %vm187_vm4, %v12074_v37  ;;  %9318 = vrot.lane.b32.xlu0 %v9317_v55, %s9774_s22  ;;  %v4104_v16 = vld [vmem:[#allocation3 + $0xc2] sm:$0xff]  ;;  %v9367_v58 = vpack.i.bf16 %v4136_v45, %v4040_v34 }
 0x335   :  { %v9362_v56 = vpack.i.bf16 %v4104_v16, %v4008_v46 }
 0x336   :  { %9333 = vrot.lane.b32.xlu1 %v9332_v31, %s9770_s13 }
 0x338   :  { %9328 = vrot.lane.b32.xlu0 %v9327_v63, %s9775_s27  ;;  %v9347_v63 = vpack.i.bf16 %v4008_v46, %v4102_v33 }
 0x33a   :  { %v3822_v60 = vpop.f32.mrf.mxu1  ;;  %9343 = vrot.lane.b32.xlu1 %v9342_v54, %s9773_s30 }
 0x33b   :  { %v12085_v13 = vadd.f32 %v11808_v15, %v3822_v60  ;;  %v12099_v60 = vpop.permute.xlu0 %5719  ;;  %v4108_v5 = vld [vmem:[#allocation3 + $0x102] sm:$0xff] }
 0x33c   :  { %v3824_v0 = vpop.f32.mrf.mxu1  ;;  %9338 = vrot.lane.b32.xlu0 %v9342_v54, %s9776_s3  ;;  %14431 = vst [vmem:[#allocation42_spill] sm:$0xff] %v12099_v60  ;;  %v4168_v54 = vld [vmem:[#allocation3 + $0xd1] sm:$0xff]  ;;  %v4076_v40 = vld [vmem:[#allocation3 + $0x101] sm:$0xff] }
 0x33d   :  { %3917 = vst.msk [vmem:[#allocation3 + $0x131] sm:$0xff] %vm187_vm4, %v12085_v13  ;;  %v9372_v33 = vpack.i.bf16 %v4168_v54, %v4072_v3 }
 0x33e   :  { %v3827_v39 = vpop.f32.mrf.mxu1  ;;  %9353 = vrot.lane.b32.xlu1 %v9352_v53, %s9774_s22 }
 0x33f   :  { %v12094_v55 = vadd.f32 %v11808_v15, %v3827_v39  ;;  %v12097_v31 = vpop.permute.xlu1 %5721  ;;  %v9357_v39 = vpack.i.bf16 %v4072_v3, %v3976_v25  ;;  %v12108_v53 = vpop.permute.xlu0 %6071 }
 0x340   :  { %14430 = vst [vmem:[#allocation41_spill] sm:$0xff] %v12097_v31  ;;  %v3829_v0 = vpop.f32.mrf.mxu1  ;;  %9348 = vrot.lane.b32.xlu0 %v9347_v63, %s9771_s16  ;;  %14433 = vst [vmem:[#allocation44_spill] sm:$0xff] %v12108_v53  ;;  %v4138_v53 = vld [vmem:[#allocation3 + $0xf0] sm:$0xff] }
 0x341   :  { %3918 = vst.msk [vmem:[#allocation3 + $0x141] sm:$0xff] %vm187_vm4, %v12094_v55  ;;  %v4010_v0 = vld [vmem:[#allocation3 + $0xd2] sm:$0xff] }
 0x342   :  { %9363 = vrot.lane.b32.xlu1 %v9362_v56, %s9775_s27  ;;  %v9382_v46 = vpack.i.bf16 %v4010_v0, %v4104_v16  ;;  %v4074_v56 = vld [vmem:[#allocation3 + $0xe1] sm:$0xff] }
 0x343   :  { %v12105_v49 = vpop.permute.xlu1 %6073 }
 0x344   :  { %14432 = vst [vmem:[#allocation43_spill] sm:$0xff] %v12105_v49  ;;  %9358 = vrot.lane.b32.xlu0 %v9357_v39, %s9772_s21  ;;  %v4042_v39 = vld [vmem:[#allocation3 + $0xe0] sm:$0xff] }
 0x345   :  { %v12112_v41 = vpop.permute.xlu0 %9168 }
 0x346   :  { %9373 = vrot.lane.b32.xlu1 %v9372_v33, %s9776_s3  ;;  %v9171_v26 = vunpack.i.h.bf16 %v12112_v41 }
 0x347   :  { %v12117_v49 = vpop.permute.xlu1 %9173 }
 0x348   :  { %9368 = vrot.lane.b32.xlu0 %v9367_v58, %s9770_s13  ;;  %v9392_v58 = vpack.i.bf16 %v4074_v56, %v4168_v54  ;;  %v3980_v54 = vld [vmem:[#allocation3 + $0xf1] sm:$0xff] }
 0x349   :  { %v3832_v63 = vpop.f32.mrf.mxu1 }
 0x34a   :  { %v12115_v25 = vadd.f32 %v11808_v15, %v3832_v63  ;;  %9383 = vrot.lane.b32.xlu1 %v9382_v46, %s9771_s16  ;;  %v9387_v46 = vpack.i.bf16 %v4042_v39, %v4136_v45  ;;  %v9170_v45 = vunpack.i.l.bf16 %v12112_v41 }
 0x34b   :  { %v3834_v3 = vpop.f32.mrf.mxu1 }
 0x34c   :  { %3919 = vst.msk [vmem:[#allocation3 + $0x151] sm:$0xff] %vm187_vm4, %v12115_v25  ;;  %9378 = vrot.lane.b32.xlu0 %v9372_v33, %s9773_s30  ;;  %v9402_v33 = vpack.i.bf16 %v4138_v53, %v4042_v39 }
 0x34d   :  { %v3837_v34 = vpop.f32.mrf.mxu1 }
 0x34e   :  { %v12124_v16 = vadd.f32 %v11808_v15, %v3837_v34  ;;  %v12126_v63 = vpop.permute.xlu0 %5723  ;;  %v12128_v31 = vpop.permute.xlu1 %6075  ;;  %9393 = vrot.lane.b32.xlu1 %v9392_v58, %s9772_s21  ;;  %v9397_v34 = vpack.i.bf16 %v4106_v32, %v4010_v0  ;;  %v9175_v0 = vunpack.i.l.bf16 %v12117_v49 }
 0x34f   :  { %14434 = vst [vmem:[#allocation45_spill] sm:$0xff] %v12126_v63  ;;  %14435 = vst [vmem:[#allocation46_spill] sm:$0xff] %v12128_v31  ;;  %v3839_v3 = vpop.f32.mrf.mxu1  ;;  %v9412_v31 = vpack.i.bf16 %v3980_v54, %v4074_v56  ;;  %v4044_v63 = vld [vmem:[#allocation3 + $0x100] sm:$0xff] }
 0x350   :  { %3920 = vst.msk [vmem:[#allocation3 + $0x161] sm:$0xff] %vm187_vm4, %v12124_v16  ;;  %9388 = vrot.lane.b32.xlu0 %v9387_v46, %s9774_s22 }
 0x352   :  { %v9179_v60 = vpop.permute.xlu0 %9178  ;;  %9403 = vrot.lane.b32.xlu1 %v9402_v33, %s9770_s13  ;;  %v12135_v47 = vpop.permute.xlu1 %9183  ;;  %v4012_v33 = vld [vmem:[#allocation3 + $0xf2] sm:$0xff] }
 0x353   :  { %v9180_v51 = vunpack.i.l.bf16 %v9179_v60  ;;  %v9417_v7 = vpack.i.bf16 %v4012_v33, %v4106_v32  ;;  %v9185_v41 = vunpack.i.l.bf16 %v12135_v47  ;;  %v5118_v32 = vsel %vm187_vm4, %v11912_v28, %v9171_v26 }
 0x354   :  { %9398 = vrot.lane.b32.xlu0 %v9397_v34, %s9775_s27  ;;  %v9422_v34 = vpack.i.bf16 %v4044_v63, %v4138_v53 }
 0x356   :  { %v3842_v58 = vpop.f32.mrf.mxu1  ;;  %v12142_v46 = vpop.permute.xlu0 %9188  ;;  %9413 = vrot.lane.b32.xlu1 %v9412_v31, %s9773_s30 }
 0x357   :  { %v12140_v3 = vadd.f32 %v11808_v15, %v3842_v58  ;;  %v5117_v58 = vsel %vm187_vm4, %v3933_v27, %v9170_v45  ;;  %v9432_v27 = vpack.i.bf16 %v4108_v5, %v4012_v33  ;;  %v4172_v45 = vld [vmem:[#allocation3 + $0x111] sm:$0xff]  ;;  %v9186_v5 = vunpack.i.h.bf16 %v12135_v47 }
 0x358   :  { %v3844_v39 = vpop.f32.mrf.mxu1  ;;  %v12148_v56 = vpop.permute.xlu1 %9193  ;;  %9408 = vrot.lane.b32.xlu0 %v9412_v31, %s9776_s3  ;;  %v9176_v31 = vunpack.i.h.bf16 %v12117_v49  ;;  %v5149_v53 = vsel %vm39_vm0, %v5117_v58, %v9175_v0  ;;  %v9190_v49 = vunpack.i.l.bf16 %v12142_v46  ;;  %v9427_v58 = vpack.i.bf16 %v4076_v40, %v3980_v54 }
 0x359   :  { %3921 = vst.msk [vmem:[#allocation3 + $0x171] sm:$0xff] %vm187_vm4, %v12140_v3  ;;  %v9195_v26 = vunpack.i.l.bf16 %v12148_v56 }
 0x35a   :  { %v3847_v48 = vpop.f32.mrf.mxu1  ;;  %v12156_v36 = vpop.permute.xlu0 %5725  ;;  %9423 = vrot.lane.b32.xlu1 %v9422_v34, %s9774_s22  ;;  %v5181_v34 = vsel %vm3392_vm6, %v5149_v53, %v9180_v51 }
 0x35b   :  { %v12154_v39 = vadd.f32 %v11808_v15, %v3847_v48  ;;  %14436 = vst [vmem:[#allocation47_spill] sm:$0xff] %v12156_v36  ;;  %v9442_v36 = vpack.i.bf16 %v4172_v45, %v4076_v40  ;;  %v5213_v33 = vsel %vm1359_vm2, %v5181_v34, %v9185_v41  ;;  %v4013_v40 = vld [vmem:[#allocation3 + $0x122] sm:$0xff]  ;;  %v9196_v45 = vunpack.i.h.bf16 %v12148_v56 }
 0x35c   :  { %v3849_v62 = vpop.f32.mrf.mxu1  ;;  %9418 = vrot.lane.b32.xlu0 %v9417_v7, %s9771_s16  ;;  %v12165_v48 = vpop.permute.xlu1 %9203  ;;  %v5150_v7 = vsel %vm39_vm0, %v5118_v32, %v9176_v31  ;;  %v5245_v54 = vsel %vm3457_vm7, %v5213_v33, %v9190_v49  ;;  %v9437_v31 = vpack.i.bf16 %v4140_v59, %v4044_v63  ;;  %v3981_v41 = vld [vmem:[#allocation3 + $0x121] sm:$0xff] }
 0x35d   :  { %3922 = vst.msk [vmem:[#allocation3 + $0x181] sm:$0xff] %vm187_vm4, %v12154_v39  ;;  %v9181_v62 = vunpack.i.h.bf16 %v9179_v60  ;;  %v9191_v60 = vunpack.i.h.bf16 %v12142_v46  ;;  %v4078_v56 = vld [vmem:[#allocation3 + $0x141] sm:$0xff] }
 0x35e   :  { %v12171_v0 = vpop.permute.xlu0 %6077  ;;  %9433 = vrot.lane.b32.xlu1 %v9432_v27, %s9775_s27  ;;  %v4014_v27 = vld [vmem:[#allocation3 + $0x132] sm:$0xff] }
 0x35f   :  { %14437 = vst [vmem:[#allocation48_spill] sm:$0xff] %v12171_v0  ;;  %v5182_v28 = vsel %vm3392_vm6, %v5150_v7, %v9181_v62  ;;  %v5277_v62 = vsel %vm1392_vm3, %v5245_v54, %v9195_v26  ;;  %v9452_v46 = vpack.i.bf16 %v4014_v27, %v4013_v40  ;;  %v4046_v26 = vld [vmem:[#allocation3 + $0x140] sm:$0xff] }
 0x360   :  { %9428 = vrot.lane.b32.xlu0 %v9427_v58, %s9772_s21  ;;  %v12179_v51 = vpop.permute.xlu1 %6079  ;;  %v5214_v49 = vsel %vm1359_vm2, %v5182_v28, %v9186_v5  ;;  %v4045_v5 = vld [vmem:[#allocation3 + $0x130] sm:$0xff]  ;;  %v4080_v0 = vld [vmem:[#allocation3 + $0x161] sm:$0xff] }
 0x361   :  { %14438 = vst [vmem:[#allocation49_spill] sm:$0xff] %v12179_v51  ;;  %v5246_v63 = vsel %vm3457_vm7, %v5214_v49, %v9191_v60 }
 0x362   :  { %v9199_v53 = vpop.permute.xlu0 %9198  ;;  %9443 = vrot.lane.b32.xlu1 %v9442_v36, %s9776_s3  ;;  %v3982_v36 = vld [vmem:[#allocation3 + $0x131] sm:$0xff]  ;;  %v5278_v54 = vsel %vm1392_vm3, %v5246_v63, %v9196_v45  ;;  %v9205_v45 = vunpack.i.l.bf16 %v12165_v48 }
 0x363   :  { %v9200_v47 = vunpack.i.l.bf16 %v9199_v53  ;;  %v9201_v58 = vunpack.i.h.bf16 %v9199_v53  ;;  %v9447_v51 = vpack.i.bf16 %v3982_v36, %v3981_v41  ;;  %v9462_v40 = vpack.i.bf16 %v4078_v56, %v3982_v36 }
 0x364   :  { %9438 = vrot.lane.b32.xlu0 %v9437_v31, %s9770_s13  ;;  %v12187_v32 = vpop.permute.xlu1 %9213  ;;  %v9206_v36 = vunpack.i.h.bf16 %v12165_v48 }
 0x365   :  { %v3852_v34 = vpop.f32.mrf.mxu1  ;;  %v5309_v59 = vsel %vm3522_vm8, %v5277_v62, %v9200_v47  ;;  %v5310_v53 = vsel %vm3522_vm8, %v5278_v54, %v9201_v58  ;;  %v4142_v47 = vld [vmem:[#allocation3 + $0x150] sm:$0xff]  ;;  %v9457_v62 = vpack.i.bf16 %v4046_v26, %v4045_v5  ;;  %v5119_v5 = vsel %vm187_vm4, %v11902_v35, %v9205_v45 }
 0x366   :  { %v12192_v7 = vadd.f32 %v11808_v15, %v3852_v34  ;;  %5527 = vmatmul.mubr.f32.vlgmr.msra.gmra.mxu0 %v5309_v59  ;;  %v9209_v33 = vpop.permute.xlu0 %9208  ;;  %9453 = vrot.lane.b32.xlu1 %v9452_v46, %s9771_s16  ;;  %v9472_v49 = vpack.i.bf16 %v4142_v47, %v4046_v26  ;;  %v3984_v59 = vld [vmem:[#allocation3 + $0x151] sm:$0xff]  ;;  %v5120_v48 = vsel %vm187_vm4, %v11934_v61, %v9206_v36 }
 0x367   :  { %v3854_v31 = vpop.f32.mrf.mxu1  ;;  %7759 = vmatprep.mubr.msk.f32.mxu0 %vm187_vm4, %v11967_v2  ;;  %v9210_v58 = vunpack.i.l.bf16 %v9209_v33  ;;  %v9482_v54 = vpack.i.bf16 %v3984_v59, %v4078_v56 }
 0x368   :  { %3923 = vst.msk [vmem:[#allocation3 + $0x191] sm:$0xff] %vm187_vm4, %v12192_v7  ;;  %9448 = vrot.lane.b32.xlu0 %v9447_v51, %s9773_s30  ;;  %v12202_v28 = vpop.permute.xlu1 %9223  ;;  %v4110_v51 = vld [vmem:[#allocation3 + $0x142] sm:$0xff] }
 0x369   :  { %v3857_v60 = vpop.f32.mrf.mxu1  ;;  %v9467_v31 = vpack.i.bf16 %v4110_v51, %v4014_v27 }
 0x36a   :  { %v12207_v41 = vadd.f32 %v11808_v15, %v3857_v60  ;;  %5532 = vmatmul.mubr.f32.gmra.mxu0 %v5310_v53  ;;  %v12209_v34 = vpop.permute.xlu0 %5727  ;;  %9463 = vrot.lane.b32.xlu1 %v9462_v40, %s9772_s21  ;;  %v5151_v40 = vsel %vm39_vm0, %v5119_v5, %v9210_v58  ;;  %v9216_v58 = vunpack.i.h.bf16 %v12187_v32 }
 0x36b   :  { %14439 = vst [vmem:[#allocation50_spill] sm:$0xff] %v12209_v34  ;;  %v3859_v2 = vpop.f32.mrf.mxu1  ;;  %7760 = vmatprep.mubr.msk.f32.mxu0 %vm187_vm4, %v11972_v44  ;;  %v9211_v44 = vunpack.i.h.bf16 %v9209_v33 }
 0x36c   :  { %3924 = vst.msk [vmem:[#allocation3 + $0x1a1] sm:$0xff] %vm187_vm4, %v12207_v41  ;;  %9458 = vrot.lane.b32.xlu0 %v9457_v62, %s9774_s22  ;;  %v12218_v46 = vpop.permute.xlu1 %5729  ;;  %v4048_v2 = vld [vmem:[#allocation3 + $0x160] sm:$0xff]  ;;  %v9215_v62 = vunpack.i.l.bf16 %v12187_v32 }
 0x36d   :  { %14440 = vst [vmem:[#allocation51_spill] sm:$0xff] %v12218_v46  ;;  %v5152_v35 = vsel %vm39_vm0, %v5120_v48, %v9211_v44  ;;  %v9492_v36 = vpack.i.bf16 %v4048_v2, %v4142_v47 }
 0x36e   :  { %v9219_v63 = vpop.permute.xlu0 %9218  ;;  %9473 = vrot.lane.b32.xlu1 %v9472_v49, %s9770_s13  ;;  %v4016_v49 = vld [vmem:[#allocation3 + $0x152] sm:$0xff]  ;;  %v5184_v44 = vsel %vm3392_vm6, %v5152_v35, %v9216_v58 }
 0x36f   :  { %v9220_v53 = vunpack.i.l.bf16 %v9219_v63  ;;  %v9221_v56 = vunpack.i.h.bf16 %v9219_v63  ;;  %v9225_v63 = vunpack.i.l.bf16 %v12202_v28  ;;  %v9487_v48 = vpack.i.bf16 %v4016_v49, %v4110_v51 }
 0x370   :  { %9468 = vrot.lane.b32.xlu0 %v9467_v31, %s9775_s27  ;;  %v9234_v60 = vpop.permute.xlu1 %9233  ;;  %v5183_v31 = vsel %vm3392_vm6, %v5151_v40, %v9215_v62 }
 0x371   :  { %v5215_v5 = vsel %vm1359_vm2, %v5183_v31, %v9220_v53  ;;  %v9226_v53 = vunpack.i.h.bf16 %v12202_v28  ;;  %v9235_v31 = vunpack.i.l.bf16 %v9234_v60  ;;  %v9497_v28 = vpack.i.bf16 %v4080_v0, %v3984_v59 }
 0x372   :  { %v3862_v26 = vpop.f32.mrf.mxu1  ;;  %v12232_v33 = vpop.permute.xlu0 %6081  ;;  %9483 = vrot.lane.b32.xlu1 %v9482_v54, %s9773_s30  ;;  %v5247_v58 = vsel %vm3457_vm7, %v5215_v5, %v9225_v63  ;;  %v4018_v63 = vld [vmem:[#allocation3 + $0x172] sm:$0xff] }
 0x373   :  { %v12230_v27 = vadd.f32 %v11808_v15, %v3862_v26  ;;  %14441 = vst [vmem:[#allocation52_spill] sm:$0xff] %v12232_v33  ;;  %v4112_v33 = vld [vmem:[#allocation3 + $0x162] sm:$0xff] }
 0x374   :  { %v3864_v45 = vpop.f32.mrf.mxu1  ;;  %9478 = vrot.lane.b32.xlu0 %v9482_v54, %s9776_s3  ;;  %v12241_v61 = vpop.permute.xlu1 %9243  ;;  %v5216_v54 = vsel %vm1359_vm2, %v5184_v44, %v9221_v56  ;;  %v9502_v35 = vpack.i.bf16 %v4112_v33, %v4016_v49  ;;  %v4176_v56 = vld [vmem:[#allocation3 + $0x171] sm:$0xff] }
 0x375   :  { %3925 = vst.msk [vmem:[#allocation3 + $0x1b1] sm:$0xff] %vm187_vm4, %v12230_v27  ;;  %v5248_v44 = vsel %vm3457_vm7, %v5216_v54, %v9226_v53  ;;  %v9512_v5 = vpack.i.bf16 %v4176_v56, %v4080_v0  ;;  %v9522_v53 = vpack.i.bf16 %v4018_v63, %v4112_v33  ;;  %v12280_v0 = vld [vmem:[%s14325_s4] ss:$0 sm:$0xff] }
 0x376   :  { %v3867_v26 = vpop.f32.mrf.mxu1  ;;  %v9229_v40 = vpop.permute.xlu0 %9228  ;;  %9493 = vrot.lane.b32.xlu1 %v9492_v36, %s9774_s22 }
 0x377   :  { %v12247_v32 = vadd.f32 %v11808_v15, %v3867_v26  ;;  %v9231_v62 = vunpack.i.h.bf16 %v9229_v40  ;;  %v9230_v45 = vunpack.i.l.bf16 %v9229_v40 }
 0x378   :  { %v3869_v47 = vpop.f32.mrf.mxu1  ;;  %9488 = vrot.lane.b32.xlu0 %v9487_v48, %s9771_s16  ;;  %v12255_v15 = vpop.permute.xlu1 %6083  ;;  %v4144_v48 = vld [vmem:[#allocation3 + $0x170] sm:$0xff] }
 0x379   :  { %3926 = vst.msk [vmem:[#allocation3 + $0x1c1] sm:$0xff] %vm187_vm4, %v12247_v32  ;;  %14442 = vst [vmem:[#allocation53_spill] sm:$0xff] %v12255_v15  ;;  %v5279_v51 = vsel %vm1392_vm3, %v5247_v58, %v9230_v45  ;;  %v5280_v40 = vsel %vm1392_vm3, %v5248_v44, %v9231_v62  ;;  %v9236_v47 = vunpack.i.h.bf16 %v9234_v60  ;;  %v9507_v54 = vpack.i.bf16 %v4144_v48, %v4048_v2  ;;  %v4082_v2 = vld [vmem:[#allocation3 + $0x181] sm:$0xff] }
 0x37a   :  { %v9239_v36 = vpop.permute.xlu0 %9238  ;;  %9503 = vrot.lane.b32.xlu1 %v9502_v35, %s9775_s27  ;;  %v5311_v26 = vsel %vm3522_vm8, %v5279_v51, %v9235_v31 }
 0x37b   :  { %5537 = vmatmul.mubr.f32.gmra.mxu0 %v5311_v26  ;;  %v5312_v59 = vsel %vm3522_vm8, %v5280_v40, %v9236_v47  ;;  %v9532_v26 = vpack.i.bf16 %v4082_v2, %v4176_v56  ;;  %v4146_v47 = vld [vmem:[#allocation3 + $0x190] sm:$0xff] }
 0x37c   :  { %9498 = vrot.lane.b32.xlu0 %v9497_v28, %s9772_s21  ;;  %v12264_v49 = vpop.permute.xlu1 %9253  ;;  %7761 = vmatprep.mubr.msk.f32.mxu0 %vm187_vm4, %v11988_v18  ;;  %v9240_v18 = vunpack.i.l.bf16 %v9239_v36  ;;  %v9241_v28 = vunpack.i.h.bf16 %v9239_v36 }
 0x37e   :  { %v12268_v45 = vpop.permute.xlu0 %5731  ;;  %9513 = vrot.lane.b32.xlu1 %v9512_v5, %s9776_s3  ;;  %v5121_v44 = vsel %vm187_vm4, %v11964_v19, %v9240_v18  ;;  %v5122_v36 = vsel %vm187_vm4, %v11991_v42, %v9241_v28 }
 0x37f   :  { %14443 = vst [vmem:[#allocation54_spill] sm:$0xff] %v12268_v45  ;;  %5542 = vmatmul.mubr.f32.gmra.mxu0 %v5312_v59  ;;  %v9245_v59 = vunpack.i.l.bf16 %v12241_v61 }
 0x380   :  { %9508 = vrot.lane.b32.xlu0 %v9507_v54, %s9770_s13  ;;  %v12273_v60 = vpop.permute.xlu1 %5733  ;;  %7762 = vmatprep.mubr.msk.f32.mxu0 %vm187_vm4, %v12018_v22  ;;  %v4050_v22 = vld [vmem:[#allocation3 + $0x180] sm:$0xff] }
 0x381   :  { %14444 = vst [vmem:[#allocation55_spill] sm:$0xff] %v12273_v60  ;;  %v3872_v62 = vpop.f32.mrf.mxu1  ;;  %v5153_v15 = vsel %vm39_vm0, %v5121_v44, %v9245_v59  ;;  %v9542_v56 = vpack.i.bf16 %v4146_v47, %v4050_v22  ;;  %v9255_v44 = vunpack.i.l.bf16 %v12264_v49  ;;  %v12321_v60 = vld [vmem:[#allocation3 + $0x1a0] sm:$0xff] }
 0x382   :  { %v12283_v31 = vadd.f32 %v12280_v0, %v3872_v62  ;;  %v9249_v35 = vpop.permute.xlu0 %9248  ;;  %9523 = vrot.lane.b32.xlu1 %v9522_v53, %s9771_s16 }
 0x383   :  { %v3874_v58 = vpop.f32.mrf.mxu1  ;;  %v9250_v40 = vunpack.i.l.bf16 %v9249_v35  ;;  %v9251_v18 = vunpack.i.h.bf16 %v9249_v35 }
 0x384   :  { %14445 = vst [vmem:[#allocation56_spill] sm:$0xff] %v12283_v31  ;;  %3927 = vst.msk [vmem:[#allocation3 + $0x1d1] sm:$0xff] %vm187_vm4, %v12283_v31  ;;  %9518 = vrot.lane.b32.xlu0 %v9512_v5, %s9773_s30  ;;  %v12289_v33 = vpop.permute.xlu1 %9263  ;;  %v9527_v5 = vpack.i.bf16 %v4050_v22, %v4144_v48  ;;  %v4114_v58 = vld [vmem:[#allocation3 + $0x182] sm:$0xff]  ;;  %v9246_v48 = vunpack.i.h.bf16 %v12241_v61 }
 0x385   :  { %v3877_v51 = vpop.f32.mrf.mxu1 }
 0x386   :  { %v12295_v54 = vadd.f32 %v12280_v0, %v3877_v51  ;;  %v9259_v62 = vpop.permute.xlu0 %9258  ;;  %9533 = vrot.lane.b32.xlu1 %v9532_v26, %s9772_s21  ;;  %v5185_v51 = vsel %vm3392_vm6, %v5153_v15, %v9250_v40  ;;  %v5154_v22 = vsel %vm39_vm0, %v5122_v36, %v9246_v48 }
 0x387   :  { %v3879_v53 = vpop.f32.mrf.mxu1  ;;  %v9260_v26 = vunpack.i.l.bf16 %v9259_v62  ;;  %v5217_v35 = vsel %vm1359_vm2, %v5185_v51, %v9255_v44  ;;  %v5186_v28 = vsel %vm3392_vm6, %v5154_v22, %v9251_v18  ;;  %v9261_v61 = vunpack.i.h.bf16 %v9259_v62  ;;  %v12330_v44 = vld [vmem:[#allocation3 + $0x192] sm:$0xff] }
 0x388   :  { %14446 = vst [vmem:[#allocation57_spill] sm:$0xff] %v12295_v54  ;;  %3928 = vst.msk [vmem:[#allocation3 + $0x1e1] sm:$0xff] %vm187_vm4, %v12295_v54  ;;  %9528 = vrot.lane.b32.xlu0 %v9527_v5, %s9774_s22  ;;  %v12302_v19 = vpop.permute.xlu1 %9273  ;;  %v12307_v53 = vld [vmem:[#allocation3 + $0x191] sm:$0xff]  ;;  %v9537_v5 = vpack.i.bf16 %v4114_v58, %v4018_v63  ;;  %v9256_v63 = vunpack.i.h.bf16 %v12264_v49  ;;  %v9562_v49 = vpack.i.bf16 %v12321_v60, %v4146_v47  ;;  %v3943_v54 = vld [vmem:[#allocation3 + $0xa0] sm:$0xff] }
 0x389   :  { %v9552_v15 = vpack.i.bf16 %v12307_v53, %v4082_v2  ;;  %v9557_v47 = vpack.i.bf16 %v12330_v44, %v4114_v58 }
 0x38a   :  { %v12311_v59 = vpop.permute.xlu0 %6085  ;;  %9543 = vrot.lane.b32.xlu1 %v9542_v56, %s9770_s13  ;;  %v9265_v56 = vunpack.i.l.bf16 %v12289_v33 }
 0x38b   :  { %14447 = vst [vmem:[#allocation58_spill] sm:$0xff] %v12311_v59  ;;  %v5249_v59 = vsel %vm3457_vm7, %v5217_v35, %v9260_v26  ;;  %v5218_v26 = vsel %vm1359_vm2, %v5186_v28, %v9256_v63  ;;  %v4084_v28 = vld [vmem:[#allocation3 + $0x1a1] sm:$0xff]  ;;  %v9275_v63 = vunpack.i.l.bf16 %v12302_v19 }
 0x38c   :  { %9538 = vrot.lane.b32.xlu0 %v9537_v5, %s9775_s27  ;;  %v12316_v42 = vpop.permute.xlu1 %6087  ;;  %v5281_v18 = vsel %vm1392_vm3, %v5249_v59, %v9265_v56 }
 0x38d   :  { %14448 = vst [vmem:[#allocation59_spill] sm:$0xff] %v12316_v42  ;;  %v9266_v42 = vunpack.i.h.bf16 %v12289_v33 }
 0x38e   :  { %v3882_v40 = vpop.f32.mrf.mxu1  ;;  %v9269_v48 = vpop.permute.xlu0 %9268  ;;  %9553 = vrot.lane.b32.xlu1 %v9552_v15, %s9773_s30 }
 0x38f   :  { %v12327_v36 = vadd.f32 %v12280_v0, %v3882_v40  ;;  %v9270_v2 = vunpack.i.l.bf16 %v9269_v48  ;;  %v9271_v5 = vunpack.i.h.bf16 %v9269_v48  ;;  %v4116_v40 = vld [vmem:[#allocation3 + $0x1a2] sm:$0xff] }
 0x390   :  { %v3884_v51 = vpop.f32.mrf.mxu1  ;;  %9548 = vrot.lane.b32.xlu0 %v9552_v15, %s9776_s3  ;;  %v9284_v62 = vpop.permute.xlu1 %9283 }
 0x391   :  { %14449 = vst [vmem:[#allocation60_spill] sm:$0xff] %v12327_v36  ;;  %3929 = vst.msk [vmem:[#allocation3 + $0x1f1] sm:$0xff] %vm187_vm4, %v12327_v36  ;;  %v5313_v35 = vsel %vm3522_vm8, %v5281_v18, %v9270_v2  ;;  %v5250_v51 = vsel %vm3457_vm7, %v5218_v26, %v9261_v61  ;;  %v9572_v61 = vpack.i.bf16 %v4116_v40, %v12330_v44  ;;  %v4180_v2 = vld [vmem:[#allocation3 + $0x1b1] sm:$0xff]  ;;  %v4195_v18 = vld [vmem:[#allocation3 + $0x82] sm:$0xff] }
 0x392   :  { %v3887_v22 = vpop.f32.mrf.mxu1  ;;  %v9279_v15 = vpop.permute.xlu0 %9278  ;;  %9563 = vrot.lane.b32.xlu1 %v9562_v49, %s9774_s22  ;;  %5547 = vmatmul.mubr.f32.gmra.mxu0 %v5313_v35  ;;  %v5282_v56 = vsel %vm1392_vm3, %v5250_v51, %v9266_v42  ;;  %v9567_v26 = vpack.i.bf16 %v4084_v28, %v12307_v53  ;;  %v12363_v35 = vld [vmem:[#allocation3 + $0x1b0] sm:$0xff]  ;;  %v5123_v42 = vsel %vm187_vm4, %v12010_v17, %v9275_v63 }
 0x393   :  { %v12342_v45 = vadd.f32 %v12280_v0, %v3887_v22  ;;  %7763 = vmatprep.mubr.msk.f32.mxu0 %vm187_vm4, %v12040_v29  ;;  %v9280_v48 = vunpack.i.l.bf16 %v9279_v15  ;;  %v5314_v58 = vsel %vm3522_vm8, %v5282_v56, %v9271_v5  ;;  %v9276_v29 = vunpack.i.h.bf16 %v12302_v19 }
 0x394   :  { %v3889_v59 = vpop.f32.mrf.mxu1  ;;  %9558 = vrot.lane.b32.xlu0 %v9557_v47, %s9771_s16  ;;  %v12352_v33 = vpop.permute.xlu1 %9293  ;;  %v9281_v22 = vunpack.i.h.bf16 %v9279_v15  ;;  %v9582_v19 = vpack.i.bf16 %v4180_v2, %v4084_v28  ;;  %v12371_v47 = vld [vmem:[#allocation3 + $0x1b2] sm:$0xff]  ;;  %v9285_v15 = vunpack.i.l.bf16 %v9284_v62 }
 0x395   :  { %14450 = vst [vmem:[#allocation61_spill] sm:$0xff] %v12342_v45  ;;  %3930 = vst.msk [vmem:[#allocation3 + $0x201] sm:$0xff] %vm187_vm4, %v12342_v45  ;;  %v5155_v51 = vsel %vm39_vm0, %v5123_v42, %v9280_v48  ;;  %v5124_v53 = vsel %vm187_vm4, %v12013_v14, %v9276_v29  ;;  %v9295_v42 = vunpack.i.l.bf16 %v12352_v33 }
 0x396   :  { %v12358_v49 = vpop.permute.xlu0 %5735  ;;  %9573 = vrot.lane.b32.xlu1 %v9572_v61, %s9775_s27  ;;  %5552 = vmatmul.mubr.f32.gmra.mxu0 %v5314_v58  ;;  %v9577_v61 = vpack.i.bf16 %v12363_v35, %v12321_v60  ;;  %v5156_v17 = vsel %vm39_vm0, %v5124_v53, %v9281_v22  ;;  %v9286_v58 = vunpack.i.h.bf16 %v9284_v62  ;;  %v5187_v28 = vsel %vm3392_vm6, %v5155_v51, %v9285_v15 }
 0x397   :  { %14451 = vst [vmem:[#allocation62_spill] sm:$0xff] %v12358_v49  ;;  %7764 = vmatprep.mubr.msk.f32.mxu0 %vm187_vm4, %v4195_v18  ;;  %v9592_v18 = vpack.i.bf16 %v12371_v47, %v4116_v40  ;;  %v4054_v40 = vld [vmem:[#allocation3 + $0x1c0] sm:$0xff] }
 0x398   :  { %9568 = vrot.lane.b32.xlu0 %v9567_v26, %s9772_s21  ;;  %v12368_v5 = vpop.permute.xlu1 %5737  ;;  %v4086_v26 = vld [vmem:[#allocation3 + $0x1c1] sm:$0xff]  ;;  %v5188_v60 = vsel %vm3392_vm6, %v5156_v17, %v9286_v58 }
 0x399   :  { %14452 = vst [vmem:[#allocation63_spill] sm:$0xff] %v12368_v5  ;;  %v9602_v58 = vpack.i.bf16 %v4086_v26, %v4180_v2 }
 0x39a   :  { %v9289_v59 = vpop.permute.xlu0 %9288  ;;  %9583 = vrot.lane.b32.xlu1 %v9582_v19, %s9776_s3 }
 0x39b   :  { %v9291_v63 = vunpack.i.h.bf16 %v9289_v59  ;;  %v9290_v56 = vunpack.i.l.bf16 %v9289_v59 }
 0x39c   :  { %9578 = vrot.lane.b32.xlu0 %v9577_v61, %s9770_s13  ;;  %v9304_v48 = vpop.permute.xlu1 %9303  ;;  %v9296_v61 = vunpack.i.h.bf16 %v12352_v33 }
 0x39d   :  { %v5219_v14 = vsel %vm1359_vm2, %v5187_v28, %v9290_v56  ;;  %v3892_v29 = vpop.f32.mrf.mxu1  ;;  %v5220_v62 = vsel %vm1359_vm2, %v5188_v60, %v9291_v63  ;;  %v9305_v56 = vunpack.i.l.bf16 %v9304_v48  ;;  %v12396_v63 = vld [vmem:[#allocation3 + $0x1d0] sm:$0xff] }
 0x39e   :  { %v12386_v22 = vadd.f32 %v12280_v0, %v3892_v29  ;;  %v9299_v53 = vpop.permute.xlu0 %9298  ;;  %9593 = vrot.lane.b32.xlu1 %v9592_v18, %s9771_s16  ;;  %v5251_v28 = vsel %vm3457_vm7, %v5219_v14, %v9295_v42  ;;  %v4196_v14 = vld [vmem:[#allocation3 + $0x92] sm:$0xff] }
 0x39f   :  { %v9301_v51 = vunpack.i.h.bf16 %v9299_v53  ;;  %v9300_v15 = vunpack.i.l.bf16 %v9299_v53  ;;  %v3894_v59 = vpop.f32.mrf.mxu1 }
 0x3a0   :  { %14453 = vst [vmem:[#allocation64_spill] sm:$0xff] %v12386_v22  ;;  %3931 = vst.msk [vmem:[#allocation3 + $0x211] sm:$0xff] %vm187_vm4, %v12386_v22  ;;  %9588 = vrot.lane.b32.xlu0 %v9582_v19, %s9773_s30  ;;  %v9314_v17 = vpop.permute.xlu1 %9313  ;;  %v9597_v59 = vpack.i.bf16 %v4054_v40, %v12363_v35  ;;  %v5252_v19 = vsel %vm3457_vm7, %v5220_v62, %v9296_v61  ;;  %v9612_v62 = vpack.i.bf16 %v12396_v63, %v4054_v40 }
 0x3a1   :  { %v3897_v29 = vpop.f32.mrf.mxu1  ;;  %v5283_v18 = vsel %vm1392_vm3, %v5251_v28, %v9300_v15  ;;  %v5284_v42 = vsel %vm1392_vm3, %v5252_v19, %v9301_v51  ;;  %v12406_v15 = vld [vmem:[#allocation3 + $0x1c2] sm:$0xff]  ;;  %v9306_v28 = vunpack.i.h.bf16 %v9304_v48  ;;  %v9315_v51 = vunpack.i.l.bf16 %v9314_v17  ;;  %v3942_v19 = vld [vmem:[#allocation3 + $0x90] sm:$0xff] }
 0x3a2   :  { %v12399_v60 = vadd.f32 %v12280_v0, %v3897_v29  ;;  %v9309_v53 = vpop.permute.xlu0 %9308  ;;  %9603 = vrot.lane.b32.xlu1 %v9602_v58, %s9772_s21  ;;  %v5315_v33 = vsel %vm3522_vm8, %v5283_v18, %v9305_v56  ;;  %v3941_v0 = vld [vmem:[#allocation3 + $0x80] sm:$0xff]  ;;  %v12414_v58 = vld [vmem:[#allocation3 + $0x1d1] sm:$0xff]  ;;  %v9607_v18 = vpack.i.bf16 %v12406_v15, %v12371_v47 }
 0x3a3   :  { %v9310_v2 = vunpack.i.l.bf16 %v9309_v53  ;;  %v3899_v5 = vpop.f32.mrf.mxu1  ;;  %5557 = vmatmul.mubr.f32.gmra.mxu0 %v5315_v33  ;;  %v9311_v61 = vunpack.i.h.bf16 %v9309_v53  ;;  %v5316_v48 = vsel %vm3522_vm8, %v5284_v42, %v9306_v28  ;;  %v12426_v28 = vld [vmem:[#allocation3 + $0x1e0] sm:$0xff] }
 0x3a4   :  { %14454 = vst [vmem:[#allocation65_spill] sm:$0xff] %v12399_v60  ;;  %3932 = vst.msk [vmem:[#allocation3 + $0x221] sm:$0xff] %vm187_vm4, %v12399_v60  ;;  %9598 = vrot.lane.b32.xlu0 %v9597_v59, %s9774_s22  ;;  %v9324_v56 = vpop.permute.xlu1 %9323  ;;  %7765 = vmatprep.mubr.msk.f32.mxu0 %vm187_vm4, %v4196_v14  ;;  %v4197_v59 = vld [vmem:[#allocation3 + $0xa2] sm:$0xff] }
 0x3a5   :  { %v5125_v5 = vsel %vm187_vm4, %v3941_v0, %v9310_v2  ;;  %v9622_v2 = vpack.i.bf16 %v12414_v58, %v4086_v26  ;;  %v5126_v14 = vsel %vm187_vm4, %v3942_v19, %v9311_v61  ;;  %v9632_v61 = vpack.i.bf16 %v12426_v28, %v12396_v63 }
 0x3a6   :  { %v9319_v29 = vpop.permute.xlu0 %9318  ;;  %9613 = vrot.lane.b32.xlu1 %v9612_v62, %s9770_s13  ;;  %v5157_v40 = vsel %vm39_vm0, %v5125_v5, %v9315_v51  ;;  %v9316_v62 = vunpack.i.h.bf16 %v9314_v17  ;;  %v12429_v51 = vld [vmem:[#allocation3 + $0x1d2] sm:$0xff] }
 0x3a7   :  { %v9320_v33 = vunpack.i.l.bf16 %v9319_v29  ;;  %5562 = vmatmul.mubr.f32.gmra.mxu0 %v5316_v48  ;;  %v9321_v0 = vunpack.i.h.bf16 %v9319_v29  ;;  %v9325_v48 = vunpack.i.l.bf16 %v9324_v56 }
 0x3a8   :  { %9608 = vrot.lane.b32.xlu0 %v9607_v18, %s9775_s27  ;;  %v9334_v53 = vpop.permute.xlu1 %9333  ;;  %7766 = vmatprep.mubr.msk.f32.mxu0 %vm187_vm4, %v4197_v59  ;;  %v5158_v18 = vsel %vm39_vm0, %v5126_v14, %v9316_v62  ;;  %v12437_v59 = vld [vmem:[#allocation3 + $0x1e2] sm:$0xff] }
 0x3a9   :  { %v5189_v42 = vsel %vm3392_vm6, %v5157_v40, %v9320_v33  ;;  %v5190_v33 = vsel %vm3392_vm6, %v5158_v18, %v9321_v0  ;;  %v9326_v40 = vunpack.i.h.bf16 %v9324_v56  ;;  %v9335_v46 = vunpack.i.l.bf16 %v9334_v53  ;;  %v4088_v62 = vld [vmem:[#allocation3 + $0x1e1] sm:$0xff]  ;;  %v4184_v18 = vld [vmem:[#allocation3 + $0x1f1] sm:$0xff] }
 0x3aa   :  { %v9329_v49 = vpop.permute.xlu0 %9328  ;;  %9623 = vrot.lane.b32.xlu1 %v9622_v2, %s9773_s30  ;;  %v5221_v29 = vsel %vm1359_vm2, %v5189_v42, %v9325_v48  ;;  %v9637_v36 = vpack.i.bf16 %v4088_v62, %v12414_v58 }
 0x3ab   :  { %v9330_v5 = vunpack.i.l.bf16 %v9329_v49  ;;  %v9331_v17 = vunpack.i.h.bf16 %v9329_v49  ;;  %v9642_v49 = vpack.i.bf16 %v12437_v59, %v12429_v51  ;;  %v5222_v56 = vsel %vm1359_vm2, %v5190_v33, %v9326_v40 }
 0x3ac   :  { %9618 = vrot.lane.b32.xlu0 %v9622_v2, %s9776_s3  ;;  %v9344_v26 = vpop.permute.xlu1 %9343  ;;  %v9627_v2 = vpack.i.bf16 %v12429_v51, %v12406_v15 }
 0x3ad   :  { %v5253_v19 = vsel %vm3457_vm7, %v5221_v29, %v9330_v5  ;;  %v9345_v60 = vunpack.i.l.bf16 %v9344_v26  ;;  %v9336_v29 = vunpack.i.h.bf16 %v9334_v53  ;;  %v9346_v22 = vunpack.i.h.bf16 %v9344_v26 }
 0x3ae   :  { %v9339_v34 = vpop.permute.xlu0 %9338  ;;  %9633 = vrot.lane.b32.xlu1 %v9632_v61, %s9774_s22  ;;  %v5285_v0 = vsel %vm1392_vm3, %v5253_v19, %v9335_v46  ;;  %v5254_v61 = vsel %vm3457_vm7, %v5222_v56, %v9331_v17  ;;  %v9652_v26 = vpack.i.bf16 %v4184_v18, %v4088_v62  ;;  %v3944_v19 = vld [vmem:[#allocation3 + $0xb0] sm:$0xff] }
 0x3af   :  { %v9340_v14 = vunpack.i.l.bf16 %v9339_v34  ;;  %v9341_v48 = vunpack.i.h.bf16 %v9339_v34  ;;  %v12453_v34 = vld [vmem:[#allocation3 + $0x1f0] sm:$0xff]  ;;  %v5127_v33 = vsel %vm187_vm4, %v3943_v54, %v9345_v60  ;;  %v5286_v17 = vsel %vm1392_vm3, %v5254_v61, %v9336_v29  ;;  %v4199_v54 = vld [vmem:[#allocation3 + $0xc2] sm:$0xff] }
 0x3b0   :  { %9628 = vrot.lane.b32.xlu0 %v9627_v2, %s9771_s16  ;;  %v9354_v42 = vpop.permute.xlu1 %9353  ;;  %v4198_v2 = vld [vmem:[#allocation3 + $0xb2] sm:$0xff]  ;;  %14455 = vst [vmem:[#allocation66_spill] sm:$0xff] %v12453_v34 }
 0x3b1   :  { %v5317_v5 = vsel %vm3522_vm8, %v5285_v0, %v9340_v14  ;;  %v5318_v58 = vsel %vm3522_vm8, %v5286_v17, %v9341_v48  ;;  %v12460_v14 = vld [vmem:[#allocation3 + $0x1f2] sm:$0xff]  ;;  %v9356_v48 = vunpack.i.h.bf16 %v9354_v42 }
 0x3b2   :  { %v9349_v45 = vpop.permute.xlu0 %9348  ;;  %9643 = vrot.lane.b32.xlu1 %v9642_v49, %s9775_s27  ;;  %5567 = vmatmul.mubr.f32.gmra.mxu0 %v5317_v5  ;;  %14456 = vst [vmem:[#allocation67_spill] sm:$0xff] %v12460_v14  ;;  %v9355_v49 = vunpack.i.l.bf16 %v9354_v42  ;;  %v9662_v61 = vpack.i.bf16 %v12460_v14, %v12437_v59 }
 0x3b3   :  { %v9351_v31 = vunpack.i.h.bf16 %v9349_v45  ;;  %v9350_v46 = vunpack.i.l.bf16 %v9349_v45  ;;  %7767 = vmatprep.mubr.msk.f32.mxu0 %vm187_vm4, %v4198_v2  ;;  %v5128_v45 = vsel %vm187_vm4, %v3944_v19, %v9346_v22  ;;  %v4090_v2 = vld [vmem:[#allocation3 + $0x201] sm:$0xff] }
 0x3b4   :  { %9638 = vrot.lane.b32.xlu0 %v9637_v36, %s9772_s21  ;;  %v9364_v53 = vpop.permute.xlu1 %9363  ;;  %v9647_v36 = vpack.i.bf16 %v12453_v34, %v12426_v28  ;;  %v12476_v19 = vld [vmem:[#allocation3 + $0x200] sm:$0xff] }
 0x3b5   :  { %v5159_v40 = vsel %vm39_vm0, %v5127_v33, %v9350_v46  ;;  %v5160_v60 = vsel %vm39_vm0, %v5128_v45, %v9351_v31  ;;  %v9365_v46 = vunpack.i.l.bf16 %v9364_v53  ;;  %14457 = vst [vmem:[#allocation68_spill] sm:$0xff] %v12476_v19 }
 0x3b6   :  { %v9359_v0 = vpop.permute.xlu0 %9358  ;;  %9653 = vrot.lane.b32.xlu1 %v9652_v26, %s9776_s3  ;;  %5572 = vmatmul.mubr.f32.gmra.mxu0 %v5318_v58  ;;  %v5191_v5 = vsel %vm3392_vm6, %v5159_v40, %v9355_v49  ;;  %v5192_v28 = vsel %vm3392_vm6, %v5160_v60, %v9356_v48  ;;  %v9366_v40 = vunpack.i.h.bf16 %v9364_v53  ;;  %v9672_v49 = vpack.i.bf16 %v4090_v2, %v4184_v18 }
 0x3b7   :  { %v9361_v62 = vunpack.i.h.bf16 %v9359_v0  ;;  %v9360_v56 = vunpack.i.l.bf16 %v9359_v0  ;;  %7768 = vmatprep.mubr.msk.f32.mxu0 %vm187_vm4, %v4199_v54 }
 0x3b8   :  { %9648 = vrot.lane.b32.xlu0 %v9647_v36, %s9770_s13  ;;  %v9374_v22 = vpop.permute.xlu1 %9373  ;;  %v12481_v36 = vld [vmem:[#allocation3 + $0x210] sm:$0xff] }
 0x3b9   :  { %v5223_v29 = vsel %vm1359_vm2, %v5191_v5, %v9360_v56  ;;  %v5224_v33 = vsel %vm1359_vm2, %v5192_v28, %v9361_v62  ;;  %v9375_v58 = vunpack.i.l.bf16 %v9374_v22  ;;  %14458 = vst [vmem:[#allocation69_spill] sm:$0xff] %v12481_v36  ;;  %v9667_v56 = vpack.i.bf16 %v12476_v19, %v12453_v34  ;;  %v12489_v5 = vld [vmem:[#allocation3 + $0x202] sm:$0xff] }
 0x3ba   :  { %v9369_v31 = vpop.permute.xlu0 %9368  ;;  %9663 = vrot.lane.b32.xlu1 %v9662_v61, %s9771_s16  ;;  %v5255_v0 = vsel %vm3457_vm7, %v5223_v29, %v9365_v46  ;;  %v5256_v53 = vsel %vm3457_vm7, %v5224_v33, %v9366_v40  ;;  %14459 = vst [vmem:[#allocation70_spill] sm:$0xff] %v12489_v5  ;;  %v9376_v61 = vunpack.i.h.bf16 %v9374_v22  ;;  %v3945_v29 = vld [vmem:[#allocation3 + $0xc0] sm:$0xff]  ;;  %v9682_v28 = vpack.i.bf16 %v12481_v36, %v12476_v19 }
 0x3bb   :  { %v9371_v42 = vunpack.i.h.bf16 %v9369_v31  ;;  %v9370_v17 = vunpack.i.l.bf16 %v9369_v31 }
 0x3bc   :  { %9658 = vrot.lane.b32.xlu0 %v9652_v26, %s9773_s30  ;;  %v9384_v45 = vpop.permute.xlu1 %9383  ;;  %v4200_v26 = vld [vmem:[#allocation3 + $0xd2] sm:$0xff] }
 0x3bd   :  { %v5287_v54 = vsel %vm1392_vm3, %v5255_v0, %v9370_v17  ;;  %v5288_v18 = vsel %vm1392_vm3, %v5256_v53, %v9371_v42  ;;  %v12496_v17 = vld [vmem:[#allocation3 + $0x211] sm:$0xff]  ;;  %v9385_v40 = vunpack.i.l.bf16 %v9384_v45  ;;  %v9677_v42 = vpack.i.bf16 %v12489_v5, %v12460_v14  ;;  %v4201_v0 = vld [vmem:[#allocation3 + $0xe2] sm:$0xff] }
 0x3be   :  { %v9379_v60 = vpop.permute.xlu0 %9378  ;;  %9673 = vrot.lane.b32.xlu1 %v9672_v49, %s9772_s21  ;;  %v5319_v62 = vsel %vm3522_vm8, %v5287_v54, %v9375_v58  ;;  %v5320_v22 = vsel %vm3522_vm8, %v5288_v18, %v9376_v61  ;;  %v3946_v54 = vld [vmem:[#allocation3 + $0xd0] sm:$0xff]  ;;  %v12508_v18 = vld [vmem:[#allocation3 + $0x220] sm:$0xff]  ;;  %v9386_v61 = vunpack.i.h.bf16 %v9384_v45 }
 0x3bf   :  { %v9380_v48 = vunpack.i.l.bf16 %v9379_v60  ;;  %5577 = vmatmul.mubr.f32.gmra.mxu0 %v5319_v62  ;;  %v9381_v31 = vunpack.i.h.bf16 %v9379_v60 }
 0x3c0   :  { %9668 = vrot.lane.b32.xlu0 %v9667_v56, %s9774_s22  ;;  %v9394_v46 = vpop.permute.xlu1 %9393  ;;  %7769 = vmatprep.mubr.msk.f32.mxu0 %vm187_vm4, %v4200_v26  ;;  %v9692_v56 = vpack.i.bf16 %v12496_v17, %v4090_v2 }
 0x3c1   :  { %v5129_v33 = vsel %vm187_vm4, %v3945_v29, %v9380_v48  ;;  %v5130_v53 = vsel %vm187_vm4, %v3946_v54, %v9381_v31  ;;  %v9395_v29 = vunpack.i.l.bf16 %v9394_v46  ;;  %v9702_v31 = vpack.i.bf16 %v12508_v18, %v12481_v36 }
 0x3c2   :  { %v9389_v58 = vpop.permute.xlu0 %9388  ;;  %9683 = vrot.lane.b32.xlu1 %v9682_v28, %s9770_s13  ;;  %v5161_v62 = vsel %vm39_vm0, %v5129_v33, %v9385_v40  ;;  %v12511_v40 = vld [vmem:[#allocation3 + $0x212] sm:$0xff]  ;;  %v9396_v54 = vunpack.i.h.bf16 %v9394_v46 }
 0x3c3   :  { %v9390_v49 = vunpack.i.l.bf16 %v9389_v58  ;;  %5582 = vmatmul.mubr.f32.gmra.mxu0 %v5320_v22  ;;  %v9391_v48 = vunpack.i.h.bf16 %v9389_v58  ;;  %14460 = vst [vmem:[#allocation71_spill] sm:$0xff] %v12511_v40  ;;  %v5162_v22 = vsel %vm39_vm0, %v5130_v53, %v9386_v61  ;;  %v4092_v61 = vld [vmem:[#allocation3 + $0x221] sm:$0xff] }
 0x3c4   :  { %9678 = vrot.lane.b32.xlu0 %v9677_v42, %s9775_s27  ;;  %v9404_v60 = vpop.permute.xlu1 %9403  ;;  %7770 = vmatprep.mubr.msk.f32.mxu0 %vm187_vm4, %v4201_v0  ;;  %v9707_v14 = vpack.i.bf16 %v4092_v61, %v12496_v17 }
 0x3c5   :  { %v5193_v26 = vsel %vm3392_vm6, %v5161_v62, %v9390_v49  ;;  %v5194_v42 = vsel %vm3392_vm6, %v5162_v22, %v9391_v48  ;;  %v12519_v49 = vld [vmem:[#allocation3 + $0x222] sm:$0xff]  ;;  %v9405_v62 = vunpack.i.l.bf16 %v9404_v60  ;;  %v4188_v22 = vld [vmem:[#allocation3 + $0x231] sm:$0xff] }
 0x3c6   :  { %v9399_v28 = vpop.permute.xlu0 %9398  ;;  %9693 = vrot.lane.b32.xlu1 %v9692_v56, %s9773_s30  ;;  %v5225_v58 = vsel %vm1359_vm2, %v5193_v26, %v9395_v29  ;;  %14461 = vst [vmem:[#allocation72_spill] sm:$0xff] %v12519_v49  ;;  %v9712_v48 = vpack.i.bf16 %v12519_v49, %v12511_v40  ;;  %v5226_v46 = vsel %vm1359_vm2, %v5194_v42, %v9396_v54  ;;  %v3947_v49 = vld [vmem:[#allocation3 + $0xe0] sm:$0xff]  ;;  %v3948_v54 = vld [vmem:[#allocation3 + $0xf0] sm:$0xff] }
 0x3c7   :  { %v9400_v33 = vunpack.i.l.bf16 %v9399_v28  ;;  %v9401_v45 = vunpack.i.h.bf16 %v9399_v28 }
 0x3c8   :  { %9688 = vrot.lane.b32.xlu0 %v9692_v56, %s9776_s3  ;;  %v9414_v2 = vpop.permute.xlu1 %9413  ;;  %v9697_v56 = vpack.i.bf16 %v12511_v40, %v12489_v5 }
 0x3c9   :  { %v5257_v0 = vsel %vm3457_vm7, %v5225_v58, %v9400_v33  ;;  %v9415_v36 = vunpack.i.l.bf16 %v9414_v2  ;;  %v9406_v58 = vunpack.i.h.bf16 %v9404_v60  ;;  %v9416_v34 = vunpack.i.h.bf16 %v9414_v2 }
 0x3ca   :  { %v9409_v19 = vpop.permute.xlu0 %9408  ;;  %9703 = vrot.lane.b32.xlu1 %v9702_v31, %s9774_s22  ;;  %v5289_v29 = vsel %vm1392_vm3, %v5257_v0, %v9405_v62  ;;  %v5258_v31 = vsel %vm3457_vm7, %v5226_v46, %v9401_v45  ;;  %v9722_v60 = vpack.i.bf16 %v4188_v22, %v4092_v61 }
 0x3cb   :  { %v9410_v53 = vunpack.i.l.bf16 %v9409_v19  ;;  %v9411_v28 = vunpack.i.h.bf16 %v9409_v19  ;;  %v4156_v19 = vld [vmem:[#allocation3 + $0x230] sm:$0xff]  ;;  %v5131_v42 = vsel %vm187_vm4, %v3947_v49, %v9415_v36  ;;  %v5290_v2 = vsel %vm1392_vm3, %v5258_v31, %v9406_v58 }
 0x3cc   :  { %9698 = vrot.lane.b32.xlu0 %v9697_v56, %s9771_s16  ;;  %v9424_v26 = vpop.permute.xlu1 %9423  ;;  %v4202_v56 = vld [vmem:[#allocation3 + $0xf2] sm:$0xff]  ;;  %v5132_v17 = vsel %vm187_vm4, %v3948_v54, %v9416_v34  ;;  %v9717_v36 = vpack.i.bf16 %v4156_v19, %v12508_v18  ;;  %v3949_v54 = vld [vmem:[#allocation3 + $0x120] sm:$0xff] }
 0x3cd   :  { %v5321_v33 = vsel %vm3522_vm8, %v5289_v29, %v9410_v53  ;;  %v5322_v53 = vsel %vm3522_vm8, %v5290_v2, %v9411_v28  ;;  %v4203_v29 = vld [vmem:[#allocation3 + $0x102] sm:$0xff]  ;;  %v9426_v46 = vunpack.i.h.bf16 %v9424_v26  ;;  %v4204_v2 = vld [vmem:[#allocation3 + $0x112] sm:$0xff] }
 0x3ce   :  { %v9419_v5 = vpop.permute.xlu0 %9418  ;;  %9713 = vrot.lane.b32.xlu1 %v9712_v48, %s9775_s27  ;;  %5587 = vmatmul.mubr.f32.gmra.mxu0 %v5321_v33  ;;  %v9425_v48 = vunpack.i.l.bf16 %v9424_v26 }
 0x3cf   :  { %v9421_v40 = vunpack.i.h.bf16 %v9419_v5  ;;  %v9420_v0 = vunpack.i.l.bf16 %v9419_v5  ;;  %7771 = vmatprep.mubr.msk.f32.mxu0 %vm187_vm4, %v4202_v56 }
 0x3d0   :  { %9708 = vrot.lane.b32.xlu0 %v9707_v14, %s9772_s21  ;;  %v9434_v45 = vpop.permute.xlu1 %9433 }
 0x3d1   :  { %v5163_v62 = vsel %vm39_vm0, %v5131_v42, %v9420_v0  ;;  %v5164_v14 = vsel %vm39_vm0, %v5132_v17, %v9421_v40  ;;  %v9435_v22 = vunpack.i.l.bf16 %v9434_v45  ;;  %v9436_v0 = vunpack.i.h.bf16 %v9434_v45 }
 0x3d2   :  { %v9429_v5 = vpop.permute.xlu0 %9428  ;;  %9723 = vrot.lane.b32.xlu1 %v9722_v60, %s9776_s3  ;;  %5592 = vmatmul.mubr.f32.gmra.mxu0 %v5322_v53  ;;  %v5195_v33 = vsel %vm3392_vm6, %v5163_v62, %v9425_v48  ;;  %v5196_v31 = vsel %vm3392_vm6, %v5164_v14, %v9426_v46 }
 0x3d3   :  { %v9431_v49 = vunpack.i.h.bf16 %v9429_v5  ;;  %v9430_v61 = vunpack.i.l.bf16 %v9429_v5  ;;  %7772 = vmatprep.mubr.msk.f32.mxu0 %vm187_vm4, %v4203_v29 }
 0x3d4   :  { %9718 = vrot.lane.b32.xlu0 %v9717_v36, %s9770_s13  ;;  %v9444_v34 = vpop.permute.xlu1 %9443 }
 0x3d5   :  { %v5227_v28 = vsel %vm1359_vm2, %v5195_v33, %v9430_v61  ;;  %v5228_v18 = vsel %vm1359_vm2, %v5196_v31, %v9431_v49  ;;  %v9445_v26 = vunpack.i.l.bf16 %v9444_v34  ;;  %v9446_v5 = vunpack.i.h.bf16 %v9444_v34  ;;  %v3950_v34 = vld [vmem:[#allocation3 + $0x130] sm:$0xff] }
 0x3d6   :  { %v9439_v58 = vpop.permute.xlu0 %9438  ;;  %5993 = vrot.lane.b32.xlu1 %v11171_v43, %s9773_s30  ;;  %v5259_v42 = vsel %vm3457_vm7, %v5227_v28, %v9435_v22  ;;  %v5260_v17 = vsel %vm3457_vm7, %v5228_v18, %v9436_v0  ;;  %v4205_v28 = vld [vmem:[#allocation3 + $0x142] sm:$0xff] }
 0x3d7   :  { %v9441_v40 = vunpack.i.h.bf16 %v9439_v58  ;;  %v9440_v56 = vunpack.i.l.bf16 %v9439_v58 }
 0x3d8   :  { %5739 = vrot.lane.b32.xlu0 %v12024_v20, %s9777_s20  ;;  %v9454_v19 = vpop.permute.xlu1 %9453 }
 0x3d9   :  { %v5291_v60 = vsel %vm1392_vm3, %v5259_v42, %v9440_v56  ;;  %v5292_v48 = vsel %vm1392_vm3, %v5260_v17, %v9441_v40  ;;  %v9455_v49 = vunpack.i.l.bf16 %v9454_v19 }
 0x3da   :  { %v9449_v62 = vpop.permute.xlu0 %9448  ;;  %5741 = vrot.lane.b32.xlu1 %v12033_v11, %s9777_s20  ;;  %v5323_v53 = vsel %vm3522_vm8, %v5291_v60, %v9445_v26  ;;  %v5324_v46 = vsel %vm3522_vm8, %v5292_v48, %v9446_v5 }
 0x3db   :  { %v9450_v45 = vunpack.i.l.bf16 %v9449_v62  ;;  %5597 = vmatmul.mubr.f32.gmra.mxu0 %v5323_v53  ;;  %v9451_v36 = vunpack.i.h.bf16 %v9449_v62 }
 0x3dc   :  { %6089 = vrot.lane.b32.xlu0 %v12003_v52, %s9778_s28  ;;  %v9464_v29 = vpop.permute.xlu1 %9463  ;;  %7773 = vmatprep.mubr.msk.f32.mxu0 %vm187_vm4, %v4204_v2 }
 0x3dd   :  { %v5133_v14 = vsel %vm187_vm4, %v3949_v54, %v9450_v45  ;;  %v5134_v31 = vsel %vm187_vm4, %v3950_v34, %v9451_v36  ;;  %v9465_v40 = vunpack.i.l.bf16 %v9464_v29  ;;  %v4206_v34 = vld [vmem:[#allocation3 + $0x152] sm:$0xff] }
 0x3de   :  { %v9459_v61 = vpop.permute.xlu0 %9458  ;;  %6091 = vrot.lane.b32.xlu1 %v12024_v20, %s9778_s28  ;;  %v5165_v22 = vsel %vm39_vm0, %v5133_v14, %v9455_v49  ;;  %v9456_v20 = vunpack.i.h.bf16 %v9454_v19  ;;  %v9466_v19 = vunpack.i.h.bf16 %v9464_v29 }
 0x3df   :  { %v9460_v33 = vunpack.i.l.bf16 %v9459_v61  ;;  %5602 = vmatmul.mubr.f32.gmra.mxu0 %v5324_v46  ;;  %v9461_v58 = vunpack.i.h.bf16 %v9459_v61 }
 0x3e0   :  { %5995 = vrot.lane.b32.xlu0 %v11185_v9, %s9773_s30  ;;  %v9474_v52 = vpop.permute.xlu1 %9473  ;;  %7774 = vmatprep.mubr.msk.f32.mxu0 %vm187_vm4, %v4205_v28  ;;  %v5166_v26 = vsel %vm39_vm0, %v5134_v31, %v9456_v20  ;;  %v3952_v20 = vld [vmem:[#allocation3 + $0x150] sm:$0xff] }
 0x3e1   :  { %v5197_v18 = vsel %vm3392_vm6, %v5165_v22, %v9460_v33  ;;  %v5198_v2 = vsel %vm3392_vm6, %v5166_v26, %v9461_v58  ;;  %v9475_v53 = vunpack.i.l.bf16 %v9474_v52  ;;  %v9476_v46 = vunpack.i.h.bf16 %v9474_v52  ;;  %v3951_v22 = vld [vmem:[#allocation3 + $0x140] sm:$0xff] }
 0x3e2   :  { %v9469_v56 = vpop.permute.xlu0 %9468  ;;  %5997 = vrot.lane.b32.xlu1 %v11194_v21, %s9773_s30  ;;  %v5229_v60 = vsel %vm1359_vm2, %v5197_v18, %v9465_v40  ;;  %v5230_v14 = vsel %vm1359_vm2, %v5198_v2, %v9466_v19 }
 0x3e3   :  { %v9470_v0 = vunpack.i.l.bf16 %v9469_v56  ;;  %v9471_v54 = vunpack.i.h.bf16 %v9469_v56 }
 0x3e4   :  { %5743 = vrot.lane.b32.xlu0 %v12045_v10, %s9777_s20  ;;  %v9484_v42 = vpop.permute.xlu1 %9483 }
 0x3e5   :  { %v5261_v62 = vsel %vm3457_vm7, %v5229_v60, %v9470_v0  ;;  %v9485_v48 = vunpack.i.l.bf16 %v9484_v42  ;;  %v5262_v29 = vsel %vm3457_vm7, %v5230_v14, %v9471_v54  ;;  %v9486_v33 = vunpack.i.h.bf16 %v9484_v42  ;;  %v4207_v42 = vld [vmem:[#allocation3 + $0x162] sm:$0xff] }
 0x3e6   :  { %v9479_v17 = vpop.permute.xlu0 %9478  ;;  %5745 = vrot.lane.b32.xlu1 %v12055_v57, %s9777_s20  ;;  %v5293_v36 = vsel %vm1392_vm3, %v5261_v62, %v9475_v53  ;;  %v5294_v52 = vsel %vm1392_vm3, %v5262_v29, %v9476_v46 }
 0x3e7   :  { %v9480_v45 = vunpack.i.l.bf16 %v9479_v17  ;;  %v9481_v49 = vunpack.i.h.bf16 %v9479_v17  ;;  %v5135_v58 = vsel %vm187_vm4, %v3951_v22, %v9485_v48  ;;  %v5136_v56 = vsel %vm187_vm4, %v3952_v20, %v9486_v33 }
 0x3e8   :  { %6093 = vrot.lane.b32.xlu0 %v12033_v11, %s9778_s28  ;;  %v9494_v5 = vpop.permute.xlu1 %9493 }
 0x3e9   :  { %v5325_v61 = vsel %vm3522_vm8, %v5293_v36, %v9480_v45  ;;  %v9495_v0 = vunpack.i.l.bf16 %v9494_v5  ;;  %v9496_v62 = vunpack.i.h.bf16 %v9494_v5 }
 0x3ea   :  { %v9489_v28 = vpop.permute.xlu0 %9488  ;;  %6095 = vrot.lane.b32.xlu1 %v12045_v10, %s9778_s28  ;;  %5607 = vmatmul.mubr.f32.gmra.mxu0 %v5325_v61  ;;  %v5326_v10 = vsel %vm3522_vm8, %v5294_v52, %v9481_v49 }
 0x3eb   :  { %v9491_v11 = vunpack.i.h.bf16 %v9489_v28  ;;  %v9490_v31 = vunpack.i.l.bf16 %v9489_v28  ;;  %7775 = vmatprep.mubr.msk.f32.mxu0 %vm187_vm4, %v4206_v34 }
 0x3ec   :  { %5999 = vrot.lane.b32.xlu0 %v11202_v12, %s9773_s30  ;;  %v9504_v18 = vpop.permute.xlu1 %9503 }
 0x3ed   :  { %v5167_v40 = vsel %vm39_vm0, %v5135_v58, %v9490_v31  ;;  %v5168_v60 = vsel %vm39_vm0, %v5136_v56, %v9491_v11  ;;  %v9505_v45 = vunpack.i.l.bf16 %v9504_v18  ;;  %v9506_v5 = vunpack.i.h.bf16 %v9504_v18  ;;  %v4208_v58 = vld [vmem:[#allocation3 + $0x172] sm:$0xff] }
 0x3ee   :  { %v9499_v26 = vpop.permute.xlu0 %9498  ;;  %6001 = vrot.lane.b32.xlu1 %v11211_v50, %s9773_s30  ;;  %5612 = vmatmul.mubr.f32.gmra.mxu0 %v5326_v10  ;;  %v5199_v19 = vsel %vm3392_vm6, %v5167_v40, %v9495_v0  ;;  %v5200_v48 = vsel %vm3392_vm6, %v5168_v60, %v9496_v62  ;;  %v3954_v60 = vld [vmem:[#allocation3 + $0x170] sm:$0xff] }
 0x3ef   :  { %v9501_v2 = vunpack.i.h.bf16 %v9499_v26  ;;  %v9500_v54 = vunpack.i.l.bf16 %v9499_v26  ;;  %7776 = vmatprep.mubr.msk.f32.mxu0 %vm187_vm4, %v4207_v42  ;;  %v4209_v42 = vld [vmem:[#allocation3 + $0x182] sm:$0xff] }
 0x3f0   :  { %5747 = vrot.lane.b32.xlu0 %v12067_v23, %s9777_s20  ;;  %v9514_v53 = vpop.permute.xlu1 %9513 }
 0x3f1   :  { %v5231_v17 = vsel %vm1359_vm2, %v5199_v19, %v9500_v54  ;;  %v5232_v14 = vsel %vm1359_vm2, %v5200_v48, %v9501_v2  ;;  %v9515_v29 = vunpack.i.l.bf16 %v9514_v53  ;;  %v9516_v52 = vunpack.i.h.bf16 %v9514_v53 }
 0x3f2   :  { %v9509_v36 = vpop.permute.xlu0 %9508  ;;  %5749 = vrot.lane.b32.xlu1 %v12074_v37, %s9777_s20  ;;  %v5263_v33 = vsel %vm3457_vm7, %v5231_v17, %v9505_v45  ;;  %v5264_v11 = vsel %vm3457_vm7, %v5232_v14, %v9506_v5 }
 0x3f3   :  { %v9511_v49 = vunpack.i.h.bf16 %v9509_v36  ;;  %v9510_v61 = vunpack.i.l.bf16 %v9509_v36 }
 0x3f4   :  { %6097 = vrot.lane.b32.xlu0 %v12055_v57, %s9778_s28  ;;  %v9524_v46 = vpop.permute.xlu1 %9523  ;;  %v3953_v57 = vld [vmem:[#allocation3 + $0x160] sm:$0xff] }
 0x3f5   :  { %v5295_v28 = vsel %vm1392_vm3, %v5263_v33, %v9510_v61  ;;  %v5296_v18 = vsel %vm1392_vm3, %v5264_v11, %v9511_v49  ;;  %v9525_v10 = vunpack.i.l.bf16 %v9524_v46  ;;  %v9526_v17 = vunpack.i.h.bf16 %v9524_v46 }
 0x3f6   :  { %v9519_v34 = vpop.permute.xlu0 %9518  ;;  %6099 = vrot.lane.b32.xlu1 %v12067_v23, %s9778_s28  ;;  %v5327_v22 = vsel %vm3522_vm8, %v5295_v28, %v9515_v29  ;;  %v5328_v0 = vsel %vm3522_vm8, %v5296_v18, %v9516_v52 }
 0x3f7   :  { %v9520_v31 = vunpack.i.l.bf16 %v9519_v34  ;;  %5617 = vmatmul.mubr.f32.gmra.mxu0 %v5327_v22  ;;  %v9521_v40 = vunpack.i.h.bf16 %v9519_v34 }
 0x3f8   :  { %6003 = vrot.lane.b32.xlu0 %v11218_v1, %s9773_s30  ;;  %v9534_v20 = vpop.permute.xlu1 %9533  ;;  %7777 = vmatprep.mubr.msk.f32.mxu0 %vm187_vm4, %v4208_v58 }
 0x3f9   :  { %v5137_v23 = vsel %vm187_vm4, %v3953_v57, %v9520_v31  ;;  %v5138_v62 = vsel %vm187_vm4, %v3954_v60, %v9521_v40  ;;  %v9535_v45 = vunpack.i.l.bf16 %v9534_v20  ;;  %v9536_v46 = vunpack.i.h.bf16 %v9534_v20  ;;  %v3956_v60 = vld [vmem:[#allocation3 + $0x190] sm:$0xff] }
 0x3fa   :  { %v9529_v56 = vpop.permute.xlu0 %9528  ;;  %6005 = vrot.lane.b32.xlu1 %v11227_v24, %s9773_s30  ;;  %v5169_v2 = vsel %vm39_vm0, %v5137_v23, %v9525_v10  ;;  %v5170_v14 = vsel %vm39_vm0, %v5138_v62, %v9526_v17 }
 0x3fb   :  { %v9530_v26 = vunpack.i.l.bf16 %v9529_v56  ;;  %5622 = vmatmul.mubr.f32.gmra.mxu0 %v5328_v0  ;;  %v9531_v19 = vunpack.i.h.bf16 %v9529_v56 }
 0x3fc   :  { %5751 = vrot.lane.b32.xlu0 %v12085_v13, %s9777_s20  ;;  %v9544_v54 = vpop.permute.xlu1 %9543  ;;  %7778 = vmatprep.mubr.msk.f32.mxu0 %vm187_vm4, %v4209_v42 }
 0x3fd   :  { %v5201_v53 = vsel %vm3392_vm6, %v5169_v2, %v9530_v26  ;;  %v5202_v5 = vsel %vm3392_vm6, %v5170_v14, %v9531_v19  ;;  %v9545_v28 = vunpack.i.l.bf16 %v9544_v54  ;;  %v9546_v20 = vunpack.i.h.bf16 %v9544_v54 }
 0x3fe   :  { %v9539_v48 = vpop.permute.xlu0 %9538  ;;  %5753 = vrot.lane.b32.xlu1 %v12094_v55, %s9777_s20  ;;  %v5233_v61 = vsel %vm1359_vm2, %v5201_v53, %v9535_v45  ;;  %v5234_v58 = vsel %vm1359_vm2, %v5202_v5, %v9536_v46 }
 0x3ff   :  { %v9540_v36 = vunpack.i.l.bf16 %v9539_v48  ;;  %v9541_v29 = vunpack.i.h.bf16 %v9539_v48 }
 0x400   :  { %6101 = vrot.lane.b32.xlu0 %v12074_v37, %s9778_s28  ;;  %v9554_v49 = vpop.permute.xlu1 %9553 }
 0x401   :  { %v5265_v33 = vsel %vm3457_vm7, %v5233_v61, %v9540_v36  ;;  %v9555_v11 = vunpack.i.l.bf16 %v9554_v49  ;;  %v5266_v57 = vsel %vm3457_vm7, %v5234_v58, %v9541_v29  ;;  %v9556_v40 = vunpack.i.h.bf16 %v9554_v49 }
 0x402   :  { %v9549_v34 = vpop.permute.xlu0 %9548  ;;  %6103 = vrot.lane.b32.xlu1 %v12085_v13, %s9778_s28  ;;  %v5297_v31 = vsel %vm1392_vm3, %v5265_v33, %v9545_v28  ;;  %v3955_v13 = vld [vmem:[#allocation3 + $0x180] sm:$0xff]  ;;  %v5298_v42 = vsel %vm1392_vm3, %v5266_v57, %v9546_v20 }
 0x403   :  { %v9550_v22 = vunpack.i.l.bf16 %v9549_v34  ;;  %v9551_v18 = vunpack.i.h.bf16 %v9549_v34  ;;  %v5139_v0 = vsel %vm187_vm4, %v3955_v13, %v9555_v11  ;;  %v5140_v62 = vsel %vm187_vm4, %v3956_v60, %v9556_v40  ;;  %v3957_v40 = vld [vmem:[#allocation3 + $0x1a0] sm:$0xff] }
 0x404   :  { %6007 = vrot.lane.b32.xlu0 %v11234_v8, %s9773_s30  ;;  %v9564_v37 = vpop.permute.xlu1 %9563  ;;  %v14551_v8 = vld [vmem:[#allocation10_spill] sm:$0xff] }
 0x405   :  { %v5329_v52 = vsel %vm3522_vm8, %v5297_v31, %v9550_v22  ;;  %v5330_v54 = vsel %vm3522_vm8, %v5298_v42, %v9551_v18  ;;  %v9565_v19 = vunpack.i.l.bf16 %v9564_v37  ;;  %v9566_v36 = vunpack.i.h.bf16 %v9564_v37 }
 0x406   :  { %v9559_v23 = vpop.permute.xlu0 %9558  ;;  %6009 = vrot.lane.b32.xlu1 %v11243_v4, %s9773_s30  ;;  %5627 = vmatmul.mubr.f32.gmra.mxu0 %v5329_v52  ;;  %v14546_v4 = vld [vmem:[#allocation41_spill] sm:$0xff] }
 0x407   :  { %v9561_v10 = vunpack.i.h.bf16 %v9559_v23  ;;  %v9560_v56 = vunpack.i.l.bf16 %v9559_v23  ;;  %7779 = vmatprep.mubr.msk.f32.mxu0 %vm187_vm4, %v12330_v44  ;;  %v4211_v44 = vld [vmem:[#allocation3 + $0x1a2] sm:$0xff] }
 0x408   :  { %5755 = vrot.lane.b32.xlu0 %v12115_v25, %s9777_s20  ;;  %v9574_v26 = vpop.permute.xlu1 %9573 }
 0x409   :  { %v5171_v2 = vsel %vm39_vm0, %v5139_v0, %v9560_v56  ;;  %v5172_v17 = vsel %vm39_vm0, %v5140_v62, %v9561_v10  ;;  %v9575_v5 = vunpack.i.l.bf16 %v9574_v26  ;;  %v9576_v22 = vunpack.i.h.bf16 %v9574_v26 }
 0x40a   :  { %v9569_v53 = vpop.permute.xlu0 %9568  ;;  %5757 = vrot.lane.b32.xlu1 %v12124_v16, %s9777_s20  ;;  %5632 = vmatmul.mubr.f32.gmra.mxu0 %v5330_v54  ;;  %v5203_v14 = vsel %vm3392_vm6, %v5171_v2, %v9565_v19  ;;  %v5204_v29 = vsel %vm3392_vm6, %v5172_v17, %v9566_v36 }
 0x40b   :  { %v9571_v45 = vunpack.i.h.bf16 %v9569_v53  ;;  %v9570_v48 = vunpack.i.l.bf16 %v9569_v53  ;;  %7780 = vmatprep.mubr.msk.f32.mxu0 %vm187_vm4, %v4211_v44 }
 0x40c   :  { %6105 = vrot.lane.b32.xlu0 %v12094_v55, %s9778_s28  ;;  %v9584_v49 = vpop.permute.xlu1 %9583 }
 0x40d   :  { %v5235_v61 = vsel %vm1359_vm2, %v5203_v14, %v9570_v48  ;;  %v5236_v46 = vsel %vm1359_vm2, %v5204_v29, %v9571_v45  ;;  %v9585_v11 = vunpack.i.l.bf16 %v9584_v49  ;;  %v9586_v20 = vunpack.i.h.bf16 %v9584_v49 }
 0x40e   :  { %v9579_v33 = vpop.permute.xlu0 %9578  ;;  %6107 = vrot.lane.b32.xlu1 %v12115_v25, %s9778_s28  ;;  %v5267_v37 = vsel %vm3457_vm7, %v5235_v61, %v9575_v5  ;;  %v5268_v18 = vsel %vm3457_vm7, %v5236_v46, %v9576_v22  ;;  %v14462_v5 = vld [vmem:[#allocation21_spill] sm:$0xff] }
 0x40f   :  { %v9581_v28 = vunpack.i.h.bf16 %v9579_v33  ;;  %v9580_v34 = vunpack.i.l.bf16 %v9579_v33 }
 0x410   :  { %6011 = vrot.lane.b32.xlu0 %v11250_v6, %s9773_s30  ;;  %v9594_v55 = vpop.permute.xlu1 %9593 }
 0x411   :  { %v5299_v31 = vsel %vm1392_vm3, %v5267_v37, %v9580_v34  ;;  %v5300_v57 = vsel %vm1392_vm3, %v5268_v18, %v9581_v28  ;;  %v9595_v56 = vunpack.i.l.bf16 %v9594_v55  ;;  %v9596_v19 = vunpack.i.h.bf16 %v9594_v55  ;;  %v9746_v18 = vld [vmem:[#allocation3 + $0x1c0] sm:$0xff] }
 0x412   :  { %v9589_v58 = vpop.permute.xlu0 %9588  ;;  %6013 = vrot.lane.b32.xlu1 %v11259_v30, %s9773_s30  ;;  %v5331_v25 = vsel %vm3522_vm8, %v5299_v31, %v9585_v11  ;;  %v5332_v26 = vsel %vm3522_vm8, %v5300_v57, %v9586_v20 }
 0x413   :  { %v9590_v52 = vunpack.i.l.bf16 %v9589_v58  ;;  %5637 = vmatmul.mubr.f32.gmra.mxu0 %v5331_v25  ;;  %v9591_v13 = vunpack.i.h.bf16 %v9589_v58 }
 0x414   :  { %5759 = vrot.lane.b32.xlu0 %v12140_v3, %s9777_s20  ;;  %v9604_v23 = vpop.permute.xlu1 %9603  ;;  %7781 = vmatprep.mubr.msk.f32.mxu0 %vm187_vm4, %v12371_v47 }
 0x415   :  { %v5141_v10 = vsel %vm187_vm4, %v3957_v40, %v9590_v52  ;;  %v5142_v47 = vsel %vm187_vm4, %v12363_v35, %v9591_v13  ;;  %v9605_v53 = vunpack.i.l.bf16 %v9604_v23  ;;  %v9606_v14 = vunpack.i.h.bf16 %v9604_v23 }
 0x416   :  { %v9599_v0 = vpop.permute.xlu0 %9598  ;;  %5761 = vrot.lane.b32.xlu1 %v12154_v39, %s9777_s20  ;;  %v5173_v60 = vsel %vm39_vm0, %v5141_v10, %v9595_v56  ;;  %v5174_v45 = vsel %vm39_vm0, %v5142_v47, %v9596_v19 }
 0x417   :  { %v9600_v42 = vunpack.i.l.bf16 %v9599_v0  ;;  %5642 = vmatmul.mubr.f32.gmra.mxu0 %v5332_v26  ;;  %v9601_v54 = vunpack.i.h.bf16 %v9599_v0 }
 0x418   :  { %6109 = vrot.lane.b32.xlu0 %v12124_v16, %s9778_s28  ;;  %v9614_v2 = vpop.permute.xlu1 %9613  ;;  %7782 = vmatprep.mubr.msk.f32.mxu0 %vm187_vm4, %v12406_v15 }
 0x419   :  { %v5205_v62 = vsel %vm3392_vm6, %v5173_v60, %v9600_v42  ;;  %v5206_v35 = vsel %vm3392_vm6, %v5174_v45, %v9601_v54  ;;  %v9615_v49 = vunpack.i.l.bf16 %v9614_v2  ;;  %v9616_v55 = vunpack.i.h.bf16 %v9614_v2 }
 0x41a   :  { %v9609_v44 = vpop.permute.xlu0 %9608  ;;  %6111 = vrot.lane.b32.xlu1 %v12140_v3, %s9778_s28  ;;  %v5237_v15 = vsel %vm1359_vm2, %v5205_v62, %v9605_v53  ;;  %v5238_v28 = vsel %vm1359_vm2, %v5206_v35, %v9606_v14 }
 0x41b   :  { %v9610_v17 = vunpack.i.l.bf16 %v9609_v44  ;;  %v9611_v48 = vunpack.i.h.bf16 %v9609_v44  ;;  %v14464_v44 = vld [vmem:[#allocation26_spill] sm:$0xff] }
 0x41c   :  { %6015 = vrot.lane.b32.xlu0 %v11266_v38, %s9773_s30  ;;  %v9624_v16 = vpop.permute.xlu1 %9623 }
 0x41d   :  { %v5269_v36 = vsel %vm3457_vm7, %v5237_v15, %v9610_v17  ;;  %v9625_v29 = vunpack.i.l.bf16 %v9624_v16  ;;  %v5270_v11 = vsel %vm3457_vm7, %v5238_v28, %v9611_v48  ;;  %v9626_v37 = vunpack.i.h.bf16 %v9624_v16  ;;  %v3961_v28 = vld [vmem:[#allocation3 + $0x1e0] sm:$0xff] }
 0x41e   :  { %v9619_v61 = vpop.permute.xlu0 %9618  ;;  %6017 = vrot.lane.b32.xlu1 %v14462_v5, %s9773_s30  ;;  %v5301_v46 = vsel %vm1392_vm3, %v5269_v36, %v9615_v49  ;;  %v5302_v20 = vsel %vm1392_vm3, %v5270_v11, %v9616_v55 }
 0x41f   :  { %v9620_v3 = vunpack.i.l.bf16 %v9619_v61  ;;  %v9621_v34 = vunpack.i.h.bf16 %v9619_v61  ;;  %v5143_v52 = vsel %vm187_vm4, %v9746_v18, %v9625_v29  ;;  %v5144_v13 = vsel %vm187_vm4, %v12396_v63, %v9626_v37  ;;  %v14463_v63 = vld [vmem:[#allocation24_spill] sm:$0xff] }
 0x420   :  { %5763 = vrot.lane.b32.xlu0 %v12192_v7, %s9777_s20  ;;  %v9634_v33 = vpop.permute.xlu1 %9633 }
 0x421   :  { %v5333_v22 = vsel %vm3522_vm8, %v5301_v46, %v9620_v3  ;;  %v5334_v23 = vsel %vm3522_vm8, %v5302_v20, %v9621_v34  ;;  %v9635_v10 = vunpack.i.l.bf16 %v9634_v33  ;;  %v9636_v42 = vunpack.i.h.bf16 %v9634_v33  ;;  %v14468_v20 = vld [vmem:[#allocation66_spill] sm:$0xff] }
 0x422   :  { %v9629_v31 = vpop.permute.xlu0 %9628  ;;  %5765 = vrot.lane.b32.xlu1 %v12207_v41, %s9777_s20  ;;  %5647 = vmatmul.mubr.f32.gmra.mxu0 %v5333_v22  ;;  %v14465_v22 = vld [vmem:[#allocation67_spill] sm:$0xff] }
 0x423   :  { %v9631_v58 = vunpack.i.h.bf16 %v9629_v31  ;;  %v9630_v25 = vunpack.i.l.bf16 %v9629_v31  ;;  %7783 = vmatprep.mubr.msk.f32.mxu0 %vm187_vm4, %v12429_v51 }
 0x424   :  { %6113 = vrot.lane.b32.xlu0 %v12154_v39, %s9778_s28  ;;  %v9644_v57 = vpop.permute.xlu1 %9643 }
 0x425   :  { %v5175_v40 = vsel %vm39_vm0, %v5143_v52, %v9630_v25  ;;  %v5176_v39 = vsel %vm39_vm0, %v5144_v13, %v9631_v58  ;;  %v9645_v62 = vunpack.i.l.bf16 %v9644_v57  ;;  %v9646_v16 = vunpack.i.h.bf16 %v9644_v57  ;;  %v14467_v57 = vld [vmem:[#allocation70_spill] sm:$0xff] }
 0x426   :  { %v12726_v56 = vpop.f32.mrf.mxu0  ;;  %v9639_v51 = vpop.permute.xlu0 %9638  ;;  %6115 = vrot.lane.b32.xlu1 %v12192_v7, %s9778_s28  ;;  %5652 = vmatmul.mubr.f32.gmra.mxu0 %v5334_v23  ;;  %v5207_v60 = vsel %vm3392_vm6, %v5175_v40, %v9635_v10  ;;  %v5208_v7 = vsel %vm3392_vm6, %v5176_v39, %v9636_v42  ;;  %v14469_v39 = vld [vmem:[#allocation29_spill] sm:$0xff]  ;;  %v14470_v42 = vld [vmem:[#allocation56_spill] sm:$0xff] }
 0x427   :  { %v9641_v0 = vunpack.i.h.bf16 %v9639_v51  ;;  %v9640_v26 = vunpack.i.l.bf16 %v9639_v51  ;;  %7784 = vmatprep.mubr.msk.f32.mxu0 %vm187_vm4, %v12437_v59 }
 0x428   :  { %v5530_v2 = vpop.f32.mrf.mxu0  ;;  %6019 = vrot.lane.b32.xlu0 %v14463_v63, %s9773_s30  ;;  %v9654_v47 = vpop.permute.xlu1 %9653 }
 0x429   :  { %v5239_v54 = vsel %vm1359_vm2, %v5207_v60, %v9640_v26  ;;  %v5240_v59 = vsel %vm1359_vm2, %v5208_v7, %v9641_v0  ;;  %v9655_v15 = vunpack.i.l.bf16 %v9654_v47  ;;  %v9656_v46 = vunpack.i.h.bf16 %v9654_v47 }
 0x42a   :  { %v12738_v19 = vpop.f32.mrf.mxu0  ;;  %v9649_v53 = vpop.permute.xlu0 %9648  ;;  %6021 = vrot.lane.b32.xlu1 %v14464_v44, %s9773_s30  ;;  %v5271_v36 = vsel %vm3457_vm7, %v5239_v54, %v9645_v62  ;;  %v5272_v3 = vsel %vm3457_vm7, %v5240_v59, %v9646_v16 }
 0x42b   :  { %v9651_v17 = vunpack.i.h.bf16 %v9649_v53  ;;  %v9650_v45 = vunpack.i.l.bf16 %v9649_v53 }
 0x42c   :  { %v5535_v35 = vpop.f32.mrf.mxu0  ;;  %5767 = vrot.lane.b32.xlu0 %v12230_v27, %s9777_s20  ;;  %v9664_v48 = vpop.permute.xlu1 %9663 }
 0x42d   :  { %v5303_v14 = vsel %vm1392_vm3, %v5271_v36, %v9650_v45  ;;  %v5304_v33 = vsel %vm1392_vm3, %v5272_v3, %v9651_v17  ;;  %v9665_v37 = vunpack.i.l.bf16 %v9664_v48  ;;  %v14471_v17 = vld [vmem:[#allocation57_spill] sm:$0xff] }
 0x42e   :  { %v9659_v49 = vpop.permute.xlu0 %9658  ;;  %5769 = vrot.lane.b32.xlu1 %v12247_v32, %s9777_s20  ;;  %v5335_v61 = vsel %vm3522_vm8, %v5303_v14, %v9655_v15  ;;  %v5336_v58 = vsel %vm3522_vm8, %v5304_v33, %v9656_v46 }
 0x42f   :  { %v9660_v29 = vunpack.i.l.bf16 %v9659_v49  ;;  %5657 = vmatmul.mubr.f32.gmra.mxu0 %v5335_v61  ;;  %v9661_v11 = vunpack.i.h.bf16 %v9659_v49 }
 0x430   :  { %6117 = vrot.lane.b32.xlu0 %v12207_v41, %s9778_s28  ;;  %v9674_v34 = vpop.permute.xlu1 %9673  ;;  %7785 = vmatprep.mubr.msk.f32.mxu0 %vm187_vm4, %v14465_v22  ;;  %v14466_v41 = vld [vmem:[#allocation28_spill] sm:$0xff]  ;;  %v14472_v22 = vld [vmem:[#allocation71_spill] sm:$0xff] }
 0x431   :  { %v5145_v55 = vsel %vm187_vm4, %v3961_v28, %v9660_v29  ;;  %v5146_v40 = vsel %vm187_vm4, %v14468_v20, %v9661_v11  ;;  %v9675_v10 = vunpack.i.l.bf16 %v9674_v34  ;;  %v9676_v7 = vunpack.i.h.bf16 %v9674_v34  ;;  %v14473_v11 = vld [vmem:[#allocation68_spill] sm:$0xff] }
 0x432   :  { %v9669_v31 = vpop.permute.xlu0 %9668  ;;  %6119 = vrot.lane.b32.xlu1 %v12230_v27, %s9778_s28  ;;  %v5177_v18 = vsel %vm39_vm0, %v5145_v55, %v9665_v37  ;;  %v9666_v27 = vunpack.i.h.bf16 %v9664_v48  ;;  %v14474_v37 = vld [vmem:[#allocation31_spill] sm:$0xff] }
 0x433   :  { %v9670_v25 = vunpack.i.l.bf16 %v9669_v31  ;;  %5662 = vmatmul.mubr.f32.gmra.mxu0 %v5336_v58  ;;  %v9671_v23 = vunpack.i.h.bf16 %v9669_v31 }
 0x434   :  { %6023 = vrot.lane.b32.xlu0 %v14466_v41, %s9773_s30  ;;  %v9684_v52 = vpop.permute.xlu1 %9683  ;;  %7786 = vmatprep.mubr.msk.f32.mxu0 %vm187_vm4, %v14467_v57  ;;  %v5178_v26 = vsel %vm39_vm0, %v5146_v40, %v9666_v27  ;;  %v14475_v57 = vld [vmem:[#allocation69_spill] sm:$0xff] }
 0x435   :  { %v5209_v13 = vsel %vm3392_vm6, %v5177_v18, %v9670_v25  ;;  %v5210_v47 = vsel %vm3392_vm6, %v5178_v26, %v9671_v23  ;;  %v9685_v53 = vunpack.i.l.bf16 %v9684_v52  ;;  %v9686_v29 = vunpack.i.h.bf16 %v9684_v52 }
 0x436   :  { %v9679_v51 = vpop.permute.xlu0 %9678  ;;  %6025 = vrot.lane.b32.xlu1 %v14469_v39, %s9773_s30  ;;  %v5241_v2 = vsel %vm1359_vm2, %v5209_v13, %v9675_v10  ;;  %v5242_v36 = vsel %vm1359_vm2, %v5210_v47, %v9676_v7  ;;  %v14476_v13 = vld [vmem:[#allocation32_spill] sm:$0xff] }
 0x437   :  { %v9680_v0 = vunpack.i.l.bf16 %v9679_v51  ;;  %v9681_v54 = vunpack.i.h.bf16 %v9679_v51 }
 0x438   :  { %5771 = vrot.lane.b32.xlu0 %v14470_v42, %s9777_s20  ;;  %v9694_v60 = vpop.permute.xlu1 %9693 }
 0x439   :  { %v5273_v62 = vsel %vm3457_vm7, %v5241_v2, %v9680_v0  ;;  %v9695_v15 = vunpack.i.l.bf16 %v9694_v60  ;;  %v5274_v3 = vsel %vm3457_vm7, %v5242_v36, %v9681_v54  ;;  %v9696_v33 = vunpack.i.h.bf16 %v9694_v60  ;;  %v14477_v0 = vld [vmem:[#allocation72_spill] sm:$0xff] }
 0x43a   :  { %v9689_v59 = vpop.permute.xlu0 %9688  ;;  %5773 = vrot.lane.b32.xlu1 %v14471_v17, %s9777_s20  ;;  %v5305_v48 = vsel %vm1392_vm3, %v5273_v62, %v9685_v53  ;;  %v5306_v58 = vsel %vm1392_vm3, %v5274_v3, %v9686_v29  ;;  %v14478_v60 = vld [vmem:[#allocation60_spill] sm:$0xff]  ;;  %v14479_v53 = vld [vmem:[#allocation61_spill] sm:$0xff] }
 0x43b   :  { %v9690_v45 = vunpack.i.l.bf16 %v9689_v59  ;;  %v12778_v16 = vpop.f32.mrf.mxu0  ;;  %v9691_v14 = vunpack.i.h.bf16 %v9689_v59  ;;  %v5147_v55 = vsel %vm187_vm4, %v14473_v11, %v9695_v15  ;;  %v5148_v20 = vsel %vm187_vm4, %v14475_v57, %v9696_v33  ;;  %v14481_v11 = vld [vmem:[#allocation36_spill] sm:$0xff] }
 0x43c   :  { %6121 = vrot.lane.b32.xlu0 %v12247_v32, %s9778_s28  ;;  %v9704_v35 = vpop.permute.xlu1 %9703 }
 0x43d   :  { %v5540_v49 = vpop.f32.mrf.mxu0  ;;  %v5337_v61 = vsel %vm3522_vm8, %v5305_v48, %v9690_v45  ;;  %v5338_v52 = vsel %vm3522_vm8, %v5306_v58, %v9691_v14  ;;  %v9705_v40 = vunpack.i.l.bf16 %v9704_v35  ;;  %v9706_v26 = vunpack.i.h.bf16 %v9704_v35 }
 0x43e   :  { %v9699_v46 = vpop.permute.xlu0 %9698  ;;  %6123 = vrot.lane.b32.xlu1 %v14470_v42, %s9778_s28  ;;  %5667 = vmatmul.mubr.f32.gmra.mxu0 %v5337_v61  ;;  %v4220_v61 = vld [vmem:[#allocation3 + $0x232] sm:$0xff] }
 0x43f   :  { %v9701_v28 = vunpack.i.h.bf16 %v9699_v46  ;;  %v9700_v32 = vunpack.i.l.bf16 %v9699_v46  ;;  %v12788_v34 = vpop.f32.mrf.mxu0  ;;  %7787 = vmatprep.mubr.msk.f32.mxu0 %vm187_vm4, %v14472_v22 }
 0x440   :  { %6027 = vrot.lane.b32.xlu0 %v14474_v37, %s9773_s30  ;;  %v9714_v31 = vpop.permute.xlu1 %9713 }
 0x441   :  { %v5179_v25 = vsel %vm39_vm0, %v5147_v55, %v9700_v32  ;;  %v5545_v18 = vpop.f32.mrf.mxu0  ;;  %v5180_v27 = vsel %vm39_vm0, %v5148_v20, %v9701_v28  ;;  %v9715_v54 = vunpack.i.l.bf16 %v9714_v31  ;;  %v9716_v35 = vunpack.i.h.bf16 %v9714_v31  ;;  %v14480_v28 = vld [vmem:[#allocation35_spill] sm:$0xff]  ;;  %v14482_v31 = vld [vmem:[#allocation64_spill] sm:$0xff] }
 0x442   :  { %v9709_v23 = vpop.permute.xlu0 %9708  ;;  %6029 = vrot.lane.b32.xlu1 %v14476_v13, %s9773_s30  ;;  %5672 = vmatmul.mubr.f32.gmra.mxu0 %v5338_v52  ;;  %v5211_v42 = vsel %vm3392_vm6, %v5179_v25, %v9705_v40  ;;  %v5212_v62 = vsel %vm3392_vm6, %v5180_v27, %v9706_v26  ;;  %v14483_v18 = vld [vmem:[#allocation65_spill] sm:$0xff]  ;;  %v12856_v27 = vld [vmem:[%s14327_s6] ss:$0 sm:$0xff]  ;;  %s9779_s6 = smov 104  }
 0x443   :  { %v9711_v10 = vunpack.i.h.bf16 %v9709_v23  ;;  %v9710_v51 = vunpack.i.l.bf16 %v9709_v23  ;;  %7788 = vmatprep.mubr.msk.f32.mxu0 %vm187_vm4, %v14477_v0 }
 0x444   :  { %5775 = vrot.lane.b32.xlu0 %v14478_v60, %s9777_s20  ;;  %v9724_v2 = vpop.permute.xlu1 %9723 }
 0x445   :  { %v5243_v47 = vsel %vm1359_vm2, %v5211_v42, %v9710_v51  ;;  %v5244_v59 = vsel %vm1359_vm2, %v5212_v62, %v9711_v10  ;;  %v9725_v48 = vunpack.i.l.bf16 %v9724_v2  ;;  %v5534_v10 = vadd.f32 %v12856_v27, %v12738_v19  ;;  %v14484_v51 = vld [vmem:[#allocation37_spill] sm:$0xff] }
 0x446   :  { %v9719_v7 = vpop.permute.xlu0 %9718  ;;  %5777 = vrot.lane.b32.xlu1 %v14479_v53, %s9777_s20  ;;  %v5275_v14 = vsel %vm3457_vm7, %v5243_v47, %v9715_v54  ;;  %v5276_v33 = vsel %vm3457_vm7, %v5244_v59, %v9716_v35  ;;  %v5529_v47 = vadd.f32 %v12856_v27, %v12726_v56  ;;  %v5539_v19 = vadd.f32 %v12856_v27, %v12778_v16 }
 0x447   :  { %v9721_v45 = vunpack.i.h.bf16 %v9719_v7  ;;  %v9720_v15 = vunpack.i.l.bf16 %v9719_v7  ;;  %v5544_v59 = vadd.f32 %v12856_v27, %v12788_v34 }
 0x448   :  { %6125 = vrot.lane.b32.xlu0 %v14471_v17, %s9778_s28  ;;  %v12816_v36 = vpop.permute.xlu1 %5993  ;;  %v9726_v17 = vunpack.i.h.bf16 %v9724_v2 }
 0x449   :  { %v5307_v49 = vsel %vm1392_vm3, %v5275_v14, %v9720_v15  ;;  %v5308_v46 = vsel %vm1392_vm3, %v5276_v33, %v9721_v45 }
 0x44a   :  { %v12820_v3 = vpop.permute.xlu0 %5739  ;;  %6127 = vrot.lane.b32.xlu1 %v14478_v60, %s9778_s28  ;;  %v5339_v29 = vsel %vm3522_vm8, %v5307_v49, %v9725_v48  ;;  %v5340_v55 = vsel %vm3522_vm8, %v5308_v46, %v9726_v17  ;;  %v14485_v60 = vld [vmem:[#allocation38_spill] sm:$0xff] }
 0x44b   :  { %5677 = vmatmul.mubr.f32.gmra.mxu0 %v5339_v29 }
 0x44c   :  { %6031 = vrot.lane.b32.xlu0 %v14480_v28, %s9773_s30  ;;  %v12829_v32 = vpop.permute.xlu1 %5741  ;;  %7789 = vmatprep.mubr.msk.f32.mxu0 %vm187_vm4, %v4220_v61 }
 0x44e   :  { %v12832_v22 = vpop.permute.xlu0 %6089  ;;  %6033 = vrot.lane.b32.xlu1 %v14481_v11, %s9773_s30 }
 0x44f   :  { %5682 = vmatmul.mubr.f32.gmra.mxu0 %v5340_v55 }
 0x450   :  { %5779 = vrot.lane.b32.xlu0 %v14482_v31, %s9777_s20  ;;  %v12839_v58 = vpop.permute.xlu1 %6091 }
 0x452   :  { %v12841_v25 = vpop.permute.xlu0 %5995  ;;  %5781 = vrot.lane.b32.xlu1 %v14483_v18, %s9777_s20  ;;  %v5548_v52 = vpop.f32.mrf.mxu0 }
 0x453   :  { %v5549_v35 = vadd.f32 %v12856_v27, %v5548_v52 }
 0x454   :  { %6129 = vrot.lane.b32.xlu0 %v14479_v53, %s9778_s28  ;;  %v12847_v57 = vpop.permute.xlu1 %5997  ;;  %v5550_v20 = vpop.f32.mrf.mxu0 }
 0x456   :  { %v12849_v40 = vpop.permute.xlu0 %5743  ;;  %6131 = vrot.lane.b32.xlu1 %v14482_v31, %s9778_s28  ;;  %v5553_v23 = vpop.f32.mrf.mxu0 }
 0x457   :  { %v5554_v34 = vadd.f32 %v12856_v27, %v5553_v23 }
 0x458   :  { %6035 = vrot.lane.b32.xlu0 %v14484_v51, %s9773_s30  ;;  %v12862_v0 = vpop.permute.xlu1 %5745  ;;  %v5555_v26 = vpop.f32.mrf.mxu0 }
 0x45a   :  { %v12864_v42 = vpop.permute.xlu0 %6093  ;;  %5849 = vrot.lane.b32.xlu1 %v5534_v10, %s9773_s30 }
 0x45c   :  { %6037 = vrot.lane.b32.xlu0 %v14485_v60, %s9773_s30  ;;  %v12869_v2 = vpop.permute.xlu1 %6095 }
 0x45e   :  { %v12873_v54 = vpop.permute.xlu0 %5999  ;;  %6169 = vrot.lane.b32.xlu1 %v5534_v10, %s9771_s16 }
 0x460   :  { %5847 = vrot.lane.b32.xlu0 %v5529_v47, %s9773_s30  ;;  %v12879_v62 = vpop.permute.xlu1 %6001 }
 0x462   :  { %v12881_v7 = vpop.permute.xlu0 %5747  ;;  %5851 = vrot.lane.b32.xlu1 %v5539_v19, %s9773_s30 }
 0x463   :  { %v5558_v53 = vpop.f32.mrf.mxu0 }
 0x464   :  { %6167 = vrot.lane.b32.xlu0 %v5529_v47, %s9771_s16  ;;  %v12887_v56 = vpop.permute.xlu1 %5749  ;;  %v5559_v33 = vadd.f32 %v12856_v27, %v5558_v53 }
 0x465   :  { %v5560_v45 = vpop.f32.mrf.mxu0 }
 0x466   :  { %v12889_v15 = vpop.permute.xlu0 %6097  ;;  %6173 = vrot.lane.b32.xlu1 %v5544_v59, %s9771_s16 }
 0x467   :  { %14486 = vst [vmem:[#allocation67_spill] sm:$0xff] %v12889_v15  ;;  %v5563_v16 = vpop.f32.mrf.mxu0  ;;  %v14548_v15 = vld [vmem:[#allocation45_spill] sm:$0xff] }
 0x468   :  { %v12893_v48 = vpop.permute.xlu1 %6099  ;;  %6171 = vrot.lane.b32.xlu0 %v5539_v19, %s9771_s16  ;;  %v5564_v31 = vadd.f32 %v12856_v27, %v5563_v16 }
 0x469   :  { %14487 = vst [vmem:[#allocation70_spill] sm:$0xff] %v12893_v48  ;;  %v5565_v14 = vpop.f32.mrf.mxu0  ;;  %v14544_v48 = vld [vmem:[#allocation7_spill] sm:$0xff] }
 0x46a   :  { %v12896_v49 = vpop.permute.xlu0 %6003  ;;  %5855 = vrot.lane.b32.xlu1 %v5549_v35, %s9773_s30 }
 0x46b   :  { %14488 = vst [vmem:[#allocation66_spill] sm:$0xff] %v12896_v49  ;;  %v14549_v49 = vld [vmem:[#allocation9_spill] sm:$0xff] }
 0x46c   :  { %v12900_v61 = vpop.permute.xlu1 %6005  ;;  %5853 = vrot.lane.b32.xlu0 %v5544_v59, %s9773_s30 }
 0x46d   :  { %14489 = vst [vmem:[#allocation56_spill] sm:$0xff] %v12900_v61 }
 0x46e   :  { %v12903_v29 = vpop.permute.xlu0 %5751  ;;  %6177 = vrot.lane.b32.xlu1 %v5554_v34, %s9771_s16 }
 0x470   :  { %v12907_v46 = vpop.permute.xlu1 %5753  ;;  %6175 = vrot.lane.b32.xlu0 %v5549_v35, %s9771_s16 }
 0x471   :  { %14490 = vst [vmem:[#allocation57_spill] sm:$0xff] %v12907_v46 }
 0x472   :  { %v12910_v17 = vpop.permute.xlu0 %6101  ;;  %v5568_v55 = vpop.f32.mrf.mxu0  ;;  %5859 = vrot.lane.b32.xlu1 %v5559_v33, %s9773_s30 }
 0x473   :  { %14491 = vst [vmem:[#allocation71_spill] sm:$0xff] %v12910_v17  ;;  %v5569_v26 = vadd.f32 %v12856_v27, %v5568_v55 }
 0x474   :  { %v12914_v52 = vpop.permute.xlu1 %6103  ;;  %v5570_v20 = vpop.f32.mrf.mxu0  ;;  %5857 = vrot.lane.b32.xlu0 %v5554_v34, %s9773_s30 }
 0x475   :  { %14492 = vst [vmem:[#allocation68_spill] sm:$0xff] %v12914_v52 }
 0x476   :  { %v12917_v23 = vpop.permute.xlu0 %6007  ;;  %v5573_v10 = vpop.f32.mrf.mxu0  ;;  %6181 = vrot.lane.b32.xlu1 %v5564_v31, %s9771_s16 }
 0x477   :  { %14493 = vst [vmem:[#allocation69_spill] sm:$0xff] %v12917_v23  ;;  %v5574_v59 = vadd.f32 %v12856_v27, %v5573_v10 }
 0x478   :  { %v12921_v47 = vpop.permute.xlu1 %6009  ;;  %v5575_v19 = vpop.f32.mrf.mxu0  ;;  %6179 = vrot.lane.b32.xlu0 %v5559_v33, %s9771_s16 }
 0x479   :  { %14494 = vst [vmem:[#allocation72_spill] sm:$0xff] %v12921_v47 }
 0x47a   :  { %v12924_v53 = vpop.permute.xlu0 %5755  ;;  %5863 = vrot.lane.b32.xlu1 %v5569_v26, %s9773_s30 }
 0x47b   :  { %14495 = vst [vmem:[#allocation60_spill] sm:$0xff] %v12924_v53  ;;  %v14543_v53 = vld [vmem:[#allocation42_spill] sm:$0xff] }
 0x47c   :  { %v12928_v45 = vpop.permute.xlu1 %5757  ;;  %5861 = vrot.lane.b32.xlu0 %v5564_v31, %s9773_s30  ;;  %v6264_v61 = vsel %vm6263_vm9, %v14544_v48, %v14543_v53  ;;  %v14552_v53 = vld [vmem:[#allocation22_spill] sm:$0xff] }
 0x47d   :  { %14496 = vst [vmem:[#allocation61_spill] sm:$0xff] %v12928_v45 }
 0x47e   :  { %v12931_v16 = vpop.permute.xlu0 %6105  ;;  %6185 = vrot.lane.b32.xlu1 %v5574_v59, %s9771_s16 }
 0x47f   :  { %14497 = vst [vmem:[#allocation64_spill] sm:$0xff] %v12931_v16  ;;  %v5578_v35 = vpop.f32.mrf.mxu0 }
 0x480   :  { %v5579_v14 = vadd.f32 %v12856_v27, %v5578_v35  ;;  %v12935_v34 = vpop.permute.xlu1 %6107  ;;  %6183 = vrot.lane.b32.xlu0 %v5569_v26, %s9771_s16 }
 0x481   :  { %14498 = vst [vmem:[#allocation65_spill] sm:$0xff] %v12935_v34  ;;  %v5580_v33 = vpop.f32.mrf.mxu0 }
 0x482   :  { %v12938_v55 = vpop.permute.xlu0 %6011  ;;  %5867 = vrot.lane.b32.xlu1 %v5579_v14, %s9773_s30 }
 0x483   :  { %14499 = vst [vmem:[#allocation73_spill] sm:$0xff] %v12938_v55  ;;  %v5583_v20 = vpop.f32.mrf.mxu0 }
 0x484   :  { %v5584_v10 = vadd.f32 %v12856_v27, %v5583_v20  ;;  %v12942_v31 = vpop.permute.xlu1 %6013  ;;  %5865 = vrot.lane.b32.xlu0 %v5574_v59, %s9773_s30 }
 0x485   :  { %14500 = vst [vmem:[#allocation74_spill] sm:$0xff] %v12942_v31  ;;  %v5585_v19 = vpop.f32.mrf.mxu0 }
 0x486   :  { %v12945_v60 = vpop.permute.xlu0 %5759  ;;  %6189 = vrot.lane.b32.xlu1 %v5584_v10, %s9771_s16 }
 0x487   :  { %14501 = vst [vmem:[#allocation75_spill] sm:$0xff] %v12945_v60 }
 0x488   :  { %v12948_v35 = vpop.permute.xlu1 %5761  ;;  %6187 = vrot.lane.b32.xlu0 %v5579_v14, %s9771_s16 }
 0x489   :  { %14502 = vst [vmem:[#allocation76_spill] sm:$0xff] %v12948_v35 }
 0x48a   :  { %v12951_v26 = vpop.permute.xlu0 %6109 }
 0x48b   :  { %14503 = vst [vmem:[#allocation77_spill] sm:$0xff] %v12951_v26 }
 0x48c   :  { %v12953_v33 = vpop.permute.xlu1 %6111  ;;  %5869 = vrot.lane.b32.xlu0 %v5584_v10, %s9773_s30 }
 0x48d   :  { %14504 = vst [vmem:[#allocation78_spill] sm:$0xff] %v12953_v33 }
 0x48e   :  { %v12956_v20 = vpop.permute.xlu0 %6015  ;;  %v5588_v51 = vpop.f32.mrf.mxu0 }
 0x48f   :  { %14505 = vst [vmem:[#allocation79_spill] sm:$0xff] %v12956_v20  ;;  %v5589_v59 = vadd.f32 %v12856_v27, %v5588_v51 }
 0x490   :  { %v12959_v19 = vpop.permute.xlu1 %6017  ;;  %v5590_v11 = vpop.f32.mrf.mxu0 }
 0x491   :  { %14506 = vst [vmem:[#allocation80_spill] sm:$0xff] %v12959_v19  ;;  %6191 = vrot.lane.b32.xlu0 %v5589_v59, %s9771_s16  ;;  %5871 = vrot.lane.b32.xlu1 %v5589_v59, %s9773_s30 }
 0x492   :  { %v12963_v28 = vpop.permute.xlu0 %5763  ;;  %v5593_v14 = vpop.f32.mrf.mxu0 }
 0x493   :  { %14507 = vst [vmem:[#allocation81_spill] sm:$0xff] %v12963_v28  ;;  %v5594_v13 = vadd.f32 %v12856_v27, %v5593_v14 }
 0x494   :  { %v12966_v37 = vpop.permute.xlu1 %5765  ;;  %v5595_v10 = vpop.f32.mrf.mxu0 }
 0x495   :  { %14508 = vst [vmem:[#allocation82_spill] sm:$0xff] %v12966_v37  ;;  %5873 = vrot.lane.b32.xlu0 %v5594_v13, %s9773_s30  ;;  %6193 = vrot.lane.b32.xlu1 %v5594_v13, %s9771_s16 }
 0x496   :  { %v12970_v51 = vpop.permute.xlu0 %6113 }
 0x497   :  { %14509 = vst [vmem:[#allocation83_spill] sm:$0xff] %v12970_v51 }
 0x498   :  { %v12972_v39 = vpop.permute.xlu1 %6115 }
 0x499   :  { %14510 = vst [vmem:[#allocation84_spill] sm:$0xff] %v12972_v39 }
 0x49a   :  { %v12974_v11 = vpop.permute.xlu0 %6019 }
 0x49b   :  { %14511 = vst [vmem:[#allocation85_spill] sm:$0xff] %v12974_v11  ;;  %v5598_v41 = vpop.f32.mrf.mxu0 }
 0x49c   :  { %v5599_v59 = vadd.f32 %v12856_v27, %v5598_v41  ;;  %v12977_v33 = vpop.permute.xlu1 %6021 }
 0x49d   :  { %14512 = vst [vmem:[#allocation86_spill] sm:$0xff] %v12977_v33  ;;  %v5600_v19 = vpop.f32.mrf.mxu0 }
 0x49e   :  { %v12979_v14 = vpop.permute.xlu0 %5767  ;;  %6195 = vrot.lane.b32.xlu0 %v5599_v59, %s9771_s16  ;;  %5875 = vrot.lane.b32.xlu1 %v5599_v59, %s9773_s30 }
 0x49f   :  { %14513 = vst [vmem:[#allocation87_spill] sm:$0xff] %v12979_v14  ;;  %v5603_v10 = vpop.f32.mrf.mxu0 }
 0x4a0   :  { %v5604_v13 = vadd.f32 %v12856_v27, %v5603_v10  ;;  %v12984_v51 = vpop.permute.xlu1 %5769 }
 0x4a1   :  { %14514 = vst [vmem:[#allocation88_spill] sm:$0xff] %v12984_v51  ;;  %v5605_v39 = vpop.f32.mrf.mxu0 }
 0x4a2   :  { %v12986_v44 = vpop.permute.xlu0 %6117  ;;  %5877 = vrot.lane.b32.xlu0 %v5604_v13, %s9773_s30  ;;  %6197 = vrot.lane.b32.xlu1 %v5604_v13, %s9771_s16 }
 0x4a3   :  { %14515 = vst [vmem:[#allocation89_spill] sm:$0xff] %v12986_v44 }
 0x4a4   :  { %v12990_v41 = vpop.permute.xlu1 %6119 }
 0x4a5   :  { %14516 = vst [vmem:[#allocation90_spill] sm:$0xff] %v12990_v41 }
 0x4a6   :  { %v12992_v19 = vpop.permute.xlu0 %6023 }
 0x4a7   :  { %14517 = vst [vmem:[#allocation91_spill] sm:$0xff] %v12992_v19 }
 0x4a8   :  { %v12994_v33 = vpop.permute.xlu1 %6025 }
 0x4a9   :  { %14518 = vst [vmem:[#allocation92_spill] sm:$0xff] %v12994_v33 }
 0x4aa   :  { %v12996_v11 = vpop.permute.xlu0 %5771  ;;  %v5608_v59 = vpop.f32.mrf.mxu0 }
 0x4ab   :  { %14519 = vst [vmem:[#allocation93_spill] sm:$0xff] %v12996_v11  ;;  %v5609_v10 = vadd.f32 %v12856_v27, %v5608_v59 }
 0x4ac   :  { %v5610_v14 = vpop.f32.mrf.mxu0  ;;  %v12999_v51 = vpop.permute.xlu1 %5773 }
 0x4ad   :  { %14520 = vst [vmem:[#allocation94_spill] sm:$0xff] %v12999_v51  ;;  %6199 = vrot.lane.b32.xlu0 %v5609_v10, %s9771_s16  ;;  %5879 = vrot.lane.b32.xlu1 %v5609_v10, %s9773_s30 }
 0x4ae   :  { %v13003_v39 = vpop.permute.xlu0 %6121  ;;  %v5613_v13 = vpop.f32.mrf.mxu0 }
 0x4af   :  { %14521 = vst [vmem:[#allocation95_spill] sm:$0xff] %v13003_v39  ;;  %v5614_v41 = vadd.f32 %v12856_v27, %v5613_v13 }
 0x4b0   :  { %v5615_v44 = vpop.f32.mrf.mxu0  ;;  %v13010_v59 = vpop.permute.xlu1 %6123 }
 0x4b1   :  { %5881 = vrot.lane.b32.xlu0 %v5614_v41, %s9773_s30  ;;  %6201 = vrot.lane.b32.xlu1 %v5614_v41, %s9771_s16  ;;  %14523 = vst [vmem:[#allocation97_spill] sm:$0xff] %v13010_v59 }
 0x4b2   :  { %v13008_v33 = vpop.permute.xlu0 %6027 }
 0x4b3   :  { %14522 = vst [vmem:[#allocation96_spill] sm:$0xff] %v13008_v33 }
 0x4b4   :  { %v13015_v11 = vpop.permute.xlu1 %6029 }
 0x4b5   :  { %14525 = vst [vmem:[#allocation99_spill] sm:$0xff] %v13015_v11 }
 0x4b6   :  { %v13012_v14 = vpop.permute.xlu0 %5775 }
 0x4b7   :  { %14524 = vst [vmem:[#allocation98_spill] sm:$0xff] %v13012_v14  ;;  %v5618_v51 = vpop.f32.mrf.mxu0 }
 0x4b8   :  { %v5619_v19 = vadd.f32 %v12856_v27, %v5618_v51  ;;  %v13026_v51 = vpop.permute.xlu1 %5777 }
 0x4b9   :  { %v5620_v10 = vpop.f32.mrf.mxu0  ;;  %14528 = vst [vmem:[#allocation102_spill] sm:$0xff] %v13026_v51 }
 0x4ba   :  { %v13017_v39 = vpop.permute.xlu0 %6125  ;;  %6203 = vrot.lane.b32.xlu0 %v5619_v19, %s9771_s16  ;;  %5883 = vrot.lane.b32.xlu1 %v5619_v19, %s9773_s30 }
 0x4bb   :  { %14526 = vst [vmem:[#allocation100_spill] sm:$0xff] %v13017_v39  ;;  %v5623_v44 = vpop.f32.mrf.mxu0 }
 0x4bc   :  { %v5624_v41 = vadd.f32 %v12856_v27, %v5623_v44  ;;  %v13030_v59 = vpop.permute.xlu1 %6127 }
 0x4bd   :  { %v5625_v13 = vpop.f32.mrf.mxu0  ;;  %14530 = vst [vmem:[#allocation104_spill] sm:$0xff] %v13030_v59 }
 0x4be   :  { %v13022_v33 = vpop.permute.xlu0 %6031  ;;  %5885 = vrot.lane.b32.xlu0 %v5624_v41, %s9773_s30  ;;  %6205 = vrot.lane.b32.xlu1 %v5624_v41, %s9771_s16 }
 0x4bf   :  { %14527 = vst [vmem:[#allocation101_spill] sm:$0xff] %v13022_v33 }
 0x4c0   :  { %v13038_v41 = vpop.permute.xlu1 %6033 }
 0x4c1   :  { %14532 = vst [vmem:[#allocation106_spill] sm:$0xff] %v13038_v41 }
 0x4c2   :  { %v13028_v10 = vpop.permute.xlu0 %5779 }
 0x4c3   :  { %14529 = vst [vmem:[#allocation103_spill] sm:$0xff] %v13028_v10 }
 0x4c6   :  { %v5628_v39 = vpop.f32.mrf.mxu0  ;;  %v13033_v14 = vpop.permute.xlu0 %6129 }
 0x4c7   :  { %v5629_v11 = vadd.f32 %v12856_v27, %v5628_v39  ;;  %14531 = vst [vmem:[#allocation105_spill] sm:$0xff] %v13033_v14  ;;  %v13044_v39 = vpop.permute.xlu1 %5781 }
 0x4c8   :  { %v5630_v19 = vpop.f32.mrf.mxu0  ;;  %14534 = vst [vmem:[#allocation108_spill] sm:$0xff] %v13044_v39 }
 0x4c9   :  { %6207 = vrot.lane.b32.xlu0 %v5629_v11, %s9771_s16  ;;  %5887 = vrot.lane.b32.xlu1 %v5629_v11, %s9773_s30 }
 0x4ca   :  { %v5633_v44 = vpop.f32.mrf.mxu0  ;;  %v13042_v10 = vpop.permute.xlu0 %6035 }
 0x4cb   :  { %v5634_v13 = vadd.f32 %v12856_v27, %v5633_v44  ;;  %14533 = vst [vmem:[#allocation107_spill] sm:$0xff] %v13042_v10 }
 0x4cc   :  { %v5635_v33 = vpop.f32.mrf.mxu0 }
 0x4cd   :  { %5889 = vrot.lane.b32.xlu0 %v5634_v13, %s9773_s30  ;;  %6209 = vrot.lane.b32.xlu1 %v5634_v13, %s9771_s16  ;;  %v13051_v33 = vpop.permute.xlu1 %6131 }
 0x4ce   :  { %v13047_v59 = vpop.permute.xlu0 %6037  ;;  %14536 = vst [vmem:[#allocation110_spill] sm:$0xff] %v13051_v33 }
 0x4cf   :  { %14535 = vst [vmem:[#allocation109_spill] sm:$0xff] %v13047_v59 }
 0x4d2   :  { %v13056_v39 = vpop.permute.xlu0 %5847 }
 0x4d3   :  { %v5638_v19 = vpop.f32.mrf.mxu0 }
 0x4d4   :  { %v5639_v14 = vadd.f32 %v12856_v27, %v5638_v19  ;;  %v13058_v19 = vpop.permute.xlu1 %5849 }
 0x4d5   :  { %v5640_v11 = vpop.f32.mrf.mxu0 }
 0x4d6   :  { %6211 = vrot.lane.b32.xlu0 %v5639_v14, %s9771_s16  ;;  %5891 = vrot.lane.b32.xlu1 %v5639_v14, %s9773_s30  ;;  %v13060_v59 = vpop.permute.xlu0 %6167 }
 0x4d7   :  { %v5643_v44 = vpop.f32.mrf.mxu0 }
 0x4d8   :  { %v5644_v41 = vadd.f32 %v12856_v27, %v5643_v44  ;;  %v13063_v14 = vpop.permute.xlu1 %6169 }
 0x4d9   :  { %v5645_v13 = vpop.f32.mrf.mxu0 }
 0x4da   :  { %5893 = vrot.lane.b32.xlu0 %v5644_v41, %s9773_s30  ;;  %6213 = vrot.lane.b32.xlu1 %v5644_v41, %s9771_s16  ;;  %v13067_v13 = vpop.permute.xlu0 %6171 }
 0x4dc   :  { %v13072_v37 = vpop.permute.xlu1 %5851 }
 0x4e2   :  { %v5648_v11 = vpop.f32.mrf.mxu0 }
 0x4e3   :  { %v5649_v10 = vadd.f32 %v12856_v27, %v5648_v11  ;;  %v13074_v11 = vpop.permute.xlu0 %5853 }
 0x4e4   :  { %v5650_v51 = vpop.f32.mrf.mxu0 }
 0x4e5   :  { %6215 = vrot.lane.b32.xlu0 %v5649_v10, %s9771_s16  ;;  %5895 = vrot.lane.b32.xlu1 %v5649_v10, %s9773_s30  ;;  %v13076_v51 = vpop.permute.xlu1 %6173 }
 0x4e6   :  { %v5653_v44 = vpop.f32.mrf.mxu0 }
 0x4e7   :  { %v5654_v41 = vadd.f32 %v12856_v27, %v5653_v44  ;;  %v13081_v44 = vpop.permute.xlu0 %6175 }
 0x4e8   :  { %v5655_v33 = vpop.f32.mrf.mxu0 }
 0x4e9   :  { %5897 = vrot.lane.b32.xlu0 %v5654_v41, %s9773_s30  ;;  %6217 = vrot.lane.b32.xlu1 %v5654_v41, %s9771_s16  ;;  %v13084_v28 = vpop.permute.xlu1 %5855 }
 0x4eb   :  { %v13088_v34 = vpop.permute.xlu0 %5857 }
 0x4ef   :  { %v5658_v26 = vpop.f32.mrf.mxu0  ;;  %v13092_v31 = vpop.permute.xlu0 %6179 }
 0x4f0   :  { %v5659_v20 = vadd.f32 %v12856_v27, %v5658_v26  ;;  %v13090_v26 = vpop.permute.xlu1 %6177 }
 0x4f1   :  { %v5660_v10 = vpop.f32.mrf.mxu0 }
 0x4f2   :  { %6219 = vrot.lane.b32.xlu0 %v5659_v20, %s9771_s16  ;;  %5899 = vrot.lane.b32.xlu1 %v5659_v20, %s9773_s30 }
 0x4f3   :  { %v5663_v33 = vpop.f32.mrf.mxu0  ;;  %v13100_v16 = vpop.permute.xlu0 %5861 }
 0x4f4   :  { %v5664_v63 = vadd.f32 %v12856_v27, %v5663_v33  ;;  %v13097_v33 = vpop.permute.xlu1 %5859 }
 0x4f5   :  { %v5665_v41 = vpop.f32.mrf.mxu0 }
 0x4f6   :  { %5901 = vrot.lane.b32.xlu0 %v5664_v63, %s9773_s30  ;;  %6221 = vrot.lane.b32.xlu1 %v5664_v63, %s9771_s16 }
 0x4f8   :  { %v13104_v55 = vpop.permute.xlu1 %6181 }
 0x4fc   :  { %v13109_v60 = vpop.permute.xlu1 %5863 }
 0x4fe   :  { %v5668_v10 = vpop.f32.mrf.mxu0 }
 0x4ff   :  { %v5669_v20 = vadd.f32 %v12856_v27, %v5668_v10  ;;  %v13106_v10 = vpop.permute.xlu0 %6183 }
 0x500   :  { %v5670_v5 = vpop.f32.mrf.mxu0 }
 0x501   :  { %6223 = vrot.lane.b32.xlu0 %v5669_v20, %s9771_s16  ;;  %5903 = vrot.lane.b32.xlu1 %v5669_v20, %s9773_s30 }
 0x502   :  { %v5673_v41 = vpop.f32.mrf.mxu0 }
 0x503   :  { %v5674_v35 = vadd.f32 %v12856_v27, %v5673_v41  ;;  %v13113_v52 = vpop.permute.xlu0 %5865 }
 0x504   :  { %v5675_v63 = vpop.f32.mrf.mxu0 }
 0x505   :  { %5905 = vrot.lane.b32.xlu0 %v5674_v35, %s9773_s30  ;;  %6225 = vrot.lane.b32.xlu1 %v5674_v35, %s9771_s16  ;;  %v13117_v35 = vpop.permute.xlu1 %6185 }
 0x50b   :  { %v5678_v5 = vpop.f32.mrf.mxu0 }
 0x50c   :  { %v5679_v38 = vadd.f32 %v12856_v27, %v5678_v5  ;;  %v13122_v5 = vpop.permute.xlu0 %6187 }
 0x50d   :  { %v5680_v20 = vpop.f32.mrf.mxu0 }
 0x50e   :  { %5907 = vrot.lane.b32.xlu1 %v5679_v38, %s9773_s30  ;;  %v13124_v20 = vpop.permute.xlu1 %5867 }
 0x50f   :  { %v5683_v41 = vpop.f32.mrf.mxu0 }
 0x510   :  { %v5684_v63 = vadd.f32 %v12856_v27, %v5683_v41  ;;  %v13126_v30 = vpop.permute.xlu0 %5869 }
 0x511   :  { %v5685_v47 = vpop.f32.mrf.mxu0 }
 0x512   :  { %5909 = vrot.lane.b32.xlu0 %v5684_v63, %s9773_s30  ;;  %6227 = vrot.lane.b32.xlu1 %v5679_v38, %s9771_s16  ;;  %v13128_v27 = vpop.permute.xlu1 %6189 }
 0x513   :  { %14537 = vst [vmem:[#allocation111_spill] sm:$0xff] %v13128_v27  ;;  %v14550_v27 = vld [vmem:[#allocation47_spill] sm:$0xff] }
 0x514   :  { %v13130_v47 = vpop.permute.xlu0 %6191  ;;  %v6267_v48 = vsel %vm6263_vm9, %v14551_v8, %v14550_v27  ;;  %v14557_v8 = vld [vmem:[#allocation25_spill] sm:$0xff] }
 0x515   :  { %14538 = vst [vmem:[#allocation112_spill] sm:$0xff] %v13130_v47 }
 0x516   :  { %6133 = vrot.lane.b32.xlu0 %v14483_v18, %s9778_s28  ;;  %6229 = vrot.lane.b32.xlu1 %v5684_v63, %s9771_s16  ;;  %v13132_v41 = vpop.permute.xlu1 %5871 }
 0x518   :  { %v13134_v38 = vpop.permute.xlu0 %5873 }
 0x51a   :  { %v13136_v45 = vpop.permute.xlu1 %6193 }
 0x51b   :  { %14539 = vst [vmem:[#allocation113_spill] sm:$0xff] %v13136_v45  ;;  %v6296_v45 = vsel %vm187_vm4, %v6264_v61, %v13056_v39 }
 0x51c   :  { %v13138_v17 = vpop.permute.xlu0 %6195 }
 0x51d   :  { %14540 = vst [vmem:[#allocation114_spill] sm:$0xff] %v13138_v17  ;;  %v14547_v17 = vld [vmem:[#allocation8_spill] sm:$0xff] }
 0x51e   :  { %v13140_v18 = vpop.permute.xlu1 %5875  ;;  %v6265_v46 = vsel %vm6263_vm9, %v14547_v17, %v14546_v4  ;;  %v6299_v4 = vsel %vm187_vm4, %v6267_v48, %v13074_v11  ;;  %v14561_v48 = vld [vmem:[#allocation43_spill] sm:$0xff] }
 0x520   :  { %v13142_v63 = vpop.permute.xlu0 %5877 }
 0x522   :  { %v13144_v23 = vpop.permute.xlu1 %6197 }
 0x523   :  { %14541 = vst [vmem:[#allocation115_spill] sm:$0xff] %v13144_v23  ;;  %v6297_v23 = vsel %vm187_vm4, %v6265_v46, %v13058_v19  ;;  %v14554_v46 = vld [vmem:[#allocation23_spill] sm:$0xff] }
 0x524   :  { %v13146_v6 = vpop.permute.xlu0 %6199  ;;  %v6330_v39 = vsel %vm6328_vm10, %v6297_v23, %v14554_v46  ;;  %v14562_v46 = vld [vmem:[#allocation51_spill] sm:$0xff] }
 0x525   :  { %14542 = vst [vmem:[#allocation116_spill] sm:$0xff] %v13146_v6  ;;  %v6266_v6 = vsel %vm6263_vm9, %v14549_v49, %v14548_v15  ;;  %v14556_v15 = vld [vmem:[#allocation44_spill] sm:$0xff] }
 0x526   :  { %v13151_v47 = vpop.permute.xlu1 %5879  ;;  %v6298_v61 = vsel %vm187_vm4, %v6266_v6, %v13072_v37  ;;  %v14559_v6 = vld [vmem:[#allocation50_spill] sm:$0xff]  ;;  %v14560_v37 = vld [vmem:[#allocation11_spill] sm:$0xff] }
 0x527   :  { %14545 = vst [vmem:[#allocation42_spill] sm:$0xff] %v13151_v47  ;;  %v6329_v47 = vsel %vm6328_vm10, %v6296_v45, %v14552_v53  ;;  %v6331_v27 = vsel %vm6328_vm10, %v6298_v61, %v14557_v8  ;;  %v14558_v45 = vld [vmem:[#allocation27_spill] sm:$0xff]  ;;  %v6268_v11 = vsel %vm6263_vm9, %v14560_v37, %v14559_v6  ;;  %v14564_v8 = vld [vmem:[#allocation46_spill] sm:$0xff] }
 0x528   :  { %v13172_v17 = vpop.permute.xlu0 %5881  ;;  %v6361_v49 = vsel %vm39_vm0, %v6329_v47, %v14556_v15  ;;  %v6332_v53 = vsel %vm6328_vm10, %v6299_v4, %v14558_v45  ;;  %v6300_v4 = vsel %vm187_vm4, %v6268_v11, %v13084_v28  ;;  %v6363_v45 = vsel %vm39_vm0, %v6331_v27, %v14564_v8  ;;  %v14569_v11 = vld [vmem:[#allocation33_spill] sm:$0xff]  ;;  %v14573_v8 = vld [vmem:[#allocation14_spill] sm:$0xff] }
 0x529   :  { %14553 = vst [vmem:[#allocation7_spill] sm:$0xff] %v13172_v17  ;;  %v6362_v17 = vsel %vm39_vm0, %v6330_v39, %v14561_v48  ;;  %v13196_v61 = vsel %vm6393_vm11, %v6361_v49, %v13060_v59  ;;  %v14565_v39 = vld [vmem:[#allocation48_spill] sm:$0xff]  ;;  %v13214_v59 = vsel %vm6393_vm11, %v6363_v45, %v13067_v13  ;;  %v14568_v49 = vld [vmem:[#allocation30_spill] sm:$0xff] }
 0x52a   :  { %v13176_v19 = vpop.permute.xlu1 %6201  ;;  %v6364_v6 = vsel %vm39_vm0, %v6332_v53, %v14565_v39  ;;  %14567 = vst [vmem:[#allocation45_spill] sm:$0xff] %v13214_v59  ;;  %v6426_v28 = vsel %vm3392_vm6, %v13196_v61, 0.0  ;;  %v6333_v27 = vsel %vm6328_vm10, %v6300_v4, %v14568_v49  ;;  %v6429_v13 = vsel %vm3392_vm6, %v13214_v59, 0.0  ;;  %v14570_v48 = vld [vmem:[#allocation54_spill] sm:$0xff]  ;;  %v14572_v4 = vld [vmem:[#allocation55_spill] sm:$0xff]  ;;  %v14574_v39 = vld [vmem:[#allocation49_spill] sm:$0xff] }
 0x52b   :  { %14555 = vst [vmem:[#allocation41_spill] sm:$0xff] %v13176_v19  ;;  %v14563_v19 = vld [vmem:[#allocation12_spill] sm:$0xff]  ;;  %v13222_v53 = vsel %vm6393_vm11, %v6364_v6, %v13076_v51  ;;  %v6271_v51 = vsel %vm6263_vm9, %v14573_v8, %v14572_v4  ;;  %v6365_v6 = vsel %vm39_vm0, %v6333_v27, %v14574_v39  ;;  %v14576_v4 = vld [vmem:[#allocation34_spill] sm:$0xff] }
 0x52c   :  { %v13189_v23 = vpop.permute.xlu0 %6203  ;;  %v6269_v47 = vsel %vm6263_vm9, %v14563_v19, %v14562_v46  ;;  %v13210_v19 = vsel %vm6393_vm11, %v6362_v17, %v13063_v14  ;;  %v14571_v46 = vld [vmem:[#allocation13_spill] sm:$0xff]  ;;  %v6431_v49 = vsel %vm3392_vm6, %v13222_v53, 0.0  ;;  %v14575_v59 = vld [vmem:[#allocation52_spill] sm:$0xff] }
 0x52d   :  { %v6301_v37 = vsel %vm187_vm4, %v6269_v47, %v13088_v34  ;;  %14566 = vst [vmem:[#allocation8_spill] sm:$0xff] %v13210_v19  ;;  %v6427_v14 = vsel %vm3392_vm6, %v13210_v19, 0.0  ;;  %v6270_v47 = vsel %vm6263_vm9, %v14571_v46, %v14570_v48  ;;  %v6303_v48 = vsel %vm187_vm4, %v6271_v51, %v13100_v16  ;;  %v14578_v16 = vld [vmem:[#allocation62_spill] sm:$0xff] }
 0x52e   :  { %v13200_v15 = vpop.permute.xlu1 %5883  ;;  %v6334_v34 = vsel %vm6328_vm10, %v6301_v37, %v14569_v11  ;;  %v6428_v45 = vadd.f32 %v6427_v14, %v6426_v28  ;;  %v6302_v11 = vsel %vm187_vm4, %v6270_v47, %v13097_v33  ;;  %v13252_v28 = vsel %vm6393_vm11, %v6365_v6, %v13081_v44  ;;  %v14577_v47 = vld [vmem:[#allocation39_spill] sm:$0xff] }
 0x52f   :  { %v6366_v19 = vsel %vm39_vm0, %v6334_v34, %v14575_v59  ;;  %v6335_v8 = vsel %vm6328_vm10, %v6302_v11, %v14576_v4  ;;  %v6336_v59 = vsel %vm6328_vm10, %v6303_v48, %v14577_v47  ;;  %v6433_v51 = vsel %vm3392_vm6, %v13252_v28, 0.0  ;;  %v14582_v11 = vld [vmem:[#allocation58_spill] sm:$0xff] }
 0x530   :  { %v13230_v17 = vpop.permute.xlu0 %5885  ;;  %v6430_v46 = vadd.f32 %v6429_v13, %v6428_v45  ;;  %v13260_v33 = vsel %vm6393_vm11, %v6366_v19, %v13090_v26  ;;  %v14579_v13 = vld [vmem:[#allocation15_spill] sm:$0xff]  ;;  %v14581_v19 = vld [vmem:[#allocation53_spill] sm:$0xff]  ;;  %v6368_v48 = vsel %vm39_vm0, %v6336_v59, %v14582_v11 }
 0x531   :  { %v6272_v44 = vsel %vm6263_vm9, %v14579_v13, %v14578_v16  ;;  %v14580_v45 = vld [vmem:[#allocation63_spill] sm:$0xff]  ;;  %v6367_v6 = vsel %vm39_vm0, %v6335_v8, %v14581_v19  ;;  %v13294_v13 = vsel %vm6393_vm11, %v6368_v48, %v13104_v55  ;;  %v14585_v48 = vld [vmem:[#allocation16_spill] sm:$0xff] }
 0x532   :  { %v13240_v37 = vpop.permute.xlu1 %6205  ;;  %v6432_v14 = vadd.f32 %v6431_v49, %v6430_v46  ;;  %v6273_v39 = vsel %vm6263_vm9, %v11171_v43, %v14580_v45  ;;  %v6304_v26 = vsel %vm187_vm4, %v6272_v44, %v13109_v60  ;;  %v6435_v49 = vsel %vm3392_vm6, %v13260_v33, 0.0  ;;  %v14583_v43 = vld [vmem:[#allocation40_spill] sm:$0xff] }
 0x533   :  { %v6305_v46 = vsel %vm187_vm4, %v6273_v39, %v13113_v52  ;;  %v13286_v47 = vsel %vm6393_vm11, %v6367_v6, %v13092_v31  ;;  %v6337_v60 = vsel %vm6328_vm10, %v6304_v26, %v14583_v43  ;;  %v6274_v31 = vsel %vm6263_vm9, %v11185_v9, %v12820_v3 }
 0x534   :  { %v6434_v4 = vadd.f32 %v6433_v51, %v6432_v14  ;;  %v6338_v59 = vsel %vm6328_vm10, %v6305_v46, %v12816_v36  ;;  %v6437_v52 = vsel %vm3392_vm6, %v13286_v47, 0.0  ;;  %v6275_v14 = vsel %vm6263_vm9, %v11194_v21, %v12829_v32  ;;  %v14584_v51 = vld [vmem:[#allocation59_spill] sm:$0xff] }
 0x535   :  { %v6369_v55 = vsel %vm39_vm0, %v6337_v60, %v14584_v51  ;;  %v6439_v45 = vsel %vm3392_vm6, %v13294_v13, 0.0  ;;  %v6306_v36 = vsel %vm187_vm4, %v6274_v31, %v13124_v20  ;;  %v6370_v39 = vsel %vm39_vm0, %v6338_v59, %v12832_v22  ;;  %v14586_v46 = vld [vmem:[#allocation111_spill] sm:$0xff] }
 0x536   :  { %v6436_v8 = vadd.f32 %v6435_v49, %v6434_v4  ;;  %v6307_v26 = vsel %vm187_vm4, %v6275_v14, %v13126_v30  ;;  %v6276_v21 = vsel %vm6263_vm9, %v11202_v12, %v12849_v40  ;;  %v13325_v32 = vsel %vm6393_vm11, %v6369_v55, %v13106_v10  ;;  %v14587_v4 = vld [vmem:[#allocation66_spill] sm:$0xff]  ;;  %v14588_v60 = vld [vmem:[#allocation67_spill] sm:$0xff]  ;;  %v14592_v14 = vld [vmem:[#allocation112_spill] sm:$0xff] }
 0x537   :  { %v6277_v22 = vsel %vm6263_vm9, %v11211_v50, %v12862_v0  ;;  %v6308_v30 = vsel %vm187_vm4, %v6276_v21, %v13132_v41  ;;  %v6339_v6 = vsel %vm6328_vm10, %v6306_v36, %v12841_v25  ;;  %v13338_v12 = vsel %vm6393_vm11, %v6370_v39, %v13117_v35  ;;  %v14593_v55 = vld [vmem:[#allocation56_spill] sm:$0xff] }
 0x538   :  { %v6438_v3 = vadd.f32 %v6437_v52, %v6436_v8  ;;  %v6340_v40 = vsel %vm6328_vm10, %v6307_v26, %v12847_v57  ;;  %v6441_v10 = vsel %vm3392_vm6, %v13325_v32, 0.0  ;;  %v6309_v50 = vsel %vm187_vm4, %v6277_v22, %v13134_v38  ;;  %v14589_v8 = vld [vmem:[#allocation42_spill] sm:$0xff]  ;;  %v14591_v52 = vld [vmem:[#allocation17_spill] sm:$0xff] }
 0x539   :  { %v6278_v0 = vsel %vm6263_vm9, %v11218_v1, %v12881_v7  ;;  %v6341_v25 = vsel %vm6328_vm10, %v6308_v30, %v12873_v54  ;;  %v6371_v35 = vsel %vm39_vm0, %v6339_v6, %v12839_v58  ;;  %v6443_v41 = vsel %vm3392_vm6, %v13338_v12, 0.0  ;;  %v14594_v26 = vld [vmem:[#allocation70_spill] sm:$0xff]  ;;  %v14596_v30 = vld [vmem:[#allocation60_spill] sm:$0xff] }
 0x53a   :  { %v6440_v20 = vadd.f32 %v6439_v45, %v6438_v3  ;;  %v6372_v57 = vsel %vm39_vm0, %v6340_v40, %v12864_v42  ;;  %v6310_v49 = vsel %vm187_vm4, %v6278_v0, %v13140_v18  ;;  %v6279_v1 = vsel %vm6263_vm9, %v11227_v24, %v12887_v56  ;;  %v14595_v3 = vld [vmem:[#allocation7_spill] sm:$0xff]  ;;  %v14599_v0 = vld [vmem:[#allocation69_spill] sm:$0xff] }
 0x53b   :  { %v13254_v27 = vpop.permute.xlu0 %6207  ;;  %v13264_v34 = vpop.permute.xlu1 %5887  ;;  %v13366_v54 = vsel %vm6393_vm11, %v6371_v35, %v13122_v5  ;;  %v6342_v58 = vsel %vm6328_vm10, %v6309_v50, %v12879_v62  ;;  %v6373_v42 = vsel %vm39_vm0, %v6341_v25, %v12869_v2  ;;  %v6311_v18 = vsel %vm187_vm4, %v6279_v1, %v13142_v63  ;;  %v14601_v1 = vld [vmem:[#allocation61_spill] sm:$0xff] }
 0x53c   :  { %v6442_v7 = vadd.f32 %v6441_v10, %v6440_v20  ;;  %v6280_v24 = vsel %vm6263_vm9, %v14585_v48, %v12903_v29  ;;  %v13381_v5 = vsel %vm6393_vm11, %v6372_v57, %v14586_v46  ;;  %v6343_v62 = vsel %vm6328_vm10, %v6310_v49, %v14587_v4  ;;  %v14590_v29 = vld [vmem:[#allocation57_spill] sm:$0xff]  ;;  %v14597_v20 = vld [vmem:[#allocation18_spill] sm:$0xff]  ;;  %v14605_v4 = vld [vmem:[#allocation68_spill] sm:$0xff] }
 0x53d   :  { %v6445_v43 = vsel %vm3392_vm6, %v13366_v54, 0.0  ;;  %v6374_v2 = vsel %vm39_vm0, %v6342_v58, %v14588_v60  ;;  %v6312_v63 = vsel %vm187_vm4, %v6280_v24, %v14589_v8  ;;  %v6281_v31 = vsel %vm6263_vm9, %v14591_v52, %v14590_v29  ;;  %v14598_v10 = vld [vmem:[#allocation113_spill] sm:$0xff]  ;;  %v14604_v24 = vld [vmem:[#allocation72_spill] sm:$0xff]  ;;  %v14606_v60 = vld [vmem:[#allocation75_spill] sm:$0xff] }
 0x53e   :  { %v6444_v56 = vadd.f32 %v6443_v41, %v6442_v7  ;;  %v13398_v51 = vsel %vm6393_vm11, %v6373_v42, %v14592_v14  ;;  %v6344_v45 = vsel %vm6328_vm10, %v6311_v18, %v14593_v55  ;;  %v6447_v39 = vsel %vm3392_vm6, %v13381_v5, 0.0  ;;  %v14600_v41 = vld [vmem:[#allocation71_spill] sm:$0xff]  ;;  %v14603_v18 = vld [vmem:[#allocation114_spill] sm:$0xff] }
 0x53f   :  { %v13290_v16 = vpop.permute.xlu0 %5889  ;;  %v13298_v44 = vpop.permute.xlu1 %6209  ;;  %v6375_v21 = vsel %vm39_vm0, %v6343_v62, %v14594_v26  ;;  %v6313_v22 = vsel %vm187_vm4, %v6281_v31, %v14595_v3  ;;  %v6282_v6 = vsel %vm6263_vm9, %v14597_v20, %v14596_v30  ;;  %v13413_v50 = vsel %vm6393_vm11, %v6374_v2, %v14598_v10  ;;  %v14602_v7 = vld [vmem:[#allocation19_spill] sm:$0xff]  ;;  %v14607_v2 = vld [vmem:[#allocation20_spill] sm:$0xff]  ;;  %v14609_v31 = vld [vmem:[#allocation73_spill] sm:$0xff] }
 0x540   :  { %v6446_v40 = vadd.f32 %v6445_v43, %v6444_v56  ;;  %v6345_v25 = vsel %vm6328_vm10, %v6312_v63, %v14599_v0  ;;  %v6449_v35 = vsel %vm3392_vm6, %v13398_v51, 0.0  ;;  %v6376_v57 = vsel %vm39_vm0, %v6344_v45, %v14600_v41  ;;  %v14608_v29 = vld [vmem:[#allocation115_spill] sm:$0xff]  ;;  %v14612_v3 = vld [vmem:[#allocation21_spill] sm:$0xff]  ;;  %v14613_v20 = vld [vmem:[#allocation116_spill] sm:$0xff] }
 0x541   :  { %v6314_v49 = vsel %vm187_vm4, %v6282_v6, %v13200_v15  ;;  %v6283_v58 = vsel %vm6263_vm9, %v14602_v7, %v14601_v1  ;;  %v13428_v48 = vsel %vm6393_vm11, %v6375_v21, %v14603_v18  ;;  %v6346_v56 = vsel %vm6328_vm10, %v6313_v22, %v14604_v24  ;;  %v14611_v21 = vld [vmem:[#allocation76_spill] sm:$0xff]  ;;  %v14619_v18 = vld [vmem:[#allocation79_spill] sm:$0xff] }
 0x542   :  { %v6448_v42 = vadd.f32 %v6447_v39, %v6446_v40  ;;  %v6451_v46 = vsel %vm3392_vm6, %v13413_v50, 0.0  ;;  %v6377_v62 = vsel %vm39_vm0, %v6345_v25, %v14605_v4  ;;  %v6315_v15 = vsel %vm187_vm4, %v6283_v58, %v13230_v17  ;;  %v14610_v39 = vld [vmem:[#allocation64_spill] sm:$0xff]  ;;  %v14614_v40 = vld [vmem:[#allocation74_spill] sm:$0xff]  ;;  %v14615_v25 = vld [vmem:[#allocation65_spill] sm:$0xff] }
 0x543   :  { %v6284_v8 = vsel %vm6263_vm9, %v14607_v2, %v14606_v60  ;;  %v13443_v52 = vsel %vm6393_vm11, %v6376_v57, %v14608_v29  ;;  %v6347_v14 = vsel %vm6328_vm10, %v6314_v49, %v14609_v31  ;;  %v6453_v45 = vsel %vm3392_vm6, %v13428_v48, 0.0  ;;  %v14616_v57 = vld [vmem:[#allocation81_spill] sm:$0xff]  ;;  %v14617_v49 = vld [vmem:[#allocation24_spill] sm:$0xff]  ;;  %v14622_v60 = vld [vmem:[#allocation26_spill] sm:$0xff] }
 0x544   :  { %v6450_v63 = vadd.f32 %v6449_v35, %v6448_v42  ;;  %v6378_v17 = vsel %vm39_vm0, %v6346_v56, %v14610_v39  ;;  %v6316_v26 = vsel %vm187_vm4, %v6284_v8, %v13264_v34  ;;  %v6285_v22 = vsel %vm6263_vm9, %v14612_v3, %v14611_v21  ;;  %v14618_v58 = vld [vmem:[#allocation41_spill] sm:$0xff]  ;;  %v14623_v29 = vld [vmem:[#allocation80_spill] sm:$0xff] }
 0x545   :  { %v13460_v6 = vsel %vm6393_vm11, %v6377_v62, %v14613_v20  ;;  %v6348_v10 = vsel %vm6328_vm10, %v6315_v15, %v14614_v40  ;;  %v6455_v0 = vsel %vm3392_vm6, %v13443_v52, 0.0  ;;  %v6379_v35 = vsel %vm39_vm0, %v6347_v14, %v14615_v25  ;;  %v14620_v4 = vld [vmem:[#allocation77_spill] sm:$0xff]  ;;  %v14621_v15 = vld [vmem:[#allocation82_spill] sm:$0xff]  ;;  %v14628_v40 = vld [vmem:[#allocation83_spill] sm:$0xff] }
 0x546   :  { %v6452_v30 = vadd.f32 %v6451_v46, %v6450_v63  ;;  %v6317_v34 = vsel %vm187_vm4, %v6285_v22, %v13290_v16  ;;  %v6286_v1 = vsel %vm6263_vm9, %v14617_v49, %v14616_v57  ;;  %v13477_v42 = vsel %vm6393_vm11, %v6378_v17, %v14618_v58  ;;  %v14625_v17 = vld [vmem:[#allocation87_spill] sm:$0xff]  ;;  %v14627_v22 = vld [vmem:[#allocation85_spill] sm:$0xff]  ;;  %v14629_v25 = vld [vmem:[#allocation88_spill] sm:$0xff] }
 0x547   :  { %v6349_v24 = vsel %vm6328_vm10, %v6316_v26, %v14619_v18  ;;  %v6457_v46 = vsel %vm3392_vm6, %v13460_v6, 0.0  ;;  %v6380_v16 = vsel %vm39_vm0, %v6348_v10, %v14620_v4  ;;  %v6287_v2 = vsel %vm6263_vm9, %v14622_v60, %v14621_v15  ;;  %v14626_v26 = vld [vmem:[#allocation28_spill] sm:$0xff]  ;;  %v14631_v49 = vld [vmem:[#allocation86_spill] sm:$0xff]  ;;  %v14634_v4 = vld [vmem:[#allocation31_spill] sm:$0xff] }
 0x548   :  { %v13318_v9 = vpop.permute.xlu0 %6211  ;;  %v13327_v19 = vpop.permute.xlu1 %5891  ;;  %v6454_v7 = vadd.f32 %v6453_v45, %v6452_v30  ;;  %v13492_v63 = vsel %vm6393_vm11, %v6379_v35, %v13189_v23  ;;  %v6350_v31 = vsel %vm6328_vm10, %v6317_v34, %v14623_v29  ;;  %v6459_v14 = vsel %vm3392_vm6, %v13477_v42, 0.0  ;;  %v14624_v45 = vld [vmem:[#allocation78_spill] sm:$0xff]  ;;  %v14630_v35 = vld [vmem:[#allocation29_spill] sm:$0xff]  ;;  %v14632_v18 = vld [vmem:[#allocation84_spill] sm:$0xff] }
 0x549   :  { %v6318_v62 = vsel %vm187_vm4, %v6286_v1, %v13327_v19  ;;  %v6381_v39 = vsel %vm39_vm0, %v6349_v24, %v14624_v45  ;;  %v6288_v21 = vsel %vm6263_vm9, %v14626_v26, %v14625_v17  ;;  %v13507_v23 = vsel %vm6393_vm11, %v6380_v16, %v13240_v37  ;;  %v14635_v15 = vld [vmem:[#allocation91_spill] sm:$0xff]  ;;  %v14638_v45 = vld [vmem:[#allocation32_spill] sm:$0xff] }
 0x54a   :  { %v6456_v8 = vadd.f32 %v6455_v0, %v6454_v7  ;;  %v6351_v30 = vsel %vm6328_vm10, %v6318_v62, %v14627_v22  ;;  %v6461_v20 = vsel %vm3392_vm6, %v13492_v63, 0.0  ;;  %v6382_v10 = vsel %vm39_vm0, %v6350_v31, %v14628_v40  ;;  %v14639_v17 = vld [vmem:[#allocation92_spill] sm:$0xff]  ;;  %v14640_v22 = vld [vmem:[#allocation90_spill] sm:$0xff]  ;;  %v14642_v40 = vld [vmem:[#allocation35_spill] sm:$0xff] }
 0x54b   :  { %v6289_v34 = vsel %vm6263_vm9, %v14630_v35, %v14629_v25  ;;  %v13521_v37 = vsel %vm6393_vm11, %v6381_v39, %v13254_v27  ;;  %v6463_v58 = vsel %vm3392_vm6, %v13507_v23, 0.0  ;;  %v13535_v27 = vsel %vm6393_vm11, %v6382_v10, %v13298_v44  ;;  %v14643_v25 = vld [vmem:[#allocation96_spill] sm:$0xff] }
 0x54c   :  { %v13359_v38 = vpop.permute.xlu0 %5893  ;;  %v13370_v11 = vpop.permute.xlu1 %6213  ;;  %v6458_v3 = vadd.f32 %v6457_v46, %v6456_v8  ;;  %v14633_v46 = vld [vmem:[#allocation93_spill] sm:$0xff] }
 0x54d   :  { %v6319_v19 = vsel %vm187_vm4, %v6287_v2, %v13359_v38  ;;  %v6290_v16 = vsel %vm6263_vm9, %v14634_v4, %v14633_v46  ;;  %v6465_v2 = vsel %vm3392_vm6, %v13521_v37, 0.0  ;;  %v14636_v8 = vld [vmem:[#allocation89_spill] sm:$0xff]  ;;  %v14647_v46 = vld [vmem:[#allocation99_spill] sm:$0xff] }
 0x54e   :  { %v6460_v57 = vadd.f32 %v6459_v14, %v6458_v3  ;;  %v6352_v1 = vsel %vm6328_vm10, %v6319_v19, %v14631_v49  ;;  %v14637_v14 = vld [vmem:[#allocation94_spill] sm:$0xff]  ;;  %v6467_v3 = vsel %vm3392_vm6, %v13535_v27, 0.0 }
 0x54f   :  { %v6384_v29 = vsel %vm39_vm0, %v6352_v1, %v14636_v8  ;;  %v6291_v39 = vsel %vm6263_vm9, %v14638_v45, %v14637_v14  ;;  %v14650_v14 = vld [vmem:[#allocation100_spill] sm:$0xff] }
 0x550   :  { %v6462_v62 = vadd.f32 %v6461_v20, %v6460_v57  ;;  %v14641_v20 = vld [vmem:[#allocation98_spill] sm:$0xff]  ;;  %v14644_v57 = vld [vmem:[#allocation95_spill] sm:$0xff] }
 0x551   :  { %v6292_v10 = vsel %vm6263_vm9, %v14642_v40, %v14641_v20  ;;  %v14653_v40 = vld [vmem:[#allocation105_spill] sm:$0xff] }
 0x552   :  { %v6464_v19 = vadd.f32 %v6463_v58, %v6462_v62  ;;  %v14645_v58 = vld [vmem:[#allocation102_spill] sm:$0xff]  ;;  %v14648_v62 = vld [vmem:[#allocation97_spill] sm:$0xff] }
 0x557   :  { %v13391_v59 = vpop.permute.xlu0 %6215  ;;  %v5896_v36 = vpop.permute.xlu1 %5895 }
 0x558   :  { %v6320_v38 = vsel %vm187_vm4, %v6288_v21, %v5896_v36  ;;  %v6383_v36 = vsel %vm39_vm0, %v6351_v30, %v14632_v18  ;;  %v14646_v18 = vld [vmem:[#allocation36_spill] sm:$0xff] }
 0x559   :  { %v6353_v60 = vsel %vm6328_vm10, %v6320_v38, %v14635_v15  ;;  %v13549_v44 = vsel %vm6393_vm11, %v6383_v36, %v13318_v9  ;;  %v6466_v38 = vadd.f32 %v6465_v2, %v6464_v19  ;;  %v13563_v9 = vsel %vm6393_vm11, %v6384_v29, %v13370_v11  ;;  %v14649_v29 = vld [vmem:[#allocation101_spill] sm:$0xff] }
 0x55a   :  { %v6293_v36 = vsel %vm6263_vm9, %v14646_v18, %v14645_v58  ;;  %v14656_v58 = vld [vmem:[#allocation107_spill] sm:$0xff] }
 0x55b   :  { %v5898_v43 = vpop.permute.xlu0 %5897  ;;  %v13447_v55 = vpop.permute.xlu1 %6217 }
 0x55c   :  { %v6321_v24 = vsel %vm187_vm4, %v6289_v34, %v5898_v43  ;;  %v6469_v34 = vsel %vm3392_vm6, %v13549_v44, 0.0 }
 0x55d   :  { %v6354_v26 = vsel %vm6328_vm10, %v6321_v24, %v14639_v17  ;;  %v6468_v24 = vadd.f32 %v6467_v3, %v6466_v38  ;;  %v14651_v17 = vld [vmem:[#allocation106_spill] sm:$0xff]  ;;  %v14652_v3 = vld [vmem:[#allocation104_spill] sm:$0xff]  ;;  %v14655_v38 = vld [vmem:[#allocation37_spill] sm:$0xff] }
 0x55e   :  { %v6386_v49 = vsel %vm39_vm0, %v6354_v26, %v14644_v57 }
 0x55f   :  { %v6470_v2 = vadd.f32 %v6469_v34, %v6468_v24  ;;  %v13588_v8 = vsel %vm6393_vm11, %v6386_v49, %v13447_v55  ;;  %v14657_v24 = vld [vmem:[#allocation110_spill] sm:$0xff] }
 0x560   :  { %v6475_v55 = vsel %vm3392_vm6, %v13588_v8, 0.0 }
 0x564   :  { %v13470_v41 = vpop.permute.xlu0 %6219  ;;  %v5900_v56 = vpop.permute.xlu1 %5899 }
 0x565   :  { %v6322_v43 = vsel %vm187_vm4, %v6290_v16, %v5900_v56  ;;  %v6385_v56 = vsel %vm39_vm0, %v6353_v60, %v14640_v22  ;;  %v6471_v16 = vsel %vm3392_vm6, %v13563_v9, 0.0 }
 0x566   :  { %v6355_v35 = vsel %vm6328_vm10, %v6322_v43, %v14643_v25  ;;  %v13577_v11 = vsel %vm6393_vm11, %v6385_v56, %v13391_v59 }
 0x567   :  { %v6387_v15 = vsel %vm39_vm0, %v6355_v35, %v14648_v62  ;;  %v6473_v43 = vsel %vm3392_vm6, %v13577_v11, 0.0 }
 0x568   :  { %v5902_v0 = vpop.permute.xlu0 %5901  ;;  %v6222_v7 = vpop.permute.xlu1 %6221  ;;  %v13598_v19 = vsel %vm6393_vm11, %v6387_v15, %v13470_v41 }
 0x569   :  { %v6323_v30 = vsel %vm187_vm4, %v6291_v39, %v5902_v0  ;;  %v6472_v39 = vadd.f32 %v6471_v16, %v6470_v2  ;;  %v6477_v20 = vsel %vm3392_vm6, %v13598_v19, 0.0 }
 0x56a   :  { %v6356_v4 = vsel %vm6328_vm10, %v6323_v30, %v14647_v46  ;;  %v14658_v46 = vld [vmem:[#allocation108_spill] sm:$0xff] }
 0x56b   :  { %v6388_v45 = vsel %vm39_vm0, %v6356_v4, %v14650_v14  ;;  %v6474_v56 = vadd.f32 %v6473_v43, %v6472_v39  ;;  %v14659_v4 = vld [vmem:[#allocation38_spill] sm:$0xff]  ;;  %v14660_v39 = vld [vmem:[#allocation109_spill] sm:$0xff] }
 0x56c   :  { %v13607_v30 = vsel %vm6393_vm11, %v6388_v45, %v6222_v7  ;;  %v6295_v16 = vsel %vm6263_vm9, %v14659_v4, %v14658_v46  ;;  %v14661_v4 = vld [vmem:[#allocation8_spill] sm:$0xff] }
 0x56d   :  { %v6476_v35 = vadd.f32 %v6475_v55, %v6474_v56  ;;  %v6479_v49 = vsel %vm3392_vm6, %v13607_v30, 0.0 }
 0x573   :  { %v6224_v31 = vpop.permute.xlu0 %6223  ;;  %v5904_v21 = vpop.permute.xlu1 %5903 }
 0x574   :  { %v6324_v0 = vsel %vm187_vm4, %v6292_v10, %v5904_v21  ;;  %v14654_v10 = vld [vmem:[#allocation103_spill] sm:$0xff] }
 0x575   :  { %v6357_v59 = vsel %vm6328_vm10, %v6324_v0, %v14649_v29  ;;  %v6294_v25 = vsel %vm6263_vm9, %v14655_v38, %v14654_v10  ;;  %v6478_v0 = vadd.f32 %v6477_v20, %v6476_v35 }
 0x576   :  { %v6389_v22 = vsel %vm39_vm0, %v6357_v59, %v14652_v3 }
 0x577   :  { %v5906_v1 = vpop.permute.xlu0 %5905  ;;  %v6226_v21 = vpop.permute.xlu1 %6225  ;;  %v13617_v34 = vsel %vm6393_vm11, %v6389_v22, %v6224_v31  ;;  %v6480_v62 = vadd.f32 %v6479_v49, %v6478_v0  ;;  %v6506_v0 = vlaneseq }
 0x578   :  { %v6325_v60 = vsel %vm187_vm4, %v6293_v36, %v5906_v1  ;;  %v6481_v36 = vsel %vm3392_vm6, %v13617_v34, 0.0 }
 0x579   :  { %v6358_v26 = vsel %vm6328_vm10, %v6325_v60, %v14651_v17  ;;  %v6482_v43 = vadd.f32 %v6481_v36, %v6480_v62  ;;  %v14662_v62 = vld [vmem:[#allocation45_spill] sm:$0xff] }
 0x57a   :  { %v6390_v41 = vsel %vm39_vm0, %v6358_v26, %v14653_v40 }
 0x57b   :  { %v13623_v1 = vsel %vm6393_vm11, %v6390_v41, %v6226_v21 }
 0x57c   :  { %v6483_v2 = vsel %vm3392_vm6, %v13623_v1, 0.0 }
 0x57d   :  { %v6484_v45 = vadd.f32 %v6483_v2, %v6482_v43 }
 0x580   :  { %v5908_v57 = vpop.permute.xlu1 %5907 }
 0x581   :  { %v6326_v7 = vsel %vm187_vm4, %v6294_v25, %v5908_v57 }
 0x582   :  { %v6359_v18 = vsel %vm6328_vm10, %v6326_v7, %v14656_v58  ;;  %v13653_v58 = vshrl.u32 %v6506_v0, 7 }
 0x583   :  { %v6391_v31 = vsel %vm39_vm0, %v6359_v18, %v14657_v24 }
 0x584   :  { %v5910_v15 = vpop.permute.xlu0 %5909  ;;  %v6228_v60 = vpop.permute.xlu1 %6227  ;;  %v13656_v36 = vsub.s32 0, %v13653_v58 }
 0x585   :  { %v6327_v29 = vsel %vm187_vm4, %v6295_v16, %v5910_v15  ;;  %v13638_v59 = vsel %vm6393_vm11, %v6391_v31, %v6228_v60 }
 0x586   :  { %v6485_v14 = vsel %vm3392_vm6, %v13638_v59, 0.0  ;;  %v6360_v17 = vsel %vm6328_vm10, %v6327_v29, %v14660_v39 }
 0x587   :  { %v6486_v3 = vadd.f32 %v6485_v14, %v6484_v45 }
 0x588   :  { %v6134_v26 = vpop.permute.xlu0 %6133  ;;  %v6230_v21 = vpop.permute.xlu1 %6229 }
 0x589   :  { %v6392_v55 = vsel %vm39_vm0, %v6360_v17, %v6134_v26 }
 0x58a   :  { %v13646_v22 = vsel %vm6393_vm11, %v6392_v55, %v6230_v21 }
 0x58b   :  { %v6487_v56 = vsel %vm3392_vm6, %v13646_v22, 0.0 }
 0x58c   :  { %v6488_v20 = vadd.f32 %v6487_v56, %v6486_v3 }
 0x58e   :  { %v6489_v40 = vrot.slane %v6488_v20, 4 }
 0x590   :  { %v6490_v41 = vadd.f32 %v6489_v40, %v6488_v20 }
 0x592   :  { %v6491_v10 = vrot.slane %v6490_v41, 2 }
 0x594   :  { %v6492_v38 = vadd.f32 %v6491_v10, %v6490_v41 }
 0x596   :  { %v6493_v25 = vrot.slane %v6492_v38, 1 }
 0x598   :  { %v6494_v35 = vadd.f32 %v6493_v25, %v6492_v38 }
 0x59a   :  { %6496 = vrot.lane.b32.xlu0 %v6494_v35, %s9779_s6 }
 0x60c   :  { %v6497_v57 = vpop.permute.xlu0 %6496 }
 0x60d   :  { %v6499_v49 = vadd.f32 %v6497_v57, %v6494_v35 }
 0x60f   :  { %v6500_v7 = vmul.f32 0.001953125, %v6499_v49 }
 0x611   :  { %6502 = vrot.lane.b32.xlu1 %v6500_v7, %s9778_s28 }
 0x683   :  { %v6503_v18 = vpop.permute.xlu1 %6502 }
 0x684   :  { %v13659_v24 = vsel %vm6328_vm10, %v6500_v7, %v6503_v18 }
 0x685   :  { %v13663_v31 = vrot.slane %v13659_v24, %v13656_v36 }
 0x687   :  { %v6510_v46 = vsub.f32 %v13196_v61, %v13663_v31  ;;  %v6511_v16 = vsub.f32 %v14661_v4, %v13663_v31  ;;  %v6512_v15 = vsub.f32 %v14662_v62, %v13663_v31  ;;  %v6513_v60 = vsub.f32 %v13222_v53, %v13663_v31 }
 0x688   :  { %v6514_v43 = vsub.f32 %v13252_v28, %v13663_v31  ;;  %v6515_v45 = vsub.f32 %v13260_v33, %v13663_v31  ;;  %v6516_v55 = vsub.f32 %v13286_v47, %v13663_v31  ;;  %v6517_v40 = vsub.f32 %v13294_v13, %v13663_v31 }
 0x689   :  { %v6542_v2 = vmul.f32 %v6510_v46, %v6510_v46  ;;  %v6543_v29 = vmul.f32 %v6511_v16, %v6511_v16  ;;  %v6544_v14 = vmul.f32 %v6512_v15, %v6512_v15  ;;  %v6545_v39 = vmul.f32 %v6513_v60, %v6513_v60 }
 0x68a   :  { %v6546_v3 = vmul.f32 %v6514_v43, %v6514_v43  ;;  %v6547_v41 = vmul.f32 %v6515_v45, %v6515_v45  ;;  %v6518_v25 = vsub.f32 %v13325_v32, %v13663_v31  ;;  %v6548_v35 = vmul.f32 %v6516_v55, %v6516_v55 }
 0x68b   :  { %v6574_v17 = vsel %vm3392_vm6, %v6542_v2, 0.0  ;;  %v6575_v26 = vsel %vm3392_vm6, %v6543_v29, 0.0  ;;  %v6577_v56 = vsel %vm3392_vm6, %v6544_v14, 0.0  ;;  %v6579_v10 = vsel %vm3392_vm6, %v6545_v39, 0.0 }
 0x68c   :  { %v6576_v21 = vadd.f32 %v6575_v26, %v6574_v17  ;;  %v6581_v57 = vsel %vm3392_vm6, %v6546_v3, 0.0  ;;  %v6519_v7 = vsub.f32 %v13338_v12, %v13663_v31  ;;  %v6549_v18 = vmul.f32 %v6517_v40, %v6517_v40 }
 0x68d   :  { %v6583_v46 = vsel %vm3392_vm6, %v6547_v41, 0.0  ;;  %v6520_v15 = vsub.f32 %v13366_v54, %v13663_v31  ;;  %v6550_v60 = vmul.f32 %v6518_v25, %v6518_v25  ;;  %v6585_v2 = vsel %vm3392_vm6, %v6548_v35, 0.0 }
 0x68e   :  { %v6578_v20 = vadd.f32 %v6577_v56, %v6576_v21  ;;  %v6521_v43 = vsub.f32 %v13381_v5, %v13663_v31  ;;  %v6551_v14 = vmul.f32 %v6519_v7, %v6519_v7  ;;  %v6587_v45 = vsel %vm3392_vm6, %v6549_v18, 0.0 }
 0x68f   :  { %v6522_v17 = vsub.f32 %v13398_v51, %v13663_v31  ;;  %v6552_v26 = vmul.f32 %v6520_v15, %v6520_v15  ;;  %v6589_v21 = vsel %vm3392_vm6, %v6550_v60, 0.0  ;;  %v6523_v3 = vsub.f32 %v13413_v50, %v13663_v31 }
 0x690   :  { %v6580_v38 = vadd.f32 %v6579_v10, %v6578_v20  ;;  %v6553_v56 = vmul.f32 %v6521_v43, %v6521_v43  ;;  %v6591_v20 = vsel %vm3392_vm6, %v6551_v14, 0.0  ;;  %v6524_v41 = vsub.f32 %v13428_v48, %v13663_v31 }
 0x691   :  { %v6554_v10 = vmul.f32 %v6522_v17, %v6522_v17  ;;  %v6525_v35 = vsub.f32 %v13443_v52, %v13663_v31  ;;  %v6526_v18 = vsub.f32 %v13460_v6, %v13663_v31  ;;  %v6527_v60 = vsub.f32 %v13477_v42, %v13663_v31 }
 0x692   :  { %v6582_v49 = vadd.f32 %v6581_v57, %v6580_v38  ;;  %v6593_v38 = vsel %vm3392_vm6, %v6552_v26, 0.0  ;;  %v6555_v57 = vmul.f32 %v6523_v3, %v6523_v3  ;;  %v6528_v14 = vsub.f32 %v13492_v63, %v13663_v31 }
 0x693   :  { %v6529_v26 = vsub.f32 %v13507_v23, %v13663_v31 }
 0x694   :  { %v6584_v16 = vadd.f32 %v6583_v46, %v6582_v49  ;;  %v6595_v49 = vsel %vm3392_vm6, %v6553_v56, 0.0  ;;  %v6556_v46 = vmul.f32 %v6524_v41, %v6524_v41  ;;  %v6530_v56 = vsub.f32 %v13521_v37, %v13663_v31 }
 0x696   :  { %v6586_v29 = vadd.f32 %v6585_v2, %v6584_v16  ;;  %v6597_v16 = vsel %vm3392_vm6, %v6554_v10, 0.0  ;;  %v6557_v2 = vmul.f32 %v6525_v35, %v6525_v35  ;;  %v6531_v10 = vsub.f32 %v13535_v27, %v13663_v31 }
 0x698   :  { %v6588_v39 = vadd.f32 %v6587_v45, %v6586_v29  ;;  %v6599_v29 = vsel %vm3392_vm6, %v6555_v57, 0.0  ;;  %v6558_v45 = vmul.f32 %v6526_v18, %v6526_v18  ;;  %v6532_v57 = vsub.f32 %v13549_v44, %v13663_v31 }
 0x69a   :  { %v6590_v55 = vadd.f32 %v6589_v21, %v6588_v39  ;;  %v6601_v39 = vsel %vm3392_vm6, %v6556_v46, 0.0  ;;  %v6559_v21 = vmul.f32 %v6527_v60, %v6527_v60  ;;  %v6533_v46 = vsub.f32 %v13563_v9, %v13663_v31 }
 0x69c   :  { %v6592_v40 = vadd.f32 %v6591_v20, %v6590_v55  ;;  %v6603_v55 = vsel %vm3392_vm6, %v6557_v2, 0.0  ;;  %v6560_v20 = vmul.f32 %v6528_v14, %v6528_v14  ;;  %v6534_v2 = vsub.f32 %v13577_v11, %v13663_v31 }
 0x69e   :  { %v6594_v25 = vadd.f32 %v6593_v38, %v6592_v40  ;;  %v6605_v40 = vsel %vm3392_vm6, %v6558_v45, 0.0  ;;  %v6561_v38 = vmul.f32 %v6529_v26, %v6529_v26  ;;  %v6535_v45 = vsub.f32 %v13588_v8, %v13663_v31 }
 0x6a0   :  { %v6596_v7 = vadd.f32 %v6595_v49, %v6594_v25  ;;  %v6607_v25 = vsel %vm3392_vm6, %v6559_v21, 0.0  ;;  %v6562_v49 = vmul.f32 %v6530_v56, %v6530_v56  ;;  %v6536_v21 = vsub.f32 %v13598_v19, %v13663_v31 }
 0x6a2   :  { %v6598_v15 = vadd.f32 %v6597_v16, %v6596_v7  ;;  %v6609_v7 = vsel %vm3392_vm6, %v6560_v20, 0.0  ;;  %v6563_v16 = vmul.f32 %v6531_v10, %v6531_v10  ;;  %v6537_v20 = vsub.f32 %v13607_v30, %v13663_v31 }
 0x6a4   :  { %v6600_v43 = vadd.f32 %v6599_v29, %v6598_v15  ;;  %v6611_v15 = vsel %vm3392_vm6, %v6561_v38, 0.0  ;;  %v6564_v29 = vmul.f32 %v6532_v57, %v6532_v57  ;;  %v6538_v38 = vsub.f32 %v13617_v34, %v13663_v31 }
 0x6a6   :  { %v6602_v17 = vadd.f32 %v6601_v39, %v6600_v43  ;;  %v6613_v43 = vsel %vm3392_vm6, %v6562_v49, 0.0  ;;  %v6565_v39 = vmul.f32 %v6533_v46, %v6533_v46  ;;  %v6539_v49 = vsub.f32 %v13623_v1, %v13663_v31 }
 0x6a8   :  { %v6604_v3 = vadd.f32 %v6603_v55, %v6602_v17  ;;  %v6615_v17 = vsel %vm3392_vm6, %v6563_v16, 0.0  ;;  %v6566_v55 = vmul.f32 %v6534_v2, %v6534_v2  ;;  %v6540_v16 = vsub.f32 %v13638_v59, %v13663_v31 }
 0x6aa   :  { %v6606_v41 = vadd.f32 %v6605_v40, %v6604_v3  ;;  %v6617_v3 = vsel %vm3392_vm6, %v6564_v29, 0.0  ;;  %v6567_v40 = vmul.f32 %v6535_v45, %v6535_v45  ;;  %v6541_v29 = vsub.f32 %v13646_v22, %v13663_v31 }
 0x6ac   :  { %v6608_v35 = vadd.f32 %v6607_v25, %v6606_v41  ;;  %v6619_v41 = vsel %vm3392_vm6, %v6565_v39, 0.0  ;;  %v6568_v25 = vmul.f32 %v6536_v21, %v6536_v21  ;;  %v6572_v39 = vmul.f32 %v6540_v16, %v6540_v16 }
 0x6ad   :  { %v6573_v21 = vmul.f32 %v6541_v29, %v6541_v29 }
 0x6ae   :  { %v6610_v18 = vadd.f32 %v6609_v7, %v6608_v35  ;;  %v6621_v35 = vsel %vm3392_vm6, %v6566_v55, 0.0  ;;  %v6569_v7 = vmul.f32 %v6537_v20, %v6537_v20 }
 0x6b0   :  { %v6612_v60 = vadd.f32 %v6611_v15, %v6610_v18  ;;  %v6623_v18 = vsel %vm3392_vm6, %v6567_v40, 0.0  ;;  %v6570_v15 = vmul.f32 %v6538_v38, %v6538_v38  ;;  %v6635_v40 = vsel %vm3392_vm6, %v6573_v21, 0.0 }
 0x6b2   :  { %v6614_v14 = vadd.f32 %v6613_v43, %v6612_v60  ;;  %v6625_v60 = vsel %vm3392_vm6, %v6568_v25, 0.0  ;;  %v6571_v43 = vmul.f32 %v6539_v49, %v6539_v49  ;;  %v13765_v49 = vld [vmem:[%s14328_s7 + $0x48] sm:$0xff] }
 0x6b3   :  { %7994 = vmatprep.subr.mxu1 %v13765_v49 }
 0x6b4   :  { %v6616_v26 = vadd.f32 %v6615_v17, %v6614_v14  ;;  %v6627_v14 = vsel %vm3392_vm6, %v6569_v7, 0.0  ;;  %v6629_v17 = vsel %vm3392_vm6, %v6570_v15, 0.0  ;;  %v6631_v55 = vsel %vm3392_vm6, %v6571_v43, 0.0  ;;  %7995 = vmatpush3.msra.mxu1 %v13765_v49  ;;  %v6649_v15 = vld [vmem:[%s14330_s9] sm:$0x1] }
 0x6b5   :  { %v13782_v43 = vld [vmem:[%s14331_s10] sm:$0x1] }
 0x6b6   :  { %v6618_v56 = vadd.f32 %v6617_v3, %v6616_v26 }
 0x6b8   :  { %v6620_v10 = vadd.f32 %v6619_v41, %v6618_v56  ;;  %v6633_v56 = vsel %vm3392_vm6, %v6572_v39, 0.0  ;;  %v13792_v39 = vld [vmem:[%s14328_s7 + $0x38] sm:$0xff] }
 0x6ba   :  { %v6622_v57 = vadd.f32 %v6621_v35, %v6620_v10 }
 0x6bc   :  { %v6624_v46 = vadd.f32 %v6623_v18, %v6622_v57 }
 0x6be   :  { %v6626_v2 = vadd.f32 %v6625_v60, %v6624_v46  ;;  %v13775_v60 = vld [vmem:[%s14328_s7 + $0x40] sm:$0xff] }
 0x6bf   :  { %7996 = vmatprep.subr.mxu1 %v13775_v60 }
 0x6c0   :  { %v6628_v45 = vadd.f32 %v6627_v14, %v6626_v2  ;;  %7997 = vmatpush3.msra.mxu1 %v13775_v60 }
 0x6c1   :  { %7998 = vmatprep.subr.mxu1 %v13792_v39 }
 0x6c2   :  { %v6630_v26 = vadd.f32 %v6629_v17, %v6628_v45  ;;  %v6667_v45 = vrot.slane %v13782_v43, %v13656_v36  ;;  %7999 = vmatpush3.msra.mxu1 %v13792_v39  ;;  %v13805_v17 = vld [vmem:[%s14328_s7 + $0x30] sm:$0xff] }
 0x6c3   :  { %8000 = vmatprep.subr.mxu1 %v13805_v17 }
 0x6c4   :  { %v6632_v3 = vadd.f32 %v6631_v55, %v6630_v26  ;;  %8001 = vmatpush3.msra.mxu1 %v13805_v17  ;;  %v6950_v55 = vld [vmem:[%s14321_s0] sm:$0xff] }
 0x6c6   :  { %v6634_v20 = vadd.f32 %v6633_v56, %v6632_v3 }
 0x6c8   :  { %v6636_v41 = vadd.f32 %v6635_v40, %v6634_v20 }
 0x6ca   :  { %v6637_v10 = vrot.slane %v6636_v41, 4 }
 0x6cc   :  { %v6638_v31 = vadd.f32 %v6637_v10, %v6636_v41 }
 0x6ce   :  { %v6639_v38 = vrot.slane %v6638_v31, 2 }
 0x6d0   :  { %v6640_v25 = vadd.f32 %v6639_v38, %v6638_v31 }
 0x6d2   :  { %v6641_v35 = vrot.slane %v6640_v25, 1 }
 0x6d4   :  { %v6642_v57 = vadd.f32 %v6641_v35, %v6640_v25 }
 0x6d6   :  { %6644 = vrot.lane.b32.xlu0 %v6642_v57, %s9779_s6 }
 0x748   :  { %v6645_v7 = vpop.permute.xlu0 %6644 }
 0x749   :  { %v6647_v18 = vadd.f32 %v6645_v7, %v6642_v57 }
 0x74b   :  { %v6648_v46 = vmul.f32 0.001953125, %v6647_v18 }
 0x74d   :  { %v6650_v16 = vadd.f32 1e-05, %v6648_v46 }
 0x74f   :  { %9727 = vrsqrt.f32 %v6650_v16 }
 0x75c   :  { %v9728_v2 = vpop.eup %9727 }
 0x75d   :  { %v6652_v29 = vmul.f32 %v9728_v2, %v6649_v15 }
 0x75f   :  { %v6657_v14 = vrot.slane %v6652_v29, %v13656_v36 }
 0x761   :  { %6658 = vrot.lane.b32.xlu1 %v6657_v14, %s9778_s28 }
 0x765   :  { %6668 = vrot.lane.b32.xlu1 %v6667_v45, %s9778_s28 }
 0x769   :  { %7016 = vrot.lane.b32.xlu1 %v14661_v4, %s9771_s16 }
 0x76d   :  { %7020 = vrot.lane.b32.xlu1 %v13222_v53, %s9771_s16  ;;  %v13818_v53 = vld [vmem:[%s14328_s7 + $0x28] sm:$0xff] }
 0x76e   :  { %8002 = vmatprep.subr.mxu1 %v13818_v53 }
 0x76f   :  { %8003 = vmatpush3.msra.mxu1 %v13818_v53 }
 0x771   :  { %7024 = vrot.lane.b32.xlu1 %v13260_v33, %s9771_s16  ;;  %v13831_v33 = vld [vmem:[%s14328_s7 + $0x20] sm:$0xff] }
 0x772   :  { %8004 = vmatprep.subr.mxu1 %v13831_v33 }
 0x773   :  { %8005 = vmatpush3.msra.mxu1 %v13831_v33 }
 0x775   :  { %7028 = vrot.lane.b32.xlu1 %v13294_v13, %s9771_s16  ;;  %v6717_v13 = vld [vmem:[%s14328_s7 + $0x18] sm:$0xff] }
 0x776   :  { %8006 = vmatprep.subr.mxu1 %v6717_v13 }
 0x777   :  { %8007 = vmatpush3.msra.mxu1 %v6717_v13 }
 0x779   :  { %7032 = vrot.lane.b32.xlu1 %v13338_v12, %s9771_s16  ;;  %v6716_v12 = vld [vmem:[%s14328_s7 + $0x10] sm:$0xff] }
 0x77a   :  { %8008 = vmatprep.subr.mxu1 %v6716_v12 }
 0x77b   :  { %8009 = vmatpush3.msra.mxu1 %v6716_v12 }
 0x77d   :  { %7036 = vrot.lane.b32.xlu1 %v13381_v5, %s9771_s16  ;;  %v6715_v5 = vld [vmem:[%s14328_s7 + $0x8] sm:$0xff] }
 0x77e   :  { %8010 = vmatprep.subr.mxu1 %v6715_v5 }
 0x77f   :  { %8011 = vmatpush3.msra.mxu1 %v6715_v5  ;;  %v6953_v5 = vld [vmem:[%s14321_s0 + $0x18] sm:$0xff] }
 0x781   :  { %7040 = vrot.lane.b32.xlu1 %v13413_v50, %s9771_s16  ;;  %v6714_v50 = vld [vmem:[%s14328_s7] sm:$0xff] }
 0x782   :  { %8012 = vmatprep.subr.mxu1 %v6714_v50 }
 0x783   :  { %8013 = vmatpush3.msra.mxu1 %v6714_v50 }
 0x785   :  { %7044 = vrot.lane.b32.xlu1 %v13443_v52, %s9771_s16  ;;  %v14663_v52 = vmov 0.0  }
 0x786   :  { %8029 = vmatprep.subr.mxu1 %v14663_v52 }
 0x789   :  { %7048 = vrot.lane.b32.xlu1 %v13477_v42, %s9771_s16 }
 0x78d   :  { %7052 = vrot.lane.b32.xlu1 %v13507_v23, %s9771_s16 }
 0x791   :  { %7056 = vrot.lane.b32.xlu1 %v13535_v27, %s9771_s16 }
 0x795   :  { %7060 = vrot.lane.b32.xlu1 %v13563_v9, %s9771_s16  ;;  %v6684_v9 = vadd.s32 48, %v13653_v58 }
 0x799   :  { %7064 = vrot.lane.b32.xlu1 %v13588_v8, %s9771_s16 }
 0x79d   :  { %7068 = vrot.lane.b32.xlu1 %v13607_v30, %s9771_s16  ;;  %v6686_v30 = vadd.s32 64, %v13653_v58 }
 0x7a1   :  { %7072 = vrot.lane.b32.xlu1 %v13623_v1, %s9771_s16 }
 0x7a5   :  { %7076 = vrot.lane.b32.xlu1 %v13646_v22, %s9771_s16  ;;  %v6687_v22 = vadd.s32 72, %v13653_v58 }
 0x7d3   :  { %v6659_v42 = vpop.permute.xlu1 %6658 }
 0x7d4   :  { %v13863_v23 = vsel %vm6328_vm10, %v6652_v29, %v6659_v42 }
 0x7d5   :  { %6673 = vrot.lane.b32.xlu0 %v13863_v23, %s9771_s16 }
 0x7d7   :  { %v6669_v1 = vpop.permute.xlu1 %6668 }
 0x7d9   :  { %7014 = vrot.lane.b32.xlu0 %v13196_v61, %s9771_s16  ;;  %v6689_v61 = vand.u32 127, %v6506_v0  ;;  %v6671_v0 = vsel %vm6328_vm10, %v13782_v43, %v6669_v1  ;;  %vm9780_vm10 = vmmov 0   ;;  %v6962_v1 = vld [vmem:[%s14321_s0 + $0x60] sm:$0xff] }
 0x7db   :  { %vm6690_vm12 = vcmp.eq.s32.totalorder %v13653_v58, %v6689_v61  ;;  %vm6696_vm3 = vcmp.eq.s32.totalorder %v6684_v9, %v6689_v61  ;;  %vm6698_vm5 = vcmp.eq.s32.totalorder %v6686_v30, %v6689_v61  ;;  %vm6699_vm8 = vcmp.eq.s32.totalorder %v6687_v22, %v6689_v61  ;;  %v7017_v41 = vpop.permute.xlu1 %7016  ;;  %v6961_v30 = vld [vmem:[%s14321_s0 + $0x58] sm:$0xff] }
 0x7dd   :  { %7018 = vrot.lane.b32.xlu0 %v14662_v62, %s9771_s16  ;;  %v6869_v62 = vmul.f32 %v13863_v23, %v13659_v24 }
 0x7df   :  { %v6870_v26 = vsub.f32 %v6671_v0, %v6869_v62  ;;  %v7021_v35 = vpop.permute.xlu1 %7020  ;;  %v6963_v0 = vld [vmem:[%s14321_s0 + $0x68] sm:$0xff] }
 0x7e0   :  { %v7113_v23 = vsel %vm39_vm0, %v6953_v5, %v7021_v35 }
 0x7e1   :  { %7022 = vrot.lane.b32.xlu0 %v13252_v28, %s9771_s16  ;;  %v6679_v28 = vadd.s32 8, %v13653_v58  ;;  %v6874_v24 = vrot.slane %v6870_v26, %v13656_v36 }
 0x7e3   :  { %vm6691_vm13 = vcmp.eq.s32.totalorder %v6679_v28, %v6689_v61  ;;  %v7025_v46 = vpop.permute.xlu1 %7024 }
 0x7e5   :  { %7026 = vrot.lane.b32.xlu0 %v13286_v47, %s9771_s16  ;;  %v6680_v47 = vadd.s32 16, %v13653_v58 }
 0x7e7   :  { %vm6692_vm14 = vcmp.eq.s32.totalorder %v6680_v47, %v6689_v61  ;;  %v7029_v29 = vpop.permute.xlu1 %7028  ;;  %v6956_v47 = vld [vmem:[%s14321_s0 + $0x30] sm:$0xff] }
 0x7e9   :  { %7030 = vrot.lane.b32.xlu0 %v13325_v32, %s9771_s16 }
 0x7eb   :  { %v7033_v45 = vpop.permute.xlu1 %7032 }
 0x7ed   :  { %7034 = vrot.lane.b32.xlu0 %v13366_v54, %s9771_s16 }
 0x7f1   :  { %7038 = vrot.lane.b32.xlu0 %v13398_v51, %s9771_s16 }
 0x7f5   :  { %7042 = vrot.lane.b32.xlu0 %v13428_v48, %s9771_s16  ;;  %v6681_v48 = vadd.s32 24, %v13653_v58 }
 0x7f7   :  { %vm6693_vm15 = vcmp.eq.s32.totalorder %v6681_v48, %v6689_v61 }
 0x7f9   :  { %7046 = vrot.lane.b32.xlu0 %v13460_v6, %s9771_s16  ;;  %v6682_v6 = vadd.s32 32, %v13653_v58 }
 0x7fb   :  { %vm6694_vm1 = vcmp.eq.s32.totalorder %v6682_v6, %v6689_v61 }
 0x7fd   :  { %7050 = vrot.lane.b32.xlu0 %v13492_v63, %s9771_s16 }
 0x801   :  { %7054 = vrot.lane.b32.xlu0 %v13521_v37, %s9771_s16 }
 0x805   :  { %7058 = vrot.lane.b32.xlu0 %v13549_v44, %s9771_s16  ;;  %v6683_v44 = vadd.s32 40, %v13653_v58 }
 0x807   :  { %vm6695_vm2 = vcmp.eq.s32.totalorder %v6683_v44, %v6689_v61  ;;  %v6959_v44 = vld [vmem:[%s14321_s0 + $0x48] sm:$0xff] }
 0x809   :  { %7062 = vrot.lane.b32.xlu0 %v13577_v11, %s9771_s16 }
 0x80d   :  { %7066 = vrot.lane.b32.xlu0 %v13598_v19, %s9771_s16  ;;  %v6685_v19 = vadd.s32 56, %v13653_v58 }
 0x80f   :  { %vm6697_vm4 = vcmp.eq.s32.totalorder %v6685_v19, %v6689_v61  ;;  %v6955_v61 = vld [vmem:[%s14321_s0 + $0x28] sm:$0xff]  ;;  %v7119_v19 = vsel %vm39_vm0, %v6959_v44, %v7033_v45  ;;  %v6974_v45 = vld [vmem:[%s14321_s0 + $0xc0] sm:$0xff] }
 0x810   :  { %v6948_v44 = vld [vmem:[%s14329_s8] sm:$0x1]  ;;  %s9782_s8 = smov [#allocation4]  }
 0x811   :  { %7070 = vrot.lane.b32.xlu0 %v13617_v34, %s9771_s16  ;;  %s7680_s14 = sshll.u32 %s9782_s8, 4  ;;  %s7681_s14 = int_to_ptr.vmem [resolvable:$true] %s7680_s14 }
 0x812   :  { %s9747_s10 = scalar_lea.vmem %s7681_s14, 2048  ;;  %p9752_p1 = scmp.lt.s32.totalorder %s7681_s14, %s7681_s14 }
 0x813   :  { %p9748_p0 = scmp.ne.s32.totalorder %s7681_s14, %s9747_s10  ;;  %p9753_p2 = scmp.lt.s32.totalorder %s9747_s10, %s9747_s10 }
 0x815   :  { %7074 = vrot.lane.b32.xlu0 %v13638_v59, %s9771_s16  ;;  %p9754_p3 = por %p9753_p2, %p9752_p1 }
 0x817   :  { %p9755_p4 = pnand %p9754_p3, %p9748_p0 }
 0x847   :  { %v6674_v32 = vpop.permute.xlu0 %6673 }
 0x848   :  { %v6676_v54 = vsel %vm39_vm0, 1.0, %v6674_v32 }
 0x849   :  { %v6703_v51 = vrot.slane %v6676_v54, %v13656_v36  ;;  %v7115_v54 = vsel %vm39_vm0, %v6955_v61, %v7025_v46  ;;  %v6971_v46 = vld [vmem:[%s14321_s0 + $0xa8] sm:$0xff] }
 0x84b   :  { %v6704_v63 = vsel %vm6690_vm12, %v6703_v51, 0.0  ;;  %v6705_v37 = vsel %vm6691_vm13, %v6703_v51, 0.0  ;;  %v6706_v27 = vsel %vm6692_vm14, %v6703_v51, 0.0  ;;  %v6707_v11 = vsel %vm6693_vm15, %v6703_v51, 0.0  ;;  %v7015_v3 = vpop.permute.xlu0 %7014 }
 0x84c   :  { %8014 = vmatprep.mubr.msk.f32.mxu1 %vm3457_vm7, %v6704_v63  ;;  %v6708_v8 = vsel %vm6694_vm1, %v6703_v51, 0.0  ;;  %v6709_v34 = vsel %vm6695_vm2, %v6703_v51, 0.0  ;;  %v6710_v59 = vsel %vm6696_vm3, %v6703_v51, 0.0  ;;  %v6711_v4 = vsel %vm6697_vm4, %v6703_v51, 0.0  ;;  %v6958_v63 = vld [vmem:[%s14321_s0 + $0x40] sm:$0xff] }
 0x84d   :  { %8015 = vmatmul.mubr.msk.f32.vlgmr.msra.gmra.mxu1 %vm3457_vm7, %v6705_v37  ;;  %v6712_v58 = vsel %vm6698_vm5, %v6703_v51, 0.0  ;;  %v6713_v21 = vsel %vm6699_vm8, %v6703_v51, 0.0  ;;  %v7110_v56 = vsel %vm39_vm0, %v6950_v55, %v7015_v3  ;;  %v6957_v51 = vld [vmem:[%s14321_s0 + $0x38] sm:$0xff] }
 0x84e   :  { %8017 = vmatprep.mubr.msk.f32.mxu1 %vm3457_vm7, %v6706_v27  ;;  %8030 = vmatpush3.msra.mxu1 %v13765_v49  ;;  %v7117_v37 = vsel %vm39_vm0, %v6957_v51, %v7029_v29  ;;  %v6965_v55 = vld [vmem:[%s14321_s0 + $0x78] sm:$0xff] }
 0x84f   :  { %8031 = vmatprep.subr.mxu1 %v14663_v52  ;;  %v7019_v31 = vpop.permute.xlu0 %7018 }
 0x850   :  { %8032 = vmatpush3.msra.mxu1 %v13775_v60 }
 0x851   :  { %8018 = vmatmul.mubr.msk.f32.gmra.mxu1 %vm3457_vm7, %v6707_v11  ;;  %8033 = vmatprep.subr.mxu1 %v14663_v52  ;;  %v6960_v11 = vld [vmem:[%s14321_s0 + $0x50] sm:$0xff] }
 0x852   :  { %8020 = vmatprep.mubr.msk.f32.mxu1 %vm3457_vm7, %v6708_v8  ;;  %8034 = vmatpush3.msra.mxu1 %v13792_v39 }
 0x853   :  { %8035 = vmatprep.subr.mxu1 %v14663_v52  ;;  %v7023_v49 = vpop.permute.xlu0 %7022 }
 0x854   :  { %8036 = vmatpush3.msra.mxu1 %v13805_v17  ;;  %v6951_v17 = vld [vmem:[%s14321_s0 + $0x8] sm:$0xff] }
 0x855   :  { %8021 = vmatmul.mubr.msk.f32.gmra.mxu1 %vm3457_vm7, %v6709_v34  ;;  %8037 = vmatprep.subr.mxu1 %v14663_v52  ;;  %v7111_v13 = vsel %vm39_vm0, %v6951_v17, %v7017_v41 }
 0x856   :  { %8023 = vmatprep.mubr.msk.f32.mxu1 %vm3457_vm7, %v6710_v59  ;;  %8038 = vmatpush3.msra.mxu1 %v13818_v53  ;;  %v7037_v53 = vpop.permute.xlu1 %7036 }
 0x857   :  { %8039 = vmatprep.subr.mxu1 %v14663_v52  ;;  %v7027_v15 = vpop.permute.xlu0 %7026  ;;  %v7121_v22 = vsel %vm39_vm0, %v6961_v30, %v7037_v53  ;;  %v6975_v53 = vld [vmem:[%s14321_s0 + $0xc8] sm:$0xff] }
 0x858   :  { %8040 = vmatpush3.msra.mxu1 %v13831_v33  ;;  %v6952_v33 = vld [vmem:[%s14321_s0 + $0x10] sm:$0xff]  ;;  %v7116_v6 = vsel %vm39_vm0, %v6956_v47, %v7027_v15  ;;  %v6979_v47 = vld [vmem:[%s14321_s0 + $0xe8] sm:$0xff] }
 0x859   :  { %8024 = vmatmul.mubr.msk.f32.gmra.mxu1 %vm3457_vm7, %v6711_v4  ;;  %v7112_v50 = vsel %vm39_vm0, %v6952_v33, %v7019_v31  ;;  %v6972_v15 = vld [vmem:[%s14321_s0 + $0xb0] sm:$0xff] }
 0x85a   :  { %8026 = vmatprep.mubr.msk.f32.mxu1 %vm3457_vm7, %v6712_v58  ;;  %v7041_v42 = vpop.permute.xlu1 %7040  ;;  %v6964_v58 = vld [vmem:[%s14321_s0 + $0x70] sm:$0xff] }
 0x85b   :  { %v7031_v14 = vpop.permute.xlu0 %7030  ;;  %v7123_v26 = vsel %vm39_vm0, %v6963_v0, %v7041_v42 }
 0x85c   :  { %v7118_v9 = vsel %vm39_vm0, %v6958_v63, %v7031_v14 }
 0x85d   :  { %8027 = vmatmul.mubr.msk.f32.gmra.mxu1 %vm3457_vm7, %v6713_v21 }
 0x85e   :  { %8041 = vmatprep.mubr.msk.f32.mxu1 %vm9780_vm10, %v14663_v52  ;;  %v6954_v52 = vld [vmem:[%s14321_s0 + $0x20] sm:$0xff]  ;;  %v7045_v48 = vpop.permute.xlu1 %7044 }
 0x85f   :  { %v7035_v39 = vpop.permute.xlu0 %7034  ;;  %v7114_v28 = vsel %vm39_vm0, %v6954_v52, %v7023_v49  ;;  %v6970_v49 = vld [vmem:[%s14321_s0 + $0xa0] sm:$0xff]  ;;  %v6977_v52 = vld [vmem:[%s14321_s0 + $0xd8] sm:$0xff] }
 0x860   :  { %v7120_v34 = vsel %vm39_vm0, %v6960_v11, %v7035_v39 }
 0x861   :  { %8042 = vmatmul.mubr.msk.f32.vlgmr.msra.gmra.mxu1 %vm3392_vm6, %v6874_v24  ;;  %v6966_v24 = vld [vmem:[%s14321_s0 + $0x80] sm:$0xff] }
 0x862   :  { %8064 = vmatprep.mubr.msk.f32.mxu1 %vm3457_vm7, %v7110_v56  ;;  %v7049_v8 = vpop.permute.xlu1 %7048 }
 0x863   :  { %v7039_v12 = vpop.permute.xlu0 %7038 }
 0x864   :  { %v7122_v62 = vsel %vm39_vm0, %v6962_v1, %v7039_v12  ;;  %v6976_v12 = vld [vmem:[%s14321_s0 + $0xd0] sm:$0xff] }
 0x866   :  { %v7053_v4 = vpop.permute.xlu1 %7052 }
 0x867   :  { %v7043_v32 = vpop.permute.xlu0 %7042 }
 0x868   :  { %v7124_v3 = vsel %vm39_vm0, %v6964_v58, %v7043_v32 }
 0x86a   :  { %v7057_v56 = vpop.permute.xlu1 %7056 }
 0x86b   :  { %v7047_v27 = vpop.permute.xlu0 %7046  ;;  %v7131_v29 = vsel %vm39_vm0, %v6971_v46, %v7057_v56 }
 0x86c   :  { %v7126_v41 = vsel %vm39_vm0, %v6966_v24, %v7047_v27 }
 0x86e   :  { %v7061_v35 = vpop.permute.xlu1 %7060 }
 0x86f   :  { %v7051_v59 = vpop.permute.xlu0 %7050 }
 0x873   :  { %v7055_v21 = vpop.permute.xlu0 %7054 }
 0x877   :  { %v7059_v31 = vpop.permute.xlu0 %7058 }
 0x878   :  { %v7132_v14 = vsel %vm39_vm0, %v6972_v15, %v7059_v31 }
 0x90d   :  { %v8016_v20 = vpop.f32.mrf.mxu1 }
 0x90f   :  { %v6820_v40 = vpop.f32.mrf.mxu1 }
 0x911   :  { %v8019_v10 = vpop.f32.mrf.mxu1 }
 0x913   :  { %v6830_v38 = vpop.f32.mrf.mxu1 }
 0x915   :  { %v8022_v25 = vpop.f32.mrf.mxu1 }
 0x917   :  { %v6840_v57 = vpop.f32.mrf.mxu1 }
 0x919   :  { %v8025_v7 = vpop.f32.mrf.mxu1 }
 0x91b   :  { %v6850_v18 = vpop.f32.mrf.mxu1 }
 0x91d   :  { %v8028_v16 = vpop.f32.mrf.mxu1 }
 0x91e   :  { %8044 = vmatprep.subr.mxu1 %v8028_v16 }
 0x91f   :  { %v6860_v60 = vpop.f32.mrf.mxu1  ;;  %8045 = vmatpush3.msra.mxu1 %v8028_v16  ;;  %v7130_v16 = vsel %vm39_vm0, %v6970_v49, %v7055_v21 }
 0x920   :  { %8046 = vmatprep.subr.mxu1 %v6860_v60 }
 0x921   :  { %v13945_v2 = vpop.f32.mrf.mxu1  ;;  %8047 = vmatpush3.msra.mxu1 %v6860_v60  ;;  %v7065_v60 = vpop.permute.xlu1 %7064 }
 0x922   :  { %8048 = vmatprep.subr.mxu1 %v8025_v7  ;;  %v7135_v5 = vsel %vm39_vm0, %v6975_v53, %v7065_v60 }
 0x923   :  { %v8043_v43 = vpop.f32.mrf.mxu1  ;;  %8049 = vmatpush3.msra.mxu1 %v8025_v7 }
 0x924   :  { %8050 = vmatprep.subr.mxu1 %v6850_v18  ;;  %v6973_v43 = vld [vmem:[%s14321_s0 + $0xb8] sm:$0xff] }
 0x925   :  { %8051 = vmatpush3.msra.mxu1 %v6850_v18  ;;  %v7063_v18 = vpop.permute.xlu0 %7062  ;;  %v7133_v17 = vsel %vm39_vm0, %v6973_v43, %v7061_v35  ;;  %v7069_v33 = vpop.permute.xlu1 %7068 }
 0x926   :  { %8052 = vmatprep.subr.mxu1 %v8022_v25 }
 0x927   :  { %8053 = vmatpush3.msra.mxu1 %v8022_v25  ;;  %v6969_v25 = vld [vmem:[%s14321_s0 + $0x98] sm:$0xff] }
 0x928   :  { %8054 = vmatprep.subr.mxu1 %v6840_v57  ;;  %v7129_v7 = vsel %vm39_vm0, %v6969_v25, %v7053_v4 }
 0x929   :  { %8055 = vmatpush3.msra.mxu1 %v6840_v57  ;;  %v7067_v39 = vpop.permute.xlu0 %7066  ;;  %v7073_v61 = vpop.permute.xlu1 %7072 }
 0x92a   :  { %8056 = vmatprep.subr.mxu1 %v8019_v10  ;;  %v7136_v42 = vsel %vm39_vm0, %v6976_v12, %v7067_v39 }
 0x92b   :  { %8057 = vmatpush3.msra.mxu1 %v8019_v10  ;;  %v6968_v10 = vld [vmem:[%s14321_s0 + $0x90] sm:$0xff] }
 0x92c   :  { %8058 = vmatprep.subr.mxu1 %v6830_v38  ;;  %v7128_v57 = vsel %vm39_vm0, %v6968_v10, %v7051_v59 }
 0x92d   :  { %8059 = vmatpush3.msra.mxu1 %v6830_v38  ;;  %v7077_v63 = vpop.permute.xlu1 %7076 }
 0x92e   :  { %8060 = vmatprep.subr.mxu1 %v8016_v20 }
 0x92f   :  { %8061 = vmatpush3.msra.mxu1 %v8016_v20  ;;  %v7125_v20 = vsel %vm39_vm0, %v6965_v55, %v7045_v48  ;;  %v7139_v48 = vsel %vm39_vm0, %v6979_v47, %v7073_v61 }
 0x930   :  { %8062 = vmatprep.subr.mxu1 %v6820_v40 }
 0x931   :  { %8063 = vmatpush3.msra.mxu1 %v6820_v40  ;;  %v6967_v40 = vld [vmem:[%s14321_s0 + $0x88] sm:$0xff] }
 0x932   :  { %8065 = vmatmul.mubr.msk.f32.vlgmr.msra.gmra.mxu1 %vm3457_vm7, %v7111_v13  ;;  %v7127_v38 = vsel %vm39_vm0, %v6967_v40, %v7049_v8  ;;  %v7134_v13 = vsel %vm39_vm0, %v6974_v45, %v7063_v18 }
 0x933   :  { %8067 = vmatprep.mubr.msk.f32.mxu1 %vm3457_vm7, %v7112_v50  ;;  %v7071_v50 = vpop.permute.xlu0 %7070 }
 0x936   :  { %8068 = vmatmul.mubr.msk.f32.gmra.mxu1 %vm3457_vm7, %v7113_v23  ;;  %v6978_v23 = vld [vmem:[%s14321_s0 + $0xe0] sm:$0xff] }
 0x937   :  { %8070 = vmatprep.mubr.msk.f32.mxu1 %vm3457_vm7, %v7114_v28  ;;  %v7137_v28 = vsel %vm39_vm0, %v6977_v52, %v7069_v33  ;;  %v7138_v32 = vsel %vm39_vm0, %v6978_v23, %v7071_v50  ;;  %v7075_v51 = vpop.permute.xlu0 %7074 }
 0x93a   :  { %8071 = vmatmul.mubr.msk.f32.gmra.mxu1 %vm3457_vm7, %v7115_v54  ;;  %v6980_v54 = vld [vmem:[%s14321_s0 + $0xf0] sm:$0xff] }
 0x93b   :  { %8073 = vmatprep.mubr.msk.f32.mxu1 %vm3457_vm7, %v7116_v6  ;;  %v6981_v6 = vld [vmem:[%s14321_s0 + $0xf8] sm:$0xff]  ;;  %s9781_s0 = smov 120  }
 0x93c   :  { %v7141_v27 = vsel %vm39_vm0, %v6981_v6, %v7077_v63 }
 0x93e   :  { %8074 = vmatmul.mubr.msk.f32.gmra.mxu1 %vm3457_vm7, %v7117_v37  ;;  %v7140_v37 = vsel %vm39_vm0, %v6980_v54, %v7075_v51 }
 0x93f   :  { %8076 = vmatprep.mubr.msk.f32.mxu1 %vm3457_vm7, %v7118_v9  ;;  %v6949_v9 = vadd.f32 %v6948_v44, %v13945_v2 }
 0x941   :  { %v14107_v11 = vrot.slane %v6949_v9, %v13656_v36 }
 0x942   :  { %8077 = vmatmul.mubr.msk.f32.gmra.mxu1 %vm3457_vm7, %v7119_v19 }
 0x943   :  { %8079 = vmatprep.mubr.msk.f32.mxu1 %vm3457_vm7, %v7120_v34 }
 0x946   :  { %8080 = vmatmul.mubr.msk.f32.gmra.mxu1 %vm3457_vm7, %v7121_v22 }
 0x947   :  { %8082 = vmatprep.mubr.msk.f32.mxu1 %vm3457_vm7, %v7122_v62 }
 0x94a   :  { %8083 = vmatmul.mubr.msk.f32.gmra.mxu1 %vm3457_vm7, %v7123_v26 }
 0x94b   :  { %8085 = vmatprep.mubr.msk.f32.mxu1 %vm3457_vm7, %v7124_v3 }
 0x94e   :  { %8086 = vmatmul.mubr.msk.f32.gmra.mxu1 %vm3457_vm7, %v7125_v20 }
 0x94f   :  { %8088 = vmatprep.mubr.msk.f32.mxu1 %vm3457_vm7, %v7126_v41 }
 0x952   :  { %8089 = vmatmul.mubr.msk.f32.gmra.mxu1 %vm3457_vm7, %v7127_v38 }
 0x953   :  { %8091 = vmatprep.mubr.msk.f32.mxu1 %vm3457_vm7, %v7128_v57 }
 0x956   :  { %8092 = vmatmul.mubr.msk.f32.gmra.mxu1 %vm3457_vm7, %v7129_v7 }
 0x957   :  { %8094 = vmatprep.mubr.msk.f32.mxu1 %vm3457_vm7, %v7130_v16 }
 0x95a   :  { %8095 = vmatmul.mubr.msk.f32.gmra.mxu1 %vm3457_vm7, %v7131_v29 }
 0x95b   :  { %8097 = vmatprep.mubr.msk.f32.mxu1 %vm3457_vm7, %v7132_v14 }
 0x95e   :  { %8098 = vmatmul.mubr.msk.f32.gmra.mxu1 %vm3457_vm7, %v7133_v17 }
 0x95f   :  { %8100 = vmatprep.mubr.msk.f32.mxu1 %vm3457_vm7, %v7134_v13 }
 0x962   :  { %8101 = vmatmul.mubr.msk.f32.gmra.mxu1 %vm3457_vm7, %v7135_v5 }
 0x963   :  { %8103 = vmatprep.mubr.msk.f32.mxu1 %vm3457_vm7, %v7136_v42 }
 0x966   :  { %8104 = vmatmul.mubr.msk.f32.gmra.mxu1 %vm3457_vm7, %v7137_v28 }
 0x967   :  { %8106 = vmatprep.mubr.msk.f32.mxu1 %vm3457_vm7, %v7138_v32 }
 0x96a   :  { %8107 = vmatmul.mubr.msk.f32.gmra.mxu1 %vm3457_vm7, %v7139_v48 }
 0x96b   :  { %8109 = vmatprep.mubr.msk.f32.mxu1 %vm3457_vm7, %v7140_v37 }
 0x96e   :  { %8110 = vmatmul.mubr.msk.f32.gmra.mxu1 %vm3457_vm7, %v7141_v27 }
 0x9f2   :  { %v8066_v8 = vpop.f32.mrf.mxu1 }
 0x9f3   :  { %v14110_v19 = vadd.f32 %v8066_v8, %v14107_v11 }
 0x9f4   :  { %v7308_v30 = vpop.f32.mrf.mxu1 }
 0x9f5   :  { %v14113_v34 = vadd.f32 %v7308_v30, %v14107_v11  ;;  %7501 = vrot.lane.b32.xlu1 %v14110_v19, %s9781_s0 }
 0x9f6   :  { %v8069_v1 = vpop.f32.mrf.mxu1 }
 0x9f7   :  { %v14118_v59 = vadd.f32 %v8069_v1, %v14107_v11  ;;  %7499 = vrot.lane.b32.xlu0 %v14113_v34, %s9781_s0 }
 0x9f8   :  { %v7318_v36 = vpop.f32.mrf.mxu1 }
 0x9f9   :  { %v14123_v2 = vadd.f32 %v7318_v36, %v14107_v11  ;;  %7505 = vrot.lane.b32.xlu1 %v14118_v59, %s9781_s0 }
 0x9fa   :  { %v8072_v22 = vpop.f32.mrf.mxu1 }
 0x9fb   :  { %v14128_v0 = vadd.f32 %v8072_v22, %v14107_v11  ;;  %7503 = vrot.lane.b32.xlu0 %v14123_v2, %s9781_s0 }
 0x9fc   :  { %v7328_v4 = vpop.f32.mrf.mxu1 }
 0x9fd   :  { %v14133_v62 = vadd.f32 %v7328_v4, %v14107_v11  ;;  %7509 = vrot.lane.b32.xlu1 %v14128_v0, %s9781_s0 }
 0x9fe   :  { %v8075_v58 = vpop.f32.mrf.mxu1 }
 0x9ff   :  { %v14138_v26 = vadd.f32 %v8075_v58, %v14107_v11  ;;  %7507 = vrot.lane.b32.xlu0 %v14133_v62, %s9781_s0 }
 0xa00   :  { %v7338_v21 = vpop.f32.mrf.mxu1 }
 0xa01   :  { %v14143_v55 = vadd.f32 %v7338_v21, %v14107_v11  ;;  %7513 = vrot.lane.b32.xlu1 %v14138_v26, %s9781_s0 }
 0xa02   :  { %v8078_v3 = vpop.f32.mrf.mxu1 }
 0xa03   :  { %v14148_v24 = vadd.f32 %v8078_v3, %v14107_v11  ;;  %7511 = vrot.lane.b32.xlu0 %v14143_v55, %s9781_s0 }
 0xa04   :  { %v7348_v56 = vpop.f32.mrf.mxu1 }
 0xa05   :  { %v14153_v20 = vadd.f32 %v7348_v56, %v14107_v11  ;;  %7517 = vrot.lane.b32.xlu1 %v14148_v24, %s9781_s0 }
 0xa06   :  { %v8081_v40 = vpop.f32.mrf.mxu1 }
 0xa07   :  { %v14158_v41 = vadd.f32 %v8081_v40, %v14107_v11  ;;  %7515 = vrot.lane.b32.xlu0 %v14153_v20, %s9781_s0 }
 0xa08   :  { %v7358_v10 = vpop.f32.mrf.mxu1 }
 0xa09   :  { %v14163_v31 = vadd.f32 %v7358_v10, %v14107_v11  ;;  %7521 = vrot.lane.b32.xlu1 %v14158_v41, %s9781_s0 }
 0xa0a   :  { %v8084_v38 = vpop.f32.mrf.mxu1 }
 0xa0b   :  { %v14168_v25 = vadd.f32 %v8084_v38, %v14107_v11  ;;  %7519 = vrot.lane.b32.xlu0 %v14163_v31, %s9781_s0 }
 0xa0c   :  { %v7368_v35 = vpop.f32.mrf.mxu1 }
 0xa0d   :  { %v14173_v57 = vadd.f32 %v7368_v35, %v14107_v11  ;;  %7525 = vrot.lane.b32.xlu1 %v14168_v25, %s9781_s0 }
 0xa0e   :  { %v8087_v49 = vpop.f32.mrf.mxu1 }
 0xa0f   :  { %v14178_v7 = vadd.f32 %v8087_v49, %v14107_v11  ;;  %7523 = vrot.lane.b32.xlu0 %v14173_v57, %s9781_s0 }
 0xa10   :  { %v7378_v18 = vpop.f32.mrf.mxu1 }
 0xa11   :  { %v14183_v46 = vadd.f32 %v7378_v18, %v14107_v11  ;;  %7529 = vrot.lane.b32.xlu1 %v14178_v7, %s9781_s0 }
 0xa12   :  { %v8090_v16 = vpop.f32.mrf.mxu1 }
 0xa13   :  { %v14188_v15 = vadd.f32 %v8090_v16, %v14107_v11  ;;  %7527 = vrot.lane.b32.xlu0 %v14183_v46, %s9781_s0 }
 0xa14   :  { %v7388_v60 = vpop.f32.mrf.mxu1 }
 0xa15   :  { %v14193_v29 = vadd.f32 %v7388_v60, %v14107_v11  ;;  %7533 = vrot.lane.b32.xlu1 %v14188_v15, %s9781_s0 }
 0xa16   :  { %v8093_v43 = vpop.f32.mrf.mxu1 }
 0xa17   :  { %v14198_v14 = vadd.f32 %v8093_v43, %v14107_v11  ;;  %7531 = vrot.lane.b32.xlu0 %v14193_v29, %s9781_s0 }
 0xa18   :  { %v7398_v45 = vpop.f32.mrf.mxu1 }
 0xa19   :  { %v14203_v39 = vadd.f32 %v7398_v45, %v14107_v11  ;;  %7537 = vrot.lane.b32.xlu1 %v14198_v14, %s9781_s0 }
 0xa1a   :  { %v8096_v17 = vpop.f32.mrf.mxu1 }
 0xa1b   :  { %v14208_v53 = vadd.f32 %v8096_v17, %v14107_v11  ;;  %7535 = vrot.lane.b32.xlu0 %v14203_v39, %s9781_s0 }
 0xa1c   :  { %v7408_v33 = vpop.f32.mrf.mxu1 }
 0xa1d   :  { %v14213_v13 = vadd.f32 %v7408_v33, %v14107_v11  ;;  %7541 = vrot.lane.b32.xlu1 %v14208_v53, %s9781_s0 }
 0xa1e   :  { %v8099_v12 = vpop.f32.mrf.mxu1 }
 0xa1f   :  { %v14218_v5 = vadd.f32 %v8099_v12, %v14107_v11  ;;  %7539 = vrot.lane.b32.xlu0 %v14213_v13, %s9781_s0 }
 0xa20   :  { %v7418_v50 = vpop.f32.mrf.mxu1 }
 0xa21   :  { %v14223_v52 = vadd.f32 %v7418_v50, %v14107_v11  ;;  %7545 = vrot.lane.b32.xlu1 %v14218_v5, %s9781_s0 }
 0xa22   :  { %v8102_v42 = vpop.f32.mrf.mxu1 }
 0xa23   :  { %v14228_v23 = vadd.f32 %v8102_v42, %v14107_v11  ;;  %7543 = vrot.lane.b32.xlu0 %v14223_v52, %s9781_s0 }
 0xa24   :  { %v7428_v61 = vpop.f32.mrf.mxu1 }
 0xa25   :  { %v14233_v28 = vadd.f32 %v7428_v61, %v14107_v11  ;;  %7549 = vrot.lane.b32.xlu1 %v14228_v23, %s9781_s0 }
 0xa26   :  { %v8105_v47 = vpop.f32.mrf.mxu1 }
 0xa27   :  { %v14238_v32 = vadd.f32 %v8105_v47, %v14107_v11  ;;  %7547 = vrot.lane.b32.xlu0 %v14233_v28, %s9781_s0 }
 0xa28   :  { %v7438_v54 = vpop.f32.mrf.mxu1 }
 0xa29   :  { %v14243_v51 = vadd.f32 %v7438_v54, %v14107_v11  ;;  %7553 = vrot.lane.b32.xlu1 %v14238_v32, %s9781_s0 }
 0xa2a   :  { %v8108_v48 = vpop.f32.mrf.mxu1 }
 0xa2b   :  { %v14248_v6 = vadd.f32 %v8108_v48, %v14107_v11  ;;  %7551 = vrot.lane.b32.xlu0 %v14243_v51, %s9781_s0 }
 0xa2c   :  { %v7448_v63 = vpop.f32.mrf.mxu1 }
 0xa2d   :  { %v14253_v37 = vadd.f32 %v7448_v63, %v14107_v11  ;;  %7557 = vrot.lane.b32.xlu1 %v14248_v6, %s9781_s0 }
 0xa2e   :  { %v8111_v27 = vpop.f32.mrf.mxu1 }
 0xa2f   :  { %v14258_v44 = vadd.f32 %v8111_v27, %v14107_v11  ;;  %7555 = vrot.lane.b32.xlu0 %v14253_v37, %s9781_s0 }
 0xa30   :  { %v7458_v9 = vpop.f32.mrf.mxu1 }
 0xa31   :  { %v14263_v8 = vadd.f32 %v7458_v9, %v14107_v11  ;;  %7561 = vrot.lane.b32.xlu1 %v14258_v44, %s9781_s0 }
 0xa33   :  { %7559 = vrot.lane.b32.xlu0 %v14263_v8, %s9781_s0 }
 0xa67   :  { %v7502_v30 = vpop.permute.xlu1 %7501 }
 0xa68   :  { %v7596_v36 = vmax.f32 %v14110_v19, %v7502_v30 }
 0xa69   :  { %v7500_v1 = vpop.permute.xlu0 %7499 }
 0xa6a   :  { %v7595_v22 = vmax.f32 %v14113_v34, %v7500_v1 }
 0xa6b   :  { %v7506_v4 = vpop.permute.xlu1 %7505 }
 0xa6c   :  { %v7627_v58 = vmax.f32 %v7595_v22, %v7596_v36  ;;  %v7598_v56 = vmax.f32 %v14118_v59, %v7506_v4 }
 0xa6d   :  { %v7504_v21 = vpop.permute.xlu0 %7503 }
 0xa6e   :  { %v7643_v3 = vmax.f32 %v7627_v58, 0.0  ;;  %v7597_v11 = vmax.f32 %v14123_v2, %v7504_v21 }
 0xa6f   :  { %v7510_v40 = vpop.permute.xlu1 %7509 }
 0xa70   :  { %7659 = vst.msk [vmem:[#allocation4] sm:$0xff] %vm6263_vm9, %v7643_v3  ;;  %v7628_v10 = vmax.f32 %v7597_v11, %v7598_v56  ;;  %v7600_v49 = vmax.f32 %v14128_v0, %v7510_v40 }
 0xa71   :  { %v7508_v38 = vpop.permute.xlu0 %7507 }
 0xa72   :  { %v7644_v35 = vmax.f32 %v7628_v10, 0.0  ;;  %v7599_v19 = vmax.f32 %v14133_v62, %v7508_v38 }
 0xa73   :  { %v7514_v18 = vpop.permute.xlu1 %7513 }
 0xa74   :  { %7660 = vst.msk [vmem:[#allocation4 + $0x8] sm:$0xff] %vm6263_vm9, %v7644_v35  ;;  %v7629_v34 = vmax.f32 %v7599_v19, %v7600_v49  ;;  %v7602_v59 = vmax.f32 %v14138_v26, %v7514_v18 }
 0xa75   :  { %v7512_v16 = vpop.permute.xlu0 %7511 }
 0xa76   :  { %v7645_v60 = vmax.f32 %v7629_v34, 0.0  ;;  %v7601_v2 = vmax.f32 %v14143_v55, %v7512_v16 }
 0xa77   :  { %v7518_v43 = vpop.permute.xlu1 %7517 }
 0xa78   :  { %7661 = vst.msk [vmem:[#allocation4 + $0x10] sm:$0xff] %vm6263_vm9, %v7645_v60  ;;  %v7630_v45 = vmax.f32 %v7601_v2, %v7602_v59  ;;  %v7604_v0 = vmax.f32 %v14148_v24, %v7518_v43 }
 0xa79   :  { %v7516_v17 = vpop.permute.xlu0 %7515 }
 0xa7a   :  { %v7646_v33 = vmax.f32 %v7630_v45, 0.0  ;;  %v7603_v62 = vmax.f32 %v14153_v20, %v7516_v17 }
 0xa7b   :  { %v7522_v12 = vpop.permute.xlu1 %7521 }
 0xa7c   :  { %7662 = vst.msk [vmem:[#allocation4 + $0x18] sm:$0xff] %vm6263_vm9, %v7646_v33  ;;  %v7631_v50 = vmax.f32 %v7603_v62, %v7604_v0  ;;  %v7606_v26 = vmax.f32 %v14158_v41, %v7522_v12 }
 0xa7d   :  { %v7520_v42 = vpop.permute.xlu0 %7519 }
 0xa7e   :  { %v7647_v61 = vmax.f32 %v7631_v50, 0.0  ;;  %v7605_v55 = vmax.f32 %v14163_v31, %v7520_v42 }
 0xa7f   :  { %v7526_v47 = vpop.permute.xlu1 %7525 }
 0xa80   :  { %7663 = vst.msk [vmem:[#allocation4 + $0x20] sm:$0xff] %vm6263_vm9, %v7647_v61  ;;  %v7632_v54 = vmax.f32 %v7605_v55, %v7606_v26  ;;  %v7608_v24 = vmax.f32 %v14168_v25, %v7526_v47 }
 0xa81   :  { %v7524_v48 = vpop.permute.xlu0 %7523 }
 0xa82   :  { %v7648_v63 = vmax.f32 %v7632_v54, 0.0  ;;  %v7607_v20 = vmax.f32 %v14173_v57, %v7524_v48 }
 0xa83   :  { %v7530_v27 = vpop.permute.xlu1 %7529 }
 0xa84   :  { %7664 = vst.msk [vmem:[#allocation4 + $0x28] sm:$0xff] %vm6263_vm9, %v7648_v63  ;;  %v7633_v9 = vmax.f32 %v7607_v20, %v7608_v24  ;;  %v7610_v41 = vmax.f32 %v14178_v7, %v7530_v27 }
 0xa85   :  { %v7528_v30 = vpop.permute.xlu0 %7527 }
 0xa86   :  { %v7649_v1 = vmax.f32 %v7633_v9, 0.0  ;;  %v7609_v31 = vmax.f32 %v14183_v46, %v7528_v30 }
 0xa87   :  { %v7534_v36 = vpop.permute.xlu1 %7533 }
 0xa88   :  { %7665 = vst.msk [vmem:[#allocation4 + $0x30] sm:$0xff] %vm6263_vm9, %v7649_v1  ;;  %v7634_v22 = vmax.f32 %v7609_v31, %v7610_v41  ;;  %v7612_v25 = vmax.f32 %v14188_v15, %v7534_v36 }
 0xa89   :  { %v7532_v4 = vpop.permute.xlu0 %7531 }
 0xa8a   :  { %v7650_v58 = vmax.f32 %v7634_v22, 0.0  ;;  %v7611_v57 = vmax.f32 %v14193_v29, %v7532_v4 }
 0xa8b   :  { %v7538_v21 = vpop.permute.xlu1 %7537 }
 0xa8c   :  { %7666 = vst.msk [vmem:[#allocation4 + $0x38] sm:$0xff] %vm6263_vm9, %v7650_v58  ;;  %v7635_v3 = vmax.f32 %v7611_v57, %v7612_v25  ;;  %v7614_v7 = vmax.f32 %v14198_v14, %v7538_v21 }
 0xa8d   :  { %v7536_v56 = vpop.permute.xlu0 %7535 }
 0xa8e   :  { %v7651_v11 = vmax.f32 %v7635_v3, 0.0  ;;  %v7613_v46 = vmax.f32 %v14203_v39, %v7536_v56 }
 0xa8f   :  { %v7542_v40 = vpop.permute.xlu1 %7541 }
 0xa90   :  { %7667 = vst.msk [vmem:[#allocation4 + $0x40] sm:$0xff] %vm6263_vm9, %v7651_v11  ;;  %v7636_v10 = vmax.f32 %v7613_v46, %v7614_v7  ;;  %v7616_v15 = vmax.f32 %v14208_v53, %v7542_v40 }
 0xa91   :  { %v7540_v38 = vpop.permute.xlu0 %7539 }
 0xa92   :  { %v7652_v35 = vmax.f32 %v7636_v10, 0.0  ;;  %v7615_v29 = vmax.f32 %v14213_v13, %v7540_v38 }
 0xa93   :  { %v7546_v49 = vpop.permute.xlu1 %7545 }
 0xa94   :  { %7668 = vst.msk [vmem:[#allocation4 + $0x48] sm:$0xff] %vm6263_vm9, %v7652_v35  ;;  %v7637_v19 = vmax.f32 %v7615_v29, %v7616_v15  ;;  %v7618_v14 = vmax.f32 %v14218_v5, %v7546_v49 }
 0xa95   :  { %v7544_v18 = vpop.permute.xlu0 %7543 }
 0xa96   :  { %v7653_v34 = vmax.f32 %v7637_v19, 0.0  ;;  %v7617_v39 = vmax.f32 %v14223_v52, %v7544_v18 }
 0xa97   :  { %v7550_v16 = vpop.permute.xlu1 %7549 }
 0xa98   :  { %7669 = vst.msk [vmem:[#allocation4 + $0x50] sm:$0xff] %vm6263_vm9, %v7653_v34  ;;  %v7638_v60 = vmax.f32 %v7617_v39, %v7618_v14  ;;  %v7620_v53 = vmax.f32 %v14228_v23, %v7550_v16 }
 0xa99   :  { %v7548_v59 = vpop.permute.xlu0 %7547 }
 0xa9a   :  { %v7654_v2 = vmax.f32 %v7638_v60, 0.0  ;;  %v7619_v13 = vmax.f32 %v14233_v28, %v7548_v59 }
 0xa9b   :  { %v7554_v43 = vpop.permute.xlu1 %7553 }
 0xa9c   :  { %7670 = vst.msk [vmem:[#allocation4 + $0x58] sm:$0xff] %vm6263_vm9, %v7654_v2  ;;  %v7639_v45 = vmax.f32 %v7619_v13, %v7620_v53  ;;  %v7622_v5 = vmax.f32 %v14238_v32, %v7554_v43 }
 0xa9d   :  { %v7552_v17 = vpop.permute.xlu0 %7551 }
 0xa9e   :  { %v7655_v33 = vmax.f32 %v7639_v45, 0.0  ;;  %v7621_v52 = vmax.f32 %v14243_v51, %v7552_v17 }
 0xa9f   :  { %v7558_v0 = vpop.permute.xlu1 %7557 }
 0xaa0   :  { %7671 = vst.msk [vmem:[#allocation4 + $0x60] sm:$0xff] %vm6263_vm9, %v7655_v33  ;;  %v7640_v62 = vmax.f32 %v7621_v52, %v7622_v5  ;;  %v7624_v23 = vmax.f32 %v14248_v6, %v7558_v0 }
 0xaa1   :  { %v7556_v12 = vpop.permute.xlu0 %7555 }
 0xaa2   :  { %v7656_v50 = vmax.f32 %v7640_v62, 0.0  ;;  %v7623_v28 = vmax.f32 %v14253_v37, %v7556_v12 }
 0xaa3   :  { %v7562_v42 = vpop.permute.xlu1 %7561 }
 0xaa4   :  { %7672 = vst.msk [vmem:[#allocation4 + $0x68] sm:$0xff] %vm6263_vm9, %v7656_v50  ;;  %v7641_v61 = vmax.f32 %v7623_v28, %v7624_v23  ;;  %v7626_v32 = vmax.f32 %v14258_v44, %v7562_v42 }
 0xaa5   :  { %v7560_v26 = vpop.permute.xlu0 %7559 }
 0xaa6   :  { %v7657_v55 = vmax.f32 %v7641_v61, 0.0  ;;  %v7625_v51 = vmax.f32 %v14263_v8, %v7560_v26 }
 0xaa8   :  { %7673 = vst.msk [vmem:[#allocation4 + $0x70] sm:$0xff] %vm6263_vm9, %v7657_v55  ;;  %v7642_v47 = vmax.f32 %v7625_v51, %v7626_v32 }
 0xaaa   :  { %v7658_v54 = vmax.f32 %v7642_v47, 0.0 }
 0xaac   :  { %7674 = vst.msk [vmem:[#allocation4 + $0x78] sm:$0xff] %vm6263_vm9, %v7658_v54 }
 0xaad   :  { %9758 = shalt.err (!%p9755_p4)
}
 0xaae   :  { %s9783_s28 = smov 128  }
 0xaaf   :  { %7686 = dma.vmem_to_hbm [thread:$0]  %s7681_s14, 2048, %s14332_s11, [#allocation5], %s9783_s28, %s9783_s28, %s9777_s20  }
 0xab0   :  { %9767 = dma.done.wait [#allocation5], 2048  }
 0xab1   :  { %9768 = vsyncadd [#allocation5], 4294965248 }
 0xab2   :  { %7690 = vsyncpa [#allocation5], 1 }

</bundles_post_ra>
